<compile_context>
chip_gen: v6e
topology: v6e:2x2x1
jax: 0.10.0
libtpu: 0.0.40
codegen_flags: <defaults>
</compile_context>

<pallas_src>
import functools

import numpy as np
import jax
import jax.numpy as jnp
from jax import lax
from jax.experimental import pallas as pl
from jax.experimental.pallas import tpu as pltpu

F32 = jnp.float32


# ------------------------------ LSTM cell math ------------------------------

def _lstm_cell(zx, h, c, whh, H):
    """One LSTM step. zx = x_t @ W_ih + (b_ih + b_hh), shape (B, 4H)."""
    z = zx + jnp.dot(h, whh, preferred_element_type=F32)
    i = jax.nn.sigmoid(z[:, 0 * H:1 * H])
    f = jax.nn.sigmoid(z[:, 1 * H:2 * H])
    g = jnp.tanh(z[:, 2 * H:3 * H])
    o = jax.nn.sigmoid(z[:, 3 * H:4 * H])
    c_new = f * c + i * g
    h_new = o * jnp.tanh(c_new)
    return h_new, c_new


def _lstm_cell_first(zx, H):
    """First step of a direction (h = c = 0): skips h @ W_hh and f * c."""
    i = jax.nn.sigmoid(zx[:, 0 * H:1 * H])
    g = jnp.tanh(zx[:, 2 * H:3 * H])
    o = jax.nn.sigmoid(zx[:, 3 * H:4 * H])
    c_new = i * g
    h_new = o * jnp.tanh(c_new)
    return h_new, c_new


# ----------------------------- Pallas kernels ------------------------------

def _bilstm_layer_kernel(x_ref, wih_ref, whh_f_ref, whh_b_ref, b_ref,
                         out_ref, xw_ref, *, seq_len, batch):
    """Bidirectional LSTM layer, both directions interleaved, full output.

    x_ref:   (T*B, I)   time-major-flattened input (row t*B + b), B padded to 8k
    wih_ref: (I, 8H)    [W_ih_fwd | W_ih_bwd] (pre-transposed, fused at prep)
    whh_*:   (H, 4H)    hidden->gates weights per direction
    b_ref:   (1, 8H)    combined biases [fwd | bwd]
    out_ref: (T*B, 2H)  per-step outputs: fwd -> [:, :H], bwd -> [:, H:]
    xw_ref:  (T*B, 8H)  VMEM scratch holding the hoisted input projection
    Gate order along 4H: i, f, g, o (PyTorch convention).
    """
    T, B = seq_len, batch
    H = whh_f_ref.shape[0]
    H4 = 4 * H

    # Hoisted input projection for ALL timesteps & both directions: one matmul,
    # bias folded in (broadcast happens exactly once, outside the time loop).
    xw_ref[...] = (jnp.dot(x_ref[...], wih_ref[...],
                           preferred_element_type=F32) + b_ref[...])

    whh_f = whh_f_ref[...]
    whh_b = whh_b_ref[...]

    # Single fused time loop: fwd handles timestep t, bwd handles T-1-t.  The
    # two chains are independent, so their matmul/EUP latencies overlap.
    h_f = c_f = h_b = c_b = None
    for t in range(T):
        rt = T - 1 - t
        zx_f = xw_ref[pl.ds(t * B, B), pl.ds(0, H4)]
        zx_b = xw_ref[pl.ds(rt * B, B), pl.ds(H4, H4)]
        if t == 0:
            h_f, c_f = _lstm_cell_first(zx_f, H)
            h_b, c_b = _lstm_cell_first(zx_b, H)
        else:
            h_f, c_f = _lstm_cell(zx_f, h_f, c_f, whh_f, H)
            h_b, c_b = _lstm_cell(zx_b, h_b, c_b, whh_b, H)
        out_ref[pl.ds(t * B, B), pl.ds(0, H)] = h_f
        out_ref[pl.ds(rt * B, B), pl.ds(H, H)] = h_b


def _bilstm_last_fc_kernel(x_ref, wihf_ref, wihb_ref, whh_f_ref, bf_ref, bb_ref,
                           fcw_ref, fcb_ref, out_ref, xwf_ref, *, seq_len, batch):
    """Final bidirectional LSTM layer fused with the FC head.

    Only output[:, -1, :] is needed downstream, so:
      * forward direction runs the full recurrence but writes NO per-step output
      * backward direction needs only its FIRST step (on x[T-1], zero state),
        so only that row block is projected through W_ih_bwd
      * FC matmul + bias done in-kernel -> out_ref (B, 6)
    xwf_ref: (T*B, 4H) scratch for the forward-direction projection only.
    """
    T, B = seq_len, batch
    H = whh_f_ref.shape[0]

    # Forward-direction projection for all timesteps (half the FLOPs / scratch
    # of projecting both directions).
    xwf_ref[...] = (jnp.dot(x_ref[...], wihf_ref[...],
                            preferred_element_type=F32) + bf_ref[...])

    # Backward direction: only t = T-1 with zero state ever reaches the output.
    x_last = x_ref[pl.ds((T - 1) * B, B), :]
    zx_b = (jnp.dot(x_last, wihb_ref[...], preferred_element_type=F32)
            + bb_ref[...])
    h_b, _ = _lstm_cell_first(zx_b, H)

    whh_f = whh_f_ref[...]
    h_f = c_f = None
    for t in range(T):
        zx_f = xwf_ref[pl.ds(t * B, B), :]
        if t == 0:
            h_f, c_f = _lstm_cell_first(zx_f, H)
        else:
            h_f, c_f = _lstm_cell(zx_f, h_f, c_f, whh_f, H)

    feat = jnp.concatenate([h_f, h_b], axis=-1)                 # (B, 2H)
    out_ref[...] = (jnp.dot(feat, fcw_ref[...],
                            preferred_element_type=F32) + fcb_ref[...])


# ----------------------------- pallas wrappers ------------------------------

def _vmem_limit_bytes(arrays, extra_bytes):
    """Scoped-VMEM limit sized to the actual buffers (+2x & headroom)."""
    total = sum(int(np.prod(a.shape)) * jnp.dtype(a.dtype).itemsize
                for a in arrays) + extra_bytes
    return int(min(max(2 * total + (4 << 20), 16 << 20), 64 << 20))


def bilstm_layer(x2d, wih, whh_f, whh_b, b, *, seq_len, batch):
    TB = x2d.shape[0]
    H = whh_f.shape[0]
    kernel = functools.partial(_bilstm_layer_kernel, seq_len=seq_len, batch=batch)
    extra = TB * 8 * H * 4 + TB * 2 * H * 4        # scratch + output
    return pl.pallas_call(
        kernel,
        out_shape=jax.ShapeDtypeStruct((TB, 2 * H), F32),
        in_specs=[pl.BlockSpec(memory_space=pltpu.MemorySpace.VMEM)] * 5,
        out_specs=pl.BlockSpec(memory_space=pltpu.MemorySpace.VMEM),
        scratch_shapes=[pltpu.VMEM((TB, 8 * H), F32)],
        compiler_params=pltpu.CompilerParams(
            vmem_limit_bytes=_vmem_limit_bytes((x2d, wih, whh_f, whh_b, b), extra)),
    )(x2d, wih, whh_f, whh_b, b)


def bilstm_last_fc(x2d, wih_f, wih_b, whh_f, b_f, b_b, fc_w, fc_b,
                   *, seq_len, batch):
    TB = x2d.shape[0]
    H = whh_f.shape[0]
    N = fc_w.shape[1]
    kernel = functools.partial(_bilstm_last_fc_kernel, seq_len=seq_len, batch=batch)
    extra = TB * 4 * H * 4 + batch * N * 4         # scratch + output
    args = (x2d, wih_f, wih_b, whh_f, b_f, b_b, fc_w, fc_b)
    return pl.pallas_call(
        kernel,
        out_shape=jax.ShapeDtypeStruct((batch, N), F32),
        in_specs=[pl.BlockSpec(memory_space=pltpu.MemorySpace.VMEM)] * 8,
        out_specs=pl.BlockSpec(memory_space=pltpu.MemorySpace.VMEM),
        scratch_shapes=[pltpu.VMEM((TB, 4 * H), F32)],
        compiler_params=pltpu.CompilerParams(
            vmem_limit_bytes=_vmem_limit_bytes(args, extra)),
    )(*args)


# ----------------------------- model wrapper -------------------------------

def init_params(key, hidden=128, layers=2, input_size=3):
    """Deterministic init mirroring nn.LSTM / nn.Linear (uniform +/- 1/sqrt(H)).
    Raw, per-direction, PyTorch-like params: (W_ih (I,4H), W_hh (H,4H), b_ih, b_hh)."""
    k = 1.0 / np.sqrt(hidden)
    lstm_params = []
    for l in range(layers):
        in_size = input_size if l == 0 else 2 * hidden
        dirs = []
        for _d in range(2):  # forward, reverse
            key, k1, k2, k3, k4 = jax.random.split(key, 5)
            w_ih = jax.random.uniform(k1, (in_size, 4 * hidden), F32, -k, k)
            w_hh = jax.random.uniform(k2, (hidden, 4 * hidden), F32, -k, k)
            b_ih = jax.random.uniform(k3, (4 * hidden,), F32, -k, k)
            b_hh = jax.random.uniform(k4, (4 * hidden,), F32, -k, k)
            dirs.append((w_ih, w_hh, b_ih, b_hh))
        lstm_params.append(dirs)
    kf = 1.0 / np.sqrt(2 * hidden)
    key, kf1, kf2 = jax.random.split(key, 3)
    fc_w = jax.random.uniform(kf1, (2 * hidden, 6), F32, -kf, kf)
    fc_b = jax.random.uniform(kf2, (1, 6), F32, -kf, kf)
    return lstm_params, (fc_w, fc_b)


def prepare_params(lstm_params):
    """One-time weight fusion (parameter-prep time, NOT per forward call):
      intermediate layers: ([W_ih_f|W_ih_b] (I,8H), W_hh_f, W_hh_b, bias (1,8H))
      last layer: per-direction (W_ih_f, W_ih_b, W_hh_f, b_f, b_b) — bwd W_hh
                  is never needed (only its zero-state first step is used)."""
    n = len(lstm_params)
    prepared = []
    for l, (p_fwd, p_bwd) in enumerate(lstm_params):
        w_ih_f, w_hh_f, b_ih_f, b_hh_f = p_fwd
        w_ih_b, w_hh_b, b_ih_b, b_hh_b = p_bwd
        b_f = (b_ih_f + b_hh_f).reshape(1, -1)
        b_b = (b_ih_b + b_hh_b).reshape(1, -1)
        if l < n - 1:
            wih = jnp.concatenate([w_ih_f, w_ih_b], axis=1)
            bcat = jnp.concatenate([b_f, b_b], axis=1)
            prepared.append((wih, w_hh_f, w_hh_b, bcat))
        else:
            prepared.append((w_ih_f, w_ih_b, w_hh_f, b_f, b_b))
    return tuple(prepared)


def lorenz_forward(x, prepared_lstm, fc_params):
    """x: (B, T, 3) -> (B, 6). Matches PyTorch bidirectional-LSTM semantics:
    output[:, t, :] = concat(h_fwd[t], h_bwd[t]); the last step uses h_fwd[T-1]
    and h_bwd at t=T-1 (the first step of the reverse pass)."""
    B, T, Fin = x.shape
    Bp = ((B + 7) // 8) * 8          # pad batch to a sublane multiple so every
                                     # per-step block is (8,128)-tile aligned
    fc_w, fc_b = fc_params

    x_tm = jnp.transpose(x, (1, 0, 2))                     # (T, B, 3)
    if Bp != B:
        x_tm = jnp.pad(x_tm, ((0, 0), (0, Bp - B), (0, 0)))
    h2d = x_tm.reshape(T * Bp, Fin)                        # time-major-flattened

    n_layers = len(prepared_lstm)
    out = None
    for l in range(n_layers):
        if l < n_layers - 1:
            wih, whh_f, whh_b, bcat = prepared_lstm[l]
            h2d = bilstm_layer(h2d, wih, whh_f, whh_b, bcat,
                               seq_len=T, batch=Bp)
        else:
            wih_f, wih_b, whh_f, b_f, b_b = prepared_lstm[l]
            out = bilstm_last_fc(h2d, wih_f, wih_b, whh_f, b_f, b_b, fc_w, fc_b,
                                 seq_len=T, batch=Bp)
    return out[:B]


lorenz_forward_jit = jax.jit(lorenz_forward)


# --------------------------- pure-JAX reference -----------------------------

def _ref_lstm_dir(x_tm, w_ih, w_hh, b_ih, b_hh, hidden):
    Bn = x_tm.shape[1]
    b = b_ih + b_hh

    def step(carry, xt):
        h, c = carry
        z = xt @ w_ih + h @ w_hh + b
        i = jax.nn.sigmoid(z[:, :hidden])
        f = jax.nn.sigmoid(z[:, hidden:2 * hidden])
        g = jnp.tanh(z[:, 2 * hidden:3 * hidden])
        o = jax.nn.sigmoid(z[:, 3 * hidden:])
        c = f * c + i * g
        h = o * jnp.tanh(c)
        return (h, c), h

    init = (jnp.zeros((Bn, hidden), F32), jnp.zeros((Bn, hidden), F32))
    _, hs = lax.scan(step, init, x_tm)
    return hs


def ref_forward(x, lstm_params, fc_params, hidden):
    h = x
    for (p_fwd, p_bwd) in lstm_params:
        x_tm = jnp.transpose(h, (1, 0, 2))
        out_f = _ref_lstm_dir(x_tm, *p_fwd, hidden)
        out_b = _ref_lstm_dir(x_tm[::-1], *p_bwd, hidden)[::-1]
        h = jnp.transpose(jnp.concatenate([out_f, out_b], axis=-1), (1, 0, 2))
    fc_w, fc_b = fc_params
    return h[:, -1, :] @ fc_w + fc_b


# --------------------------------- main -------------------------------------

if __name__ == "__main__":
    # Module defaults are hidden_size=128, layers=2; H=128 also keeps all gate
    # and output-column slices 128-lane aligned.  Small batch/seq for the demo.
    B, T, HIDDEN, LAYERS = 2, 8, 128, 2

    key = jax.random.PRNGKey(0)
    key, kx, kp = jax.random.split(key, 3)
    x = jax.random.normal(kx, (B, T, 3), F32)
    lstm_raw, fc_params = init_params(kp, hidden=HIDDEN, layers=LAYERS)
    prepared = prepare_params(lstm_raw)

    out = lorenz_forward_jit(x, prepared, fc_params)
    out = jax.block_until_ready(out)
    assert out.shape == (B, 6), out.shape

    ref = jax.block_until_ready(ref_forward(x, lstm_raw, fc_params, HIDDEN))
    np.testing.assert_allclose(np.asarray(out), np.asarray(ref),
                               atol=1e-4, rtol=1e-3)

    print("KERNEL_OK")
</pallas_src>

<mosaic_0001>
module attributes {stable_mosaic.version = 11 : i64} {
  func.func @_bilstm_layer_kernel(%arg0: memref<64x3xf32, #tpu.memory_space<vmem>>, %arg1: memref<3x1024xf32, #tpu.memory_space<vmem>>, %arg2: memref<128x512xf32, #tpu.memory_space<vmem>>, %arg3: memref<128x512xf32, #tpu.memory_space<vmem>>, %arg4: memref<1x1024xf32, #tpu.memory_space<vmem>>, %arg5: memref<64x256xf32, #tpu.memory_space<vmem>>, %arg6: memref<64x1024xf32, #tpu.memory_space<vmem>>) attributes {dimension_semantics = [], scalar_prefetch = 0 : i64, scratch_operands = 1 : i64, tpu.core_type = #tpu.core_type<tc>} {
    %c0 = arith.constant 0 : index
    %c0_0 = arith.constant 0 : index
    %0 = vector.load %arg0[%c0, %c0_0] : memref<64x3xf32, #tpu.memory_space<vmem>>, vector<64x3xf32>
    %c0_1 = arith.constant 0 : index
    %c0_2 = arith.constant 0 : index
    %1 = vector.load %arg1[%c0_1, %c0_2] : memref<3x1024xf32, #tpu.memory_space<vmem>>, vector<3x1024xf32>
    %cst = arith.constant dense<0.000000e+00> : vector<64x1024xf32>
    %2 = tpu.matmul %0, %1, %cst {dimension_numbers = #tpu.dot_dimension_numbers<[1], [0], [0], [1], [0, 0, 1, 1], [], []>} : vector<64x3xf32>, vector<3x1024xf32>, vector<64x1024xf32> -> vector<64x1024xf32>
    %c0_3 = arith.constant 0 : index
    %c0_4 = arith.constant 0 : index
    %3 = vector.load %arg4[%c0_3, %c0_4] : memref<1x1024xf32, #tpu.memory_space<vmem>>, vector<1x1024xf32>
    %4 = vector.broadcast %3 : vector<1x1024xf32> to vector<64x1024xf32>
    %5 = arith.addf %2, %4 : vector<64x1024xf32>
    %c0_5 = arith.constant 0 : index
    %c0_6 = arith.constant 0 : index
    %6 = vector.load %arg6[%c0_5, %c0_6] : memref<64x1024xf32, #tpu.memory_space<vmem>>, vector<64x1024xf32>
    tpu.vector_store %arg6[%c0_5, %c0_6], %5 {strides = array<i32>} : memref<64x1024xf32, #tpu.memory_space<vmem>>, vector<64x1024xf32>,
    %c0_7 = arith.constant 0 : index
    %c0_8 = arith.constant 0 : index
    %7 = vector.load %arg2[%c0_7, %c0_8] : memref<128x512xf32, #tpu.memory_space<vmem>>, vector<128x512xf32>
    %c0_9 = arith.constant 0 : index
    %c0_10 = arith.constant 0 : index
    %8 = vector.load %arg3[%c0_9, %c0_10] : memref<128x512xf32, #tpu.memory_space<vmem>>, vector<128x512xf32>
    %c0_11 = arith.constant 0 : index
    %c0_12 = arith.constant 0 : index
    %9 = vector.load %arg6[%c0_11, %c0_12] : memref<64x1024xf32, #tpu.memory_space<vmem>>, vector<8x512xf32>
    %c56 = arith.constant 56 : index
    %c512 = arith.constant 512 : index
    %10 = vector.load %arg6[%c56, %c512] : memref<64x1024xf32, #tpu.memory_space<vmem>>, vector<8x512xf32>
    %11 = vector.extract_strided_slice %9 {offsets = [0, 0], sizes = [8, 128], strides = [1, 1]} : vector<8x512xf32> to vector<8x128xf32>
    %12 = arith.negf %11 : vector<8x128xf32>
    %13 = math.exp %12 : vector<8x128xf32>
    %cst_13 = arith.constant 1.000000e+00 : f32
    %14 = vector.broadcast %cst_13 : f32 to vector<8x128xf32>
    %15 = arith.addf %14, %13 : vector<8x128xf32>
    %16 = arith.divf %14, %15 : vector<8x128xf32>
    %17 = vector.extract_strided_slice %9 {offsets = [0, 256], sizes = [8, 128], strides = [1, 1]} : vector<8x512xf32> to vector<8x128xf32>
    %18 = math.tanh %17 : vector<8x128xf32>
    %19 = vector.extract_strided_slice %9 {offsets = [0, 384], sizes = [8, 128], strides = [1, 1]} : vector<8x512xf32> to vector<8x128xf32>
    %20 = arith.negf %19 : vector<8x128xf32>
    %21 = math.exp %20 : vector<8x128xf32>
    %cst_14 = arith.constant 1.000000e+00 : f32
    %22 = vector.broadcast %cst_14 : f32 to vector<8x128xf32>
    %23 = arith.addf %22, %21 : vector<8x128xf32>
    %24 = arith.divf %22, %23 : vector<8x128xf32>
    %25 = arith.mulf %16, %18 : vector<8x128xf32>
    %26 = math.tanh %25 : vector<8x128xf32>
    %27 = arith.mulf %24, %26 : vector<8x128xf32>
    %28 = vector.extract_strided_slice %10 {offsets = [0, 0], sizes = [8, 128], strides = [1, 1]} : vector<8x512xf32> to vector<8x128xf32>
    %29 = arith.negf %28 : vector<8x128xf32>
    %30 = math.exp %29 : vector<8x128xf32>
    %cst_15 = arith.constant 1.000000e+00 : f32
    %31 = vector.broadcast %cst_15 : f32 to vector<8x128xf32>
    %32 = arith.addf %31, %30 : vector<8x128xf32>
    %33 = arith.divf %31, %32 : vector<8x128xf32>
    %34 = vector.extract_strided_slice %10 {offsets = [0, 256], sizes = [8, 128], strides = [1, 1]} : vector<8x512xf32> to vector<8x128xf32>
    %35 = math.tanh %34 : vector<8x128xf32>
    %36 = vector.extract_strided_slice %10 {offsets = [0, 384], sizes = [8, 128], strides = [1, 1]} : vector<8x512xf32> to vector<8x128xf32>
    %37 = arith.negf %36 : vector<8x128xf32>
    %38 = math.exp %37 : vector<8x128xf32>
    %cst_16 = arith.constant 1.000000e+00 : f32
    %39 = vector.broadcast %cst_16 : f32 to vector<8x128xf32>
    %40 = arith.addf %39, %38 : vector<8x128xf32>
    %41 = arith.divf %39, %40 : vector<8x128xf32>
    %42 = arith.mulf %33, %35 : vector<8x128xf32>
    %43 = math.tanh %42 : vector<8x128xf32>
    %44 = arith.mulf %41, %43 : vector<8x128xf32>
    %c0_17 = arith.constant 0 : index
    %c0_18 = arith.constant 0 : index
    %45 = vector.load %arg5[%c0_17, %c0_18] : memref<64x256xf32, #tpu.memory_space<vmem>>, vector<8x128xf32>
    tpu.vector_store %arg5[%c0_17, %c0_18], %27 {strides = array<i32>} : memref<64x256xf32, #tpu.memory_space<vmem>>, vector<8x128xf32>,
    %c56_19 = arith.constant 56 : index
    %c128 = arith.constant 128 : index
    %46 = vector.load %arg5[%c56_19, %c128] : memref<64x256xf32, #tpu.memory_space<vmem>>, vector<8x128xf32>
    tpu.vector_store %arg5[%c56_19, %c128], %44 {strides = array<i32>} : memref<64x256xf32, #tpu.memory_space<vmem>>, vector<8x128xf32>,
    %c8 = arith.constant 8 : index
    %c0_20 = arith.constant 0 : index
    %47 = vector.load %arg6[%c8, %c0_20] : memref<64x1024xf32, #tpu.memory_space<vmem>>, vector<8x512xf32>
    %c48 = arith.constant 48 : index
    %c512_21 = arith.constant 512 : index
    %48 = vector.load %arg6[%c48, %c512_21] : memref<64x1024xf32, #tpu.memory_space<vmem>>, vector<8x512xf32>
    %cst_22 = arith.constant dense<0.000000e+00> : vector<8x512xf32>
    %49 = tpu.matmul %27, %7, %cst_22 {dimension_numbers = #tpu.dot_dimension_numbers<[1], [0], [0], [1], [0, 0, 1, 1], [], []>} : vector<8x128xf32>, vector<128x512xf32>, vector<8x512xf32> -> vector<8x512xf32>
    %50 = arith.addf %47, %49 : vector<8x512xf32>
    %51 = vector.extract_strided_slice %50 {offsets = [0, 0], sizes = [8, 128], strides = [1, 1]} : vector<8x512xf32> to vector<8x128xf32>
    %52 = arith.negf %51 : vector<8x128xf32>
    %53 = math.exp %52 : vector<8x128xf32>
    %cst_23 = arith.constant 1.000000e+00 : f32
    %54 = vector.broadcast %cst_23 : f32 to vector<8x128xf32>
    %55 = arith.addf %54, %53 : vector<8x128xf32>
    %56 = arith.divf %54, %55 : vector<8x128xf32>
    %57 = vector.extract_strided_slice %50 {offsets = [0, 128], sizes = [8, 128], strides = [1, 1]} : vector<8x512xf32> to vector<8x128xf32>
    %58 = arith.negf %57 : vector<8x128xf32>
    %59 = math.exp %58 : vector<8x128xf32>
    %cst_24 = arith.constant 1.000000e+00 : f32
    %60 = vector.broadcast %cst_24 : f32 to vector<8x128xf32>
    %61 = arith.addf %60, %59 : vector<8x128xf32>
    %62 = arith.divf %60, %61 : vector<8x128xf32>
    %63 = vector.extract_strided_slice %50 {offsets = [0, 256], sizes = [8, 128], strides = [1, 1]} : vector<8x512xf32> to vector<8x128xf32>
    %64 = math.tanh %63 : vector<8x128xf32>
    %65 = vector.extract_strided_slice %50 {offsets = [0, 384], sizes = [8, 128], strides = [1, 1]} : vector<8x512xf32> to vector<8x128xf32>
    %66 = arith.negf %65 : vector<8x128xf32>
    %67 = math.exp %66 : vector<8x128xf32>
    %cst_25 = arith.constant 1.000000e+00 : f32
    %68 = vector.broadcast %cst_25 : f32 to vector<8x128xf32>
    %69 = arith.addf %68, %67 : vector<8x128xf32>
    %70 = arith.divf %68, %69 : vector<8x128xf32>
    %71 = arith.mulf %62, %25 : vector<8x128xf32>
    %72 = arith.mulf %56, %64 : vector<8x128xf32>
    %73 = arith.addf %71, %72 : vector<8x128xf32>
    %74 = math.tanh %73 : vector<8x128xf32>
    %75 = arith.mulf %70, %74 : vector<8x128xf32>
    %cst_26 = arith.constant dense<0.000000e+00> : vector<8x512xf32>
    %76 = tpu.matmul %44, %8, %cst_26 {dimension_numbers = #tpu.dot_dimension_numbers<[1], [0], [0], [1], [0, 0, 1, 1], [], []>} : vector<8x128xf32>, vector<128x512xf32>, vector<8x512xf32> -> vector<8x512xf32>
    %77 = arith.addf %48, %76 : vector<8x512xf32>
    %78 = vector.extract_strided_slice %77 {offsets = [0, 0], sizes = [8, 128], strides = [1, 1]} : vector<8x512xf32> to vector<8x128xf32>
    %79 = arith.negf %78 : vector<8x128xf32>
    %80 = math.exp %79 : vector<8x128xf32>
    %cst_27 = arith.constant 1.000000e+00 : f32
    %81 = vector.broadcast %cst_27 : f32 to vector<8x128xf32>
    %82 = arith.addf %81, %80 : vector<8x128xf32>
    %83 = arith.divf %81, %82 : vector<8x128xf32>
    %84 = vector.extract_strided_slice %77 {offsets = [0, 128], sizes = [8, 128], strides = [1, 1]} : vector<8x512xf32> to vector<8x128xf32>
    %85 = arith.negf %84 : vector<8x128xf32>
    %86 = math.exp %85 : vector<8x128xf32>
    %cst_28 = arith.constant 1.000000e+00 : f32
    %87 = vector.broadcast %cst_28 : f32 to vector<8x128xf32>
    %88 = arith.addf %87, %86 : vector<8x128xf32>
    %89 = arith.divf %87, %88 : vector<8x128xf32>
    %90 = vector.extract_strided_slice %77 {offsets = [0, 256], sizes = [8, 128], strides = [1, 1]} : vector<8x512xf32> to vector<8x128xf32>
    %91 = math.tanh %90 : vector<8x128xf32>
    %92 = vector.extract_strided_slice %77 {offsets = [0, 384], sizes = [8, 128], strides = [1, 1]} : vector<8x512xf32> to vector<8x128xf32>
    %93 = arith.negf %92 : vector<8x128xf32>
    %94 = math.exp %93 : vector<8x128xf32>
    %cst_29 = arith.constant 1.000000e+00 : f32
    %95 = vector.broadcast %cst_29 : f32 to vector<8x128xf32>
    %96 = arith.addf %95, %94 : vector<8x128xf32>
    %97 = arith.divf %95, %96 : vector<8x128xf32>
    %98 = arith.mulf %89, %42 : vector<8x128xf32>
    %99 = arith.mulf %83, %91 : vector<8x128xf32>
    %100 = arith.addf %98, %99 : vector<8x128xf32>
    %101 = math.tanh %100 : vector<8x128xf32>
    %102 = arith.mulf %97, %101 : vector<8x128xf32>
    %c8_30 = arith.constant 8 : index
    %c0_31 = arith.constant 0 : index
    %103 = vector.load %arg5[%c8_30, %c0_31] : memref<64x256xf32, #tpu.memory_space<vmem>>, vector<8x128xf32>
    tpu.vector_store %arg5[%c8_30, %c0_31], %75 {strides = array<i32>} : memref<64x256xf32, #tpu.memory_space<vmem>>, vector<8x128xf32>,
    %c48_32 = arith.constant 48 : index
    %c128_33 = arith.constant 128 : index
    %104 = vector.load %arg5[%c48_32, %c128_33] : memref<64x256xf32, #tpu.memory_space<vmem>>, vector<8x128xf32>
    tpu.vector_store %arg5[%c48_32, %c128_33], %102 {strides = array<i32>} : memref<64x256xf32, #tpu.memory_space<vmem>>, vector<8x128xf32>,
    %c16 = arith.constant 16 : index
    %c0_34 = arith.constant 0 : index
    %105 = vector.load %arg6[%c16, %c0_34] : memref<64x1024xf32, #tpu.memory_space<vmem>>, vector<8x512xf32>
    %c40 = arith.constant 40 : index
    %c512_35 = arith.constant 512 : index
    %106 = vector.load %arg6[%c40, %c512_35] : memref<64x1024xf32, #tpu.memory_space<vmem>>, vector<8x512xf32>
    %cst_36 = arith.constant dense<0.000000e+00> : vector<8x512xf32>
    %107 = tpu.matmul %75, %7, %cst_36 {dimension_numbers = #tpu.dot_dimension_numbers<[1], [0], [0], [1], [0, 0, 1, 1], [], []>} : vector<8x128xf32>, vector<128x512xf32>, vector<8x512xf32> -> vector<8x512xf32>
    %108 = arith.addf %105, %107 : vector<8x512xf32>
    %109 = vector.extract_strided_slice %108 {offsets = [0, 0], sizes = [8, 128], strides = [1, 1]} : vector<8x512xf32> to vector<8x128xf32>
    %110 = arith.negf %109 : vector<8x128xf32>
    %111 = math.exp %110 : vector<8x128xf32>
    %cst_37 = arith.constant 1.000000e+00 : f32
    %112 = vector.broadcast %cst_37 : f32 to vector<8x128xf32>
    %113 = arith.addf %112, %111 : vector<8x128xf32>
    %114 = arith.divf %112, %113 : vector<8x128xf32>
    %115 = vector.extract_strided_slice %108 {offsets = [0, 128], sizes = [8, 128], strides = [1, 1]} : vector<8x512xf32> to vector<8x128xf32>
    %116 = arith.negf %115 : vector<8x128xf32>
    %117 = math.exp %116 : vector<8x128xf32>
    %cst_38 = arith.constant 1.000000e+00 : f32
    %118 = vector.broadcast %cst_38 : f32 to vector<8x128xf32>
    %119 = arith.addf %118, %117 : vector<8x128xf32>
    %120 = arith.divf %118, %119 : vector<8x128xf32>
    %121 = vector.extract_strided_slice %108 {offsets = [0, 256], sizes = [8, 128], strides = [1, 1]} : vector<8x512xf32> to vector<8x128xf32>
    %122 = math.tanh %121 : vector<8x128xf32>
    %123 = vector.extract_strided_slice %108 {offsets = [0, 384], sizes = [8, 128], strides = [1, 1]} : vector<8x512xf32> to vector<8x128xf32>
    %124 = arith.negf %123 : vector<8x128xf32>
    %125 = math.exp %124 : vector<8x128xf32>
    %cst_39 = arith.constant 1.000000e+00 : f32
    %126 = vector.broadcast %cst_39 : f32 to vector<8x128xf32>
    %127 = arith.addf %126, %125 : vector<8x128xf32>
    %128 = arith.divf %126, %127 : vector<8x128xf32>
    %129 = arith.mulf %120, %73 : vector<8x128xf32>
    %130 = arith.mulf %114, %122 : vector<8x128xf32>
    %131 = arith.addf %129, %130 : vector<8x128xf32>
    %132 = math.tanh %131 : vector<8x128xf32>
    %133 = arith.mulf %128, %132 : vector<8x128xf32>
    %cst_40 = arith.constant dense<0.000000e+00> : vector<8x512xf32>
    %134 = tpu.matmul %102, %8, %cst_40 {dimension_numbers = #tpu.dot_dimension_numbers<[1], [0], [0], [1], [0, 0, 1, 1], [], []>} : vector<8x128xf32>, vector<128x512xf32>, vector<8x512xf32> -> vector<8x512xf32>
    %135 = arith.addf %106, %134 : vector<8x512xf32>
    %136 = vector.extract_strided_slice %135 {offsets = [0, 0], sizes = [8, 128], strides = [1, 1]} : vector<8x512xf32> to vector<8x128xf32>
    %137 = arith.negf %136 : vector<8x128xf32>
    %138 = math.exp %137 : vector<8x128xf32>
    %cst_41 = arith.constant 1.000000e+00 : f32
    %139 = vector.broadcast %cst_41 : f32 to vector<8x128xf32>
    %140 = arith.addf %139, %138 : vector<8x128xf32>
    %141 = arith.divf %139, %140 : vector<8x128xf32>
    %142 = vector.extract_strided_slice %135 {offsets = [0, 128], sizes = [8, 128], strides = [1, 1]} : vector<8x512xf32> to vector<8x128xf32>
    %143 = arith.negf %142 : vector<8x128xf32>
    %144 = math.exp %143 : vector<8x128xf32>
    %cst_42 = arith.constant 1.000000e+00 : f32
    %145 = vector.broadcast %cst_42 : f32 to vector<8x128xf32>
    %146 = arith.addf %145, %144 : vector<8x128xf32>
    %147 = arith.divf %145, %146 : vector<8x128xf32>
    %148 = vector.extract_strided_slice %135 {offsets = [0, 256], sizes = [8, 128], strides = [1, 1]} : vector<8x512xf32> to vector<8x128xf32>
    %149 = math.tanh %148 : vector<8x128xf32>
    %150 = vector.extract_strided_slice %135 {offsets = [0, 384], sizes = [8, 128], strides = [1, 1]} : vector<8x512xf32> to vector<8x128xf32>
    %151 = arith.negf %150 : vector<8x128xf32>
    %152 = math.exp %151 : vector<8x128xf32>
    %cst_43 = arith.constant 1.000000e+00 : f32
    %153 = vector.broadcast %cst_43 : f32 to vector<8x128xf32>
    %154 = arith.addf %153, %152 : vector<8x128xf32>
    %155 = arith.divf %153, %154 : vector<8x128xf32>
    %156 = arith.mulf %147, %100 : vector<8x128xf32>
    %157 = arith.mulf %141, %149 : vector<8x128xf32>
    %158 = arith.addf %156, %157 : vector<8x128xf32>
    %159 = math.tanh %158 : vector<8x128xf32>
    %160 = arith.mulf %155, %159 : vector<8x128xf32>
    %c16_44 = arith.constant 16 : index
    %c0_45 = arith.constant 0 : index
    %161 = vector.load %arg5[%c16_44, %c0_45] : memref<64x256xf32, #tpu.memory_space<vmem>>, vector<8x128xf32>
    tpu.vector_store %arg5[%c16_44, %c0_45], %133 {strides = array<i32>} : memref<64x256xf32, #tpu.memory_space<vmem>>, vector<8x128xf32>,
    %c40_46 = arith.constant 40 : index
    %c128_47 = arith.constant 128 : index
    %162 = vector.load %arg5[%c40_46, %c128_47] : memref<64x256xf32, #tpu.memory_space<vmem>>, vector<8x128xf32>
    tpu.vector_store %arg5[%c40_46, %c128_47], %160 {strides = array<i32>} : memref<64x256xf32, #tpu.memory_space<vmem>>, vector<8x128xf32>,
    %c24 = arith.constant 24 : index
    %c0_48 = arith.constant 0 : index
    %163 = vector.load %arg6[%c24, %c0_48] : memref<64x1024xf32, #tpu.memory_space<vmem>>, vector<8x512xf32>
    %c32 = arith.constant 32 : index
    %c512_49 = arith.constant 512 : index
    %164 = vector.load %arg6[%c32, %c512_49] : memref<64x1024xf32, #tpu.memory_space<vmem>>, vector<8x512xf32>
    %cst_50 = arith.constant dense<0.000000e+00> : vector<8x512xf32>
    %165 = tpu.matmul %133, %7, %cst_50 {dimension_numbers = #tpu.dot_dimension_numbers<[1], [0], [0], [1], [0, 0, 1, 1], [], []>} : vector<8x128xf32>, vector<128x512xf32>, vector<8x512xf32> -> vector<8x512xf32>
    %166 = arith.addf %163, %165 : vector<8x512xf32>
    %167 = vector.extract_strided_slice %166 {offsets = [0, 0], sizes = [8, 128], strides = [1, 1]} : vector<8x512xf32> to vector<8x128xf32>
    %168 = arith.negf %167 : vector<8x128xf32>
    %169 = math.exp %168 : vector<8x128xf32>
    %cst_51 = arith.constant 1.000000e+00 : f32
    %170 = vector.broadcast %cst_51 : f32 to vector<8x128xf32>
    %171 = arith.addf %170, %169 : vector<8x128xf32>
    %172 = arith.divf %170, %171 : vector<8x128xf32>
    %173 = vector.extract_strided_slice %166 {offsets = [0, 128], sizes = [8, 128], strides = [1, 1]} : vector<8x512xf32> to vector<8x128xf32>
    %174 = arith.negf %173 : vector<8x128xf32>
    %175 = math.exp %174 : vector<8x128xf32>
    %cst_52 = arith.constant 1.000000e+00 : f32
    %176 = vector.broadcast %cst_52 : f32 to vector<8x128xf32>
    %177 = arith.addf %176, %175 : vector<8x128xf32>
    %178 = arith.divf %176, %177 : vector<8x128xf32>
    %179 = vector.extract_strided_slice %166 {offsets = [0, 256], sizes = [8, 128], strides = [1, 1]} : vector<8x512xf32> to vector<8x128xf32>
    %180 = math.tanh %179 : vector<8x128xf32>
    %181 = vector.extract_strided_slice %166 {offsets = [0, 384], sizes = [8, 128], strides = [1, 1]} : vector<8x512xf32> to vector<8x128xf32>
    %182 = arith.negf %181 : vector<8x128xf32>
    %183 = math.exp %182 : vector<8x128xf32>
    %cst_53 = arith.constant 1.000000e+00 : f32
    %184 = vector.broadcast %cst_53 : f32 to vector<8x128xf32>
    %185 = arith.addf %184, %183 : vector<8x128xf32>
    %186 = arith.divf %184, %185 : vector<8x128xf32>
    %187 = arith.mulf %178, %131 : vector<8x128xf32>
    %188 = arith.mulf %172, %180 : vector<8x128xf32>
    %189 = arith.addf %187, %188 : vector<8x128xf32>
    %190 = math.tanh %189 : vector<8x128xf32>
    %191 = arith.mulf %186, %190 : vector<8x128xf32>
    %cst_54 = arith.constant dense<0.000000e+00> : vector<8x512xf32>
    %192 = tpu.matmul %160, %8, %cst_54 {dimension_numbers = #tpu.dot_dimension_numbers<[1], [0], [0], [1], [0, 0, 1, 1], [], []>} : vector<8x128xf32>, vector<128x512xf32>, vector<8x512xf32> -> vector<8x512xf32>
    %193 = arith.addf %164, %192 : vector<8x512xf32>
    %194 = vector.extract_strided_slice %193 {offsets = [0, 0], sizes = [8, 128], strides = [1, 1]} : vector<8x512xf32> to vector<8x128xf32>
    %195 = arith.negf %194 : vector<8x128xf32>
    %196 = math.exp %195 : vector<8x128xf32>
    %cst_55 = arith.constant 1.000000e+00 : f32
    %197 = vector.broadcast %cst_55 : f32 to vector<8x128xf32>
    %198 = arith.addf %197, %196 : vector<8x128xf32>
    %199 = arith.divf %197, %198 : vector<8x128xf32>
    %200 = vector.extract_strided_slice %193 {offsets = [0, 128], sizes = [8, 128], strides = [1, 1]} : vector<8x512xf32> to vector<8x128xf32>
    %201 = arith.negf %200 : vector<8x128xf32>
    %202 = math.exp %201 : vector<8x128xf32>
    %cst_56 = arith.constant 1.000000e+00 : f32
    %203 = vector.broadcast %cst_56 : f32 to vector<8x128xf32>
    %204 = arith.addf %203, %202 : vector<8x128xf32>
    %205 = arith.divf %203, %204 : vector<8x128xf32>
    %206 = vector.extract_strided_slice %193 {offsets = [0, 256], sizes = [8, 128], strides = [1, 1]} : vector<8x512xf32> to vector<8x128xf32>
    %207 = math.tanh %206 : vector<8x128xf32>
    %208 = vector.extract_strided_slice %193 {offsets = [0, 384], sizes = [8, 128], strides = [1, 1]} : vector<8x512xf32> to vector<8x128xf32>
    %209 = arith.negf %208 : vector<8x128xf32>
    %210 = math.exp %209 : vector<8x128xf32>
    %cst_57 = arith.constant 1.000000e+00 : f32
    %211 = vector.broadcast %cst_57 : f32 to vector<8x128xf32>
    %212 = arith.addf %211, %210 : vector<8x128xf32>
    %213 = arith.divf %211, %212 : vector<8x128xf32>
    %214 = arith.mulf %205, %158 : vector<8x128xf32>
    %215 = arith.mulf %199, %207 : vector<8x128xf32>
    %216 = arith.addf %214, %215 : vector<8x128xf32>
    %217 = math.tanh %216 : vector<8x128xf32>
    %218 = arith.mulf %213, %217 : vector<8x128xf32>
    %c24_58 = arith.constant 24 : index
    %c0_59 = arith.constant 0 : index
    %219 = vector.load %arg5[%c24_58, %c0_59] : memref<64x256xf32, #tpu.memory_space<vmem>>, vector<8x128xf32>
    tpu.vector_store %arg5[%c24_58, %c0_59], %191 {strides = array<i32>} : memref<64x256xf32, #tpu.memory_space<vmem>>, vector<8x128xf32>,
    %c32_60 = arith.constant 32 : index
    %c128_61 = arith.constant 128 : index
    %220 = vector.load %arg5[%c32_60, %c128_61] : memref<64x256xf32, #tpu.memory_space<vmem>>, vector<8x128xf32>
    tpu.vector_store %arg5[%c32_60, %c128_61], %218 {strides = array<i32>} : memref<64x256xf32, #tpu.memory_space<vmem>>, vector<8x128xf32>,
    %c32_62 = arith.constant 32 : index
    %c0_63 = arith.constant 0 : index
    %221 = vector.load %arg6[%c32_62, %c0_63] : memref<64x1024xf32, #tpu.memory_space<vmem>>, vector<8x512xf32>
    %c24_64 = arith.constant 24 : index
    %c512_65 = arith.constant 512 : index
    %222 = vector.load %arg6[%c24_64, %c512_65] : memref<64x1024xf32, #tpu.memory_space<vmem>>, vector<8x512xf32>
    %cst_66 = arith.constant dense<0.000000e+00> : vector<8x512xf32>
    %223 = tpu.matmul %191, %7, %cst_66 {dimension_numbers = #tpu.dot_dimension_numbers<[1], [0], [0], [1], [0, 0, 1, 1], [], []>} : vector<8x128xf32>, vector<128x512xf32>, vector<8x512xf32> -> vector<8x512xf32>
    %224 = arith.addf %221, %223 : vector<8x512xf32>
    %225 = vector.extract_strided_slice %224 {offsets = [0, 0], sizes = [8, 128], strides = [1, 1]} : vector<8x512xf32> to vector<8x128xf32>
    %226 = arith.negf %225 : vector<8x128xf32>
    %227 = math.exp %226 : vector<8x128xf32>
    %cst_67 = arith.constant 1.000000e+00 : f32
    %228 = vector.broadcast %cst_67 : f32 to vector<8x128xf32>
    %229 = arith.addf %228, %227 : vector<8x128xf32>
    %230 = arith.divf %228, %229 : vector<8x128xf32>
    %231 = vector.extract_strided_slice %224 {offsets = [0, 128], sizes = [8, 128], strides = [1, 1]} : vector<8x512xf32> to vector<8x128xf32>
    %232 = arith.negf %231 : vector<8x128xf32>
    %233 = math.exp %232 : vector<8x128xf32>
    %cst_68 = arith.constant 1.000000e+00 : f32
    %234 = vector.broadcast %cst_68 : f32 to vector<8x128xf32>
    %235 = arith.addf %234, %233 : vector<8x128xf32>
    %236 = arith.divf %234, %235 : vector<8x128xf32>
    %237 = vector.extract_strided_slice %224 {offsets = [0, 256], sizes = [8, 128], strides = [1, 1]} : vector<8x512xf32> to vector<8x128xf32>
    %238 = math.tanh %237 : vector<8x128xf32>
    %239 = vector.extract_strided_slice %224 {offsets = [0, 384], sizes = [8, 128], strides = [1, 1]} : vector<8x512xf32> to vector<8x128xf32>
    %240 = arith.negf %239 : vector<8x128xf32>
    %241 = math.exp %240 : vector<8x128xf32>
    %cst_69 = arith.constant 1.000000e+00 : f32
    %242 = vector.broadcast %cst_69 : f32 to vector<8x128xf32>
    %243 = arith.addf %242, %241 : vector<8x128xf32>
    %244 = arith.divf %242, %243 : vector<8x128xf32>
    %245 = arith.mulf %236, %189 : vector<8x128xf32>
    %246 = arith.mulf %230, %238 : vector<8x128xf32>
    %247 = arith.addf %245, %246 : vector<8x128xf32>
    %248 = math.tanh %247 : vector<8x128xf32>
    %249 = arith.mulf %244, %248 : vector<8x128xf32>
    %cst_70 = arith.constant dense<0.000000e+00> : vector<8x512xf32>
    %250 = tpu.matmul %218, %8, %cst_70 {dimension_numbers = #tpu.dot_dimension_numbers<[1], [0], [0], [1], [0, 0, 1, 1], [], []>} : vector<8x128xf32>, vector<128x512xf32>, vector<8x512xf32> -> vector<8x512xf32>
    %251 = arith.addf %222, %250 : vector<8x512xf32>
    %252 = vector.extract_strided_slice %251 {offsets = [0, 0], sizes = [8, 128], strides = [1, 1]} : vector<8x512xf32> to vector<8x128xf32>
    %253 = arith.negf %252 : vector<8x128xf32>
    %254 = math.exp %253 : vector<8x128xf32>
    %cst_71 = arith.constant 1.000000e+00 : f32
    %255 = vector.broadcast %cst_71 : f32 to vector<8x128xf32>
    %256 = arith.addf %255, %254 : vector<8x128xf32>
    %257 = arith.divf %255, %256 : vector<8x128xf32>
    %258 = vector.extract_strided_slice %251 {offsets = [0, 128], sizes = [8, 128], strides = [1, 1]} : vector<8x512xf32> to vector<8x128xf32>
    %259 = arith.negf %258 : vector<8x128xf32>
    %260 = math.exp %259 : vector<8x128xf32>
    %cst_72 = arith.constant 1.000000e+00 : f32
    %261 = vector.broadcast %cst_72 : f32 to vector<8x128xf32>
    %262 = arith.addf %261, %260 : vector<8x128xf32>
    %263 = arith.divf %261, %262 : vector<8x128xf32>
    %264 = vector.extract_strided_slice %251 {offsets = [0, 256], sizes = [8, 128], strides = [1, 1]} : vector<8x512xf32> to vector<8x128xf32>
    %265 = math.tanh %264 : vector<8x128xf32>
    %266 = vector.extract_strided_slice %251 {offsets = [0, 384], sizes = [8, 128], strides = [1, 1]} : vector<8x512xf32> to vector<8x128xf32>
    %267 = arith.negf %266 : vector<8x128xf32>
    %268 = math.exp %267 : vector<8x128xf32>
    %cst_73 = arith.constant 1.000000e+00 : f32
    %269 = vector.broadcast %cst_73 : f32 to vector<8x128xf32>
    %270 = arith.addf %269, %268 : vector<8x128xf32>
    %271 = arith.divf %269, %270 : vector<8x128xf32>
    %272 = arith.mulf %263, %216 : vector<8x128xf32>
    %273 = arith.mulf %257, %265 : vector<8x128xf32>
    %274 = arith.addf %272, %273 : vector<8x128xf32>
    %275 = math.tanh %274 : vector<8x128xf32>
    %276 = arith.mulf %271, %275 : vector<8x128xf32>
    %c32_74 = arith.constant 32 : index
    %c0_75 = arith.constant 0 : index
    %277 = vector.load %arg5[%c32_74, %c0_75] : memref<64x256xf32, #tpu.memory_space<vmem>>, vector<8x128xf32>
    tpu.vector_store %arg5[%c32_74, %c0_75], %249 {strides = array<i32>} : memref<64x256xf32, #tpu.memory_space<vmem>>, vector<8x128xf32>,
    %c24_76 = arith.constant 24 : index
    %c128_77 = arith.constant 128 : index
    %278 = vector.load %arg5[%c24_76, %c128_77] : memref<64x256xf32, #tpu.memory_space<vmem>>, vector<8x128xf32>
    tpu.vector_store %arg5[%c24_76, %c128_77], %276 {strides = array<i32>} : memref<64x256xf32, #tpu.memory_space<vmem>>, vector<8x128xf32>,
    %c40_78 = arith.constant 40 : index
    %c0_79 = arith.constant 0 : index
    %279 = vector.load %arg6[%c40_78, %c0_79] : memref<64x1024xf32, #tpu.memory_space<vmem>>, vector<8x512xf32>
    %c16_80 = arith.constant 16 : index
    %c512_81 = arith.constant 512 : index
    %280 = vector.load %arg6[%c16_80, %c512_81] : memref<64x1024xf32, #tpu.memory_space<vmem>>, vector<8x512xf32>
    %cst_82 = arith.constant dense<0.000000e+00> : vector<8x512xf32>
    %281 = tpu.matmul %249, %7, %cst_82 {dimension_numbers = #tpu.dot_dimension_numbers<[1], [0], [0], [1], [0, 0, 1, 1], [], []>} : vector<8x128xf32>, vector<128x512xf32>, vector<8x512xf32> -> vector<8x512xf32>
    %282 = arith.addf %279, %281 : vector<8x512xf32>
    %283 = vector.extract_strided_slice %282 {offsets = [0, 0], sizes = [8, 128], strides = [1, 1]} : vector<8x512xf32> to vector<8x128xf32>
    %284 = arith.negf %283 : vector<8x128xf32>
    %285 = math.exp %284 : vector<8x128xf32>
    %cst_83 = arith.constant 1.000000e+00 : f32
    %286 = vector.broadcast %cst_83 : f32 to vector<8x128xf32>
    %287 = arith.addf %286, %285 : vector<8x128xf32>
    %288 = arith.divf %286, %287 : vector<8x128xf32>
    %289 = vector.extract_strided_slice %282 {offsets = [0, 128], sizes = [8, 128], strides = [1, 1]} : vector<8x512xf32> to vector<8x128xf32>
    %290 = arith.negf %289 : vector<8x128xf32>
    %291 = math.exp %290 : vector<8x128xf32>
    %cst_84 = arith.constant 1.000000e+00 : f32
    %292 = vector.broadcast %cst_84 : f32 to vector<8x128xf32>
    %293 = arith.addf %292, %291 : vector<8x128xf32>
    %294 = arith.divf %292, %293 : vector<8x128xf32>
    %295 = vector.extract_strided_slice %282 {offsets = [0, 256], sizes = [8, 128], strides = [1, 1]} : vector<8x512xf32> to vector<8x128xf32>
    %296 = math.tanh %295 : vector<8x128xf32>
    %297 = vector.extract_strided_slice %282 {offsets = [0, 384], sizes = [8, 128], strides = [1, 1]} : vector<8x512xf32> to vector<8x128xf32>
    %298 = arith.negf %297 : vector<8x128xf32>
    %299 = math.exp %298 : vector<8x128xf32>
    %cst_85 = arith.constant 1.000000e+00 : f32
    %300 = vector.broadcast %cst_85 : f32 to vector<8x128xf32>
    %301 = arith.addf %300, %299 : vector<8x128xf32>
    %302 = arith.divf %300, %301 : vector<8x128xf32>
    %303 = arith.mulf %294, %247 : vector<8x128xf32>
    %304 = arith.mulf %288, %296 : vector<8x128xf32>
    %305 = arith.addf %303, %304 : vector<8x128xf32>
    %306 = math.tanh %305 : vector<8x128xf32>
    %307 = arith.mulf %302, %306 : vector<8x128xf32>
    %cst_86 = arith.constant dense<0.000000e+00> : vector<8x512xf32>
    %308 = tpu.matmul %276, %8, %cst_86 {dimension_numbers = #tpu.dot_dimension_numbers<[1], [0], [0], [1], [0, 0, 1, 1], [], []>} : vector<8x128xf32>, vector<128x512xf32>, vector<8x512xf32> -> vector<8x512xf32>
    %309 = arith.addf %280, %308 : vector<8x512xf32>
    %310 = vector.extract_strided_slice %309 {offsets = [0, 0], sizes = [8, 128], strides = [1, 1]} : vector<8x512xf32> to vector<8x128xf32>
    %311 = arith.negf %310 : vector<8x128xf32>
    %312 = math.exp %311 : vector<8x128xf32>
    %cst_87 = arith.constant 1.000000e+00 : f32
    %313 = vector.broadcast %cst_87 : f32 to vector<8x128xf32>
    %314 = arith.addf %313, %312 : vector<8x128xf32>
    %315 = arith.divf %313, %314 : vector<8x128xf32>
    %316 = vector.extract_strided_slice %309 {offsets = [0, 128], sizes = [8, 128], strides = [1, 1]} : vector<8x512xf32> to vector<8x128xf32>
    %317 = arith.negf %316 : vector<8x128xf32>
    %318 = math.exp %317 : vector<8x128xf32>
    %cst_88 = arith.constant 1.000000e+00 : f32
    %319 = vector.broadcast %cst_88 : f32 to vector<8x128xf32>
    %320 = arith.addf %319, %318 : vector<8x128xf32>
    %321 = arith.divf %319, %320 : vector<8x128xf32>
    %322 = vector.extract_strided_slice %309 {offsets = [0, 256], sizes = [8, 128], strides = [1, 1]} : vector<8x512xf32> to vector<8x128xf32>
    %323 = math.tanh %322 : vector<8x128xf32>
    %324 = vector.extract_strided_slice %309 {offsets = [0, 384], sizes = [8, 128], strides = [1, 1]} : vector<8x512xf32> to vector<8x128xf32>
    %325 = arith.negf %324 : vector<8x128xf32>
    %326 = math.exp %325 : vector<8x128xf32>
    %cst_89 = arith.constant 1.000000e+00 : f32
    %327 = vector.broadcast %cst_89 : f32 to vector<8x128xf32>
    %328 = arith.addf %327, %326 : vector<8x128xf32>
    %329 = arith.divf %327, %328 : vector<8x128xf32>
    %330 = arith.mulf %321, %274 : vector<8x128xf32>
    %331 = arith.mulf %315, %323 : vector<8x128xf32>
    %332 = arith.addf %330, %331 : vector<8x128xf32>
    %333 = math.tanh %332 : vector<8x128xf32>
    %334 = arith.mulf %329, %333 : vector<8x128xf32>
    %c40_90 = arith.constant 40 : index
    %c0_91 = arith.constant 0 : index
    %335 = vector.load %arg5[%c40_90, %c0_91] : memref<64x256xf32, #tpu.memory_space<vmem>>, vector<8x128xf32>
    tpu.vector_store %arg5[%c40_90, %c0_91], %307 {strides = array<i32>} : memref<64x256xf32, #tpu.memory_space<vmem>>, vector<8x128xf32>,
    %c16_92 = arith.constant 16 : index
    %c128_93 = arith.constant 128 : index
    %336 = vector.load %arg5[%c16_92, %c128_93] : memref<64x256xf32, #tpu.memory_space<vmem>>, vector<8x128xf32>
    tpu.vector_store %arg5[%c16_92, %c128_93], %334 {strides = array<i32>} : memref<64x256xf32, #tpu.memory_space<vmem>>, vector<8x128xf32>,
    %c48_94 = arith.constant 48 : index
    %c0_95 = arith.constant 0 : index
    %337 = vector.load %arg6[%c48_94, %c0_95] : memref<64x1024xf32, #tpu.memory_space<vmem>>, vector<8x512xf32>
    %c8_96 = arith.constant 8 : index
    %c512_97 = arith.constant 512 : index
    %338 = vector.load %arg6[%c8_96, %c512_97] : memref<64x1024xf32, #tpu.memory_space<vmem>>, vector<8x512xf32>
    %cst_98 = arith.constant dense<0.000000e+00> : vector<8x512xf32>
    %339 = tpu.matmul %307, %7, %cst_98 {dimension_numbers = #tpu.dot_dimension_numbers<[1], [0], [0], [1], [0, 0, 1, 1], [], []>} : vector<8x128xf32>, vector<128x512xf32>, vector<8x512xf32> -> vector<8x512xf32>
    %340 = arith.addf %337, %339 : vector<8x512xf32>
    %341 = vector.extract_strided_slice %340 {offsets = [0, 0], sizes = [8, 128], strides = [1, 1]} : vector<8x512xf32> to vector<8x128xf32>
    %342 = arith.negf %341 : vector<8x128xf32>
    %343 = math.exp %342 : vector<8x128xf32>
    %cst_99 = arith.constant 1.000000e+00 : f32
    %344 = vector.broadcast %cst_99 : f32 to vector<8x128xf32>
    %345 = arith.addf %344, %343 : vector<8x128xf32>
    %346 = arith.divf %344, %345 : vector<8x128xf32>
    %347 = vector.extract_strided_slice %340 {offsets = [0, 128], sizes = [8, 128], strides = [1, 1]} : vector<8x512xf32> to vector<8x128xf32>
    %348 = arith.negf %347 : vector<8x128xf32>
    %349 = math.exp %348 : vector<8x128xf32>
    %cst_100 = arith.constant 1.000000e+00 : f32
    %350 = vector.broadcast %cst_100 : f32 to vector<8x128xf32>
    %351 = arith.addf %350, %349 : vector<8x128xf32>
    %352 = arith.divf %350, %351 : vector<8x128xf32>
    %353 = vector.extract_strided_slice %340 {offsets = [0, 256], sizes = [8, 128], strides = [1, 1]} : vector<8x512xf32> to vector<8x128xf32>
    %354 = math.tanh %353 : vector<8x128xf32>
    %355 = vector.extract_strided_slice %340 {offsets = [0, 384], sizes = [8, 128], strides = [1, 1]} : vector<8x512xf32> to vector<8x128xf32>
    %356 = arith.negf %355 : vector<8x128xf32>
    %357 = math.exp %356 : vector<8x128xf32>
    %cst_101 = arith.constant 1.000000e+00 : f32
    %358 = vector.broadcast %cst_101 : f32 to vector<8x128xf32>
    %359 = arith.addf %358, %357 : vector<8x128xf32>
    %360 = arith.divf %358, %359 : vector<8x128xf32>
    %361 = arith.mulf %352, %305 : vector<8x128xf32>
    %362 = arith.mulf %346, %354 : vector<8x128xf32>
    %363 = arith.addf %361, %362 : vector<8x128xf32>
    %364 = math.tanh %363 : vector<8x128xf32>
    %365 = arith.mulf %360, %364 : vector<8x128xf32>
    %cst_102 = arith.constant dense<0.000000e+00> : vector<8x512xf32>
    %366 = tpu.matmul %334, %8, %cst_102 {dimension_numbers = #tpu.dot_dimension_numbers<[1], [0], [0], [1], [0, 0, 1, 1], [], []>} : vector<8x128xf32>, vector<128x512xf32>, vector<8x512xf32> -> vector<8x512xf32>
    %367 = arith.addf %338, %366 : vector<8x512xf32>
    %368 = vector.extract_strided_slice %367 {offsets = [0, 0], sizes = [8, 128], strides = [1, 1]} : vector<8x512xf32> to vector<8x128xf32>
    %369 = arith.negf %368 : vector<8x128xf32>
    %370 = math.exp %369 : vector<8x128xf32>
    %cst_103 = arith.constant 1.000000e+00 : f32
    %371 = vector.broadcast %cst_103 : f32 to vector<8x128xf32>
    %372 = arith.addf %371, %370 : vector<8x128xf32>
    %373 = arith.divf %371, %372 : vector<8x128xf32>
    %374 = vector.extract_strided_slice %367 {offsets = [0, 128], sizes = [8, 128], strides = [1, 1]} : vector<8x512xf32> to vector<8x128xf32>
    %375 = arith.negf %374 : vector<8x128xf32>
    %376 = math.exp %375 : vector<8x128xf32>
    %cst_104 = arith.constant 1.000000e+00 : f32
    %377 = vector.broadcast %cst_104 : f32 to vector<8x128xf32>
    %378 = arith.addf %377, %376 : vector<8x128xf32>
    %379 = arith.divf %377, %378 : vector<8x128xf32>
    %380 = vector.extract_strided_slice %367 {offsets = [0, 256], sizes = [8, 128], strides = [1, 1]} : vector<8x512xf32> to vector<8x128xf32>
    %381 = math.tanh %380 : vector<8x128xf32>
    %382 = vector.extract_strided_slice %367 {offsets = [0, 384], sizes = [8, 128], strides = [1, 1]} : vector<8x512xf32> to vector<8x128xf32>
    %383 = arith.negf %382 : vector<8x128xf32>
    %384 = math.exp %383 : vector<8x128xf32>
    %cst_105 = arith.constant 1.000000e+00 : f32
    %385 = vector.broadcast %cst_105 : f32 to vector<8x128xf32>
    %386 = arith.addf %385, %384 : vector<8x128xf32>
    %387 = arith.divf %385, %386 : vector<8x128xf32>
    %388 = arith.mulf %379, %332 : vector<8x128xf32>
    %389 = arith.mulf %373, %381 : vector<8x128xf32>
    %390 = arith.addf %388, %389 : vector<8x128xf32>
    %391 = math.tanh %390 : vector<8x128xf32>
    %392 = arith.mulf %387, %391 : vector<8x128xf32>
    %c48_106 = arith.constant 48 : index
    %c0_107 = arith.constant 0 : index
    %393 = vector.load %arg5[%c48_106, %c0_107] : memref<64x256xf32, #tpu.memory_space<vmem>>, vector<8x128xf32>
    tpu.vector_store %arg5[%c48_106, %c0_107], %365 {strides = array<i32>} : memref<64x256xf32, #tpu.memory_space<vmem>>, vector<8x128xf32>,
    %c8_108 = arith.constant 8 : index
    %c128_109 = arith.constant 128 : index
    %394 = vector.load %arg5[%c8_108, %c128_109] : memref<64x256xf32, #tpu.memory_space<vmem>>, vector<8x128xf32>
    tpu.vector_store %arg5[%c8_108, %c128_109], %392 {strides = array<i32>} : memref<64x256xf32, #tpu.memory_space<vmem>>, vector<8x128xf32>,
    %c56_110 = arith.constant 56 : index
    %c0_111 = arith.constant 0 : index
    %395 = vector.load %arg6[%c56_110, %c0_111] : memref<64x1024xf32, #tpu.memory_space<vmem>>, vector<8x512xf32>
    %c0_112 = arith.constant 0 : index
    %c512_113 = arith.constant 512 : index
    %396 = vector.load %arg6[%c0_112, %c512_113] : memref<64x1024xf32, #tpu.memory_space<vmem>>, vector<8x512xf32>
    %cst_114 = arith.constant dense<0.000000e+00> : vector<8x512xf32>
    %397 = tpu.matmul %365, %7, %cst_114 {dimension_numbers = #tpu.dot_dimension_numbers<[1], [0], [0], [1], [0, 0, 1, 1], [], []>} : vector<8x128xf32>, vector<128x512xf32>, vector<8x512xf32> -> vector<8x512xf32>
    %398 = arith.addf %395, %397 : vector<8x512xf32>
    %399 = vector.extract_strided_slice %398 {offsets = [0, 0], sizes = [8, 128], strides = [1, 1]} : vector<8x512xf32> to vector<8x128xf32>
    %400 = arith.negf %399 : vector<8x128xf32>
    %401 = math.exp %400 : vector<8x128xf32>
    %cst_115 = arith.constant 1.000000e+00 : f32
    %402 = vector.broadcast %cst_115 : f32 to vector<8x128xf32>
    %403 = arith.addf %402, %401 : vector<8x128xf32>
    %404 = arith.divf %402, %403 : vector<8x128xf32>
    %405 = vector.extract_strided_slice %398 {offsets = [0, 128], sizes = [8, 128], strides = [1, 1]} : vector<8x512xf32> to vector<8x128xf32>
    %406 = arith.negf %405 : vector<8x128xf32>
    %407 = math.exp %406 : vector<8x128xf32>
    %cst_116 = arith.constant 1.000000e+00 : f32
    %408 = vector.broadcast %cst_116 : f32 to vector<8x128xf32>
    %409 = arith.addf %408, %407 : vector<8x128xf32>
    %410 = arith.divf %408, %409 : vector<8x128xf32>
    %411 = vector.extract_strided_slice %398 {offsets = [0, 256], sizes = [8, 128], strides = [1, 1]} : vector<8x512xf32> to vector<8x128xf32>
    %412 = math.tanh %411 : vector<8x128xf32>
    %413 = vector.extract_strided_slice %398 {offsets = [0, 384], sizes = [8, 128], strides = [1, 1]} : vector<8x512xf32> to vector<8x128xf32>
    %414 = arith.negf %413 : vector<8x128xf32>
    %415 = math.exp %414 : vector<8x128xf32>
    %cst_117 = arith.constant 1.000000e+00 : f32
    %416 = vector.broadcast %cst_117 : f32 to vector<8x128xf32>
    %417 = arith.addf %416, %415 : vector<8x128xf32>
    %418 = arith.divf %416, %417 : vector<8x128xf32>
    %419 = arith.mulf %410, %363 : vector<8x128xf32>
    %420 = arith.mulf %404, %412 : vector<8x128xf32>
    %421 = arith.addf %419, %420 : vector<8x128xf32>
    %422 = math.tanh %421 : vector<8x128xf32>
    %423 = arith.mulf %418, %422 : vector<8x128xf32>
    %cst_118 = arith.constant dense<0.000000e+00> : vector<8x512xf32>
    %424 = tpu.matmul %392, %8, %cst_118 {dimension_numbers = #tpu.dot_dimension_numbers<[1], [0], [0], [1], [0, 0, 1, 1], [], []>} : vector<8x128xf32>, vector<128x512xf32>, vector<8x512xf32> -> vector<8x512xf32>
    %425 = arith.addf %396, %424 : vector<8x512xf32>
    %426 = vector.extract_strided_slice %425 {offsets = [0, 0], sizes = [8, 128], strides = [1, 1]} : vector<8x512xf32> to vector<8x128xf32>
    %427 = arith.negf %426 : vector<8x128xf32>
    %428 = math.exp %427 : vector<8x128xf32>
    %cst_119 = arith.constant 1.000000e+00 : f32
    %429 = vector.broadcast %cst_119 : f32 to vector<8x128xf32>
    %430 = arith.addf %429, %428 : vector<8x128xf32>
    %431 = arith.divf %429, %430 : vector<8x128xf32>
    %432 = vector.extract_strided_slice %425 {offsets = [0, 128], sizes = [8, 128], strides = [1, 1]} : vector<8x512xf32> to vector<8x128xf32>
    %433 = arith.negf %432 : vector<8x128xf32>
    %434 = math.exp %433 : vector<8x128xf32>
    %cst_120 = arith.constant 1.000000e+00 : f32
    %435 = vector.broadcast %cst_120 : f32 to vector<8x128xf32>
    %436 = arith.addf %435, %434 : vector<8x128xf32>
    %437 = arith.divf %435, %436 : vector<8x128xf32>
    %438 = vector.extract_strided_slice %425 {offsets = [0, 256], sizes = [8, 128], strides = [1, 1]} : vector<8x512xf32> to vector<8x128xf32>
    %439 = math.tanh %438 : vector<8x128xf32>
    %440 = vector.extract_strided_slice %425 {offsets = [0, 384], sizes = [8, 128], strides = [1, 1]} : vector<8x512xf32> to vector<8x128xf32>
    %441 = arith.negf %440 : vector<8x128xf32>
    %442 = math.exp %441 : vector<8x128xf32>
    %cst_121 = arith.constant 1.000000e+00 : f32
    %443 = vector.broadcast %cst_121 : f32 to vector<8x128xf32>
    %444 = arith.addf %443, %442 : vector<8x128xf32>
    %445 = arith.divf %443, %444 : vector<8x128xf32>
    %446 = arith.mulf %437, %390 : vector<8x128xf32>
    %447 = arith.mulf %431, %439 : vector<8x128xf32>
    %448 = arith.addf %446, %447 : vector<8x128xf32>
    %449 = math.tanh %448 : vector<8x128xf32>
    %450 = arith.mulf %445, %449 : vector<8x128xf32>
    %c56_122 = arith.constant 56 : index
    %c0_123 = arith.constant 0 : index
    %451 = vector.load %arg5[%c56_122, %c0_123] : memref<64x256xf32, #tpu.memory_space<vmem>>, vector<8x128xf32>
    tpu.vector_store %arg5[%c56_122, %c0_123], %423 {strides = array<i32>} : memref<64x256xf32, #tpu.memory_space<vmem>>, vector<8x128xf32>,
    %c0_124 = arith.constant 0 : index
    %c128_125 = arith.constant 128 : index
    %452 = vector.load %arg5[%c0_124, %c128_125] : memref<64x256xf32, #tpu.memory_space<vmem>>, vector<8x128xf32>
    tpu.vector_store %arg5[%c0_124, %c128_125], %450 {strides = array<i32>} : memref<64x256xf32, #tpu.memory_space<vmem>>, vector<8x128xf32>,
    return
  }
}

module attributes {stable_mosaic.version = 11 : i64} {
  func.func @_bilstm_last_fc_kernel(%arg0: memref<64x256xf32, #tpu.memory_space<vmem>>, %arg1: memref<256x512xf32, #tpu.memory_space<vmem>>, %arg2: memref<256x512xf32, #tpu.memory_space<vmem>>, %arg3: memref<128x512xf32, #tpu.memory_space<vmem>>, %arg4: memref<1x512xf32, #tpu.memory_space<vmem>>, %arg5: memref<1x512xf32, #tpu.memory_space<vmem>>, %arg6: memref<256x6xf32, #tpu.memory_space<vmem>>, %arg7: memref<1x6xf32, #tpu.memory_space<vmem>>, %arg8: memref<8x6xf32, #tpu.memory_space<vmem>>, %arg9: memref<64x512xf32, #tpu.memory_space<vmem>>) attributes {dimension_semantics = [], scalar_prefetch = 0 : i64, scratch_operands = 1 : i64, tpu.core_type = #tpu.core_type<tc>} {
    %c0 = arith.constant 0 : index
    %c0_0 = arith.constant 0 : index
    %0 = vector.load %arg0[%c0, %c0_0] : memref<64x256xf32, #tpu.memory_space<vmem>>, vector<64x256xf32>
    %c0_1 = arith.constant 0 : index
    %c0_2 = arith.constant 0 : index
    %1 = vector.load %arg1[%c0_1, %c0_2] : memref<256x512xf32, #tpu.memory_space<vmem>>, vector<256x512xf32>
    %cst = arith.constant dense<0.000000e+00> : vector<64x512xf32>
    %2 = tpu.matmul %0, %1, %cst {dimension_numbers = #tpu.dot_dimension_numbers<[1], [0], [0], [1], [0, 0, 1, 1], [], []>} : vector<64x256xf32>, vector<256x512xf32>, vector<64x512xf32> -> vector<64x512xf32>
    %c0_3 = arith.constant 0 : index
    %c0_4 = arith.constant 0 : index
    %3 = vector.load %arg4[%c0_3, %c0_4] : memref<1x512xf32, #tpu.memory_space<vmem>>, vector<1x512xf32>
    %4 = vector.broadcast %3 : vector<1x512xf32> to vector<64x512xf32>
    %5 = arith.addf %2, %4 : vector<64x512xf32>
    %c0_5 = arith.constant 0 : index
    %c0_6 = arith.constant 0 : index
    %6 = vector.load %arg9[%c0_5, %c0_6] : memref<64x512xf32, #tpu.memory_space<vmem>>, vector<64x512xf32>
    tpu.vector_store %arg9[%c0_5, %c0_6], %5 {strides = array<i32>} : memref<64x512xf32, #tpu.memory_space<vmem>>, vector<64x512xf32>,
    %c56 = arith.constant 56 : index
    %c0_7 = arith.constant 0 : index
    %7 = vector.load %arg0[%c56, %c0_7] : memref<64x256xf32, #tpu.memory_space<vmem>>, vector<8x256xf32>
    %c0_8 = arith.constant 0 : index
    %c0_9 = arith.constant 0 : index
    %8 = vector.load %arg2[%c0_8, %c0_9] : memref<256x512xf32, #tpu.memory_space<vmem>>, vector<256x512xf32>
    %cst_10 = arith.constant dense<0.000000e+00> : vector<8x512xf32>
    %9 = tpu.matmul %7, %8, %cst_10 {dimension_numbers = #tpu.dot_dimension_numbers<[1], [0], [0], [1], [0, 0, 1, 1], [], []>} : vector<8x256xf32>, vector<256x512xf32>, vector<8x512xf32> -> vector<8x512xf32>
    %c0_11 = arith.constant 0 : index
    %c0_12 = arith.constant 0 : index
    %10 = vector.load %arg5[%c0_11, %c0_12] : memref<1x512xf32, #tpu.memory_space<vmem>>, vector<1x512xf32>
    %11 = vector.broadcast %10 : vector<1x512xf32> to vector<8x512xf32>
    %12 = arith.addf %9, %11 : vector<8x512xf32>
    %13 = vector.extract_strided_slice %12 {offsets = [0, 0], sizes = [8, 128], strides = [1, 1]} : vector<8x512xf32> to vector<8x128xf32>
    %14 = arith.negf %13 : vector<8x128xf32>
    %15 = math.exp %14 : vector<8x128xf32>
    %cst_13 = arith.constant 1.000000e+00 : f32
    %16 = vector.broadcast %cst_13 : f32 to vector<8x128xf32>
    %17 = arith.addf %16, %15 : vector<8x128xf32>
    %18 = arith.divf %16, %17 : vector<8x128xf32>
    %19 = vector.extract_strided_slice %12 {offsets = [0, 256], sizes = [8, 128], strides = [1, 1]} : vector<8x512xf32> to vector<8x128xf32>
    %20 = math.tanh %19 : vector<8x128xf32>
    %21 = vector.extract_strided_slice %12 {offsets = [0, 384], sizes = [8, 128], strides = [1, 1]} : vector<8x512xf32> to vector<8x128xf32>
    %22 = arith.negf %21 : vector<8x128xf32>
    %23 = math.exp %22 : vector<8x128xf32>
    %cst_14 = arith.constant 1.000000e+00 : f32
    %24 = vector.broadcast %cst_14 : f32 to vector<8x128xf32>
    %25 = arith.addf %24, %23 : vector<8x128xf32>
    %26 = arith.divf %24, %25 : vector<8x128xf32>
    %27 = arith.mulf %18, %20 : vector<8x128xf32>
    %28 = math.tanh %27 : vector<8x128xf32>
    %29 = arith.mulf %26, %28 : vector<8x128xf32>
    %c0_15 = arith.constant 0 : index
    %c0_16 = arith.constant 0 : index
    %30 = vector.load %arg3[%c0_15, %c0_16] : memref<128x512xf32, #tpu.memory_space<vmem>>, vector<128x512xf32>
    %c0_17 = arith.constant 0 : index
    %c0_18 = arith.constant 0 : index
    %31 = vector.load %arg9[%c0_17, %c0_18] : memref<64x512xf32, #tpu.memory_space<vmem>>, vector<8x512xf32>
    %32 = vector.extract_strided_slice %31 {offsets = [0, 0], sizes = [8, 128], strides = [1, 1]} : vector<8x512xf32> to vector<8x128xf32>
    %33 = arith.negf %32 : vector<8x128xf32>
    %34 = math.exp %33 : vector<8x128xf32>
    %cst_19 = arith.constant 1.000000e+00 : f32
    %35 = vector.broadcast %cst_19 : f32 to vector<8x128xf32>
    %36 = arith.addf %35, %34 : vector<8x128xf32>
    %37 = arith.divf %35, %36 : vector<8x128xf32>
    %38 = vector.extract_strided_slice %31 {offsets = [0, 256], sizes = [8, 128], strides = [1, 1]} : vector<8x512xf32> to vector<8x128xf32>
    %39 = math.tanh %38 : vector<8x128xf32>
    %40 = vector.extract_strided_slice %31 {offsets = [0, 384], sizes = [8, 128], strides = [1, 1]} : vector<8x512xf32> to vector<8x128xf32>
    %41 = arith.negf %40 : vector<8x128xf32>
    %42 = math.exp %41 : vector<8x128xf32>
    %cst_20 = arith.constant 1.000000e+00 : f32
    %43 = vector.broadcast %cst_20 : f32 to vector<8x128xf32>
    %44 = arith.addf %43, %42 : vector<8x128xf32>
    %45 = arith.divf %43, %44 : vector<8x128xf32>
    %46 = arith.mulf %37, %39 : vector<8x128xf32>
    %47 = math.tanh %46 : vector<8x128xf32>
    %48 = arith.mulf %45, %47 : vector<8x128xf32>
    %c8 = arith.constant 8 : index
    %c0_21 = arith.constant 0 : index
    %49 = vector.load %arg9[%c8, %c0_21] : memref<64x512xf32, #tpu.memory_space<vmem>>, vector<8x512xf32>
    %cst_22 = arith.constant dense<0.000000e+00> : vector<8x512xf32>
    %50 = tpu.matmul %48, %30, %cst_22 {dimension_numbers = #tpu.dot_dimension_numbers<[1], [0], [0], [1], [0, 0, 1, 1], [], []>} : vector<8x128xf32>, vector<128x512xf32>, vector<8x512xf32> -> vector<8x512xf32>
    %51 = arith.addf %49, %50 : vector<8x512xf32>
    %52 = vector.extract_strided_slice %51 {offsets = [0, 0], sizes = [8, 128], strides = [1, 1]} : vector<8x512xf32> to vector<8x128xf32>
    %53 = arith.negf %52 : vector<8x128xf32>
    %54 = math.exp %53 : vector<8x128xf32>
    %cst_23 = arith.constant 1.000000e+00 : f32
    %55 = vector.broadcast %cst_23 : f32 to vector<8x128xf32>
    %56 = arith.addf %55, %54 : vector<8x128xf32>
    %57 = arith.divf %55, %56 : vector<8x128xf32>
    %58 = vector.extract_strided_slice %51 {offsets = [0, 128], sizes = [8, 128], strides = [1, 1]} : vector<8x512xf32> to vector<8x128xf32>
    %59 = arith.negf %58 : vector<8x128xf32>
    %60 = math.exp %59 : vector<8x128xf32>
    %cst_24 = arith.constant 1.000000e+00 : f32
    %61 = vector.broadcast %cst_24 : f32 to vector<8x128xf32>
    %62 = arith.addf %61, %60 : vector<8x128xf32>
    %63 = arith.divf %61, %62 : vector<8x128xf32>
    %64 = vector.extract_strided_slice %51 {offsets = [0, 256], sizes = [8, 128], strides = [1, 1]} : vector<8x512xf32> to vector<8x128xf32>
    %65 = math.tanh %64 : vector<8x128xf32>
    %66 = vector.extract_strided_slice %51 {offsets = [0, 384], sizes = [8, 128], strides = [1, 1]} : vector<8x512xf32> to vector<8x128xf32>
    %67 = arith.negf %66 : vector<8x128xf32>
    %68 = math.exp %67 : vector<8x128xf32>
    %cst_25 = arith.constant 1.000000e+00 : f32
    %69 = vector.broadcast %cst_25 : f32 to vector<8x128xf32>
    %70 = arith.addf %69, %68 : vector<8x128xf32>
    %71 = arith.divf %69, %70 : vector<8x128xf32>
    %72 = arith.mulf %63, %46 : vector<8x128xf32>
    %73 = arith.mulf %57, %65 : vector<8x128xf32>
    %74 = arith.addf %72, %73 : vector<8x128xf32>
    %75 = math.tanh %74 : vector<8x128xf32>
    %76 = arith.mulf %71, %75 : vector<8x128xf32>
    %c16 = arith.constant 16 : index
    %c0_26 = arith.constant 0 : index
    %77 = vector.load %arg9[%c16, %c0_26] : memref<64x512xf32, #tpu.memory_space<vmem>>, vector<8x512xf32>
    %cst_27 = arith.constant dense<0.000000e+00> : vector<8x512xf32>
    %78 = tpu.matmul %76, %30, %cst_27 {dimension_numbers = #tpu.dot_dimension_numbers<[1], [0], [0], [1], [0, 0, 1, 1], [], []>} : vector<8x128xf32>, vector<128x512xf32>, vector<8x512xf32> -> vector<8x512xf32>
    %79 = arith.addf %77, %78 : vector<8x512xf32>
    %80 = vector.extract_strided_slice %79 {offsets = [0, 0], sizes = [8, 128], strides = [1, 1]} : vector<8x512xf32> to vector<8x128xf32>
    %81 = arith.negf %80 : vector<8x128xf32>
    %82 = math.exp %81 : vector<8x128xf32>
    %cst_28 = arith.constant 1.000000e+00 : f32
    %83 = vector.broadcast %cst_28 : f32 to vector<8x128xf32>
    %84 = arith.addf %83, %82 : vector<8x128xf32>
    %85 = arith.divf %83, %84 : vector<8x128xf32>
    %86 = vector.extract_strided_slice %79 {offsets = [0, 128], sizes = [8, 128], strides = [1, 1]} : vector<8x512xf32> to vector<8x128xf32>
    %87 = arith.negf %86 : vector<8x128xf32>
    %88 = math.exp %87 : vector<8x128xf32>
    %cst_29 = arith.constant 1.000000e+00 : f32
    %89 = vector.broadcast %cst_29 : f32 to vector<8x128xf32>
    %90 = arith.addf %89, %88 : vector<8x128xf32>
    %91 = arith.divf %89, %90 : vector<8x128xf32>
    %92 = vector.extract_strided_slice %79 {offsets = [0, 256], sizes = [8, 128], strides = [1, 1]} : vector<8x512xf32> to vector<8x128xf32>
    %93 = math.tanh %92 : vector<8x128xf32>
    %94 = vector.extract_strided_slice %79 {offsets = [0, 384], sizes = [8, 128], strides = [1, 1]} : vector<8x512xf32> to vector<8x128xf32>
    %95 = arith.negf %94 : vector<8x128xf32>
    %96 = math.exp %95 : vector<8x128xf32>
    %cst_30 = arith.constant 1.000000e+00 : f32
    %97 = vector.broadcast %cst_30 : f32 to vector<8x128xf32>
    %98 = arith.addf %97, %96 : vector<8x128xf32>
    %99 = arith.divf %97, %98 : vector<8x128xf32>
    %100 = arith.mulf %91, %74 : vector<8x128xf32>
    %101 = arith.mulf %85, %93 : vector<8x128xf32>
    %102 = arith.addf %100, %101 : vector<8x128xf32>
    %103 = math.tanh %102 : vector<8x128xf32>
    %104 = arith.mulf %99, %103 : vector<8x128xf32>
    %c24 = arith.constant 24 : index
    %c0_31 = arith.constant 0 : index
    %105 = vector.load %arg9[%c24, %c0_31] : memref<64x512xf32, #tpu.memory_space<vmem>>, vector<8x512xf32>
    %cst_32 = arith.constant dense<0.000000e+00> : vector<8x512xf32>
    %106 = tpu.matmul %104, %30, %cst_32 {dimension_numbers = #tpu.dot_dimension_numbers<[1], [0], [0], [1], [0, 0, 1, 1], [], []>} : vector<8x128xf32>, vector<128x512xf32>, vector<8x512xf32> -> vector<8x512xf32>
    %107 = arith.addf %105, %106 : vector<8x512xf32>
    %108 = vector.extract_strided_slice %107 {offsets = [0, 0], sizes = [8, 128], strides = [1, 1]} : vector<8x512xf32> to vector<8x128xf32>
    %109 = arith.negf %108 : vector<8x128xf32>
    %110 = math.exp %109 : vector<8x128xf32>
    %cst_33 = arith.constant 1.000000e+00 : f32
    %111 = vector.broadcast %cst_33 : f32 to vector<8x128xf32>
    %112 = arith.addf %111, %110 : vector<8x128xf32>
    %113 = arith.divf %111, %112 : vector<8x128xf32>
    %114 = vector.extract_strided_slice %107 {offsets = [0, 128], sizes = [8, 128], strides = [1, 1]} : vector<8x512xf32> to vector<8x128xf32>
    %115 = arith.negf %114 : vector<8x128xf32>
    %116 = math.exp %115 : vector<8x128xf32>
    %cst_34 = arith.constant 1.000000e+00 : f32
    %117 = vector.broadcast %cst_34 : f32 to vector<8x128xf32>
    %118 = arith.addf %117, %116 : vector<8x128xf32>
    %119 = arith.divf %117, %118 : vector<8x128xf32>
    %120 = vector.extract_strided_slice %107 {offsets = [0, 256], sizes = [8, 128], strides = [1, 1]} : vector<8x512xf32> to vector<8x128xf32>
    %121 = math.tanh %120 : vector<8x128xf32>
    %122 = vector.extract_strided_slice %107 {offsets = [0, 384], sizes = [8, 128], strides = [1, 1]} : vector<8x512xf32> to vector<8x128xf32>
    %123 = arith.negf %122 : vector<8x128xf32>
    %124 = math.exp %123 : vector<8x128xf32>
    %cst_35 = arith.constant 1.000000e+00 : f32
    %125 = vector.broadcast %cst_35 : f32 to vector<8x128xf32>
    %126 = arith.addf %125, %124 : vector<8x128xf32>
    %127 = arith.divf %125, %126 : vector<8x128xf32>
    %128 = arith.mulf %119, %102 : vector<8x128xf32>
    %129 = arith.mulf %113, %121 : vector<8x128xf32>
    %130 = arith.addf %128, %129 : vector<8x128xf32>
    %131 = math.tanh %130 : vector<8x128xf32>
    %132 = arith.mulf %127, %131 : vector<8x128xf32>
    %c32 = arith.constant 32 : index
    %c0_36 = arith.constant 0 : index
    %133 = vector.load %arg9[%c32, %c0_36] : memref<64x512xf32, #tpu.memory_space<vmem>>, vector<8x512xf32>
    %cst_37 = arith.constant dense<0.000000e+00> : vector<8x512xf32>
    %134 = tpu.matmul %132, %30, %cst_37 {dimension_numbers = #tpu.dot_dimension_numbers<[1], [0], [0], [1], [0, 0, 1, 1], [], []>} : vector<8x128xf32>, vector<128x512xf32>, vector<8x512xf32> -> vector<8x512xf32>
    %135 = arith.addf %133, %134 : vector<8x512xf32>
    %136 = vector.extract_strided_slice %135 {offsets = [0, 0], sizes = [8, 128], strides = [1, 1]} : vector<8x512xf32> to vector<8x128xf32>
    %137 = arith.negf %136 : vector<8x128xf32>
    %138 = math.exp %137 : vector<8x128xf32>
    %cst_38 = arith.constant 1.000000e+00 : f32
    %139 = vector.broadcast %cst_38 : f32 to vector<8x128xf32>
    %140 = arith.addf %139, %138 : vector<8x128xf32>
    %141 = arith.divf %139, %140 : vector<8x128xf32>
    %142 = vector.extract_strided_slice %135 {offsets = [0, 128], sizes = [8, 128], strides = [1, 1]} : vector<8x512xf32> to vector<8x128xf32>
    %143 = arith.negf %142 : vector<8x128xf32>
    %144 = math.exp %143 : vector<8x128xf32>
    %cst_39 = arith.constant 1.000000e+00 : f32
    %145 = vector.broadcast %cst_39 : f32 to vector<8x128xf32>
    %146 = arith.addf %145, %144 : vector<8x128xf32>
    %147 = arith.divf %145, %146 : vector<8x128xf32>
    %148 = vector.extract_strided_slice %135 {offsets = [0, 256], sizes = [8, 128], strides = [1, 1]} : vector<8x512xf32> to vector<8x128xf32>
    %149 = math.tanh %148 : vector<8x128xf32>
    %150 = vector.extract_strided_slice %135 {offsets = [0, 384], sizes = [8, 128], strides = [1, 1]} : vector<8x512xf32> to vector<8x128xf32>
    %151 = arith.negf %150 : vector<8x128xf32>
    %152 = math.exp %151 : vector<8x128xf32>
    %cst_40 = arith.constant 1.000000e+00 : f32
    %153 = vector.broadcast %cst_40 : f32 to vector<8x128xf32>
    %154 = arith.addf %153, %152 : vector<8x128xf32>
    %155 = arith.divf %153, %154 : vector<8x128xf32>
    %156 = arith.mulf %147, %130 : vector<8x128xf32>
    %157 = arith.mulf %141, %149 : vector<8x128xf32>
    %158 = arith.addf %156, %157 : vector<8x128xf32>
    %159 = math.tanh %158 : vector<8x128xf32>
    %160 = arith.mulf %155, %159 : vector<8x128xf32>
    %c40 = arith.constant 40 : index
    %c0_41 = arith.constant 0 : index
    %161 = vector.load %arg9[%c40, %c0_41] : memref<64x512xf32, #tpu.memory_space<vmem>>, vector<8x512xf32>
    %cst_42 = arith.constant dense<0.000000e+00> : vector<8x512xf32>
    %162 = tpu.matmul %160, %30, %cst_42 {dimension_numbers = #tpu.dot_dimension_numbers<[1], [0], [0], [1], [0, 0, 1, 1], [], []>} : vector<8x128xf32>, vector<128x512xf32>, vector<8x512xf32> -> vector<8x512xf32>
    %163 = arith.addf %161, %162 : vector<8x512xf32>
    %164 = vector.extract_strided_slice %163 {offsets = [0, 0], sizes = [8, 128], strides = [1, 1]} : vector<8x512xf32> to vector<8x128xf32>
    %165 = arith.negf %164 : vector<8x128xf32>
    %166 = math.exp %165 : vector<8x128xf32>
    %cst_43 = arith.constant 1.000000e+00 : f32
    %167 = vector.broadcast %cst_43 : f32 to vector<8x128xf32>
    %168 = arith.addf %167, %166 : vector<8x128xf32>
    %169 = arith.divf %167, %168 : vector<8x128xf32>
    %170 = vector.extract_strided_slice %163 {offsets = [0, 128], sizes = [8, 128], strides = [1, 1]} : vector<8x512xf32> to vector<8x128xf32>
    %171 = arith.negf %170 : vector<8x128xf32>
    %172 = math.exp %171 : vector<8x128xf32>
    %cst_44 = arith.constant 1.000000e+00 : f32
    %173 = vector.broadcast %cst_44 : f32 to vector<8x128xf32>
    %174 = arith.addf %173, %172 : vector<8x128xf32>
    %175 = arith.divf %173, %174 : vector<8x128xf32>
    %176 = vector.extract_strided_slice %163 {offsets = [0, 256], sizes = [8, 128], strides = [1, 1]} : vector<8x512xf32> to vector<8x128xf32>
    %177 = math.tanh %176 : vector<8x128xf32>
    %178 = vector.extract_strided_slice %163 {offsets = [0, 384], sizes = [8, 128], strides = [1, 1]} : vector<8x512xf32> to vector<8x128xf32>
    %179 = arith.negf %178 : vector<8x128xf32>
    %180 = math.exp %179 : vector<8x128xf32>
    %cst_45 = arith.constant 1.000000e+00 : f32
    %181 = vector.broadcast %cst_45 : f32 to vector<8x128xf32>
    %182 = arith.addf %181, %180 : vector<8x128xf32>
    %183 = arith.divf %181, %182 : vector<8x128xf32>
    %184 = arith.mulf %175, %158 : vector<8x128xf32>
    %185 = arith.mulf %169, %177 : vector<8x128xf32>
    %186 = arith.addf %184, %185 : vector<8x128xf32>
    %187 = math.tanh %186 : vector<8x128xf32>
    %188 = arith.mulf %183, %187 : vector<8x128xf32>
    %c48 = arith.constant 48 : index
    %c0_46 = arith.constant 0 : index
    %189 = vector.load %arg9[%c48, %c0_46] : memref<64x512xf32, #tpu.memory_space<vmem>>, vector<8x512xf32>
    %cst_47 = arith.constant dense<0.000000e+00> : vector<8x512xf32>
    %190 = tpu.matmul %188, %30, %cst_47 {dimension_numbers = #tpu.dot_dimension_numbers<[1], [0], [0], [1], [0, 0, 1, 1], [], []>} : vector<8x128xf32>, vector<128x512xf32>, vector<8x512xf32> -> vector<8x512xf32>
    %191 = arith.addf %189, %190 : vector<8x512xf32>
    %192 = vector.extract_strided_slice %191 {offsets = [0, 0], sizes = [8, 128], strides = [1, 1]} : vector<8x512xf32> to vector<8x128xf32>
    %193 = arith.negf %192 : vector<8x128xf32>
    %194 = math.exp %193 : vector<8x128xf32>
    %cst_48 = arith.constant 1.000000e+00 : f32
    %195 = vector.broadcast %cst_48 : f32 to vector<8x128xf32>
    %196 = arith.addf %195, %194 : vector<8x128xf32>
    %197 = arith.divf %195, %196 : vector<8x128xf32>
    %198 = vector.extract_strided_slice %191 {offsets = [0, 128], sizes = [8, 128], strides = [1, 1]} : vector<8x512xf32> to vector<8x128xf32>
    %199 = arith.negf %198 : vector<8x128xf32>
    %200 = math.exp %199 : vector<8x128xf32>
    %cst_49 = arith.constant 1.000000e+00 : f32
    %201 = vector.broadcast %cst_49 : f32 to vector<8x128xf32>
    %202 = arith.addf %201, %200 : vector<8x128xf32>
    %203 = arith.divf %201, %202 : vector<8x128xf32>
    %204 = vector.extract_strided_slice %191 {offsets = [0, 256], sizes = [8, 128], strides = [1, 1]} : vector<8x512xf32> to vector<8x128xf32>
    %205 = math.tanh %204 : vector<8x128xf32>
    %206 = vector.extract_strided_slice %191 {offsets = [0, 384], sizes = [8, 128], strides = [1, 1]} : vector<8x512xf32> to vector<8x128xf32>
    %207 = arith.negf %206 : vector<8x128xf32>
    %208 = math.exp %207 : vector<8x128xf32>
    %cst_50 = arith.constant 1.000000e+00 : f32
    %209 = vector.broadcast %cst_50 : f32 to vector<8x128xf32>
    %210 = arith.addf %209, %208 : vector<8x128xf32>
    %211 = arith.divf %209, %210 : vector<8x128xf32>
    %212 = arith.mulf %203, %186 : vector<8x128xf32>
    %213 = arith.mulf %197, %205 : vector<8x128xf32>
    %214 = arith.addf %212, %213 : vector<8x128xf32>
    %215 = math.tanh %214 : vector<8x128xf32>
    %216 = arith.mulf %211, %215 : vector<8x128xf32>
    %c56_51 = arith.constant 56 : index
    %c0_52 = arith.constant 0 : index
    %217 = vector.load %arg9[%c56_51, %c0_52] : memref<64x512xf32, #tpu.memory_space<vmem>>, vector<8x512xf32>
    %cst_53 = arith.constant dense<0.000000e+00> : vector<8x512xf32>
    %218 = tpu.matmul %216, %30, %cst_53 {dimension_numbers = #tpu.dot_dimension_numbers<[1], [0], [0], [1], [0, 0, 1, 1], [], []>} : vector<8x128xf32>, vector<128x512xf32>, vector<8x512xf32> -> vector<8x512xf32>
    %219 = arith.addf %217, %218 : vector<8x512xf32>
    %220 = vector.extract_strided_slice %219 {offsets = [0, 0], sizes = [8, 128], strides = [1, 1]} : vector<8x512xf32> to vector<8x128xf32>
    %221 = arith.negf %220 : vector<8x128xf32>
    %222 = math.exp %221 : vector<8x128xf32>
    %cst_54 = arith.constant 1.000000e+00 : f32
    %223 = vector.broadcast %cst_54 : f32 to vector<8x128xf32>
    %224 = arith.addf %223, %222 : vector<8x128xf32>
    %225 = arith.divf %223, %224 : vector<8x128xf32>
    %226 = vector.extract_strided_slice %219 {offsets = [0, 128], sizes = [8, 128], strides = [1, 1]} : vector<8x512xf32> to vector<8x128xf32>
    %227 = arith.negf %226 : vector<8x128xf32>
    %228 = math.exp %227 : vector<8x128xf32>
    %cst_55 = arith.constant 1.000000e+00 : f32
    %229 = vector.broadcast %cst_55 : f32 to vector<8x128xf32>
    %230 = arith.addf %229, %228 : vector<8x128xf32>
    %231 = arith.divf %229, %230 : vector<8x128xf32>
    %232 = vector.extract_strided_slice %219 {offsets = [0, 256], sizes = [8, 128], strides = [1, 1]} : vector<8x512xf32> to vector<8x128xf32>
    %233 = math.tanh %232 : vector<8x128xf32>
    %234 = vector.extract_strided_slice %219 {offsets = [0, 384], sizes = [8, 128], strides = [1, 1]} : vector<8x512xf32> to vector<8x128xf32>
    %235 = arith.negf %234 : vector<8x128xf32>
    %236 = math.exp %235 : vector<8x128xf32>
    %cst_56 = arith.constant 1.000000e+00 : f32
    %237 = vector.broadcast %cst_56 : f32 to vector<8x128xf32>
    %238 = arith.addf %237, %236 : vector<8x128xf32>
    %239 = arith.divf %237, %238 : vector<8x128xf32>
    %240 = arith.mulf %231, %214 : vector<8x128xf32>
    %241 = arith.mulf %225, %233 : vector<8x128xf32>
    %242 = arith.addf %240, %241 : vector<8x128xf32>
    %243 = math.tanh %242 : vector<8x128xf32>
    %244 = arith.mulf %239, %243 : vector<8x128xf32>
    %245 = tpu.concatenate %244, %29 in 1 : vector<8x128xf32>, vector<8x128xf32> -> vector<8x256xf32>
    %c0_57 = arith.constant 0 : index
    %c0_58 = arith.constant 0 : index
    %246 = vector.load %arg6[%c0_57, %c0_58] : memref<256x6xf32, #tpu.memory_space<vmem>>, vector<256x6xf32>
    %cst_59 = arith.constant dense<0.000000e+00> : vector<8x6xf32>
    %247 = tpu.matmul %245, %246, %cst_59 {dimension_numbers = #tpu.dot_dimension_numbers<[1], [0], [0], [1], [0, 0, 1, 1], [], []>} : vector<8x256xf32>, vector<256x6xf32>, vector<8x6xf32> -> vector<8x6xf32>
    %c0_60 = arith.constant 0 : index
    %c0_61 = arith.constant 0 : index
    %248 = vector.load %arg7[%c0_60, %c0_61] : memref<1x6xf32, #tpu.memory_space<vmem>>, vector<1x6xf32>
    %249 = vector.broadcast %248 : vector<1x6xf32> to vector<8x6xf32>
    %250 = arith.addf %247, %249 : vector<8x6xf32>
    %c0_62 = arith.constant 0 : index
    %c0_63 = arith.constant 0 : index
    %251 = vector.load %arg8[%c0_62, %c0_63] : memref<8x6xf32, #tpu.memory_space<vmem>>, vector<8x6xf32>
    tpu.vector_store %arg8[%c0_62, %c0_63], %250 {strides = array<i32>} : memref<8x6xf32, #tpu.memory_space<vmem>>, vector<8x6xf32>,
    return
  }
}

</mosaic_0001>

<bundles_post_ra>
// kernel: lorenz_forward.3
= control target key start
LH: loop header
LB: loop body
LE: loop exit
PB: predicated region body
PF: predicated region fallthrough
CT: control target
= control target key end

     0   :  { %13 = vsyncpa [#allocation4], 0  ;;  %s2476_s27 = smov [#allocation3]   ;;  %s4348_s0 = inlined_call_operand.vmem [shape: f32[64,256], index: 0, kind: input, shape index: {}]   ;;  %s4349_s1 = inlined_call_operand.vmem [shape: f32[256,512], index: 1, kind: input, shape index: {}]   ;;  %s4350_s2 = inlined_call_operand.hbm [shape: f32[256,512], index: 2, kind: input, shape index: {}]   ;;  %s4351_s3 = inlined_call_operand.vmem [shape: f32[128,512], index: 3, kind: input, shape index: {}]   ;;  %s4352_s4 = inlined_call_operand.vmem [shape: f32[1,512], index: 4, kind: input, shape index: {}]   ;;  %s4353_s5 = inlined_call_operand.vmem [shape: f32[1,512], index: 5, kind: input, shape index: {}]   ;;  %s4354_s6 = inlined_call_operand.vmem [shape: f32[256,6], index: 6, kind: input, shape index: {}]   ;;  %s4355_s7 = inlined_call_operand.vmem [shape: f32[1,6], index: 7, kind: input, shape index: {}]   ;;  %s4356_s8 = inlined_call_operand.vmem [shape: f32[8,6], index: 8, kind: output, shape index: {}]  }
   0x1   :  { %s23_s28 = sshll.u32 %s2476_s27, 4  ;;  %s24_s28 = int_to_ptr.vmem [resolvable:$true] %s23_s28 }
   0x2   :  { %s2462_s29 = scalar_lea.vmem %s24_s28, 16384  ;;  %p2467_p1 = scmp.lt.s32.totalorder %s24_s28, %s24_s28 }
   0x3   :  { %p2463_p0 = scmp.ne.s32.totalorder %s24_s28, %s2462_s29  ;;  %p2468_p2 = scmp.lt.s32.totalorder %s2462_s29, %s2462_s29 }
   0x5   :  { %p2469_p3 = por %p2468_p2, %p2467_p1 }
   0x7   :  { %p2470_p4 = pnand %p2469_p3, %p2463_p0 }
   0x9   :  { %2473 = shalt.err (!%p2470_p4)
}
   0xa   :  { %s2477_s30 = smov 512   ;;  %s2478_s9 = smov 32  }
   0xb   :  { %29 = dma.hbm_to_vmem [thread:$0]  %s4350_s2, 16384, %s24_s28, [#allocation4], %s2477_s30, %s2477_s30, %s2478_s9  }
   0xc   :  { %2474 = dma.done.wait [#allocation4], 16384  }
   0xd   :  { %2475 = vsyncadd [#allocation4], 4294950912  ;;  %v120_v0 = vld [vmem:[%s4349_s1 + $0x1e8] sm:$0xff]  ;;  %v119_v1 = vld [vmem:[%s4349_s1 + $0x1e0] sm:$0xff]  ;;  %vm2181_vm0 = vcmask 48128  }
   0xe   :  { %v116_v2 = vld [vmem:[%s4349_s1 + $0x1c8] sm:$0xff]  ;;  %209 = vmatprep.subr.mxu0 %v120_v0  ;;  %v115_v3 = vld [vmem:[%s4349_s1 + $0x1c0] sm:$0xff]  ;;  %v122_v7 = vld [vmem:[%s4349_s1 + $0x1f8] sm:$0xff] }
   0xf   :  { %210 = vmatpush1.msra.mxu0 %v119_v1  ;;  %v112_v4 = vld [vmem:[%s4349_s1 + $0x1a8] sm:$0xff]  ;;  %v111_v5 = vld [vmem:[%s4349_s1 + $0x1a0] sm:$0xff]  ;;  %322 = vmatprep.subr.mxu1 %v122_v7  ;;  %v121_v9 = vld [vmem:[%s4349_s1 + $0x1f0] sm:$0xff] }
  0x10   :  { %211 = vmatprep.subr.mxu0 %v116_v2  ;;  %v108_v6 = vld [vmem:[%s4349_s1 + $0x188] sm:$0xff]  ;;  %v107_v8 = vld [vmem:[%s4349_s1 + $0x180] sm:$0xff]  ;;  %v118_v10 = vld [vmem:[%s4349_s1 + $0x1d8] sm:$0xff]  ;;  %323 = vmatpush1.msra.mxu1 %v121_v9 }
  0x11   :  { %212 = vmatpush1.msra.mxu0 %v115_v3  ;;  %v104_v11 = vld [vmem:[%s4349_s1 + $0x168] sm:$0xff]  ;;  %v117_v12 = vld [vmem:[%s4349_s1 + $0x1d0] sm:$0xff]  ;;  %v103_v13 = vld [vmem:[%s4349_s1 + $0x160] sm:$0xff]  ;;  %324 = vmatprep.subr.mxu1 %v118_v10 }
  0x12   :  { %213 = vmatprep.subr.mxu0 %v112_v4  ;;  %v114_v14 = vld [vmem:[%s4349_s1 + $0x1b8] sm:$0xff]  ;;  %v113_v15 = vld [vmem:[%s4349_s1 + $0x1b0] sm:$0xff]  ;;  %v100_v16 = vld [vmem:[%s4349_s1 + $0x148] sm:$0xff]  ;;  %325 = vmatpush1.msra.mxu1 %v117_v12 }
  0x13   :  { %214 = vmatpush1.msra.mxu0 %v111_v5  ;;  %v110_v17 = vld [vmem:[%s4349_s1 + $0x198] sm:$0xff]  ;;  %v99_v18 = vld [vmem:[%s4349_s1 + $0x140] sm:$0xff]  ;;  %326 = vmatprep.subr.mxu1 %v114_v14  ;;  %v109_v19 = vld [vmem:[%s4349_s1 + $0x190] sm:$0xff] }
  0x14   :  { %215 = vmatprep.subr.mxu0 %v108_v6  ;;  %v96_v20 = vld [vmem:[%s4349_s1 + $0x128] sm:$0xff]  ;;  %327 = vmatpush1.msra.mxu1 %v113_v15  ;;  %v106_v21 = vld [vmem:[%s4349_s1 + $0x178] sm:$0xff]  ;;  %v95_v22 = vld [vmem:[%s4349_s1 + $0x120] sm:$0xff] }
  0x15   :  { %216 = vmatpush1.msra.mxu0 %v107_v8  ;;  %328 = vmatprep.subr.mxu1 %v110_v17  ;;  %v105_v23 = vld [vmem:[%s4349_s1 + $0x170] sm:$0xff]  ;;  %v92_v24 = vld [vmem:[%s4349_s1 + $0x108] sm:$0xff]  ;;  %v102_v25 = vld [vmem:[%s4349_s1 + $0x158] sm:$0xff] }
  0x16   :  { %217 = vmatprep.subr.mxu0 %v104_v11  ;;  %329 = vmatpush1.msra.mxu1 %v109_v19  ;;  %v91_v26 = vld [vmem:[%s4349_s1 + $0x100] sm:$0xff]  ;;  %v101_v27 = vld [vmem:[%s4349_s1 + $0x150] sm:$0xff]  ;;  %v88_v28 = vld [vmem:[%s4349_s1 + $0xe8] sm:$0xff] }
  0x17   :  { %218 = vmatpush1.msra.mxu0 %v103_v13  ;;  %330 = vmatprep.subr.mxu1 %v106_v21  ;;  %v98_v29 = vld [vmem:[%s4349_s1 + $0x138] sm:$0xff]  ;;  %v87_v30 = vld [vmem:[%s4349_s1 + $0xe0] sm:$0xff]  ;;  %v97_v31 = vld [vmem:[%s4349_s1 + $0x130] sm:$0xff] }
  0x18   :  { %219 = vmatprep.subr.mxu0 %v100_v16  ;;  %331 = vmatpush1.msra.mxu1 %v105_v23  ;;  %v84_v32 = vld [vmem:[%s4349_s1 + $0xc8] sm:$0xff]  ;;  %v94_v33 = vld [vmem:[%s4349_s1 + $0x118] sm:$0xff]  ;;  %v83_v34 = vld [vmem:[%s4349_s1 + $0xc0] sm:$0xff] }
  0x19   :  { %220 = vmatpush1.msra.mxu0 %v99_v18  ;;  %332 = vmatprep.subr.mxu1 %v102_v25  ;;  %v93_v35 = vld [vmem:[%s4349_s1 + $0x110] sm:$0xff]  ;;  %v80_v36 = vld [vmem:[%s4349_s1 + $0xa8] sm:$0xff]  ;;  %v90_v37 = vld [vmem:[%s4349_s1 + $0xf8] sm:$0xff] }
  0x1a   :  { %221 = vmatprep.subr.mxu0 %v96_v20  ;;  %333 = vmatpush1.msra.mxu1 %v101_v27  ;;  %v79_v38 = vld [vmem:[%s4349_s1 + $0xa0] sm:$0xff]  ;;  %v89_v39 = vld [vmem:[%s4349_s1 + $0xf0] sm:$0xff]  ;;  %v76_v40 = vld [vmem:[%s4349_s1 + $0x88] sm:$0xff] }
  0x1b   :  { %222 = vmatpush1.msra.mxu0 %v95_v22  ;;  %334 = vmatprep.subr.mxu1 %v98_v29  ;;  %v86_v41 = vld [vmem:[%s4349_s1 + $0xd8] sm:$0xff]  ;;  %v75_v42 = vld [vmem:[%s4349_s1 + $0x80] sm:$0xff]  ;;  %v85_v43 = vld [vmem:[%s4349_s1 + $0xd0] sm:$0xff] }
  0x1c   :  { %223 = vmatprep.subr.mxu0 %v92_v24  ;;  %335 = vmatpush1.msra.mxu1 %v97_v31  ;;  %v72_v44 = vld [vmem:[%s4349_s1 + $0x68] sm:$0xff]  ;;  %v82_v45 = vld [vmem:[%s4349_s1 + $0xb8] sm:$0xff]  ;;  %v71_v46 = vld [vmem:[%s4349_s1 + $0x60] sm:$0xff] }
  0x1d   :  { %224 = vmatpush1.msra.mxu0 %v91_v26  ;;  %336 = vmatprep.subr.mxu1 %v94_v33  ;;  %v81_v47 = vld [vmem:[%s4349_s1 + $0xb0] sm:$0xff]  ;;  %v68_v48 = vld [vmem:[%s4349_s1 + $0x48] sm:$0xff]  ;;  %v78_v49 = vld [vmem:[%s4349_s1 + $0x98] sm:$0xff] }
  0x1e   :  { %225 = vmatprep.subr.mxu0 %v88_v28  ;;  %337 = vmatpush1.msra.mxu1 %v93_v35  ;;  %v67_v50 = vld [vmem:[%s4349_s1 + $0x40] sm:$0xff]  ;;  %v77_v51 = vld [vmem:[%s4349_s1 + $0x90] sm:$0xff]  ;;  %v64_v52 = vld [vmem:[%s4349_s1 + $0x28] sm:$0xff] }
  0x1f   :  { %226 = vmatpush1.msra.mxu0 %v87_v30  ;;  %338 = vmatprep.subr.mxu1 %v90_v37  ;;  %v74_v53 = vld [vmem:[%s4349_s1 + $0x78] sm:$0xff]  ;;  %v63_v54 = vld [vmem:[%s4349_s1 + $0x20] sm:$0xff]  ;;  %v73_v55 = vld [vmem:[%s4349_s1 + $0x70] sm:$0xff] }
  0x20   :  { %227 = vmatprep.subr.mxu0 %v84_v32  ;;  %339 = vmatpush1.msra.mxu1 %v89_v39  ;;  %v60_v56 = vld [vmem:[%s4349_s1 + $0x8] sm:$0xff]  ;;  %v70_v57 = vld [vmem:[%s4349_s1 + $0x58] sm:$0xff]  ;;  %v59_v58 = vld [vmem:[%s4349_s1] sm:$0xff] }
  0x21   :  { %228 = vmatpush1.msra.mxu0 %v83_v34  ;;  %340 = vmatprep.subr.mxu1 %v86_v41  ;;  %v69_v59 = vld [vmem:[%s4349_s1 + $0x50] sm:$0xff]  ;;  %v184_v60 = vld [vmem:[%s4349_s1 + $0x3e8] sm:$0xff]  ;;  %v66_v61 = vld [vmem:[%s4349_s1 + $0x38] sm:$0xff] }
  0x22   :  { %229 = vmatprep.subr.mxu0 %v80_v36  ;;  %341 = vmatpush1.msra.mxu1 %v85_v43  ;;  %v183_v62 = vld [vmem:[%s4349_s1 + $0x3e0] sm:$0xff]  ;;  %v65_v63 = vld [vmem:[%s4349_s1 + $0x30] sm:$0xff]  ;;  %v180_v0 = vld [vmem:[%s4349_s1 + $0x3c8] sm:$0xff] }
  0x23   :  { %230 = vmatpush1.msra.mxu0 %v79_v38  ;;  %342 = vmatprep.subr.mxu1 %v82_v45  ;;  %v62_v1 = vld [vmem:[%s4349_s1 + $0x18] sm:$0xff]  ;;  %v179_v2 = vld [vmem:[%s4349_s1 + $0x3c0] sm:$0xff]  ;;  %v61_v3 = vld [vmem:[%s4349_s1 + $0x10] sm:$0xff] }
  0x24   :  { %231 = vmatprep.subr.mxu0 %v76_v40  ;;  %343 = vmatpush1.msra.mxu1 %v81_v47  ;;  %v176_v4 = vld [vmem:[%s4349_s1 + $0x3a8] sm:$0xff]  ;;  %v186_v5 = vld [vmem:[%s4349_s1 + $0x3f8] sm:$0xff]  ;;  %v175_v6 = vld [vmem:[%s4349_s1 + $0x3a0] sm:$0xff] }
  0x25   :  { %232 = vmatpush1.msra.mxu0 %v75_v42  ;;  %344 = vmatprep.subr.mxu1 %v78_v49  ;;  %v185_v7 = vld [vmem:[%s4349_s1 + $0x3f0] sm:$0xff]  ;;  %v172_v8 = vld [vmem:[%s4349_s1 + $0x388] sm:$0xff]  ;;  %v182_v9 = vld [vmem:[%s4349_s1 + $0x3d8] sm:$0xff] }
  0x26   :  { %233 = vmatprep.subr.mxu0 %v72_v44  ;;  %345 = vmatpush1.msra.mxu1 %v77_v51  ;;  %v171_v10 = vld [vmem:[%s4349_s1 + $0x380] sm:$0xff]  ;;  %v181_v11 = vld [vmem:[%s4349_s1 + $0x3d0] sm:$0xff]  ;;  %v168_v12 = vld [vmem:[%s4349_s1 + $0x368] sm:$0xff] }
  0x27   :  { %234 = vmatpush1.msra.mxu0 %v71_v46  ;;  %346 = vmatprep.subr.mxu1 %v74_v53  ;;  %v178_v13 = vld [vmem:[%s4349_s1 + $0x3b8] sm:$0xff]  ;;  %v167_v14 = vld [vmem:[%s4349_s1 + $0x360] sm:$0xff]  ;;  %v177_v15 = vld [vmem:[%s4349_s1 + $0x3b0] sm:$0xff] }
  0x28   :  { %235 = vmatprep.subr.mxu0 %v68_v48  ;;  %347 = vmatpush1.msra.mxu1 %v73_v55  ;;  %v164_v16 = vld [vmem:[%s4349_s1 + $0x348] sm:$0xff]  ;;  %v174_v17 = vld [vmem:[%s4349_s1 + $0x398] sm:$0xff]  ;;  %v163_v18 = vld [vmem:[%s4349_s1 + $0x340] sm:$0xff] }
  0x29   :  { %236 = vmatpush1.msra.mxu0 %v67_v50  ;;  %348 = vmatprep.subr.mxu1 %v70_v57  ;;  %v173_v19 = vld [vmem:[%s4349_s1 + $0x390] sm:$0xff]  ;;  %v160_v20 = vld [vmem:[%s4349_s1 + $0x328] sm:$0xff]  ;;  %v170_v21 = vld [vmem:[%s4349_s1 + $0x378] sm:$0xff] }
  0x2a   :  { %237 = vmatprep.subr.mxu0 %v64_v52  ;;  %349 = vmatpush1.msra.mxu1 %v69_v59  ;;  %v159_v22 = vld [vmem:[%s4349_s1 + $0x320] sm:$0xff]  ;;  %v169_v23 = vld [vmem:[%s4349_s1 + $0x370] sm:$0xff]  ;;  %v156_v24 = vld [vmem:[%s4349_s1 + $0x308] sm:$0xff] }
  0x2b   :  { %238 = vmatpush1.msra.mxu0 %v63_v54  ;;  %350 = vmatprep.subr.mxu1 %v66_v61  ;;  %v166_v25 = vld [vmem:[%s4349_s1 + $0x358] sm:$0xff]  ;;  %v155_v26 = vld [vmem:[%s4349_s1 + $0x300] sm:$0xff]  ;;  %v165_v27 = vld [vmem:[%s4349_s1 + $0x350] sm:$0xff] }
  0x2c   :  { %239 = vmatprep.subr.mxu0 %v60_v56  ;;  %351 = vmatpush1.msra.mxu1 %v65_v63  ;;  %v152_v28 = vld [vmem:[%s4349_s1 + $0x2e8] sm:$0xff]  ;;  %v162_v29 = vld [vmem:[%s4349_s1 + $0x338] sm:$0xff]  ;;  %v151_v30 = vld [vmem:[%s4349_s1 + $0x2e0] sm:$0xff] }
  0x2d   :  { %240 = vmatpush1.msra.mxu0 %v59_v58  ;;  %352 = vmatprep.subr.mxu1 %v62_v1  ;;  %v161_v31 = vld [vmem:[%s4349_s1 + $0x330] sm:$0xff]  ;;  %v148_v32 = vld [vmem:[%s4349_s1 + $0x2c8] sm:$0xff]  ;;  %v158_v33 = vld [vmem:[%s4349_s1 + $0x318] sm:$0xff] }
  0x2e   :  { %241 = vmatprep.subr.mxu0 %v184_v60  ;;  %353 = vmatpush1.msra.mxu1 %v61_v3  ;;  %v147_v34 = vld [vmem:[%s4349_s1 + $0x2c0] sm:$0xff]  ;;  %v157_v35 = vld [vmem:[%s4349_s1 + $0x310] sm:$0xff]  ;;  %v144_v36 = vld [vmem:[%s4349_s1 + $0x2a8] sm:$0xff] }
  0x2f   :  { %242 = vmatpush2.msra.mxu0 %v183_v62  ;;  %354 = vmatprep.subr.mxu1 %v186_v5  ;;  %v154_v37 = vld [vmem:[%s4349_s1 + $0x2f8] sm:$0xff]  ;;  %v143_v38 = vld [vmem:[%s4349_s1 + $0x2a0] sm:$0xff]  ;;  %v153_v39 = vld [vmem:[%s4349_s1 + $0x2f0] sm:$0xff] }
  0x30   :  { %243 = vmatprep.subr.mxu0 %v180_v0  ;;  %355 = vmatpush2.msra.mxu1 %v185_v7  ;;  %v140_v40 = vld [vmem:[%s4349_s1 + $0x288] sm:$0xff]  ;;  %v150_v41 = vld [vmem:[%s4349_s1 + $0x2d8] sm:$0xff]  ;;  %v139_v42 = vld [vmem:[%s4349_s1 + $0x280] sm:$0xff] }
  0x31   :  { %244 = vmatpush2.msra.mxu0 %v179_v2  ;;  %356 = vmatprep.subr.mxu1 %v182_v9  ;;  %v44_v43 = vld [vmem:[%s4348_s0 + $0x8] sm:$0xff]  ;;  %v149_v45 = vld [vmem:[%s4349_s1 + $0x2d0] sm:$0xff]  ;;  %v135_v46 = vld [vmem:[%s4349_s1 + $0x260] sm:$0xff] }
  0x32   :  { %245 = vmatprep.subr.mxu0 %v176_v4  ;;  %357 = vmatpush2.msra.mxu1 %v181_v11  ;;  %v136_v44 = vld [vmem:[%s4349_s1 + $0x268] sm:$0xff]  ;;  %v146_v47 = vld [vmem:[%s4349_s1 + $0x2b8] sm:$0xff]  ;;  %v145_v49 = vld [vmem:[%s4349_s1 + $0x2b0] sm:$0xff] }
  0x33   :  { %246 = vmatpush2.msra.mxu0 %v175_v6  ;;  %358 = vmatprep.subr.mxu1 %v178_v13  ;;  %v132_v48 = vld [vmem:[%s4349_s1 + $0x248] sm:$0xff]  ;;  %v131_v50 = vld [vmem:[%s4349_s1 + $0x240] sm:$0xff]  ;;  %v142_v51 = vld [vmem:[%s4349_s1 + $0x298] sm:$0xff] }
  0x34   :  { %247 = vmatprep.subr.mxu0 %v172_v8  ;;  %359 = vmatpush2.msra.mxu1 %v177_v15  ;;  %v128_v52 = vld [vmem:[%s4349_s1 + $0x228] sm:$0xff]  ;;  %v141_v53 = vld [vmem:[%s4349_s1 + $0x290] sm:$0xff]  ;;  %v127_v54 = vld [vmem:[%s4349_s1 + $0x220] sm:$0xff] }
  0x35   :  { %248 = vmatpush2.msra.mxu0 %v171_v10  ;;  %360 = vmatprep.subr.mxu1 %v174_v17  ;;  %v138_v55 = vld [vmem:[%s4349_s1 + $0x278] sm:$0xff]  ;;  %v124_v56 = vld [vmem:[%s4349_s1 + $0x208] sm:$0xff]  ;;  %v137_v57 = vld [vmem:[%s4349_s1 + $0x270] sm:$0xff] }
  0x36   :  { %249 = vmatprep.subr.mxu0 %v168_v12  ;;  %361 = vmatpush2.msra.mxu1 %v173_v19  ;;  %v123_v58 = vld [vmem:[%s4349_s1 + $0x200] sm:$0xff]  ;;  %v134_v59 = vld [vmem:[%s4349_s1 + $0x258] sm:$0xff]  ;;  %v133_v61 = vld [vmem:[%s4349_s1 + $0x250] sm:$0xff] }
  0x37   :  { %250 = vmatpush2.msra.mxu0 %v167_v14  ;;  %362 = vmatprep.subr.mxu1 %v170_v21  ;;  %v43_v60 = vld [vmem:[%s4348_s0] sm:$0xff]  ;;  %v130_v62 = vld [vmem:[%s4349_s1 + $0x238] sm:$0xff]  ;;  %v129_v63 = vld [vmem:[%s4349_s1 + $0x230] sm:$0xff] }
  0x38   :  { %251 = vmatprep.subr.mxu0 %v164_v16  ;;  %363 = vmatpush2.msra.mxu1 %v169_v23  ;;  %v530_v0 = vld [vmem:[#allocation3 + $0x1e8] sm:$0xff]  ;;  %v126_v1 = vld [vmem:[%s4349_s1 + $0x218] sm:$0xff]  ;;  %v529_v2 = vld [vmem:[#allocation3 + $0x1e0] sm:$0xff] }
  0x39   :  { %252 = vmatpush2.msra.mxu0 %v163_v18  ;;  %364 = vmatprep.subr.mxu1 %v166_v25  ;;  %v125_v3 = vld [vmem:[%s4349_s1 + $0x210] sm:$0xff]  ;;  %v526_v4 = vld [vmem:[#allocation3 + $0x1c8] sm:$0xff]  ;;  %v532_v5 = vld [vmem:[#allocation3 + $0x1f8] sm:$0xff] }
  0x3a   :  { %253 = vmatprep.subr.mxu0 %v160_v20  ;;  %365 = vmatpush2.msra.mxu1 %v165_v27  ;;  %v531_v6 = vld [vmem:[#allocation3 + $0x1f0] sm:$0xff]  ;;  %v525_v7 = vld [vmem:[#allocation3 + $0x1c0] sm:$0xff]  ;;  %v528_v8 = vld [vmem:[#allocation3 + $0x1d8] sm:$0xff] }
  0x3b   :  { %254 = vmatpush2.msra.mxu0 %v159_v22  ;;  %366 = vmatprep.subr.mxu1 %v162_v29  ;;  %v522_v9 = vld [vmem:[#allocation3 + $0x1a8] sm:$0xff]  ;;  %v527_v10 = vld [vmem:[#allocation3 + $0x1d0] sm:$0xff]  ;;  %v521_v11 = vld [vmem:[#allocation3 + $0x1a0] sm:$0xff] }
  0x3c   :  { %255 = vmatprep.subr.mxu0 %v156_v24  ;;  %367 = vmatpush2.msra.mxu1 %v161_v31  ;;  %v524_v12 = vld [vmem:[#allocation3 + $0x1b8] sm:$0xff]  ;;  %v518_v13 = vld [vmem:[#allocation3 + $0x188] sm:$0xff]  ;;  %v523_v14 = vld [vmem:[#allocation3 + $0x1b0] sm:$0xff] }
  0x3d   :  { %256 = vmatpush2.msra.mxu0 %v155_v26  ;;  %368 = vmatprep.subr.mxu1 %v158_v33  ;;  %v517_v15 = vld [vmem:[#allocation3 + $0x180] sm:$0xff]  ;;  %v520_v16 = vld [vmem:[#allocation3 + $0x198] sm:$0xff]  ;;  %v514_v17 = vld [vmem:[#allocation3 + $0x168] sm:$0xff] }
  0x3e   :  { %257 = vmatprep.subr.mxu0 %v152_v28  ;;  %369 = vmatpush2.msra.mxu1 %v157_v35  ;;  %v519_v18 = vld [vmem:[#allocation3 + $0x190] sm:$0xff]  ;;  %v513_v19 = vld [vmem:[#allocation3 + $0x160] sm:$0xff]  ;;  %v516_v20 = vld [vmem:[#allocation3 + $0x178] sm:$0xff] }
  0x3f   :  { %258 = vmatpush2.msra.mxu0 %v151_v30  ;;  %370 = vmatprep.subr.mxu1 %v154_v37  ;;  %v510_v21 = vld [vmem:[#allocation3 + $0x148] sm:$0xff]  ;;  %v515_v22 = vld [vmem:[#allocation3 + $0x170] sm:$0xff]  ;;  %v509_v23 = vld [vmem:[#allocation3 + $0x140] sm:$0xff] }
  0x40   :  { %259 = vmatprep.subr.mxu0 %v148_v32  ;;  %371 = vmatpush2.msra.mxu1 %v153_v39  ;;  %v512_v24 = vld [vmem:[#allocation3 + $0x158] sm:$0xff]  ;;  %v506_v25 = vld [vmem:[#allocation3 + $0x128] sm:$0xff]  ;;  %v511_v26 = vld [vmem:[#allocation3 + $0x150] sm:$0xff] }
  0x41   :  { %260 = vmatpush2.msra.mxu0 %v147_v34  ;;  %372 = vmatprep.subr.mxu1 %v150_v41  ;;  %v505_v27 = vld [vmem:[#allocation3 + $0x120] sm:$0xff]  ;;  %v508_v28 = vld [vmem:[#allocation3 + $0x138] sm:$0xff]  ;;  %v502_v29 = vld [vmem:[#allocation3 + $0x108] sm:$0xff] }
  0x42   :  { %261 = vmatprep.subr.mxu0 %v144_v36  ;;  %273 = vmatprep.mubr.f32.mxu0 %v44_v43  ;;  %v507_v30 = vld [vmem:[#allocation3 + $0x130] sm:$0xff]  ;;  %v501_v31 = vld [vmem:[#allocation3 + $0x100] sm:$0xff]  ;;  %v504_v32 = vld [vmem:[#allocation3 + $0x118] sm:$0xff] }
  0x43   :  { %262 = vmatpush2.msra.mxu0 %v143_v38  ;;  %373 = vmatpush2.msra.mxu1 %v149_v45  ;;  %v498_v33 = vld [vmem:[#allocation3 + $0xe8] sm:$0xff]  ;;  %v503_v34 = vld [vmem:[#allocation3 + $0x110] sm:$0xff]  ;;  %v497_v35 = vld [vmem:[#allocation3 + $0xe0] sm:$0xff] }
  0x44   :  { %263 = vmatprep.subr.mxu0 %v140_v40  ;;  %374 = vmatprep.subr.mxu1 %v146_v47  ;;  %v500_v36 = vld [vmem:[#allocation3 + $0xf8] sm:$0xff]  ;;  %v494_v37 = vld [vmem:[#allocation3 + $0xc8] sm:$0xff]  ;;  %v499_v38 = vld [vmem:[#allocation3 + $0xf0] sm:$0xff] }
  0x45   :  { %264 = vmatpush2.msra.mxu0 %v139_v42  ;;  %375 = vmatpush2.msra.mxu1 %v145_v49  ;;  %v493_v39 = vld [vmem:[#allocation3 + $0xc0] sm:$0xff]  ;;  %v496_v40 = vld [vmem:[#allocation3 + $0xd8] sm:$0xff]  ;;  %v490_v41 = vld [vmem:[#allocation3 + $0xa8] sm:$0xff] }
  0x46   :  { %265 = vmatprep.subr.mxu0 %v136_v44  ;;  %376 = vmatprep.subr.mxu1 %v142_v51  ;;  %v495_v42 = vld [vmem:[#allocation3 + $0xd0] sm:$0xff]  ;;  %v492_v44 = vld [vmem:[#allocation3 + $0xb8] sm:$0xff]  ;;  %v486_v45 = vld [vmem:[#allocation3 + $0x88] sm:$0xff] }
  0x47   :  { %266 = vmatpush2.msra.mxu0 %v135_v46  ;;  %377 = vmatpush2.msra.mxu1 %v141_v53  ;;  %v491_v46 = vld [vmem:[#allocation3 + $0xb0] sm:$0xff]  ;;  %v485_v47 = vld [vmem:[#allocation3 + $0x80] sm:$0xff]  ;;  %v482_v49 = vld [vmem:[#allocation3 + $0x68] sm:$0xff] }
  0x48   :  { %267 = vmatprep.subr.mxu0 %v132_v48  ;;  %378 = vmatprep.subr.mxu1 %v138_v55  ;;  %v488_v48 = vld [vmem:[#allocation3 + $0x98] sm:$0xff]  ;;  %v481_v51 = vld [vmem:[#allocation3 + $0x60] sm:$0xff]  ;;  %v478_v53 = vld [vmem:[#allocation3 + $0x48] sm:$0xff] }
  0x49   :  { %268 = vmatpush2.msra.mxu0 %v131_v50  ;;  %379 = vmatpush2.msra.mxu1 %v137_v57  ;;  %v487_v50 = vld [vmem:[#allocation3 + $0x90] sm:$0xff]  ;;  %v477_v55 = vld [vmem:[#allocation3 + $0x40] sm:$0xff]  ;;  %v474_v57 = vld [vmem:[#allocation3 + $0x28] sm:$0xff] }
  0x4a   :  { %269 = vmatprep.subr.mxu0 %v128_v52  ;;  %380 = vmatprep.subr.mxu1 %v134_v59  ;;  %v484_v52 = vld [vmem:[#allocation3 + $0x78] sm:$0xff]  ;;  %v473_v59 = vld [vmem:[#allocation3 + $0x20] sm:$0xff] }
  0x4b   :  { %270 = vmatpush2.msra.mxu0 %v127_v54  ;;  %381 = vmatpush2.msra.mxu1 %v133_v61  ;;  %v483_v54 = vld [vmem:[#allocation3 + $0x70] sm:$0xff]  ;;  %v470_v61 = vld [vmem:[#allocation3 + $0x8] sm:$0xff] }
  0x4c   :  { %271 = vmatprep.subr.mxu0 %v124_v56  ;;  %382 = vmatprep.subr.mxu1 %v130_v62  ;;  %v480_v56 = vld [vmem:[#allocation3 + $0x58] sm:$0xff]  ;;  %v475_v62 = vld [vmem:[#allocation3 + $0x30] sm:$0xff] }
  0x4d   :  { %272 = vmatpush2.msra.mxu0 %v123_v58  ;;  %386 = vmatprep.mubr.f32.mxu1 %v44_v43  ;;  %v489_v43 = vld [vmem:[#allocation3 + $0xa0] sm:$0xff]  ;;  %v479_v58 = vld [vmem:[#allocation3 + $0x50] sm:$0xff] }
  0x4e   :  { %274 = vmatmul.mubr.f32.vlgmr.msra.gmra.mxu0 %v43_v60  ;;  %383 = vmatpush2.msra.mxu1 %v129_v63  ;;  %v469_v63 = vld [vmem:[#allocation3] sm:$0xff] }
  0x4f   :  { %614 = vmatprep.subr.mxu0 %v530_v0  ;;  %384 = vmatprep.subr.mxu1 %v126_v1  ;;  %v472_v0 = vld [vmem:[#allocation3 + $0x18] sm:$0xff]  ;;  %v594_v1 = vld [vmem:[#allocation3 + $0x3e8] sm:$0xff] }
  0x50   :  { %615 = vmatpush1.msra.mxu0 %v529_v2  ;;  %385 = vmatpush2.msra.mxu1 %v125_v3  ;;  %v471_v2 = vld [vmem:[#allocation3 + $0x10] sm:$0xff]  ;;  %v593_v3 = vld [vmem:[#allocation3 + $0x3e0] sm:$0xff] }
  0x51   :  { %616 = vmatprep.subr.mxu0 %v526_v4  ;;  %387 = vmatmul.mubr.f32.vlgmr.msra.gmra.mxu1 %v43_v60  ;;  %v476_v60 = vld [vmem:[#allocation3 + $0x38] sm:$0xff] }
  0x52   :  { %684 = vmatprep.subr.mxu1 %v532_v5  ;;  %617 = vmatpush1.msra.mxu0 %v525_v7  ;;  %v596_v4 = vld [vmem:[#allocation3 + $0x3f8] sm:$0xff]  ;;  %v590_v5 = vld [vmem:[#allocation3 + $0x3c8] sm:$0xff] }
  0x53   :  { %685 = vmatpush1.msra.mxu1 %v531_v6  ;;  %618 = vmatprep.subr.mxu0 %v522_v9  ;;  %v595_v6 = vld [vmem:[#allocation3 + $0x3f0] sm:$0xff]  ;;  %v46_v7 = vld [vmem:[%s4348_s0 + $0x18] sm:$0xff] }
  0x54   :  { %686 = vmatprep.subr.mxu1 %v528_v8  ;;  %619 = vmatpush1.msra.mxu0 %v521_v11  ;;  %v589_v8 = vld [vmem:[#allocation3 + $0x3c0] sm:$0xff]  ;;  %v592_v9 = vld [vmem:[#allocation3 + $0x3d8] sm:$0xff]  ;;  %v586_v11 = vld [vmem:[#allocation3 + $0x3a8] sm:$0xff] }
  0x55   :  { %687 = vmatpush1.msra.mxu1 %v527_v10  ;;  %620 = vmatprep.subr.mxu0 %v518_v13  ;;  %v45_v10 = vld [vmem:[%s4348_s0 + $0x10] sm:$0xff]  ;;  %v585_v13 = vld [vmem:[#allocation3 + $0x3a0] sm:$0xff] }
  0x56   :  { %688 = vmatprep.subr.mxu1 %v524_v12  ;;  %621 = vmatpush1.msra.mxu0 %v517_v15  ;;  %v591_v12 = vld [vmem:[#allocation3 + $0x3d0] sm:$0xff]  ;;  %v582_v15 = vld [vmem:[#allocation3 + $0x388] sm:$0xff] }
  0x57   :  { %689 = vmatpush1.msra.mxu1 %v523_v14  ;;  %622 = vmatprep.subr.mxu0 %v514_v17  ;;  %v588_v14 = vld [vmem:[#allocation3 + $0x3b8] sm:$0xff]  ;;  %v48_v17 = vld [vmem:[%s4348_s0 + $0x28] sm:$0xff] }
  0x58   :  { %690 = vmatprep.subr.mxu1 %v520_v16  ;;  %623 = vmatpush1.msra.mxu0 %v513_v19  ;;  %v587_v16 = vld [vmem:[#allocation3 + $0x3b0] sm:$0xff]  ;;  %v584_v19 = vld [vmem:[#allocation3 + $0x398] sm:$0xff] }
  0x59   :  { %691 = vmatpush1.msra.mxu1 %v519_v18  ;;  %624 = vmatprep.subr.mxu0 %v510_v21  ;;  %v581_v18 = vld [vmem:[#allocation3 + $0x380] sm:$0xff]  ;;  %v578_v21 = vld [vmem:[#allocation3 + $0x368] sm:$0xff] }
  0x5a   :  { %692 = vmatprep.subr.mxu1 %v516_v20  ;;  %625 = vmatpush1.msra.mxu0 %v509_v23  ;;  %v47_v20 = vld [vmem:[%s4348_s0 + $0x20] sm:$0xff] }
  0x5b   :  { %693 = vmatpush1.msra.mxu1 %v515_v22  ;;  %626 = vmatprep.subr.mxu0 %v506_v25  ;;  %v583_v22 = vld [vmem:[#allocation3 + $0x390] sm:$0xff]  ;;  %v577_v23 = vld [vmem:[#allocation3 + $0x360] sm:$0xff]  ;;  %v574_v25 = vld [vmem:[#allocation3 + $0x348] sm:$0xff] }
  0x5c   :  { %694 = vmatprep.subr.mxu1 %v512_v24  ;;  %627 = vmatpush1.msra.mxu0 %v505_v27  ;;  %v580_v24 = vld [vmem:[#allocation3 + $0x378] sm:$0xff] }
  0x5d   :  { %695 = vmatpush1.msra.mxu1 %v511_v26  ;;  %628 = vmatprep.subr.mxu0 %v502_v29  ;;  %v579_v26 = vld [vmem:[#allocation3 + $0x370] sm:$0xff]  ;;  %v50_v27 = vld [vmem:[%s4348_s0 + $0x38] sm:$0xff] }
  0x5e   :  { %696 = vmatprep.subr.mxu1 %v508_v28  ;;  %629 = vmatpush1.msra.mxu0 %v501_v31  ;;  %v573_v28 = vld [vmem:[#allocation3 + $0x340] sm:$0xff]  ;;  %v576_v29 = vld [vmem:[#allocation3 + $0x358] sm:$0xff]  ;;  %v570_v31 = vld [vmem:[#allocation3 + $0x328] sm:$0xff] }
  0x5f   :  { %697 = vmatpush1.msra.mxu1 %v507_v30  ;;  %630 = vmatprep.subr.mxu0 %v498_v33  ;;  %v49_v30 = vld [vmem:[%s4348_s0 + $0x30] sm:$0xff]  ;;  %v569_v33 = vld [vmem:[#allocation3 + $0x320] sm:$0xff] }
  0x60   :  { %698 = vmatprep.subr.mxu1 %v504_v32  ;;  %631 = vmatpush1.msra.mxu0 %v497_v35  ;;  %v575_v32 = vld [vmem:[#allocation3 + $0x350] sm:$0xff]  ;;  %v566_v35 = vld [vmem:[#allocation3 + $0x308] sm:$0xff] }
  0x61   :  { %699 = vmatpush1.msra.mxu1 %v503_v34  ;;  %632 = vmatprep.subr.mxu0 %v494_v37  ;;  %v572_v34 = vld [vmem:[#allocation3 + $0x338] sm:$0xff]  ;;  %v52_v37 = vld [vmem:[%s4348_s0 + $0x48] sm:$0xff] }
  0x62   :  { %700 = vmatprep.subr.mxu1 %v500_v36  ;;  %633 = vmatpush1.msra.mxu0 %v493_v39  ;;  %v571_v36 = vld [vmem:[#allocation3 + $0x330] sm:$0xff]  ;;  %v568_v39 = vld [vmem:[#allocation3 + $0x318] sm:$0xff] }
  0x63   :  { %701 = vmatpush1.msra.mxu1 %v499_v38  ;;  %634 = vmatprep.subr.mxu0 %v490_v41  ;;  %v565_v38 = vld [vmem:[#allocation3 + $0x300] sm:$0xff]  ;;  %v562_v41 = vld [vmem:[#allocation3 + $0x2e8] sm:$0xff] }
  0x64   :  { %702 = vmatprep.subr.mxu1 %v496_v40  ;;  %635 = vmatpush1.msra.mxu0 %v489_v43  ;;  %v51_v40 = vld [vmem:[%s4348_s0 + $0x40] sm:$0xff] }
  0x65   :  { %703 = vmatpush1.msra.mxu1 %v495_v42  ;;  %636 = vmatprep.subr.mxu0 %v486_v45  ;;  %v567_v42 = vld [vmem:[#allocation3 + $0x310] sm:$0xff]  ;;  %v561_v43 = vld [vmem:[#allocation3 + $0x2e0] sm:$0xff]  ;;  %v558_v45 = vld [vmem:[#allocation3 + $0x2c8] sm:$0xff] }
  0x66   :  { %704 = vmatprep.subr.mxu1 %v492_v44  ;;  %637 = vmatpush1.msra.mxu0 %v485_v47  ;;  %v564_v44 = vld [vmem:[#allocation3 + $0x2f8] sm:$0xff] }
  0x67   :  { %705 = vmatpush1.msra.mxu1 %v491_v46  ;;  %638 = vmatprep.subr.mxu0 %v482_v49  ;;  %v563_v46 = vld [vmem:[#allocation3 + $0x2f0] sm:$0xff]  ;;  %v54_v47 = vld [vmem:[%s4348_s0 + $0x58] sm:$0xff] }
  0x68   :  { %706 = vmatprep.subr.mxu1 %v488_v48  ;;  %639 = vmatpush1.msra.mxu0 %v481_v51  ;;  %v557_v48 = vld [vmem:[#allocation3 + $0x2c0] sm:$0xff]  ;;  %v560_v49 = vld [vmem:[#allocation3 + $0x2d8] sm:$0xff]  ;;  %v554_v51 = vld [vmem:[#allocation3 + $0x2a8] sm:$0xff] }
  0x69   :  { %707 = vmatpush1.msra.mxu1 %v487_v50  ;;  %640 = vmatprep.subr.mxu0 %v478_v53  ;;  %v53_v50 = vld [vmem:[%s4348_s0 + $0x50] sm:$0xff]  ;;  %v553_v53 = vld [vmem:[#allocation3 + $0x2a0] sm:$0xff] }
  0x6a   :  { %708 = vmatprep.subr.mxu1 %v484_v52  ;;  %641 = vmatpush1.msra.mxu0 %v477_v55  ;;  %v559_v52 = vld [vmem:[#allocation3 + $0x2d0] sm:$0xff]  ;;  %v550_v55 = vld [vmem:[#allocation3 + $0x288] sm:$0xff] }
  0x6b   :  { %709 = vmatpush1.msra.mxu1 %v483_v54  ;;  %642 = vmatprep.subr.mxu0 %v474_v57  ;;  %v556_v54 = vld [vmem:[#allocation3 + $0x2b8] sm:$0xff]  ;;  %v56_v57 = vld [vmem:[%s4348_s0 + $0x68] sm:$0xff] }
  0x6c   :  { %710 = vmatprep.subr.mxu1 %v480_v56  ;;  %643 = vmatpush1.msra.mxu0 %v473_v59  ;;  %v555_v56 = vld [vmem:[#allocation3 + $0x2b0] sm:$0xff]  ;;  %v552_v59 = vld [vmem:[#allocation3 + $0x298] sm:$0xff] }
  0x6d   :  { %711 = vmatpush1.msra.mxu1 %v479_v58  ;;  %644 = vmatprep.subr.mxu0 %v470_v61  ;;  %v549_v58 = vld [vmem:[#allocation3 + $0x280] sm:$0xff]  ;;  %v546_v61 = vld [vmem:[#allocation3 + $0x268] sm:$0xff] }
  0x6e   :  { %712 = vmatprep.subr.mxu1 %v476_v60  ;;  %645 = vmatpush1.msra.mxu0 %v469_v63  ;;  %v55_v60 = vld [vmem:[%s4348_s0 + $0x60] sm:$0xff] }
  0x6f   :  { %713 = vmatpush1.msra.mxu1 %v475_v62  ;;  %646 = vmatprep.subr.mxu0 %v594_v1  ;;  %v551_v62 = vld [vmem:[#allocation3 + $0x290] sm:$0xff]  ;;  %v545_v63 = vld [vmem:[#allocation3 + $0x260] sm:$0xff]  ;;  %v542_v1 = vld [vmem:[#allocation3 + $0x248] sm:$0xff] }
  0x70   :  { %714 = vmatprep.subr.mxu1 %v472_v0  ;;  %647 = vmatpush2.msra.mxu0 %v593_v3  ;;  %v548_v0 = vld [vmem:[#allocation3 + $0x278] sm:$0xff] }
  0x71   :  { %715 = vmatpush1.msra.mxu1 %v471_v2  ;;  %648 = vmatprep.subr.mxu0 %v590_v5  ;;  %v547_v2 = vld [vmem:[#allocation3 + $0x270] sm:$0xff]  ;;  %v58_v3 = vld [vmem:[%s4348_s0 + $0x78] sm:$0xff] }
  0x72   :  { %716 = vmatprep.subr.mxu1 %v596_v4  ;;  %279 = vmatprep.mubr.f32.mxu0 %v46_v7  ;;  %v541_v4 = vld [vmem:[#allocation3 + $0x240] sm:$0xff]  ;;  %v544_v5 = vld [vmem:[#allocation3 + $0x258] sm:$0xff] }
  0x73   :  { %717 = vmatpush2.msra.mxu1 %v595_v6  ;;  %649 = vmatpush2.msra.mxu0 %v589_v8  ;;  %v57_v6 = vld [vmem:[%s4348_s0 + $0x70] sm:$0xff] }
  0x74   :  { %718 = vmatprep.subr.mxu1 %v592_v9  ;;  %280 = vmatmul.mubr.f32.gmra.mxu0 %v45_v10  ;;  %v543_v8 = vld [vmem:[#allocation3 + $0x250] sm:$0xff]  ;;  %v537_v9 = vld [vmem:[#allocation3 + $0x220] sm:$0xff] }
  0x75   :  { %650 = vmatprep.subr.mxu0 %v586_v11  ;;  %719 = vmatpush2.msra.mxu1 %v591_v12  ;;  %v534_v11 = vld [vmem:[#allocation3 + $0x208] sm:$0xff]  ;;  %v539_v12 = vld [vmem:[#allocation3 + $0x230] sm:$0xff] }
  0x76   :  { %392 = vmatprep.mubr.f32.mxu1 %v46_v7  ;;  %651 = vmatpush2.msra.mxu0 %v585_v13  ;;  %v538_v7 = vld [vmem:[#allocation3 + $0x228] sm:$0xff]  ;;  %v533_v13 = vld [vmem:[#allocation3 + $0x200] sm:$0xff] }
  0x77   :  { %720 = vmatprep.subr.mxu1 %v588_v14  ;;  %393 = vmatmul.mubr.f32.gmra.mxu1 %v45_v10  ;;  %v540_v10 = vld [vmem:[#allocation3 + $0x238] sm:$0xff] }
  0x78   :  { %652 = vmatprep.subr.mxu0 %v582_v15  ;;  %721 = vmatpush2.msra.mxu1 %v587_v16  ;;  %v536_v14 = vld [vmem:[#allocation3 + $0x218] sm:$0xff]  ;;  %v535_v15 = vld [vmem:[#allocation3 + $0x210] sm:$0xff]  ;;  %v2963_v16 = vld [vmem:[%s4351_s3 + $0x1e8] sm:$0xff] }
  0x79   :  { %285 = vmatprep.mubr.f32.mxu0 %v48_v17  ;;  %653 = vmatpush2.msra.mxu0 %v581_v18  ;;  %4445 = vst [vmem:[#allocation6_spill] sm:$0xff] %v2963_v16  ;;  %v2973_v18 = vld [vmem:[%s4351_s3 + $0x1e0] sm:$0xff] }
  0x7a   :  { %722 = vmatprep.subr.mxu1 %v584_v19  ;;  %286 = vmatmul.mubr.f32.gmra.mxu0 %v47_v20  ;;  %v2978_v19 = vld [vmem:[%s4351_s3 + $0x1f0] sm:$0xff] }
  0x7b   :  { %654 = vmatprep.subr.mxu0 %v578_v21  ;;  %723 = vmatpush2.msra.mxu1 %v583_v22  ;;  %v2990_v21 = vld [vmem:[%s4351_s3 + $0x1d8] sm:$0xff]  ;;  %v2995_v22 = vld [vmem:[%s4351_s3 + $0x1c0] sm:$0xff] }
  0x7c   :  { %398 = vmatprep.mubr.f32.mxu1 %v48_v17  ;;  %655 = vmatpush2.msra.mxu0 %v577_v23  ;;  %v2968_v17 = vld [vmem:[%s4351_s3 + $0x1f8] sm:$0xff]  ;;  %v3001_v23 = vld [vmem:[%s4351_s3 + $0x1d0] sm:$0xff] }
  0x7d   :  { %724 = vmatprep.subr.mxu1 %v580_v24  ;;  %399 = vmatmul.mubr.f32.gmra.mxu1 %v47_v20  ;;  %4446 = vst [vmem:[#allocation7_spill] sm:$0xff] %v2968_v17  ;;  %v2983_v20 = vld [vmem:[%s4351_s3 + $0x1c8] sm:$0xff] }
  0x7e   :  { %656 = vmatprep.subr.mxu0 %v574_v25  ;;  %725 = vmatpush2.msra.mxu1 %v579_v26  ;;  %v3006_v24 = vld [vmem:[%s4351_s3 + $0x1a8] sm:$0xff]  ;;  %v3013_v25 = vld [vmem:[%s4351_s3 + $0x1b8] sm:$0xff]  ;;  %v3018_v26 = vld [vmem:[%s4351_s3 + $0x1a0] sm:$0xff] }
  0x7f   :  { %291 = vmatprep.mubr.f32.mxu0 %v50_v27  ;;  %657 = vmatpush2.msra.mxu0 %v573_v28  ;;  %v3030_v28 = vld [vmem:[%s4351_s3 + $0x188] sm:$0xff] }
  0x80   :  { %726 = vmatprep.subr.mxu1 %v576_v29  ;;  %404 = vmatprep.mubr.f32.mxu1 %v50_v27  ;;  %v3025_v27 = vld [vmem:[%s4351_s3 + $0x1b0] sm:$0xff]  ;;  %v3037_v29 = vld [vmem:[%s4351_s3 + $0x198] sm:$0xff] }
  0x81   :  { %292 = vmatmul.mubr.f32.gmra.mxu0 %v49_v30  ;;  %658 = vmatprep.subr.mxu0 %v570_v31  ;;  %v3049_v31 = vld [vmem:[%s4351_s3 + $0x190] sm:$0xff] }
  0x82   :  { %727 = vmatpush2.msra.mxu1 %v575_v32  ;;  %659 = vmatpush2.msra.mxu0 %v569_v33  ;;  %v3054_v32 = vld [vmem:[%s4351_s3 + $0x168] sm:$0xff]  ;;  %v3061_v33 = vld [vmem:[%s4351_s3 + $0x178] sm:$0xff] }
  0x83   :  { %728 = vmatprep.subr.mxu1 %v572_v34  ;;  %405 = vmatmul.mubr.f32.gmra.mxu1 %v49_v30  ;;  %v3042_v30 = vld [vmem:[%s4351_s3 + $0x180] sm:$0xff] }
  0x84   :  { %660 = vmatprep.subr.mxu0 %v566_v35  ;;  %729 = vmatpush2.msra.mxu1 %v571_v36  ;;  %v3066_v34 = vld [vmem:[%s4351_s3 + $0x160] sm:$0xff]  ;;  %v3073_v35 = vld [vmem:[%s4351_s3 + $0x170] sm:$0xff]  ;;  %v3078_v36 = vld [vmem:[%s4351_s3 + $0x148] sm:$0xff] }
  0x85   :  { %297 = vmatprep.mubr.f32.mxu0 %v52_v37  ;;  %661 = vmatpush2.msra.mxu0 %v565_v38  ;;  %v3090_v38 = vld [vmem:[%s4351_s3 + $0x140] sm:$0xff] }
  0x86   :  { %730 = vmatprep.subr.mxu1 %v568_v39  ;;  %298 = vmatmul.mubr.f32.gmra.mxu0 %v51_v40  ;;  %v3097_v39 = vld [vmem:[%s4351_s3 + $0x150] sm:$0xff] }
  0x87   :  { %662 = vmatprep.subr.mxu0 %v562_v41  ;;  %731 = vmatpush2.msra.mxu1 %v567_v42  ;;  %v3109_v41 = vld [vmem:[%s4351_s3 + $0x138] sm:$0xff]  ;;  %v3114_v42 = vld [vmem:[%s4351_s3 + $0x120] sm:$0xff] }
  0x88   :  { %410 = vmatprep.mubr.f32.mxu1 %v52_v37  ;;  %663 = vmatpush2.msra.mxu0 %v561_v43  ;;  %v3085_v37 = vld [vmem:[%s4351_s3 + $0x158] sm:$0xff]  ;;  %v3121_v43 = vld [vmem:[%s4351_s3 + $0x130] sm:$0xff] }
  0x89   :  { %732 = vmatprep.subr.mxu1 %v564_v44  ;;  %411 = vmatmul.mubr.f32.gmra.mxu1 %v51_v40  ;;  %v3102_v40 = vld [vmem:[%s4351_s3 + $0x128] sm:$0xff] }
  0x8a   :  { %664 = vmatprep.subr.mxu0 %v558_v45  ;;  %733 = vmatpush2.msra.mxu1 %v563_v46  ;;  %v3126_v44 = vld [vmem:[%s4351_s3 + $0x108] sm:$0xff]  ;;  %v3133_v45 = vld [vmem:[%s4351_s3 + $0x118] sm:$0xff]  ;;  %v3138_v46 = vld [vmem:[%s4351_s3 + $0x100] sm:$0xff] }
  0x8b   :  { %303 = vmatprep.mubr.f32.mxu0 %v54_v47  ;;  %665 = vmatpush2.msra.mxu0 %v557_v48  ;;  %v3150_v48 = vld [vmem:[%s4351_s3 + $0xe8] sm:$0xff] }
  0x8c   :  { %734 = vmatprep.subr.mxu1 %v560_v49  ;;  %304 = vmatmul.mubr.f32.gmra.mxu0 %v53_v50  ;;  %v3157_v49 = vld [vmem:[%s4351_s3 + $0xf8] sm:$0xff] }
  0x8d   :  { %666 = vmatprep.subr.mxu0 %v554_v51  ;;  %735 = vmatpush2.msra.mxu1 %v559_v52  ;;  %v3169_v51 = vld [vmem:[%s4351_s3 + $0xf0] sm:$0xff]  ;;  %v3174_v52 = vld [vmem:[%s4351_s3 + $0xc8] sm:$0xff] }
  0x8e   :  { %416 = vmatprep.mubr.f32.mxu1 %v54_v47  ;;  %667 = vmatpush2.msra.mxu0 %v553_v53  ;;  %v3145_v47 = vld [vmem:[%s4351_s3 + $0x110] sm:$0xff]  ;;  %v3181_v53 = vld [vmem:[%s4351_s3 + $0xd8] sm:$0xff] }
  0x8f   :  { %736 = vmatprep.subr.mxu1 %v556_v54  ;;  %417 = vmatmul.mubr.f32.gmra.mxu1 %v53_v50  ;;  %v3162_v50 = vld [vmem:[%s4351_s3 + $0xe0] sm:$0xff] }
  0x90   :  { %668 = vmatprep.subr.mxu0 %v550_v55  ;;  %737 = vmatpush2.msra.mxu1 %v555_v56  ;;  %v3186_v54 = vld [vmem:[%s4351_s3 + $0xc0] sm:$0xff]  ;;  %v3193_v55 = vld [vmem:[%s4351_s3 + $0xd0] sm:$0xff]  ;;  %v3198_v56 = vld [vmem:[%s4351_s3 + $0xa8] sm:$0xff] }
  0x91   :  { %309 = vmatprep.mubr.f32.mxu0 %v56_v57  ;;  %669 = vmatpush2.msra.mxu0 %v549_v58  ;;  %v3210_v58 = vld [vmem:[%s4351_s3 + $0xa0] sm:$0xff] }
  0x92   :  { %738 = vmatprep.subr.mxu1 %v552_v59  ;;  %310 = vmatmul.mubr.f32.gmra.mxu0 %v55_v60  ;;  %4448 = vst [vmem:[#allocation9_spill] sm:$0xff] %v3210_v58  ;;  %v3217_v59 = vld [vmem:[%s4351_s3 + $0xb0] sm:$0xff] }
  0x93   :  { %670 = vmatprep.subr.mxu0 %v546_v61  ;;  %739 = vmatpush2.msra.mxu1 %v551_v62  ;;  %4449 = vst [vmem:[#allocation10_spill] sm:$0xff] %v3217_v59  ;;  %v3229_v61 = vld [vmem:[%s4351_s3 + $0x98] sm:$0xff]  ;;  %v3234_v62 = vld [vmem:[%s4351_s3 + $0x80] sm:$0xff] }
  0x94   :  { %422 = vmatprep.mubr.f32.mxu1 %v56_v57  ;;  %671 = vmatpush2.msra.mxu0 %v545_v63  ;;  %v3205_v57 = vld [vmem:[%s4351_s3 + $0xb8] sm:$0xff]  ;;  %4451 = vst [vmem:[#allocation12_spill] sm:$0xff] %v3229_v61  ;;  %4452 = vst [vmem:[#allocation13_spill] sm:$0xff] %v3234_v62  ;;  %v3241_v63 = vld [vmem:[%s4351_s3 + $0x90] sm:$0xff] }
  0x95   :  { %740 = vmatprep.subr.mxu1 %v548_v0  ;;  %423 = vmatmul.mubr.f32.gmra.mxu1 %v55_v60  ;;  %4447 = vst [vmem:[#allocation8_spill] sm:$0xff] %v3205_v57  ;;  %v3222_v60 = vld [vmem:[%s4351_s3 + $0x88] sm:$0xff]  ;;  %4453 = vst [vmem:[#allocation14_spill] sm:$0xff] %v3241_v63 }
  0x96   :  { %672 = vmatprep.subr.mxu0 %v542_v1  ;;  %741 = vmatpush2.msra.mxu1 %v547_v2  ;;  %4450 = vst [vmem:[#allocation11_spill] sm:$0xff] %v3222_v60  ;;  %v3246_v0 = vld [vmem:[%s4351_s3 + $0x68] sm:$0xff]  ;;  %v3253_v1 = vld [vmem:[%s4351_s3 + $0x78] sm:$0xff]  ;;  %v3258_v2 = vld [vmem:[%s4351_s3 + $0x60] sm:$0xff] }
  0x97   :  { %315 = vmatprep.mubr.f32.mxu0 %v58_v3  ;;  %673 = vmatpush2.msra.mxu0 %v541_v4  ;;  %4454 = vst [vmem:[#allocation15_spill] sm:$0xff] %v3246_v0  ;;  %4455 = vst [vmem:[#allocation16_spill] sm:$0xff] %v3253_v1  ;;  %v3270_v4 = vld [vmem:[%s4351_s3 + $0x48] sm:$0xff] }
  0x98   :  { %742 = vmatprep.subr.mxu1 %v544_v5  ;;  %316 = vmatmul.mubr.f32.gmra.mxu0 %v57_v6  ;;  %4456 = vst [vmem:[#allocation17_spill] sm:$0xff] %v3258_v2  ;;  %4458 = vst [vmem:[#allocation19_spill] sm:$0xff] %v3270_v4  ;;  %v3277_v5 = vld [vmem:[%s4351_s3 + $0x58] sm:$0xff] }
  0x99   :  { %674 = vmatprep.subr.mxu0 %v538_v7  ;;  %743 = vmatpush2.msra.mxu1 %v543_v8  ;;  %4459 = vst [vmem:[#allocation20_spill] sm:$0xff] %v3277_v5  ;;  %v3289_v7 = vld [vmem:[%s4351_s3 + $0x50] sm:$0xff]  ;;  %v3294_v8 = vld [vmem:[%s4351_s3 + $0x28] sm:$0xff] }
  0x9a   :  { %428 = vmatprep.mubr.f32.mxu1 %v58_v3  ;;  %675 = vmatpush2.msra.mxu0 %v537_v9  ;;  %4461 = vst [vmem:[#allocation22_spill] sm:$0xff] %v3289_v7  ;;  %4462 = vst [vmem:[#allocation23_spill] sm:$0xff] %v3294_v8  ;;  %v3301_v9 = vld [vmem:[%s4351_s3 + $0x38] sm:$0xff] }
  0x9b   :  { %744 = vmatprep.subr.mxu1 %v540_v10  ;;  %429 = vmatmul.mubr.f32.gmra.mxu1 %v57_v6  ;;  %4463 = vst [vmem:[#allocation24_spill] sm:$0xff] %v3301_v9  ;;  %v3306_v10 = vld [vmem:[%s4351_s3 + $0x20] sm:$0xff] }
  0x9c   :  { %676 = vmatprep.subr.mxu0 %v534_v11  ;;  %745 = vmatpush2.msra.mxu1 %v539_v12  ;;  %4464 = vst [vmem:[#allocation25_spill] sm:$0xff] %v3306_v10  ;;  %v3313_v11 = vld [vmem:[%s4351_s3 + $0x30] sm:$0xff]  ;;  %v3318_v12 = vld [vmem:[%s4351_s3 + $0x8] sm:$0xff] }
  0x9d   :  { %677 = vmatpush2.msra.mxu0 %v533_v13  ;;  %678 = vmatprep.mubr.f32.mxu0 %v58_v3  ;;  %4465 = vst [vmem:[#allocation26_spill] sm:$0xff] %v3313_v11  ;;  %4466 = vst [vmem:[#allocation27_spill] sm:$0xff] %v3318_v12  ;;  %v3325_v13 = vld [vmem:[%s4351_s3 + $0x18] sm:$0xff] }
  0x9e   :  { %746 = vmatprep.subr.mxu1 %v536_v14  ;;  %679 = vmatmul.mubr.f32.vlgmr.msra.gmra.mxu0 %v57_v6  ;;  %4467 = vst [vmem:[#allocation28_spill] sm:$0xff] %v3325_v13  ;;  %v3330_v14 = vld [vmem:[%s4351_s3] sm:$0xff] }
  0x9f   :  { %747 = vmatpush2.msra.mxu1 %v535_v15  ;;  %748 = vmatprep.mubr.f32.mxu1 %v58_v3  ;;  %v3265_v3 = vld [vmem:[%s4351_s3 + $0x70] sm:$0xff]  ;;  %4468 = vst [vmem:[#allocation29_spill] sm:$0xff] %v3330_v14 }
  0xa0   :  { %858 = vmatprep.subr.mxu0 %v2963_v16  ;;  %929 = vmatprep.subr.mxu1 %v2968_v17  ;;  %4457 = vst [vmem:[#allocation18_spill] sm:$0xff] %v3265_v3  ;;  %v3337_v15 = vld [vmem:[%s4351_s3 + $0x10] sm:$0xff] }
  0xa1   :  { %749 = vmatmul.mubr.f32.vlgmr.msra.gmra.mxu1 %v57_v6  ;;  %859 = vmatpush1.msra.mxu0 %v2973_v18  ;;  %v3282_v6 = vld [vmem:[%s4351_s3 + $0x40] sm:$0xff]  ;;  %4469 = vst [vmem:[#allocation30_spill] sm:$0xff] %v3337_v15 }
  0xa2   :  { %930 = vmatpush1.msra.mxu1 %v2978_v19  ;;  %860 = vmatprep.subr.mxu0 %v2983_v20  ;;  %4460 = vst [vmem:[#allocation21_spill] sm:$0xff] %v3282_v6 }
  0xa3   :  { %931 = vmatprep.subr.mxu1 %v2990_v21  ;;  %861 = vmatpush1.msra.mxu0 %v2995_v22 }
  0xa4   :  { %932 = vmatpush1.msra.mxu1 %v3001_v23  ;;  %862 = vmatprep.subr.mxu0 %v3006_v24 }
  0xa5   :  { %933 = vmatprep.subr.mxu1 %v3013_v25  ;;  %863 = vmatpush1.msra.mxu0 %v3018_v26 }
  0xa6   :  { %934 = vmatpush1.msra.mxu1 %v3025_v27  ;;  %864 = vmatprep.subr.mxu0 %v3030_v28 }
  0xa7   :  { %935 = vmatprep.subr.mxu1 %v3037_v29  ;;  %865 = vmatpush1.msra.mxu0 %v3042_v30 }
  0xa8   :  { %936 = vmatpush1.msra.mxu1 %v3049_v31  ;;  %866 = vmatprep.subr.mxu0 %v3054_v32 }
  0xa9   :  { %937 = vmatprep.subr.mxu1 %v3061_v33  ;;  %867 = vmatpush1.msra.mxu0 %v3066_v34 }
  0xaa   :  { %938 = vmatpush1.msra.mxu1 %v3073_v35  ;;  %868 = vmatprep.subr.mxu0 %v3078_v36 }
  0xab   :  { %939 = vmatprep.subr.mxu1 %v3085_v37  ;;  %869 = vmatpush1.msra.mxu0 %v3090_v38 }
  0xac   :  { %940 = vmatpush1.msra.mxu1 %v3097_v39  ;;  %870 = vmatprep.subr.mxu0 %v3102_v40 }
  0xad   :  { %941 = vmatprep.subr.mxu1 %v3109_v41  ;;  %871 = vmatpush1.msra.mxu0 %v3114_v42 }
  0xae   :  { %942 = vmatpush1.msra.mxu1 %v3121_v43  ;;  %872 = vmatprep.subr.mxu0 %v3126_v44 }
  0xaf   :  { %943 = vmatprep.subr.mxu1 %v3133_v45  ;;  %873 = vmatpush1.msra.mxu0 %v3138_v46 }
  0xb0   :  { %944 = vmatpush1.msra.mxu1 %v3145_v47  ;;  %874 = vmatprep.subr.mxu0 %v3150_v48 }
  0xb1   :  { %945 = vmatprep.subr.mxu1 %v3157_v49  ;;  %875 = vmatpush1.msra.mxu0 %v3162_v50 }
  0xb2   :  { %946 = vmatpush1.msra.mxu1 %v3169_v51  ;;  %876 = vmatprep.subr.mxu0 %v3174_v52 }
  0xb3   :  { %947 = vmatprep.subr.mxu1 %v3181_v53  ;;  %877 = vmatpush1.msra.mxu0 %v3186_v54 }
  0xb4   :  { %948 = vmatpush1.msra.mxu1 %v3193_v55  ;;  %878 = vmatprep.subr.mxu0 %v3198_v56 }
  0xb5   :  { %949 = vmatprep.subr.mxu1 %v3205_v57  ;;  %879 = vmatpush1.msra.mxu0 %v3210_v58 }
  0xb6   :  { %950 = vmatpush1.msra.mxu1 %v3217_v59  ;;  %880 = vmatprep.subr.mxu0 %v3222_v60 }
  0xb7   :  { %951 = vmatprep.subr.mxu1 %v3229_v61  ;;  %881 = vmatpush1.msra.mxu0 %v3234_v62 }
  0xb8   :  { %952 = vmatpush1.msra.mxu1 %v3241_v63  ;;  %882 = vmatprep.subr.mxu0 %v3246_v0 }
  0xb9   :  { %953 = vmatprep.subr.mxu1 %v3253_v1  ;;  %883 = vmatpush1.msra.mxu0 %v3258_v2 }
  0xba   :  { %954 = vmatpush1.msra.mxu1 %v3265_v3  ;;  %884 = vmatprep.subr.mxu0 %v3270_v4 }
  0xbb   :  { %955 = vmatprep.subr.mxu1 %v3277_v5  ;;  %885 = vmatpush1.msra.mxu0 %v3282_v6 }
  0xbc   :  { %956 = vmatpush1.msra.mxu1 %v3289_v7  ;;  %886 = vmatprep.subr.mxu0 %v3294_v8  ;;  %v4371_v8 = vmov 0.0  }
  0xbd   :  { %957 = vmatprep.subr.mxu1 %v3301_v9  ;;  %887 = vmatpush1.msra.mxu0 %v3306_v10  ;;  %v189_v10 = vlaneseq }
  0xbe   :  { %958 = vmatpush1.msra.mxu1 %v3313_v11  ;;  %888 = vmatprep.subr.mxu0 %v3318_v12 }
  0xbf   :  { %959 = vmatprep.subr.mxu1 %v3325_v13  ;;  %889 = vmatpush1.msra.mxu0 %v3330_v14  ;;  %v3348_v9 = vshrl.u32 %v189_v10, 7  ;;  %v187_v14 = vld [vmem:[%s4352_s4] sm:$0xf] }
  0xc0   :  { %922 = vmatprep.mubr.f32.mxu0 %v4371_v8  ;;  %960 = vmatpush1.msra.mxu1 %v3337_v15 }
  0xc1   :  { %993 = vmatprep.mubr.f32.mxu1 %v4371_v8  ;;  %1032 = vmatprep.subr.mxu0 %v2963_v16  ;;  %4470 = vst [vmem:[#allocation31_spill] sm:$0xff] %v3348_v9  ;;  %v4387_v12 = vsub.s32 0, %v3348_v9  ;;  %v4390_v8 = vsub.s32 3, %v3348_v9  ;;  %v4397_v5 = vsub.s32 2, %v3348_v9 }
  0xc2   :  { %1103 = vmatprep.subr.mxu1 %v2968_v17 }
  0xc3   :  { %v3356_v13 = vrot.slane %v187_v14, %v4387_v12  ;;  %v3362_v10 = vrot.slane %v187_v14, %v4390_v8  ;;  %v3368_v12 = vrot.slane %v187_v14, %v4397_v5 }
  0xc5   :  { %4471 = vst [vmem:[#allocation32_spill] sm:$0xff] %v3356_v13 }
 0x10e   :  { %v275_v15 = vpop.f32.mrf.mxu0 }
 0x10f   :  { %v276_v16 = vadd.f32 %v275_v15, %v3356_v13 }
 0x110   :  { %v277_v11 = vpop.f32.mrf.mxu0 }
 0x111   :  { %v2190_v17 = vmul.f32 -1.442695, %v276_v16  ;;  %v388_v7 = vpop.f32.mrf.mxu1 }
 0x112   :  { %v389_v15 = vadd.f32 %v388_v7, %v3368_v12 }
 0x113   :  { %2253 = vpow2.f32 %v2190_v17  ;;  %v390_v6 = vpop.f32.mrf.mxu1 }
 0x114   :  { %v391_v4 = vadd.f32 %v390_v6, %v3362_v10 }
 0x116   :  { %v2191_v3 = vmul.f32 -1.442695, %v391_v4  ;;  %v195_v4 = vsub.s32 1, %v3348_v9 }
 0x118   :  { %2255 = vpow2.f32 %v2191_v3  ;;  %v3381_v7 = vrot.slane %v187_v14, %v195_v4 }
 0x119   :  { %2257 = vtanh.f32 %v389_v15 }
 0x120   :  { %v2254_v16 = vpop.eup %2253 }
 0x121   :  { %v841_v11 = vadd.f32 1.0, %v2254_v16 }
 0x123   :  { %2259 = vrcp.f32 %v841_v11 }
 0x125   :  { %v2256_v8 = vpop.eup %2255 }
 0x126   :  { %v848_v17 = vadd.f32 1.0, %v2256_v8  ;;  %v2258_v13 = vpop.eup %2257 }
 0x128   :  { %2261 = vrcp.f32 %v848_v17 }
 0x130   :  { %v2260_v2 = vpop.eup %2259 }
 0x131   :  { %v3371_v1 = vmul.f32 %v2260_v2, %v2258_v13 }
 0x133   :  { %2263 = vtanh.f32 %v3371_v1 }
 0x134   :  { %v3374_v6 = vpop.f32.mrf.mxu0 }
 0x135   :  { %v2262_v16 = vpop.eup %2261 }
 0x136   :  { %v3376_v5 = vpop.f32.mrf.mxu0 }
 0x137   :  { %v3386_v11 = vpop.f32.mrf.mxu1 }
 0x139   :  { %v3390_v17 = vpop.f32.mrf.mxu1 }
 0x13a   :  { %v3379_v3 = vpop.f32.mrf.mxu0 }
 0x13b   :  { %4472 = vst [vmem:[#allocation33_spill] sm:$0xff] %v3379_v3  ;;  %v4490_v3 = vld [vmem:[#allocation20_spill] sm:$0xff] }
 0x13c   :  { %v289_v15 = vpop.f32.mrf.mxu0 }
 0x13d   :  { %v3384_v8 = vadd.f32 %v289_v15, %v3381_v7  ;;  %v3400_v14 = vpop.f32.mrf.mxu1 }
 0x13e   :  { %4474 = vst [vmem:[#allocation35_spill] sm:$0xff] %v3400_v14 }
 0x13f   :  { %4473 = vst [vmem:[#allocation34_spill] sm:$0xff] %v3384_v8  ;;  %v3410_v4 = vpop.f32.mrf.mxu1  ;;  %v4489_v8 = vld [vmem:[#allocation19_spill] sm:$0xff] }
 0x140   :  { %v2264_v2 = vpop.eup %2263  ;;  %4475 = vst [vmem:[#allocation36_spill] sm:$0xff] %v3410_v4  ;;  %v4486_v4 = vld [vmem:[#allocation17_spill] sm:$0xff] }
 0x141   :  { %v853_v13 = vmul.f32 %v2264_v2, %v2262_v16  ;;  %v3414_v15 = vpop.f32.mrf.mxu0 }
 0x142   :  { %4476 = vst [vmem:[#allocation37_spill] sm:$0xff] %v3414_v15 }
 0x143   :  { %923 = vmatmul.mubr.f32.vlgmr.msra.gmra.mxu0 %v853_v13  ;;  %994 = vmatmul.mubr.f32.vlgmr.msra.gmra.mxu1 %v853_v13  ;;  %v295_v16 = vpop.f32.mrf.mxu0  ;;  %v3425_v13 = vpop.f32.mrf.mxu1 }
 0x144   :  { %1033 = vmatpush1.msra.mxu0 %v2973_v18  ;;  %1104 = vmatpush1.msra.mxu1 %v2978_v19  ;;  %v3423_v2 = vadd.f32 %v295_v16, %v3381_v7  ;;  %4478 = vst [vmem:[#allocation39_spill] sm:$0xff] %v3425_v13 }
 0x145   :  { %1034 = vmatprep.subr.mxu0 %v2983_v20  ;;  %1105 = vmatprep.subr.mxu1 %v2990_v21  ;;  %v3437_v13 = vpop.f32.mrf.mxu1 }
 0x146   :  { %1035 = vmatpush1.msra.mxu0 %v2995_v22  ;;  %1106 = vmatpush1.msra.mxu1 %v3001_v23  ;;  %4477 = vst [vmem:[#allocation38_spill] sm:$0xff] %v3423_v2  ;;  %v3431_v15 = vpop.f32.mrf.mxu0  ;;  %4480 = vst [vmem:[#allocation41_spill] sm:$0xff] %v3437_v13 }
 0x147   :  { %1036 = vmatprep.subr.mxu0 %v3006_v24  ;;  %1107 = vmatprep.subr.mxu1 %v3013_v25  ;;  %4479 = vst [vmem:[#allocation40_spill] sm:$0xff] %v3431_v15 }
 0x148   :  { %1037 = vmatpush1.msra.mxu0 %v3018_v26  ;;  %1108 = vmatpush1.msra.mxu1 %v3025_v27  ;;  %v301_v16 = vpop.f32.mrf.mxu0 }
 0x149   :  { %1038 = vmatprep.subr.mxu0 %v3030_v28  ;;  %1109 = vmatprep.subr.mxu1 %v3037_v29  ;;  %v3442_v2 = vadd.f32 %v301_v16, %v3381_v7  ;;  %v3452_v13 = vpop.f32.mrf.mxu1 }
 0x14a   :  { %1039 = vmatpush1.msra.mxu0 %v3042_v30  ;;  %1110 = vmatpush1.msra.mxu1 %v3049_v31  ;;  %4483 = vst [vmem:[#allocation44_spill] sm:$0xff] %v3452_v13 }
 0x14b   :  { %1040 = vmatprep.subr.mxu0 %v3054_v32  ;;  %1111 = vmatprep.subr.mxu1 %v3061_v33  ;;  %4481 = vst [vmem:[#allocation42_spill] sm:$0xff] %v3442_v2  ;;  %v4484_v2 = vld [vmem:[#allocation16_spill] sm:$0xff]  ;;  %v3465_v13 = vpop.f32.mrf.mxu1 }
 0x14c   :  { %1041 = vmatpush1.msra.mxu0 %v3066_v34  ;;  %1112 = vmatpush1.msra.mxu1 %v3073_v35  ;;  %v3450_v15 = vpop.f32.mrf.mxu0  ;;  %4488 = vst [vmem:[#allocation46_spill] sm:$0xff] %v3465_v13 }
 0x14d   :  { %1042 = vmatprep.subr.mxu0 %v3078_v36  ;;  %1113 = vmatprep.subr.mxu1 %v3085_v37  ;;  %4482 = vst [vmem:[#allocation43_spill] sm:$0xff] %v3450_v15  ;;  %v4487_v15 = vld [vmem:[#allocation18_spill] sm:$0xff] }
 0x14e   :  { %1043 = vmatpush1.msra.mxu0 %v3090_v38  ;;  %1114 = vmatpush1.msra.mxu1 %v3097_v39  ;;  %v307_v16 = vpop.f32.mrf.mxu0 }
 0x14f   :  { %1044 = vmatprep.subr.mxu0 %v3102_v40  ;;  %1115 = vmatprep.subr.mxu1 %v3109_v41  ;;  %v3461_v14 = vadd.f32 %v307_v16, %v3381_v7  ;;  %v4495_v16 = vld [vmem:[#allocation24_spill] sm:$0xff]  ;;  %v3477_v13 = vpop.f32.mrf.mxu1 }
 0x150   :  { %1045 = vmatpush1.msra.mxu0 %v3114_v42  ;;  %1116 = vmatpush1.msra.mxu1 %v3121_v43  ;;  %4498 = vst [vmem:[#allocation48_spill] sm:$0xff] %v3477_v13 }
 0x151   :  { %1046 = vmatprep.subr.mxu0 %v3126_v44  ;;  %1117 = vmatprep.subr.mxu1 %v3133_v45  ;;  %4485 = vst [vmem:[#allocation45_spill] sm:$0xff] %v3461_v14  ;;  %v4496_v14 = vld [vmem:[#allocation25_spill] sm:$0xff] }
 0x152   :  { %1047 = vmatpush1.msra.mxu0 %v3138_v46  ;;  %1118 = vmatpush1.msra.mxu1 %v3145_v47 }
 0x153   :  { %1048 = vmatprep.subr.mxu0 %v3150_v48  ;;  %1119 = vmatprep.subr.mxu1 %v3157_v49 }
 0x154   :  { %1049 = vmatpush1.msra.mxu0 %v3162_v50  ;;  %1120 = vmatpush1.msra.mxu1 %v3169_v51 }
 0x155   :  { %1050 = vmatprep.subr.mxu0 %v3174_v52  ;;  %1121 = vmatprep.subr.mxu1 %v3181_v53 }
 0x156   :  { %1051 = vmatpush1.msra.mxu0 %v3186_v54  ;;  %1122 = vmatpush1.msra.mxu1 %v3193_v55 }
 0x157   :  { %1052 = vmatprep.subr.mxu0 %v3198_v56  ;;  %1123 = vmatprep.subr.mxu1 %v3205_v57 }
 0x158   :  { %1053 = vmatpush1.msra.mxu0 %v3210_v58  ;;  %1124 = vmatpush1.msra.mxu1 %v3217_v59 }
 0x159   :  { %1054 = vmatprep.subr.mxu0 %v3222_v60  ;;  %1125 = vmatprep.subr.mxu1 %v3229_v61 }
 0x15a   :  { %1055 = vmatpush1.msra.mxu0 %v3234_v62  ;;  %1126 = vmatpush1.msra.mxu1 %v3241_v63  ;;  %v4491_v62 = vld [vmem:[#allocation21_spill] sm:$0xff]  ;;  %v4492_v63 = vld [vmem:[#allocation22_spill] sm:$0xff] }
 0x15b   :  { %1056 = vmatprep.subr.mxu0 %v3246_v0  ;;  %1127 = vmatprep.subr.mxu1 %v4484_v2  ;;  %v3471_v0 = vpop.f32.mrf.mxu0  ;;  %v4494_v2 = vld [vmem:[#allocation23_spill] sm:$0xff] }
 0x15c   :  { %1057 = vmatpush1.msra.mxu0 %v4486_v4  ;;  %1128 = vmatpush1.msra.mxu1 %v4487_v15  ;;  %4493 = vst [vmem:[#allocation47_spill] sm:$0xff] %v3471_v0  ;;  %v4497_v4 = vld [vmem:[#allocation26_spill] sm:$0xff]  ;;  %v4503_v0 = vmov 0.0  }
 0x15d   :  { %1058 = vmatprep.subr.mxu0 %v4489_v8  ;;  %1129 = vmatprep.subr.mxu1 %v4490_v3  ;;  %v313_v15 = vpop.f32.mrf.mxu0  ;;  %v4499_v8 = vld [vmem:[#allocation27_spill] sm:$0xff]  ;;  %v4500_v3 = vld [vmem:[#allocation28_spill] sm:$0xff] }
 0x15e   :  { %1059 = vmatpush1.msra.mxu0 %v4491_v62  ;;  %1130 = vmatpush1.msra.mxu1 %v4492_v63  ;;  %v3482_v62 = vadd.f32 %v313_v15, %v3381_v7  ;;  %v4502_v63 = vld [vmem:[#allocation29_spill] sm:$0xff]  ;;  %v3495_v15 = vpop.f32.mrf.mxu1 }
 0x15f   :  { %1060 = vmatprep.subr.mxu0 %v4494_v2  ;;  %1131 = vmatprep.subr.mxu1 %v4495_v16  ;;  %v4504_v2 = vld [vmem:[#allocation30_spill] sm:$0xff]  ;;  %v3490_v13 = vpop.f32.mrf.mxu0  ;;  %4508 = vst [vmem:[#allocation51_spill] sm:$0xff] %v3495_v15  ;;  %v4515_v15 = vsub.s32 2, %v3348_v9 }
 0x160   :  { %1061 = vmatpush1.msra.mxu0 %v4496_v14  ;;  %1132 = vmatpush1.msra.mxu1 %v4497_v4  ;;  %4501 = vst [vmem:[#allocation49_spill] sm:$0xff] %v3482_v62  ;;  %v4505_v14 = vld [vmem:[#allocation6_spill] sm:$0xff]  ;;  %v4506_v4 = vld [vmem:[#allocation7_spill] sm:$0xff]  ;;  %4507 = vst [vmem:[#allocation50_spill] sm:$0xff] %v3490_v13 }
 0x161   :  { %1062 = vmatprep.subr.mxu0 %v4499_v8  ;;  %1133 = vmatprep.subr.mxu1 %v4500_v3  ;;  %v597_v3 = vld [vmem:[%s4353_s5] sm:$0xf]  ;;  %v319_v62 = vpop.f32.mrf.mxu0 }
 0x162   :  { %1063 = vmatpush1.msra.mxu0 %v4502_v63  ;;  %1096 = vmatprep.mubr.f32.mxu0 %v4503_v0  ;;  %v3498_v63 = vadd.f32 %v319_v62, %v3381_v7  ;;  %v606_v62 = vrot.slane %v597_v3, %v4515_v15 }
 0x163   :  { %1134 = vmatpush1.msra.mxu1 %v4504_v2  ;;  %1167 = vmatprep.mubr.f32.mxu1 %v4503_v0  ;;  %v4510_v2 = vsub.s32 0, %v3348_v9  ;;  %v3502_v0 = vpop.f32.mrf.mxu1  ;;  %v4539_v9 = vld [vmem:[#allocation28_spill] sm:$0xff] }
 0x164   :  { %1206 = vmatprep.subr.mxu0 %v4505_v14  ;;  %1277 = vmatprep.subr.mxu1 %v4506_v4  ;;  %4509 = vst [vmem:[#allocation52_spill] sm:$0xff] %v3498_v63  ;;  %4511 = vst [vmem:[#allocation53_spill] sm:$0xff] %v3502_v0  ;;  %v680_v14 = vpop.f32.mrf.mxu0 }
 0x165   :  { %v602_v8 = vrot.slane %v597_v3, %v4510_v2  ;;  %v3504_v61 = vpop.f32.mrf.mxu1 }
 0x166   :  { %v682_v4 = vpop.f32.mrf.mxu0  ;;  %4512 = vst [vmem:[#allocation54_spill] sm:$0xff] %v3504_v61 }
 0x167   :  { %v681_v16 = vadd.f32 %v680_v14, %v602_v8  ;;  %v3506_v60 = vpop.f32.mrf.mxu1  ;;  %v4517_v4 = vld [vmem:[#allocation32_spill] sm:$0xff] }
 0x168   :  { %4513 = vst [vmem:[#allocation55_spill] sm:$0xff] %v3506_v60  ;;  %v284_v60 = vadd.f32 %v3376_v5, %v3381_v7 }
 0x169   :  { %v2188_v13 = vmul.f32 -1.442695, %v681_v16  ;;  %v3508_v59 = vpop.f32.mrf.mxu1 }
 0x16a   :  { %4514 = vst [vmem:[#allocation56_spill] sm:$0xff] %v3508_v59 }
 0x16b   :  { %2265 = vpow2.f32 %v2188_v13  ;;  %v750_v63 = vpop.f32.mrf.mxu1  ;;  %v282_v13 = vadd.f32 %v3374_v6, %v4517_v4  ;;  %v395_v6 = vadd.f32 %v3386_v11, %v3368_v12 }
 0x16c   :  { %v751_v58 = vadd.f32 %v750_v63, %v606_v62 }
 0x16d   :  { %v3518_v3 = vpop.f32.mrf.mxu1 }
 0x16e   :  { %2267 = vtanh.f32 %v751_v58  ;;  %4518 = vst [vmem:[#allocation58_spill] sm:$0xff] %v3518_v3  ;;  %v4538_v3 = vld [vmem:[#allocation27_spill] sm:$0xff] }
 0x178   :  { %v2266_v57 = vpop.eup %2265 }
 0x179   :  { %v758_v2 = vadd.f32 1.0, %v2266_v57 }
 0x17b   :  { %2269 = vrcp.f32 %v758_v2  ;;  %v2268_v0 = vpop.eup %2267 }
 0x188   :  { %v2270_v8 = vpop.eup %2269 }
 0x189   :  { %v3512_v14 = vmul.f32 %v2270_v8, %v2268_v0  ;;  %v397_v0 = vadd.f32 %v3390_v17, %v3362_v10 }
 0x18b   :  { %4516 = vst [vmem:[#allocation57_spill] sm:$0xff] %v3512_v14  ;;  %v4537_v14 = vld [vmem:[#allocation26_spill] sm:$0xff] }
 0x203   :  { %v924_v16 = vpop.f32.mrf.mxu0  ;;  %v995_v57 = vpop.f32.mrf.mxu1 }
 0x204   :  { %v1000_v59 = vadd.f32 %v924_v16, %v282_v13  ;;  %v1002_v7 = vadd.f32 %v995_v57, %v395_v6  ;;  %v4520_v6 = vld [vmem:[#allocation9_spill] sm:$0xff] }
 0x205   :  { %v926_v61 = vpop.f32.mrf.mxu0  ;;  %v997_v62 = vpop.f32.mrf.mxu1 }
 0x206   :  { %v2192_v63 = vmul.f32 -1.442695, %v1000_v59  ;;  %v1001_v15 = vadd.f32 %v926_v61, %v284_v60  ;;  %v1003_v2 = vadd.f32 %v997_v62, %v397_v0 }
 0x208   :  { %2271 = vpow2.f32 %v2192_v63  ;;  %v2193_v58 = vmul.f32 -1.442695, %v1001_v15  ;;  %v2194_v8 = vmul.f32 -1.442695, %v1003_v2 }
 0x20a   :  { %2273 = vpow2.f32 %v2193_v58 }
 0x20b   :  { %2275 = vpow2.f32 %v2194_v8  ;;  %v4521_v8 = vld [vmem:[#allocation10_spill] sm:$0xff] }
 0x215   :  { %v2272_v5 = vpop.eup %2271 }
 0x216   :  { %v1007_v13 = vadd.f32 1.0, %v2272_v5  ;;  %v4522_v5 = vld [vmem:[#allocation11_spill] sm:$0xff] }
 0x217   :  { %v2274_v16 = vpop.eup %2273 }
 0x218   :  { %2277 = vrcp.f32 %v1007_v13  ;;  %v1013_v59 = vadd.f32 1.0, %v2274_v16  ;;  %v2276_v60 = vpop.eup %2275  ;;  %v4524_v13 = vld [vmem:[#allocation13_spill] sm:$0xff]  ;;  %v4525_v16 = vld [vmem:[#allocation14_spill] sm:$0xff] }
 0x219   :  { %2279 = vtanh.f32 %v1002_v7  ;;  %v1020_v58 = vadd.f32 1.0, %v2276_v60  ;;  %v4523_v7 = vld [vmem:[#allocation12_spill] sm:$0xff] }
 0x21a   :  { %2281 = vrcp.f32 %v1013_v59  ;;  %v4526_v59 = vld [vmem:[#allocation15_spill] sm:$0xff]  ;;  %v4527_v60 = vld [vmem:[#allocation16_spill] sm:$0xff] }
 0x21b   :  { %2283 = vrcp.f32 %v1020_v58  ;;  %v4531_v58 = vld [vmem:[#allocation20_spill] sm:$0xff] }
 0x225   :  { %v2278_v61 = vpop.eup %2277 }
 0x226   :  { %v2280_v63 = vpop.eup %2279 }
 0x227   :  { %v2282_v15 = vpop.eup %2281  ;;  %v1024_v17 = vmul.f32 %v2280_v63, %v2278_v61  ;;  %v4528_v61 = vld [vmem:[#allocation17_spill] sm:$0xff]  ;;  %v4529_v63 = vld [vmem:[#allocation18_spill] sm:$0xff] }
 0x228   :  { %v1023_v62 = vmul.f32 %v2282_v15, %v3371_v1  ;;  %v2284_v11 = vpop.eup %2283  ;;  %v4519_v1 = vld [vmem:[#allocation8_spill] sm:$0xff]  ;;  %v4530_v15 = vld [vmem:[#allocation19_spill] sm:$0xff] }
 0x22a   :  { %v3525_v0 = vadd.f32 %v1024_v17, %v1023_v62  ;;  %v4532_v17 = vld [vmem:[#allocation21_spill] sm:$0xff]  ;;  %v4533_v62 = vld [vmem:[#allocation22_spill] sm:$0xff] }
 0x22c   :  { %2285 = vtanh.f32 %v3525_v0 }
 0x239   :  { %v2286_v57 = vpop.eup %2285 }
 0x23a   :  { %v1027_v2 = vmul.f32 %v2286_v57, %v2284_v11  ;;  %v4534_v11 = vld [vmem:[#allocation23_spill] sm:$0xff]  ;;  %v4535_v57 = vld [vmem:[#allocation24_spill] sm:$0xff] }
 0x23c   :  { %1097 = vmatmul.mubr.f32.vlgmr.msra.gmra.mxu0 %v1027_v2  ;;  %1168 = vmatmul.mubr.f32.vlgmr.msra.gmra.mxu1 %v1027_v2  ;;  %v4536_v2 = vld [vmem:[#allocation25_spill] sm:$0xff] }
 0x23d   :  { %1207 = vmatpush1.msra.mxu0 %v2973_v18  ;;  %1278 = vmatpush1.msra.mxu1 %v2978_v19 }
 0x23e   :  { %1208 = vmatprep.subr.mxu0 %v2983_v20  ;;  %1279 = vmatprep.subr.mxu1 %v2990_v21 }
 0x23f   :  { %1209 = vmatpush1.msra.mxu0 %v2995_v22  ;;  %1280 = vmatpush1.msra.mxu1 %v3001_v23 }
 0x240   :  { %1210 = vmatprep.subr.mxu0 %v3006_v24  ;;  %1281 = vmatprep.subr.mxu1 %v3013_v25 }
 0x241   :  { %1211 = vmatpush1.msra.mxu0 %v3018_v26  ;;  %1282 = vmatpush1.msra.mxu1 %v3025_v27 }
 0x242   :  { %1212 = vmatprep.subr.mxu0 %v3030_v28  ;;  %1283 = vmatprep.subr.mxu1 %v3037_v29 }
 0x243   :  { %1213 = vmatpush1.msra.mxu0 %v3042_v30  ;;  %1284 = vmatpush1.msra.mxu1 %v3049_v31 }
 0x244   :  { %1214 = vmatprep.subr.mxu0 %v3054_v32  ;;  %1285 = vmatprep.subr.mxu1 %v3061_v33 }
 0x245   :  { %1215 = vmatpush1.msra.mxu0 %v3066_v34  ;;  %1286 = vmatpush1.msra.mxu1 %v3073_v35 }
 0x246   :  { %1216 = vmatprep.subr.mxu0 %v3078_v36  ;;  %1287 = vmatprep.subr.mxu1 %v3085_v37 }
 0x247   :  { %1217 = vmatpush1.msra.mxu0 %v3090_v38  ;;  %1288 = vmatpush1.msra.mxu1 %v3097_v39 }
 0x248   :  { %1218 = vmatprep.subr.mxu0 %v3102_v40  ;;  %1289 = vmatprep.subr.mxu1 %v3109_v41 }
 0x249   :  { %1219 = vmatpush1.msra.mxu0 %v3114_v42  ;;  %1290 = vmatpush1.msra.mxu1 %v3121_v43 }
 0x24a   :  { %1220 = vmatprep.subr.mxu0 %v3126_v44  ;;  %1291 = vmatprep.subr.mxu1 %v3133_v45 }
 0x24b   :  { %1221 = vmatpush1.msra.mxu0 %v3138_v46  ;;  %1292 = vmatpush1.msra.mxu1 %v3145_v47 }
 0x24c   :  { %1222 = vmatprep.subr.mxu0 %v3150_v48  ;;  %1293 = vmatprep.subr.mxu1 %v3157_v49 }
 0x24d   :  { %1223 = vmatpush1.msra.mxu0 %v3162_v50  ;;  %1294 = vmatpush1.msra.mxu1 %v3169_v51 }
 0x24e   :  { %1224 = vmatprep.subr.mxu0 %v3174_v52  ;;  %1295 = vmatprep.subr.mxu1 %v3181_v53 }
 0x24f   :  { %1225 = vmatpush1.msra.mxu0 %v3186_v54  ;;  %1296 = vmatpush1.msra.mxu1 %v3193_v55 }
 0x250   :  { %1226 = vmatprep.subr.mxu0 %v3198_v56  ;;  %1297 = vmatprep.subr.mxu1 %v4519_v1 }
 0x251   :  { %1227 = vmatpush1.msra.mxu0 %v4520_v6  ;;  %1298 = vmatpush1.msra.mxu1 %v4521_v8 }
 0x252   :  { %1228 = vmatprep.subr.mxu0 %v4522_v5  ;;  %1299 = vmatprep.subr.mxu1 %v4523_v7 }
 0x253   :  { %1229 = vmatpush1.msra.mxu0 %v4524_v13  ;;  %1300 = vmatpush1.msra.mxu1 %v4525_v16 }
 0x254   :  { %1230 = vmatprep.subr.mxu0 %v4526_v59  ;;  %1301 = vmatprep.subr.mxu1 %v4527_v60 }
 0x255   :  { %1231 = vmatpush1.msra.mxu0 %v4528_v61  ;;  %1302 = vmatpush1.msra.mxu1 %v4529_v63  ;;  %v4540_v63 = vld [vmem:[#allocation29_spill] sm:$0xff] }
 0x256   :  { %1232 = vmatprep.subr.mxu0 %v4530_v15  ;;  %1303 = vmatprep.subr.mxu1 %v4531_v58  ;;  %v4541_v15 = vmov 0.0   ;;  %v4542_v58 = vld [vmem:[#allocation30_spill] sm:$0xff] }
 0x257   :  { %1233 = vmatpush1.msra.mxu0 %v4532_v17  ;;  %1304 = vmatpush1.msra.mxu1 %v4533_v62  ;;  %v4543_v62 = vld [vmem:[#allocation6_spill] sm:$0xff] }
 0x258   :  { %1234 = vmatprep.subr.mxu0 %v4534_v11  ;;  %1305 = vmatprep.subr.mxu1 %v4535_v57  ;;  %v4544_v11 = vld [vmem:[#allocation7_spill] sm:$0xff] }
 0x259   :  { %1235 = vmatpush1.msra.mxu0 %v4536_v2  ;;  %1306 = vmatpush1.msra.mxu1 %v4537_v14  ;;  %v4545_v2 = vld [vmem:[#allocation33_spill] sm:$0xff] }
 0x25a   :  { %1236 = vmatprep.subr.mxu0 %v4538_v3  ;;  %1307 = vmatprep.subr.mxu1 %v4539_v9  ;;  %v288_v57 = vadd.f32 %v4545_v2, %v4517_v4  ;;  %v4546_v9 = vld [vmem:[#allocation34_spill] sm:$0xff] }
 0x25b   :  { %1237 = vmatpush1.msra.mxu0 %v4540_v63  ;;  %1270 = vmatprep.mubr.f32.mxu0 %v4541_v15 }
 0x25c   :  { %1308 = vmatpush1.msra.mxu1 %v4542_v58  ;;  %1341 = vmatprep.mubr.f32.mxu1 %v4541_v15  ;;  %v4547_v15 = vld [vmem:[#allocation36_spill] sm:$0xff] }
 0x25d   :  { %1380 = vmatprep.subr.mxu0 %v4543_v62  ;;  %1451 = vmatprep.subr.mxu1 %v4544_v11  ;;  %v403_v16 = vadd.f32 %v4547_v15, %v3362_v10  ;;  %v4548_v11 = vld [vmem:[#allocation35_spill] sm:$0xff] }
 0x25e   :  { %v401_v13 = vadd.f32 %v4548_v11, %v3368_v12 }
 0x2fc   :  { %v1098_v14 = vpop.f32.mrf.mxu0  ;;  %v1169_v63 = vpop.f32.mrf.mxu1 }
 0x2fd   :  { %v1174_v17 = vadd.f32 %v1098_v14, %v288_v57  ;;  %v1176_v7 = vadd.f32 %v1169_v63, %v401_v13 }
 0x2fe   :  { %v1100_v3 = vpop.f32.mrf.mxu0  ;;  %v1171_v58 = vpop.f32.mrf.mxu1 }
 0x2ff   :  { %v2195_v61 = vmul.f32 -1.442695, %v1174_v17  ;;  %v1175_v60 = vadd.f32 %v1100_v3, %v4546_v9  ;;  %v1177_v62 = vadd.f32 %v1171_v58, %v403_v16 }
 0x301   :  { %2287 = vpow2.f32 %v2195_v61  ;;  %v2196_v59 = vmul.f32 -1.442695, %v1175_v60  ;;  %v2197_v2 = vmul.f32 -1.442695, %v1177_v62 }
 0x303   :  { %2289 = vpow2.f32 %v2196_v59 }
 0x304   :  { %2291 = vtanh.f32 %v1176_v7 }
 0x305   :  { %2293 = vpow2.f32 %v2197_v2 }
 0x30e   :  { %v2288_v4 = vpop.eup %2287 }
 0x30f   :  { %v1181_v14 = vadd.f32 1.0, %v2288_v4 }
 0x310   :  { %v2290_v17 = vpop.eup %2289 }
 0x311   :  { %2295 = vrcp.f32 %v1181_v14  ;;  %v1187_v9 = vadd.f32 1.0, %v2290_v17  ;;  %v2292_v3 = vpop.eup %2291  ;;  %v4574_v14 = vld [vmem:[#allocation41_spill] sm:$0xff] }
 0x312   :  { %v2294_v59 = vpop.eup %2293  ;;  %v409_v17 = vadd.f32 %v4574_v14, %v3362_v10  ;;  %v3715_v14 = vld [vmem:[%s4351_s3 + $0x1d0] sm:$0xff] }
 0x313   :  { %2297 = vrcp.f32 %v1187_v9  ;;  %v1194_v15 = vadd.f32 1.0, %v2294_v59 }
 0x315   :  { %2299 = vrcp.f32 %v1194_v15 }
 0x31e   :  { %v2296_v60 = vpop.eup %2295 }
 0x31f   :  { %v1198_v61 = vmul.f32 %v2296_v60, %v2292_v3  ;;  %v4575_v3 = vld [vmem:[#allocation39_spill] sm:$0xff] }
 0x320   :  { %v2298_v57 = vpop.eup %2297  ;;  %v407_v59 = vadd.f32 %v4575_v3, %v3368_v12  ;;  %v3733_v3 = vld [vmem:[%s4351_s3 + $0x1a0] sm:$0xff] }
 0x321   :  { %v1197_v16 = vmul.f32 %v2298_v57, %v3525_v0  ;;  %v4573_v0 = vld [vmem:[#allocation38_spill] sm:$0xff] }
 0x322   :  { %v2300_v4 = vpop.eup %2299 }
 0x323   :  { %v3602_v58 = vadd.f32 %v1198_v61, %v1197_v16 }
 0x325   :  { %2301 = vtanh.f32 %v3602_v58 }
 0x332   :  { %v2302_v7 = vpop.eup %2301 }
 0x333   :  { %v1201_v13 = vmul.f32 %v2302_v7, %v2300_v4 }
 0x335   :  { %1271 = vmatmul.mubr.f32.vlgmr.msra.gmra.mxu0 %v1201_v13  ;;  %1342 = vmatmul.mubr.f32.vlgmr.msra.gmra.mxu1 %v1201_v13 }
 0x336   :  { %1381 = vmatpush1.msra.mxu0 %v2973_v18  ;;  %1452 = vmatpush1.msra.mxu1 %v2978_v19  ;;  %v4549_v18 = vld [vmem:[#allocation12_spill] sm:$0xff]  ;;  %v4550_v19 = vld [vmem:[#allocation13_spill] sm:$0xff] }
 0x337   :  { %1382 = vmatprep.subr.mxu0 %v2983_v20  ;;  %1453 = vmatprep.subr.mxu1 %v2990_v21  ;;  %v4551_v20 = vld [vmem:[#allocation14_spill] sm:$0xff]  ;;  %v4552_v21 = vld [vmem:[#allocation15_spill] sm:$0xff] }
 0x338   :  { %1383 = vmatpush1.msra.mxu0 %v2995_v22  ;;  %1454 = vmatpush1.msra.mxu1 %v3001_v23  ;;  %v4553_v22 = vld [vmem:[#allocation16_spill] sm:$0xff]  ;;  %v4554_v23 = vld [vmem:[#allocation17_spill] sm:$0xff] }
 0x339   :  { %1384 = vmatprep.subr.mxu0 %v3006_v24  ;;  %1455 = vmatprep.subr.mxu1 %v3013_v25  ;;  %v4555_v24 = vld [vmem:[#allocation18_spill] sm:$0xff]  ;;  %v4556_v25 = vld [vmem:[#allocation19_spill] sm:$0xff] }
 0x33a   :  { %1385 = vmatpush1.msra.mxu0 %v3018_v26  ;;  %1456 = vmatpush1.msra.mxu1 %v3025_v27  ;;  %v4557_v26 = vld [vmem:[#allocation20_spill] sm:$0xff]  ;;  %v4558_v27 = vld [vmem:[#allocation21_spill] sm:$0xff] }
 0x33b   :  { %1386 = vmatprep.subr.mxu0 %v3030_v28  ;;  %1457 = vmatprep.subr.mxu1 %v3037_v29  ;;  %v4559_v28 = vld [vmem:[#allocation22_spill] sm:$0xff]  ;;  %v4560_v29 = vld [vmem:[#allocation23_spill] sm:$0xff] }
 0x33c   :  { %1387 = vmatpush1.msra.mxu0 %v3042_v30  ;;  %1458 = vmatpush1.msra.mxu1 %v3049_v31  ;;  %v4561_v30 = vld [vmem:[#allocation24_spill] sm:$0xff]  ;;  %v4562_v31 = vld [vmem:[#allocation25_spill] sm:$0xff] }
 0x33d   :  { %1388 = vmatprep.subr.mxu0 %v3054_v32  ;;  %1459 = vmatprep.subr.mxu1 %v3061_v33  ;;  %v4563_v32 = vld [vmem:[#allocation26_spill] sm:$0xff]  ;;  %v4564_v33 = vld [vmem:[#allocation27_spill] sm:$0xff] }
 0x33e   :  { %1389 = vmatpush1.msra.mxu0 %v3066_v34  ;;  %1460 = vmatpush1.msra.mxu1 %v3073_v35  ;;  %v4565_v34 = vld [vmem:[#allocation28_spill] sm:$0xff]  ;;  %v4566_v35 = vld [vmem:[#allocation29_spill] sm:$0xff] }
 0x33f   :  { %1390 = vmatprep.subr.mxu0 %v3078_v36  ;;  %1461 = vmatprep.subr.mxu1 %v3085_v37  ;;  %v4567_v36 = vmov 0.0   ;;  %v4568_v37 = vld [vmem:[#allocation30_spill] sm:$0xff] }
 0x340   :  { %1391 = vmatpush1.msra.mxu0 %v3090_v38  ;;  %1462 = vmatpush1.msra.mxu1 %v3097_v39  ;;  %v4569_v38 = vld [vmem:[#allocation6_spill] sm:$0xff]  ;;  %v4570_v39 = vld [vmem:[#allocation7_spill] sm:$0xff] }
 0x341   :  { %1392 = vmatprep.subr.mxu0 %v3102_v40  ;;  %1463 = vmatprep.subr.mxu1 %v3109_v41  ;;  %v4571_v40 = vld [vmem:[#allocation32_spill] sm:$0xff]  ;;  %v4572_v41 = vld [vmem:[#allocation37_spill] sm:$0xff] }
 0x342   :  { %1393 = vmatpush1.msra.mxu0 %v3114_v42  ;;  %1464 = vmatpush1.msra.mxu1 %v3121_v43  ;;  %v294_v42 = vadd.f32 %v4572_v41, %v4571_v40 }
 0x343   :  { %1394 = vmatprep.subr.mxu0 %v3126_v44  ;;  %1465 = vmatprep.subr.mxu1 %v3133_v45 }
 0x344   :  { %1395 = vmatpush1.msra.mxu0 %v3138_v46  ;;  %1466 = vmatpush1.msra.mxu1 %v3145_v47 }
 0x345   :  { %1396 = vmatprep.subr.mxu0 %v3150_v48  ;;  %1467 = vmatprep.subr.mxu1 %v3157_v49 }
 0x346   :  { %1397 = vmatpush1.msra.mxu0 %v3162_v50  ;;  %1468 = vmatpush1.msra.mxu1 %v3169_v51 }
 0x347   :  { %1398 = vmatprep.subr.mxu0 %v3174_v52  ;;  %1469 = vmatprep.subr.mxu1 %v3181_v53 }
 0x348   :  { %1399 = vmatpush1.msra.mxu0 %v3186_v54  ;;  %1470 = vmatpush1.msra.mxu1 %v3193_v55 }
 0x349   :  { %1400 = vmatprep.subr.mxu0 %v3198_v56  ;;  %1471 = vmatprep.subr.mxu1 %v4519_v1 }
 0x34a   :  { %1401 = vmatpush1.msra.mxu0 %v4520_v6  ;;  %1472 = vmatpush1.msra.mxu1 %v4521_v8 }
 0x34b   :  { %1402 = vmatprep.subr.mxu0 %v4522_v5  ;;  %1473 = vmatprep.subr.mxu1 %v4549_v18 }
 0x34c   :  { %1403 = vmatpush1.msra.mxu0 %v4550_v19  ;;  %1474 = vmatpush1.msra.mxu1 %v4551_v20 }
 0x34d   :  { %1404 = vmatprep.subr.mxu0 %v4552_v21  ;;  %1475 = vmatprep.subr.mxu1 %v4553_v22 }
 0x34e   :  { %1405 = vmatpush1.msra.mxu0 %v4554_v23  ;;  %1476 = vmatpush1.msra.mxu1 %v4555_v24 }
 0x34f   :  { %1406 = vmatprep.subr.mxu0 %v4556_v25  ;;  %1477 = vmatprep.subr.mxu1 %v4557_v26 }
 0x350   :  { %1407 = vmatpush1.msra.mxu0 %v4558_v27  ;;  %1478 = vmatpush1.msra.mxu1 %v4559_v28 }
 0x351   :  { %1408 = vmatprep.subr.mxu0 %v4560_v29  ;;  %1479 = vmatprep.subr.mxu1 %v4561_v30 }
 0x352   :  { %1409 = vmatpush1.msra.mxu0 %v4562_v31  ;;  %1480 = vmatpush1.msra.mxu1 %v4563_v32 }
 0x353   :  { %1410 = vmatprep.subr.mxu0 %v4564_v33  ;;  %1481 = vmatprep.subr.mxu1 %v4565_v34 }
 0x354   :  { %1411 = vmatpush1.msra.mxu0 %v4566_v35  ;;  %1444 = vmatprep.mubr.f32.mxu0 %v4567_v36 }
 0x355   :  { %1482 = vmatpush1.msra.mxu1 %v4568_v37  ;;  %1515 = vmatprep.mubr.f32.mxu1 %v4567_v36 }
 0x356   :  { %1554 = vmatprep.subr.mxu0 %v4569_v38  ;;  %1625 = vmatprep.subr.mxu1 %v4570_v39 }
 0x3f5   :  { %v1272_v43 = vpop.f32.mrf.mxu0  ;;  %v1343_v62 = vpop.f32.mrf.mxu1 }
 0x3f6   :  { %v1348_v44 = vadd.f32 %v1272_v43, %v294_v42  ;;  %v1350_v60 = vadd.f32 %v1343_v62, %v407_v59  ;;  %v3697_v62 = vld [vmem:[%s4351_s3 + $0x1c8] sm:$0xff]  ;;  %v3739_v59 = vld [vmem:[%s4351_s3 + $0x1b0] sm:$0xff] }
 0x3f7   :  { %v1274_v45 = vpop.f32.mrf.mxu0  ;;  %v1345_v2 = vpop.f32.mrf.mxu1 }
 0x3f8   :  { %v2198_v46 = vmul.f32 -1.442695, %v1348_v44  ;;  %v1349_v63 = vadd.f32 %v1274_v45, %v4573_v0  ;;  %v1351_v9 = vadd.f32 %v1345_v2, %v409_v17  ;;  %v3709_v2 = vld [vmem:[%s4351_s3 + $0x1c0] sm:$0xff]  ;;  %v3721_v17 = vld [vmem:[%s4351_s3 + $0x1a8] sm:$0xff] }
 0x3fa   :  { %2303 = vpow2.f32 %v2198_v46  ;;  %v2199_v11 = vmul.f32 -1.442695, %v1349_v63  ;;  %v2200_v61 = vmul.f32 -1.442695, %v1351_v9  ;;  %v3685_v63 = vld [vmem:[%s4351_s3 + $0x1e0] sm:$0xff]  ;;  %v3727_v9 = vld [vmem:[%s4351_s3 + $0x1b8] sm:$0xff] }
 0x3fc   :  { %2305 = vpow2.f32 %v2199_v11  ;;  %v3703_v11 = vld [vmem:[%s4351_s3 + $0x1d8] sm:$0xff] }
 0x3fd   :  { %2307 = vtanh.f32 %v1350_v60  ;;  %v3745_v60 = vld [vmem:[%s4351_s3 + $0x188] sm:$0xff] }
 0x3fe   :  { %2309 = vpow2.f32 %v2200_v61  ;;  %v3751_v61 = vld [vmem:[%s4351_s3 + $0x198] sm:$0xff] }
 0x407   :  { %v2304_v57 = vpop.eup %2303 }
 0x408   :  { %v1355_v15 = vadd.f32 1.0, %v2304_v57  ;;  %v3757_v57 = vld [vmem:[%s4351_s3 + $0x180] sm:$0xff] }
 0x409   :  { %v2306_v16 = vpop.eup %2305 }
 0x40a   :  { %2311 = vrcp.f32 %v1355_v15  ;;  %v1361_v4 = vadd.f32 1.0, %v2306_v16  ;;  %v2308_v7 = vpop.eup %2307  ;;  %v3763_v15 = vld [vmem:[%s4351_s3 + $0x190] sm:$0xff]  ;;  %v3769_v16 = vld [vmem:[%s4351_s3 + $0x168] sm:$0xff] }
 0x40b   :  { %v2310_v13 = vpop.eup %2309 }
 0x40c   :  { %2313 = vrcp.f32 %v1361_v4  ;;  %v1368_v42 = vadd.f32 1.0, %v2310_v13  ;;  %v3775_v4 = vld [vmem:[%s4351_s3 + $0x178] sm:$0xff]  ;;  %v3787_v13 = vld [vmem:[%s4351_s3 + $0x170] sm:$0xff] }
 0x40e   :  { %2315 = vrcp.f32 %v1368_v42  ;;  %v3811_v42 = vld [vmem:[%s4351_s3 + $0x150] sm:$0xff] }
 0x417   :  { %v2312_v38 = vpop.eup %2311 }
 0x418   :  { %v1372_v39 = vmul.f32 %v2312_v38, %v2308_v7  ;;  %v3781_v7 = vld [vmem:[%s4351_s3 + $0x160] sm:$0xff]  ;;  %v3793_v38 = vld [vmem:[%s4351_s3 + $0x148] sm:$0xff] }
 0x419   :  { %v2314_v41 = vpop.eup %2313 }
 0x41a   :  { %v1371_v43 = vmul.f32 %v2314_v41, %v3602_v58  ;;  %v3691_v58 = vld [vmem:[%s4351_s3 + $0x1f0] sm:$0xff]  ;;  %v3805_v41 = vld [vmem:[%s4351_s3 + $0x140] sm:$0xff] }
 0x41b   :  { %v2316_v45 = vpop.eup %2315 }
 0x41c   :  { %v3679_v44 = vadd.f32 %v1372_v39, %v1371_v43  ;;  %v3799_v39 = vld [vmem:[%s4351_s3 + $0x158] sm:$0xff]  ;;  %v3817_v43 = vld [vmem:[%s4351_s3 + $0x128] sm:$0xff] }
 0x41d   :  { %4576 = vst [vmem:[#allocation8_spill] sm:$0xff] %v3817_v43 }
 0x41e   :  { %2317 = vtanh.f32 %v3679_v44 }
 0x42b   :  { %v2318_v46 = vpop.eup %2317 }
 0x42c   :  { %v1375_v0 = vmul.f32 %v2318_v46, %v2316_v45  ;;  %v3823_v45 = vld [vmem:[%s4351_s3 + $0x138] sm:$0xff]  ;;  %v3829_v46 = vld [vmem:[%s4351_s3 + $0x120] sm:$0xff] }
 0x42d   :  { %4577 = vst [vmem:[#allocation9_spill] sm:$0xff] %v3823_v45  ;;  %4578 = vst [vmem:[#allocation10_spill] sm:$0xff] %v3829_v46 }
 0x42e   :  { %1445 = vmatmul.mubr.f32.vlgmr.msra.gmra.mxu0 %v1375_v0  ;;  %1516 = vmatmul.mubr.f32.vlgmr.msra.gmra.mxu1 %v1375_v0  ;;  %v3835_v0 = vld [vmem:[%s4351_s3 + $0x130] sm:$0xff] }
 0x42f   :  { %1555 = vmatpush1.msra.mxu0 %v3685_v63  ;;  %1626 = vmatpush1.msra.mxu1 %v3691_v58 }
 0x430   :  { %1556 = vmatprep.subr.mxu0 %v3697_v62  ;;  %1627 = vmatprep.subr.mxu1 %v3703_v11 }
 0x431   :  { %1557 = vmatpush1.msra.mxu0 %v3709_v2  ;;  %1628 = vmatpush1.msra.mxu1 %v3715_v14 }
 0x432   :  { %1558 = vmatprep.subr.mxu0 %v3721_v17  ;;  %1629 = vmatprep.subr.mxu1 %v3727_v9 }
 0x433   :  { %1559 = vmatpush1.msra.mxu0 %v3733_v3  ;;  %1630 = vmatpush1.msra.mxu1 %v3739_v59 }
 0x434   :  { %1560 = vmatprep.subr.mxu0 %v3745_v60  ;;  %1631 = vmatprep.subr.mxu1 %v3751_v61 }
 0x435   :  { %1561 = vmatpush1.msra.mxu0 %v3757_v57  ;;  %1632 = vmatpush1.msra.mxu1 %v3763_v15 }
 0x436   :  { %1562 = vmatprep.subr.mxu0 %v3769_v16  ;;  %1633 = vmatprep.subr.mxu1 %v3775_v4 }
 0x437   :  { %1563 = vmatpush1.msra.mxu0 %v3781_v7  ;;  %1634 = vmatpush1.msra.mxu1 %v3787_v13 }
 0x438   :  { %1564 = vmatprep.subr.mxu0 %v3793_v38  ;;  %1635 = vmatprep.subr.mxu1 %v3799_v39 }
 0x439   :  { %1565 = vmatpush1.msra.mxu0 %v3805_v41  ;;  %1636 = vmatpush1.msra.mxu1 %v3811_v42 }
 0x43a   :  { %1566 = vmatprep.subr.mxu0 %v3817_v43  ;;  %1637 = vmatprep.subr.mxu1 %v3823_v45  ;;  %v3841_v43 = vld [vmem:[%s4351_s3 + $0x108] sm:$0xff]  ;;  %v3847_v45 = vld [vmem:[%s4351_s3 + $0x118] sm:$0xff] }
 0x43b   :  { %1567 = vmatpush1.msra.mxu0 %v3829_v46  ;;  %1638 = vmatpush1.msra.mxu1 %v3835_v0  ;;  %v3853_v46 = vld [vmem:[%s4351_s3 + $0x100] sm:$0xff] }
 0x43c   :  { %1568 = vmatprep.subr.mxu0 %v3841_v43  ;;  %1639 = vmatprep.subr.mxu1 %v3847_v45 }
 0x43d   :  { %1569 = vmatpush1.msra.mxu0 %v3853_v46  ;;  %1640 = vmatpush1.msra.mxu1 %v3145_v47  ;;  %v3894_v47 = vld [vmem:[%s4351_s3 + $0x1e8] sm:$0xff] }
 0x43e   :  { %1570 = vmatprep.subr.mxu0 %v3150_v48  ;;  %1641 = vmatprep.subr.mxu1 %v3157_v49  ;;  %v3900_v48 = vld [vmem:[%s4351_s3 + $0x1f8] sm:$0xff]  ;;  %v4579_v49 = vld [vmem:[#allocation40_spill] sm:$0xff] }
 0x43f   :  { %1571 = vmatpush1.msra.mxu0 %v3162_v50  ;;  %1642 = vmatpush1.msra.mxu1 %v3169_v51  ;;  %v300_v50 = vadd.f32 %v4579_v49, %v4571_v40 }
 0x440   :  { %1572 = vmatprep.subr.mxu0 %v3174_v52  ;;  %1643 = vmatprep.subr.mxu1 %v3181_v53 }
 0x441   :  { %1573 = vmatpush1.msra.mxu0 %v3186_v54  ;;  %1644 = vmatpush1.msra.mxu1 %v3193_v55  ;;  %v4580_v55 = vld [vmem:[#allocation42_spill] sm:$0xff] }
 0x442   :  { %1574 = vmatprep.subr.mxu0 %v3198_v56  ;;  %1645 = vmatprep.subr.mxu1 %v4519_v1 }
 0x443   :  { %1575 = vmatpush1.msra.mxu0 %v4520_v6  ;;  %1646 = vmatpush1.msra.mxu1 %v4521_v8 }
 0x444   :  { %1576 = vmatprep.subr.mxu0 %v4522_v5  ;;  %1647 = vmatprep.subr.mxu1 %v4549_v18  ;;  %v4581_v5 = vld [vmem:[#allocation46_spill] sm:$0xff] }
 0x445   :  { %1577 = vmatpush1.msra.mxu0 %v4550_v19  ;;  %1648 = vmatpush1.msra.mxu1 %v4551_v20  ;;  %v415_v18 = vadd.f32 %v4581_v5, %v3362_v10  ;;  %v4582_v20 = vld [vmem:[#allocation44_spill] sm:$0xff]  ;;  %v3988_v5 = vld [vmem:[%s4351_s3 + $0xc0] sm:$0xff] }
 0x446   :  { %1578 = vmatprep.subr.mxu0 %v4552_v21  ;;  %1649 = vmatprep.subr.mxu1 %v4553_v22  ;;  %v413_v21 = vadd.f32 %v4582_v20, %v3368_v12  ;;  %v4006_v20 = vld [vmem:[%s4351_s3 + $0xb8] sm:$0xff] }
 0x447   :  { %1579 = vmatpush1.msra.mxu0 %v4554_v23  ;;  %1650 = vmatpush1.msra.mxu1 %v4555_v24 }
 0x448   :  { %1580 = vmatprep.subr.mxu0 %v4556_v25  ;;  %1651 = vmatprep.subr.mxu1 %v4557_v26 }
 0x449   :  { %1581 = vmatpush1.msra.mxu0 %v4558_v27  ;;  %1652 = vmatpush1.msra.mxu1 %v4559_v28 }
 0x44a   :  { %1582 = vmatprep.subr.mxu0 %v4560_v29  ;;  %1653 = vmatprep.subr.mxu1 %v4561_v30 }
 0x44b   :  { %1583 = vmatpush1.msra.mxu0 %v4562_v31  ;;  %1654 = vmatpush1.msra.mxu1 %v4563_v32 }
 0x44c   :  { %1584 = vmatprep.subr.mxu0 %v4564_v33  ;;  %1655 = vmatprep.subr.mxu1 %v4565_v34 }
 0x44d   :  { %1585 = vmatpush1.msra.mxu0 %v4566_v35  ;;  %1618 = vmatprep.mubr.f32.mxu0 %v4567_v36 }
 0x44e   :  { %1656 = vmatpush1.msra.mxu1 %v4568_v37  ;;  %1689 = vmatprep.mubr.f32.mxu1 %v4567_v36 }
 0x44f   :  { %1728 = vmatprep.subr.mxu0 %v3894_v47  ;;  %1799 = vmatprep.subr.mxu1 %v3900_v48 }
 0x4ee   :  { %v1446_v51 = vpop.f32.mrf.mxu0  ;;  %v1517_v1 = vpop.f32.mrf.mxu1 }
 0x4ef   :  { %v1522_v52 = vadd.f32 %v1446_v51, %v300_v50  ;;  %v1524_v22 = vadd.f32 %v1517_v1, %v413_v21  ;;  %v4584_v51 = vld [vmem:[#allocation9_spill] sm:$0xff]  ;;  %v3970_v1 = vld [vmem:[%s4351_s3 + $0xf0] sm:$0xff]  ;;  %v4012_v21 = vld [vmem:[%s4351_s3 + $0xa0] sm:$0xff] }
 0x4f0   :  { %v1448_v53 = vpop.f32.mrf.mxu0  ;;  %v1519_v8 = vpop.f32.mrf.mxu1 }
 0x4f1   :  { %v2201_v54 = vmul.f32 -1.442695, %v1522_v52  ;;  %v1523_v56 = vadd.f32 %v1448_v53, %v4580_v55  ;;  %v1525_v19 = vadd.f32 %v1519_v8, %v415_v18  ;;  %v4585_v52 = vld [vmem:[#allocation10_spill] sm:$0xff]  ;;  %v3946_v53 = vld [vmem:[%s4351_s3 + $0x110] sm:$0xff]  ;;  %v3958_v55 = vld [vmem:[%s4351_s3 + $0xf8] sm:$0xff] }
 0x4f2   :  { %v3982_v8 = vld [vmem:[%s4351_s3 + $0xd8] sm:$0xff]  ;;  %v3994_v18 = vld [vmem:[%s4351_s3 + $0xd0] sm:$0xff] }
 0x4f3   :  { %2319 = vpow2.f32 %v2201_v54  ;;  %v2202_v6 = vmul.f32 -1.442695, %v1523_v56  ;;  %v2203_v23 = vmul.f32 -1.442695, %v1525_v19  ;;  %v3952_v54 = vld [vmem:[%s4351_s3 + $0xe8] sm:$0xff]  ;;  %v3964_v56 = vld [vmem:[%s4351_s3 + $0xe0] sm:$0xff] }
 0x4f4   :  { %v4000_v19 = vld [vmem:[%s4351_s3 + $0xa8] sm:$0xff] }
 0x4f5   :  { %2321 = vpow2.f32 %v2202_v6  ;;  %v3976_v6 = vld [vmem:[%s4351_s3 + $0xc8] sm:$0xff] }
 0x4f6   :  { %2323 = vtanh.f32 %v1524_v22  ;;  %v4018_v22 = vld [vmem:[%s4351_s3 + $0xb0] sm:$0xff] }
 0x4f7   :  { %2325 = vpow2.f32 %v2203_v23  ;;  %v4024_v23 = vld [vmem:[%s4351_s3 + $0x88] sm:$0xff] }
 0x500   :  { %v2320_v24 = vpop.eup %2319 }
 0x501   :  { %v1529_v25 = vadd.f32 1.0, %v2320_v24  ;;  %v4030_v24 = vld [vmem:[%s4351_s3 + $0x98] sm:$0xff] }
 0x502   :  { %v2322_v26 = vpop.eup %2321  ;;  %4586 = vst [vmem:[#allocation11_spill] sm:$0xff] %v4030_v24 }
 0x503   :  { %2327 = vrcp.f32 %v1529_v25  ;;  %v1535_v27 = vadd.f32 1.0, %v2322_v26  ;;  %v2324_v28 = vpop.eup %2323  ;;  %v4036_v25 = vld [vmem:[%s4351_s3 + $0x80] sm:$0xff]  ;;  %v4042_v26 = vld [vmem:[%s4351_s3 + $0x90] sm:$0xff] }
 0x504   :  { %v2326_v29 = vpop.eup %2325  ;;  %4587 = vst [vmem:[#allocation33_spill] sm:$0xff] %v4036_v25  ;;  %4588 = vst [vmem:[#allocation34_spill] sm:$0xff] %v4042_v26 }
 0x505   :  { %2329 = vrcp.f32 %v1535_v27  ;;  %v1542_v33 = vadd.f32 1.0, %v2326_v29  ;;  %v4048_v27 = vld [vmem:[%s4351_s3 + $0x68] sm:$0xff]  ;;  %v4060_v29 = vld [vmem:[%s4351_s3 + $0x60] sm:$0xff] }
 0x506   :  { %4589 = vst [vmem:[#allocation36_spill] sm:$0xff] %v4048_v27  ;;  %4591 = vst [vmem:[#allocation12_spill] sm:$0xff] %v4060_v29 }
 0x507   :  { %2331 = vrcp.f32 %v1542_v33  ;;  %v4084_v33 = vld [vmem:[%s4351_s3 + $0x40] sm:$0xff] }
 0x508   :  { %4595 = vst [vmem:[#allocation16_spill] sm:$0xff] %v4084_v33 }
 0x510   :  { %v2328_v30 = vpop.eup %2327 }
 0x511   :  { %v1546_v31 = vmul.f32 %v2328_v30, %v2324_v28  ;;  %v4054_v28 = vld [vmem:[%s4351_s3 + $0x78] sm:$0xff]  ;;  %v4066_v30 = vld [vmem:[%s4351_s3 + $0x70] sm:$0xff] }
 0x512   :  { %v2330_v32 = vpop.eup %2329  ;;  %4590 = vst [vmem:[#allocation35_spill] sm:$0xff] %v4054_v28  ;;  %4592 = vst [vmem:[#allocation13_spill] sm:$0xff] %v4066_v30 }
 0x513   :  { %v1545_v34 = vmul.f32 %v2330_v32, %v3679_v44  ;;  %v4583_v44 = vld [vmem:[#allocation8_spill] sm:$0xff]  ;;  %v4078_v32 = vld [vmem:[%s4351_s3 + $0x58] sm:$0xff] }
 0x514   :  { %v2332_v37 = vpop.eup %2331  ;;  %4594 = vst [vmem:[#allocation15_spill] sm:$0xff] %v4078_v32 }
 0x515   :  { %v3911_v35 = vadd.f32 %v1546_v31, %v1545_v34  ;;  %v4072_v31 = vld [vmem:[%s4351_s3 + $0x48] sm:$0xff]  ;;  %v4090_v34 = vld [vmem:[%s4351_s3 + $0x50] sm:$0xff] }
 0x516   :  { %4593 = vst [vmem:[#allocation14_spill] sm:$0xff] %v4072_v31  ;;  %4596 = vst [vmem:[#allocation17_spill] sm:$0xff] %v4090_v34 }
 0x517   :  { %2333 = vtanh.f32 %v3911_v35 }
 0x524   :  { %v2334_v49 = vpop.eup %2333 }
 0x525   :  { %v1549_v50 = vmul.f32 %v2334_v49, %v2332_v37  ;;  %v4096_v37 = vld [vmem:[%s4351_s3 + $0x28] sm:$0xff]  ;;  %v4102_v49 = vld [vmem:[%s4351_s3 + $0x38] sm:$0xff] }
 0x526   :  { %4597 = vst [vmem:[#allocation18_spill] sm:$0xff] %v4096_v37  ;;  %4598 = vst [vmem:[#allocation19_spill] sm:$0xff] %v4102_v49 }
 0x527   :  { %1619 = vmatmul.mubr.f32.vlgmr.msra.gmra.mxu0 %v1549_v50  ;;  %1690 = vmatmul.mubr.f32.vlgmr.msra.gmra.mxu1 %v1549_v50  ;;  %v4108_v50 = vld [vmem:[%s4351_s3 + $0x20] sm:$0xff] }
 0x528   :  { %1729 = vmatpush1.msra.mxu0 %v3685_v63  ;;  %1800 = vmatpush1.msra.mxu1 %v3691_v58  ;;  %4599 = vst [vmem:[#allocation20_spill] sm:$0xff] %v4108_v50 }
 0x529   :  { %1730 = vmatprep.subr.mxu0 %v3697_v62  ;;  %1801 = vmatprep.subr.mxu1 %v3703_v11 }
 0x52a   :  { %1731 = vmatpush1.msra.mxu0 %v3709_v2  ;;  %1802 = vmatpush1.msra.mxu1 %v3715_v14 }
 0x52b   :  { %1732 = vmatprep.subr.mxu0 %v3721_v17  ;;  %1803 = vmatprep.subr.mxu1 %v3727_v9 }
 0x52c   :  { %1733 = vmatpush1.msra.mxu0 %v3733_v3  ;;  %1804 = vmatpush1.msra.mxu1 %v3739_v59 }
 0x52d   :  { %1734 = vmatprep.subr.mxu0 %v3745_v60  ;;  %1805 = vmatprep.subr.mxu1 %v3751_v61 }
 0x52e   :  { %1735 = vmatpush1.msra.mxu0 %v3757_v57  ;;  %1806 = vmatpush1.msra.mxu1 %v3763_v15 }
 0x52f   :  { %1736 = vmatprep.subr.mxu0 %v3769_v16  ;;  %1807 = vmatprep.subr.mxu1 %v3775_v4 }
 0x530   :  { %1737 = vmatpush1.msra.mxu0 %v3781_v7  ;;  %1808 = vmatpush1.msra.mxu1 %v3787_v13 }
 0x531   :  { %1738 = vmatprep.subr.mxu0 %v3793_v38  ;;  %1809 = vmatprep.subr.mxu1 %v3799_v39 }
 0x532   :  { %1739 = vmatpush1.msra.mxu0 %v3805_v41  ;;  %1810 = vmatpush1.msra.mxu1 %v3811_v42 }
 0x533   :  { %1740 = vmatprep.subr.mxu0 %v4583_v44  ;;  %1811 = vmatprep.subr.mxu1 %v4584_v51 }
 0x534   :  { %1741 = vmatpush1.msra.mxu0 %v4585_v52  ;;  %1812 = vmatpush1.msra.mxu1 %v3835_v0 }
 0x535   :  { %1742 = vmatprep.subr.mxu0 %v3841_v43  ;;  %1813 = vmatprep.subr.mxu1 %v3847_v45 }
 0x536   :  { %1743 = vmatpush1.msra.mxu0 %v3853_v46  ;;  %1814 = vmatpush1.msra.mxu1 %v3946_v53 }
 0x537   :  { %1744 = vmatprep.subr.mxu0 %v3952_v54  ;;  %1815 = vmatprep.subr.mxu1 %v3958_v55 }
 0x538   :  { %1745 = vmatpush1.msra.mxu0 %v3964_v56  ;;  %1816 = vmatpush1.msra.mxu1 %v3970_v1 }
 0x539   :  { %1746 = vmatprep.subr.mxu0 %v3976_v6  ;;  %1817 = vmatprep.subr.mxu1 %v3982_v8 }
 0x53a   :  { %1747 = vmatpush1.msra.mxu0 %v3988_v5  ;;  %1818 = vmatpush1.msra.mxu1 %v3994_v18 }
 0x53b   :  { %1748 = vmatprep.subr.mxu0 %v4000_v19  ;;  %1819 = vmatprep.subr.mxu1 %v4006_v20 }
 0x53c   :  { %1749 = vmatpush1.msra.mxu0 %v4012_v21  ;;  %1820 = vmatpush1.msra.mxu1 %v4018_v22 }
 0x53d   :  { %1750 = vmatprep.subr.mxu0 %v4024_v23  ;;  %1821 = vmatprep.subr.mxu1 %v4030_v24 }
 0x53e   :  { %1751 = vmatpush1.msra.mxu0 %v4036_v25  ;;  %1822 = vmatpush1.msra.mxu1 %v4042_v26 }
 0x53f   :  { %1752 = vmatprep.subr.mxu0 %v4048_v27  ;;  %1823 = vmatprep.subr.mxu1 %v4054_v28 }
 0x540   :  { %1753 = vmatpush1.msra.mxu0 %v4060_v29  ;;  %1824 = vmatpush1.msra.mxu1 %v4066_v30  ;;  %v4606_v30 = vld [vmem:[#allocation45_spill] sm:$0xff] }
 0x541   :  { %1754 = vmatprep.subr.mxu0 %v4072_v31  ;;  %1825 = vmatprep.subr.mxu1 %v4078_v32 }
 0x542   :  { %1755 = vmatpush1.msra.mxu0 %v4084_v33  ;;  %1826 = vmatpush1.msra.mxu1 %v4090_v34  ;;  %v4114_v34 = vld [vmem:[%s4351_s3 + $0x30] sm:$0xff] }
 0x543   :  { %1756 = vmatprep.subr.mxu0 %v4096_v37  ;;  %1827 = vmatprep.subr.mxu1 %v4102_v49  ;;  %4600 = vst [vmem:[#allocation21_spill] sm:$0xff] %v4114_v34  ;;  %v4120_v37 = vld [vmem:[%s4351_s3 + $0x8] sm:$0xff]  ;;  %v4126_v49 = vld [vmem:[%s4351_s3 + $0x18] sm:$0xff] }
 0x544   :  { %1757 = vmatpush1.msra.mxu0 %v4108_v50  ;;  %1828 = vmatpush1.msra.mxu1 %v4114_v34  ;;  %4601 = vst [vmem:[#allocation22_spill] sm:$0xff] %v4120_v37  ;;  %4602 = vst [vmem:[#allocation23_spill] sm:$0xff] %v4126_v49  ;;  %v4132_v50 = vld [vmem:[%s4351_s3] sm:$0xff] }
 0x545   :  { %1758 = vmatprep.subr.mxu0 %v4120_v37  ;;  %1829 = vmatprep.subr.mxu1 %v4126_v49  ;;  %4603 = vst [vmem:[#allocation24_spill] sm:$0xff] %v4132_v50  ;;  %v4139_v37 = vld [vmem:[%s4351_s3 + $0x10] sm:$0xff]  ;;  %v4605_v49 = vld [vmem:[#allocation43_spill] sm:$0xff] }
 0x546   :  { %1759 = vmatpush1.msra.mxu0 %v4132_v50  ;;  %1792 = vmatprep.mubr.f32.mxu0 %v4567_v36  ;;  %4604 = vst [vmem:[#allocation25_spill] sm:$0xff] %v4139_v37  ;;  %v306_v34 = vadd.f32 %v4605_v49, %v4571_v40 }
 0x547   :  { %1830 = vmatpush1.msra.mxu1 %v4139_v37  ;;  %1863 = vmatprep.mubr.f32.mxu1 %v4567_v36  ;;  %v4607_v36 = vld [vmem:[#allocation51_spill] sm:$0xff] }
 0x548   :  { %1902 = vmatprep.subr.mxu0 %v3894_v47  ;;  %1973 = vmatprep.subr.mxu1 %v3900_v48  ;;  %v421_v26 = vadd.f32 %v4607_v36, %v3362_v10  ;;  %v4608_v48 = vld [vmem:[#allocation48_spill] sm:$0xff] }
 0x549   :  { %v419_v25 = vadd.f32 %v4608_v48, %v3368_v12 }
 0x5e7   :  { %v1620_v33 = vpop.f32.mrf.mxu0  ;;  %v1691_v28 = vpop.f32.mrf.mxu1 }
 0x5e8   :  { %v1696_v50 = vadd.f32 %v1620_v33, %v306_v34  ;;  %v1698_v24 = vadd.f32 %v1691_v28, %v419_v25 }
 0x5e9   :  { %v1622_v32 = vpop.f32.mrf.mxu0  ;;  %v1693_v37 = vpop.f32.mrf.mxu1 }
 0x5ea   :  { %v2204_v31 = vmul.f32 -1.442695, %v1696_v50  ;;  %v1697_v29 = vadd.f32 %v1622_v32, %v4606_v30  ;;  %v1699_v47 = vadd.f32 %v1693_v37, %v421_v26 }
 0x5ec   :  { %2335 = vpow2.f32 %v2204_v31  ;;  %v2205_v27 = vmul.f32 -1.442695, %v1697_v29  ;;  %v2206_v49 = vmul.f32 -1.442695, %v1699_v47 }
 0x5ee   :  { %2337 = vpow2.f32 %v2205_v27 }
 0x5ef   :  { %2339 = vtanh.f32 %v1698_v24 }
 0x5f0   :  { %2341 = vpow2.f32 %v2206_v49 }
 0x5f9   :  { %v2336_v40 = vpop.eup %2335 }
 0x5fa   :  { %v1703_v33 = vadd.f32 1.0, %v2336_v40 }
 0x5fb   :  { %v2338_v34 = vpop.eup %2337 }
 0x5fc   :  { %2343 = vrcp.f32 %v1703_v33  ;;  %v1709_v30 = vadd.f32 1.0, %v2338_v34  ;;  %v2340_v29 = vpop.eup %2339 }
 0x5fd   :  { %v2342_v27 = vpop.eup %2341 }
 0x5fe   :  { %2345 = vrcp.f32 %v1709_v30  ;;  %v1716_v36 = vadd.f32 1.0, %v2342_v27 }
 0x600   :  { %2347 = vrcp.f32 %v1716_v36 }
 0x609   :  { %v2344_v31 = vpop.eup %2343 }
 0x60a   :  { %v1720_v32 = vmul.f32 %v2344_v31, %v2340_v29 }
 0x60b   :  { %v2346_v50 = vpop.eup %2345 }
 0x60c   :  { %v1719_v26 = vmul.f32 %v2346_v50, %v3911_v35 }
 0x60d   :  { %v2348_v40 = vpop.eup %2347 }
 0x60e   :  { %v4153_v37 = vadd.f32 %v1720_v32, %v1719_v26 }
 0x610   :  { %2349 = vtanh.f32 %v4153_v37 }
 0x61d   :  { %v2350_v24 = vpop.eup %2349 }
 0x61e   :  { %v1723_v25 = vmul.f32 %v2350_v24, %v2348_v40  ;;  %v4637_v24 = vld [vmem:[#allocation57_spill] sm:$0xff] }
 0x620   :  { %1793 = vmatmul.mubr.f32.vlgmr.msra.gmra.mxu0 %v1723_v25  ;;  %1864 = vmatmul.mubr.f32.vlgmr.msra.gmra.mxu1 %v1723_v25 }
 0x621   :  { %1903 = vmatpush1.msra.mxu0 %v3685_v63  ;;  %1974 = vmatpush1.msra.mxu1 %v3691_v58  ;;  %v4609_v63 = vld [vmem:[#allocation11_spill] sm:$0xff]  ;;  %v4610_v58 = vld [vmem:[#allocation33_spill] sm:$0xff] }
 0x622   :  { %1904 = vmatprep.subr.mxu0 %v3697_v62  ;;  %1975 = vmatprep.subr.mxu1 %v3703_v11  ;;  %v4611_v62 = vld [vmem:[#allocation34_spill] sm:$0xff]  ;;  %v4612_v11 = vld [vmem:[#allocation36_spill] sm:$0xff] }
 0x623   :  { %1905 = vmatpush1.msra.mxu0 %v3709_v2  ;;  %1976 = vmatpush1.msra.mxu1 %v3715_v14  ;;  %v4613_v2 = vld [vmem:[#allocation35_spill] sm:$0xff]  ;;  %v4614_v14 = vld [vmem:[#allocation12_spill] sm:$0xff] }
 0x624   :  { %1906 = vmatprep.subr.mxu0 %v3721_v17  ;;  %1977 = vmatprep.subr.mxu1 %v3727_v9  ;;  %v4615_v17 = vld [vmem:[#allocation13_spill] sm:$0xff]  ;;  %v4616_v9 = vld [vmem:[#allocation14_spill] sm:$0xff] }
 0x625   :  { %1907 = vmatpush1.msra.mxu0 %v3733_v3  ;;  %1978 = vmatpush1.msra.mxu1 %v3739_v59  ;;  %v4617_v3 = vld [vmem:[#allocation15_spill] sm:$0xff]  ;;  %v4618_v59 = vld [vmem:[#allocation16_spill] sm:$0xff] }
 0x626   :  { %1908 = vmatprep.subr.mxu0 %v3745_v60  ;;  %1979 = vmatprep.subr.mxu1 %v3751_v61  ;;  %v4619_v60 = vld [vmem:[#allocation17_spill] sm:$0xff]  ;;  %v4620_v61 = vld [vmem:[#allocation18_spill] sm:$0xff] }
 0x627   :  { %1909 = vmatpush1.msra.mxu0 %v3757_v57  ;;  %1980 = vmatpush1.msra.mxu1 %v3763_v15  ;;  %v4621_v57 = vld [vmem:[#allocation19_spill] sm:$0xff]  ;;  %v4622_v15 = vld [vmem:[#allocation20_spill] sm:$0xff] }
 0x628   :  { %1910 = vmatprep.subr.mxu0 %v3769_v16  ;;  %1981 = vmatprep.subr.mxu1 %v3775_v4  ;;  %v4623_v16 = vld [vmem:[#allocation21_spill] sm:$0xff]  ;;  %v4624_v4 = vld [vmem:[#allocation22_spill] sm:$0xff] }
 0x629   :  { %1911 = vmatpush1.msra.mxu0 %v3781_v7  ;;  %1982 = vmatpush1.msra.mxu1 %v3787_v13  ;;  %v4625_v7 = vld [vmem:[#allocation23_spill] sm:$0xff]  ;;  %v4626_v13 = vld [vmem:[#allocation24_spill] sm:$0xff] }
 0x62a   :  { %1912 = vmatprep.subr.mxu0 %v3793_v38  ;;  %1983 = vmatprep.subr.mxu1 %v3799_v39  ;;  %v4627_v38 = vmov 0.0   ;;  %v4628_v39 = vld [vmem:[#allocation25_spill] sm:$0xff] }
 0x62b   :  { %1913 = vmatpush1.msra.mxu0 %v3805_v41  ;;  %1984 = vmatpush1.msra.mxu1 %v3811_v42  ;;  %v4629_v41 = vld [vmem:[#allocation32_spill] sm:$0xff]  ;;  %v4630_v42 = vld [vmem:[#allocation47_spill] sm:$0xff] }
 0x62c   :  { %1914 = vmatprep.subr.mxu0 %v4583_v44  ;;  %1985 = vmatprep.subr.mxu1 %v4584_v51  ;;  %v4631_v44 = vld [vmem:[#allocation49_spill] sm:$0xff] }
 0x62d   :  { %1915 = vmatpush1.msra.mxu0 %v4585_v52  ;;  %1986 = vmatpush1.msra.mxu1 %v3835_v0 }
 0x62e   :  { %1916 = vmatprep.subr.mxu0 %v3841_v43  ;;  %1987 = vmatprep.subr.mxu1 %v3847_v45  ;;  %v312_v43 = vadd.f32 %v4630_v42, %v4629_v41  ;;  %v2080_v42 = vld [vmem:[%s4354_s6 + $0x40] sm:$0xff] }
 0x62f   :  { %1917 = vmatpush1.msra.mxu0 %v3853_v46  ;;  %1988 = vmatpush1.msra.mxu1 %v3946_v53 }
 0x630   :  { %1918 = vmatprep.subr.mxu0 %v3952_v54  ;;  %1989 = vmatprep.subr.mxu1 %v3958_v55  ;;  %v2453_v54 = vld [vmem:[%s4353_s5] sm:$0xf]  ;;  %v4632_v55 = vld [vmem:[#allocation31_spill] sm:$0xff] }
 0x631   :  { %1919 = vmatpush1.msra.mxu0 %v3964_v56  ;;  %1990 = vmatpush1.msra.mxu1 %v3970_v1  ;;  %v4633_v56 = vsub.s32 3, %v4632_v55  ;;  %v2090_v55 = vld [vmem:[%s4354_s6 + $0x90] sm:$0xff] }
 0x632   :  { %1920 = vmatprep.subr.mxu0 %v3976_v6  ;;  %1991 = vmatprep.subr.mxu1 %v3982_v8  ;;  %v4634_v8 = vld [vmem:[#allocation54_spill] sm:$0xff] }
 0x633   :  { %1921 = vmatpush1.msra.mxu0 %v3988_v5  ;;  %1992 = vmatpush1.msra.mxu1 %v3994_v18  ;;  %v610_v1 = vrot.slane %v2453_v54, %v4633_v56  ;;  %v427_v5 = vadd.f32 %v4634_v8, %v3362_v10  ;;  %v4635_v18 = vld [vmem:[#allocation58_spill] sm:$0xff]  ;;  %v2075_v54 = vld [vmem:[%s4354_s6 + $0x18] sm:$0xff]  ;;  %v2074_v56 = vld [vmem:[%s4354_s6 + $0x10] sm:$0xff] }
 0x634   :  { %1922 = vmatprep.subr.mxu0 %v4000_v19  ;;  %1993 = vmatprep.subr.mxu1 %v4006_v20  ;;  %v2088_v8 = vld [vmem:[%s4354_s6 + $0x80] sm:$0xff] }
 0x635   :  { %1923 = vmatpush1.msra.mxu0 %v4012_v21  ;;  %1994 = vmatpush1.msra.mxu1 %v4018_v22  ;;  %v753_v19 = vadd.f32 %v4635_v18, %v610_v1  ;;  %v4636_v21 = vld [vmem:[#allocation53_spill] sm:$0xff]  ;;  %v2089_v1 = vld [vmem:[%s4354_s6 + $0x88] sm:$0xff]  ;;  %v4638_v18 = vld [vmem:[#allocation50_spill] sm:$0xff] }
 0x636   :  { %1924 = vmatprep.subr.mxu0 %v4024_v23  ;;  %1995 = vmatprep.subr.mxu1 %v4609_v63  ;;  %v425_v22 = vadd.f32 %v4636_v21, %v3368_v12 }
 0x637   :  { %1925 = vmatpush1.msra.mxu0 %v4610_v58  ;;  %1996 = vmatpush1.msra.mxu1 %v4611_v62  ;;  %v2189_v23 = vmul.f32 -1.442695, %v753_v19  ;;  %v318_v19 = vadd.f32 %v4638_v18, %v4629_v41 }
 0x638   :  { %1926 = vmatprep.subr.mxu0 %v4612_v11  ;;  %1997 = vmatprep.subr.mxu1 %v4613_v2 }
 0x639   :  { %1927 = vmatpush1.msra.mxu0 %v4614_v14  ;;  %1998 = vmatpush1.msra.mxu1 %v4615_v17  ;;  %v2087_v17 = vld [vmem:[%s4354_s6 + $0x78] sm:$0xff] }
 0x63a   :  { %1928 = vmatprep.subr.mxu0 %v4616_v9  ;;  %1999 = vmatprep.subr.mxu1 %v4617_v3  ;;  %v2102_v9 = vld [vmem:[%s4354_s6 + $0xf0] sm:$0xff] }
 0x63b   :  { %1929 = vmatpush1.msra.mxu0 %v4618_v59  ;;  %2000 = vmatpush1.msra.mxu1 %v4619_v60  ;;  %v2086_v3 = vld [vmem:[%s4354_s6 + $0x70] sm:$0xff]  ;;  %v2101_v59 = vld [vmem:[%s4354_s6 + $0xe8] sm:$0xff] }
 0x63c   :  { %1930 = vmatprep.subr.mxu0 %v4620_v61  ;;  %2001 = vmatprep.subr.mxu1 %v4621_v57  ;;  %v2085_v60 = vld [vmem:[%s4354_s6 + $0x68] sm:$0xff]  ;;  %v2100_v61 = vld [vmem:[%s4354_s6 + $0xe0] sm:$0xff] }
 0x63d   :  { %1931 = vmatpush1.msra.mxu0 %v4622_v15  ;;  %2002 = vmatpush1.msra.mxu1 %v4623_v16  ;;  %v2084_v57 = vld [vmem:[%s4354_s6 + $0x60] sm:$0xff]  ;;  %v2099_v15 = vld [vmem:[%s4354_s6 + $0xd8] sm:$0xff] }
 0x63e   :  { %1932 = vmatprep.subr.mxu0 %v4624_v4  ;;  %2003 = vmatprep.subr.mxu1 %v4625_v7  ;;  %v2083_v16 = vld [vmem:[%s4354_s6 + $0x58] sm:$0xff]  ;;  %v2098_v4 = vld [vmem:[%s4354_s6 + $0xd0] sm:$0xff] }
 0x63f   :  { %1933 = vmatpush1.msra.mxu0 %v4626_v13  ;;  %1966 = vmatprep.mubr.f32.mxu0 %v4627_v38  ;;  %v2082_v7 = vld [vmem:[%s4354_s6 + $0x50] sm:$0xff]  ;;  %v2097_v13 = vld [vmem:[%s4354_s6 + $0xc8] sm:$0xff] }
 0x640   :  { %2004 = vmatpush1.msra.mxu1 %v4628_v39  ;;  %2037 = vmatprep.mubr.f32.mxu1 %v4627_v38  ;;  %v2081_v38 = vld [vmem:[%s4354_s6 + $0x48] sm:$0xff]  ;;  %v2096_v39 = vld [vmem:[%s4354_s6 + $0xc0] sm:$0xff] }
 0x6e0   :  { %v1794_v45 = vpop.f32.mrf.mxu0  ;;  %v1865_v52 = vpop.f32.mrf.mxu1 }
 0x6e1   :  { %v1870_v46 = vadd.f32 %v1794_v45, %v312_v43  ;;  %v1872_v28 = vadd.f32 %v1865_v52, %v425_v22  ;;  %v2095_v43 = vld [vmem:[%s4354_s6 + $0xb8] sm:$0xff]  ;;  %v2076_v52 = vld [vmem:[%s4354_s6 + $0x20] sm:$0xff] }
 0x6e2   :  { %v1796_v0 = vpop.f32.mrf.mxu0  ;;  %v1867_v6 = vpop.f32.mrf.mxu1  ;;  %v2079_v45 = vld [vmem:[%s4354_s6 + $0x38] sm:$0xff] }
 0x6e3   :  { %v2207_v35 = vmul.f32 -1.442695, %v1870_v46  ;;  %v1871_v51 = vadd.f32 %v1796_v0, %v4631_v44  ;;  %v1873_v20 = vadd.f32 %v1867_v6, %v427_v5  ;;  %v2094_v46 = vld [vmem:[%s4354_s6 + $0xb0] sm:$0xff]  ;;  %v2077_v44 = vld [vmem:[%s4354_s6 + $0x28] sm:$0xff]  ;;  %v2072_v5 = vld [vmem:[%s4354_s6] sm:$0xff] }
 0x6e4   :  { %v2078_v0 = vld [vmem:[%s4354_s6 + $0x30] sm:$0xff]  ;;  %v2073_v6 = vld [vmem:[%s4354_s6 + $0x8] sm:$0xff] }
 0x6e5   :  { %2351 = vpow2.f32 %v2207_v35  ;;  %v2208_v53 = vmul.f32 -1.442695, %v1871_v51  ;;  %v2209_v47 = vmul.f32 -1.442695, %v1873_v20  ;;  %v2093_v35 = vld [vmem:[%s4354_s6 + $0xa8] sm:$0xff]  ;;  %v2092_v51 = vld [vmem:[%s4354_s6 + $0xa0] sm:$0xff] }
 0x6e7   :  { %2353 = vpow2.f32 %v2208_v53  ;;  %v2091_v53 = vld [vmem:[%s4354_s6 + $0x98] sm:$0xff] }
 0x6e8   :  { %2355 = vpow2.f32 %v2189_v23 }
 0x6e9   :  { %2357 = vtanh.f32 %v1872_v28  ;;  %v4639_v28 = vld [vmem:[#allocation52_spill] sm:$0xff] }
 0x6ea   :  { %2359 = vpow2.f32 %v2209_v47 }
 0x6f2   :  { %v2352_v48 = vpop.eup %2351 }
 0x6f3   :  { %v1877_v49 = vadd.f32 1.0, %v2352_v48 }
 0x6f4   :  { %v2354_v33 = vpop.eup %2353 }
 0x6f5   :  { %2361 = vrcp.f32 %v1877_v49  ;;  %v1883_v34 = vadd.f32 1.0, %v2354_v33  ;;  %v2356_v30 = vpop.eup %2355 }
 0x6f6   :  { %v2358_v29 = vpop.eup %2357  ;;  %v765_v32 = vadd.f32 1.0, %v2356_v30 }
 0x6f7   :  { %2363 = vrcp.f32 %v1883_v34  ;;  %v2360_v27 = vpop.eup %2359  ;;  %v4640_v34 = vld [vmem:[#allocation56_spill] sm:$0xff] }
 0x6f8   :  { %v1890_v26 = vadd.f32 1.0, %v2360_v27  ;;  %2365 = vrcp.f32 %v765_v32  ;;  %v433_v30 = vadd.f32 %v4640_v34, %v3362_v10  ;;  %v4641_v27 = vld [vmem:[#allocation55_spill] sm:$0xff] }
 0x6f9   :  { %2367 = vtanh.f32 %v4637_v24 }
 0x6fa   :  { %2369 = vrcp.f32 %v1890_v26 }
 0x702   :  { %v2362_v31 = vpop.eup %2361 }
 0x703   :  { %v1894_v50 = vmul.f32 %v2362_v31, %v2358_v29  ;;  %v431_v31 = vadd.f32 %v4641_v27, %v3368_v12 }
 0x704   :  { %v2364_v36 = vpop.eup %2363 }
 0x705   :  { %v1893_v40 = vmul.f32 %v2364_v36, %v4153_v37  ;;  %v2366_v63 = vpop.eup %2365  ;;  %v2103_v37 = vld [vmem:[%s4354_s6 + $0xf8] sm:$0xff] }
 0x706   :  { %v2368_v58 = vpop.eup %2367  ;;  %2214 = vmatprep.subr.mxu0 %v2103_v37 }
 0x707   :  { %v4235_v25 = vadd.f32 %v1894_v50, %v1893_v40  ;;  %v2370_v62 = vpop.eup %2369  ;;  %v770_v14 = vmul.f32 %v2368_v58, %v2366_v63 }
 0x709   :  { %2371 = vtanh.f32 %v4235_v25 }
 0x716   :  { %v2372_v11 = vpop.eup %2371 }
 0x717   :  { %v1897_v2 = vmul.f32 %v2372_v11, %v2370_v62 }
 0x719   :  { %1967 = vmatmul.mubr.f32.vlgmr.msra.gmra.mxu0 %v1897_v2  ;;  %2038 = vmatmul.mubr.f32.vlgmr.msra.gmra.mxu1 %v1897_v2 }
 0x71a   :  { %2175 = vmatprep.mubr.f32.mxu0 %v770_v14  ;;  %2215 = vmatpush3.msra.mxu0 %v2087_v17 }
 0x71b   :  { %2216 = vmatprep.subr.mxu0 %v2102_v9 }
 0x71c   :  { %2217 = vmatpush3.msra.mxu0 %v2086_v3  ;;  %v2213_v3 = vld [vmem:[%s4355_s7] ss:$0 sm:$0xff] }
 0x71d   :  { %2218 = vmatprep.subr.mxu0 %v2101_v59 }
 0x71e   :  { %2219 = vmatpush3.msra.mxu0 %v2085_v60 }
 0x71f   :  { %2220 = vmatprep.subr.mxu0 %v2100_v61 }
 0x720   :  { %2221 = vmatpush3.msra.mxu0 %v2084_v57 }
 0x721   :  { %2222 = vmatprep.subr.mxu0 %v2099_v15 }
 0x722   :  { %2223 = vmatpush3.msra.mxu0 %v2083_v16 }
 0x723   :  { %2224 = vmatprep.subr.mxu0 %v2098_v4 }
 0x724   :  { %2225 = vmatpush3.msra.mxu0 %v2082_v7 }
 0x725   :  { %2226 = vmatprep.subr.mxu0 %v2097_v13 }
 0x726   :  { %2227 = vmatpush3.msra.mxu0 %v2081_v38 }
 0x727   :  { %2228 = vmatprep.subr.mxu0 %v2096_v39 }
 0x728   :  { %2229 = vmatpush3.msra.mxu0 %v2080_v42 }
 0x729   :  { %2230 = vmatprep.subr.mxu0 %v2095_v43 }
 0x72a   :  { %2231 = vmatpush3.msra.mxu0 %v2079_v45 }
 0x72b   :  { %2232 = vmatprep.subr.mxu0 %v2094_v46 }
 0x72c   :  { %2233 = vmatpush3.msra.mxu0 %v2078_v0 }
 0x72d   :  { %2234 = vmatprep.subr.mxu0 %v2093_v35 }
 0x72e   :  { %2235 = vmatpush3.msra.mxu0 %v2077_v44 }
 0x72f   :  { %2236 = vmatprep.subr.mxu0 %v2092_v51 }
 0x730   :  { %2237 = vmatpush3.msra.mxu0 %v2076_v52 }
 0x731   :  { %2238 = vmatprep.subr.mxu0 %v2091_v53 }
 0x732   :  { %2239 = vmatpush3.msra.mxu0 %v2075_v54 }
 0x733   :  { %2240 = vmatprep.subr.mxu0 %v2090_v55 }
 0x734   :  { %2241 = vmatpush3.msra.mxu0 %v2074_v56 }
 0x735   :  { %2242 = vmatprep.subr.mxu0 %v2089_v1 }
 0x736   :  { %2243 = vmatpush3.msra.mxu0 %v2073_v6 }
 0x737   :  { %2244 = vmatprep.subr.mxu0 %v2088_v8 }
 0x738   :  { %2245 = vmatpush3.msra.mxu0 %v2072_v5 }
 0x7d9   :  { %v1968_v20 = vpop.f32.mrf.mxu0  ;;  %v2039_v48 = vpop.f32.mrf.mxu1 }
 0x7da   :  { %v2044_v21 = vadd.f32 %v1968_v20, %v318_v19  ;;  %v2046_v32 = vadd.f32 %v2039_v48, %v431_v31 }
 0x7db   :  { %v1970_v22 = vpop.f32.mrf.mxu0  ;;  %v2041_v33 = vpop.f32.mrf.mxu1 }
 0x7dc   :  { %v2210_v23 = vmul.f32 -1.442695, %v2044_v21  ;;  %v2045_v47 = vadd.f32 %v1970_v22, %v4639_v28  ;;  %v2047_v29 = vadd.f32 %v2041_v33, %v433_v30 }
 0x7de   :  { %2373 = vpow2.f32 %v2210_v23  ;;  %v2211_v49 = vmul.f32 -1.442695, %v2045_v47  ;;  %v2212_v41 = vmul.f32 -1.442695, %v2047_v29 }
 0x7e0   :  { %2375 = vpow2.f32 %v2211_v49 }
 0x7e1   :  { %2377 = vtanh.f32 %v2046_v32 }
 0x7e2   :  { %2379 = vpow2.f32 %v2212_v41 }
 0x7eb   :  { %v2374_v50 = vpop.eup %2373 }
 0x7ec   :  { %v2051_v36 = vadd.f32 1.0, %v2374_v50 }
 0x7ed   :  { %v2376_v26 = vpop.eup %2375 }
 0x7ee   :  { %2381 = vrcp.f32 %v2051_v36  ;;  %v2057_v40 = vadd.f32 1.0, %v2376_v26  ;;  %v2378_v24 = vpop.eup %2377 }
 0x7ef   :  { %v2380_v63 = vpop.eup %2379 }
 0x7f0   :  { %2383 = vrcp.f32 %v2057_v40  ;;  %v2064_v10 = vadd.f32 1.0, %v2380_v63 }
 0x7f2   :  { %2385 = vrcp.f32 %v2064_v10 }
 0x7fb   :  { %v2382_v58 = vpop.eup %2381 }
 0x7fc   :  { %v2068_v62 = vmul.f32 %v2382_v58, %v2378_v24 }
 0x7fd   :  { %v2384_v11 = vpop.eup %2383 }
 0x7fe   :  { %v2067_v2 = vmul.f32 %v2384_v11, %v4235_v25 }
 0x7ff   :  { %v2386_v12 = vpop.eup %2385 }
 0x800   :  { %v2069_v14 = vadd.f32 %v2068_v62, %v2067_v2 }
 0x802   :  { %2387 = vtanh.f32 %v2069_v14 }
 0x80f   :  { %v2388_v37 = vpop.eup %2387 }
 0x810   :  { %v2071_v17 = vmul.f32 %v2388_v37, %v2386_v12 }
 0x812   :  { %2176 = vmatmul.mubr.f32.vlgmr.msra.gmra.mxu0 %v2071_v17 }
 0x8d2   :  { %v2246_v9 = vpop.f32.mrf.mxu0 }
 0x8d4   :  { %v2247_v59 = vpop.f32.mrf.mxu0 }
 0x8d5   :  { %v2248_v60 = vadd.f32 %v2247_v59, %v2246_v9 }
 0x8d7   :  { %v2178_v61 = vadd.f32 %v2248_v60, %v2213_v3 }
 0x8d9   :  { %2182 = vst.msk [vmem:[%s4356_s8] sm:$0xff] %vm2181_vm0, %v2178_v61 }
 0x8da   :  { %2187 = vsyncpa [#allocation4], 1 }

// kernel: lorenz_forward.2
= control target key start
LH: loop header
LB: loop body
LE: loop exit
PB: predicated region body
PF: predicated region fallthrough
CT: control target
= control target key end

     0   :  { %10 = vsyncpa [#allocation4], 0  ;;  %s6024_s0 = inlined_call_operand.vmem [shape: f32[64,3], index: 0, kind: input, shape index: {}]   ;;  %s6025_s1 = inlined_call_operand.hbm [shape: f32[3,1024], index: 1, kind: input, shape index: {}]   ;;  %s6026_s2 = inlined_call_operand.hbm [shape: f32[128,512], index: 2, kind: input, shape index: {}]   ;;  %s6027_s3 = inlined_call_operand.hbm [shape: f32[128,512], index: 3, kind: input, shape index: {}]   ;;  %s6028_s4 = inlined_call_operand.hbm [shape: f32[1,1024], index: 4, kind: input, shape index: {}]   ;;  %s6029_s5 = inlined_call_operand.vmem [shape: f32[64,256], index: 5, kind: output, shape index: {}]  }
   0x1   :  { %11 = vsyncpa [#allocation6], 0 }
   0x2   :  { %12 = vsyncpa [#allocation9], 0  ;;  %s4003_s18 = smov [#allocation5]  }
   0x3   :  { %s30_s19 = sshll.u32 %s4003_s18, 4  ;;  %s31_s19 = int_to_ptr.vmem [resolvable:$true] %s30_s19 }
   0x4   :  { %s3925_s20 = scalar_lea.vmem %s31_s19, 8192  ;;  %p3930_p1 = scmp.lt.s32.totalorder %s31_s19, %s31_s19 }
   0x5   :  { %p3926_p0 = scmp.ne.s32.totalorder %s31_s19, %s3925_s20  ;;  %p3931_p2 = scmp.lt.s32.totalorder %s3925_s20, %s3925_s20 }
   0x7   :  { %p3932_p3 = por %p3931_p2, %p3930_p1 }
   0x9   :  { %p3933_p4 = pnand %p3932_p3, %p3926_p0 }
   0xb   :  { %3936 = shalt.err (!%p3933_p4)
}
   0xc   :  { %s4004_s21 = smov 512   ;;  %s4005_s22 = smov 32  }
   0xd   :  { %36 = dma.hbm_to_vmem [thread:$0]  %s6026_s2, 8192, %s31_s19, [#allocation6], %s4004_s21, %s4004_s21, %s4005_s22  }
   0xe   :  { %s4006_s25 = smov [#allocation3]   ;;  %s4007_s27 = smov [#allocation7]  }
   0xf   :  { %s21_s26 = sshll.u32 %s4006_s25, 4  ;;  %s42_s28 = sshll.u32 %s4007_s27, 4  ;;  %s22_s26 = int_to_ptr.vmem [resolvable:$true] %s21_s26  ;;  %s43_s28 = int_to_ptr.vmem [resolvable:$true] %s42_s28 }
  0x10   :  { %s3945_s29 = scalar_lea.vmem %s22_s26, 512  ;;  %p3950_p6 = scmp.lt.s32.totalorder %s22_s26, %s22_s26 }
  0x11   :  { %p3946_p5 = scmp.ne.s32.totalorder %s22_s26, %s3945_s29  ;;  %p3951_p7 = scmp.lt.s32.totalorder %s3945_s29, %s3945_s29 }
  0x13   :  { %p3952_p8 = por %p3951_p7, %p3950_p6 }
  0x15   :  { %p3953_p9 = pnand %p3952_p8, %p3946_p5 }
  0x17   :  { %3956 = shalt.err (!%p3953_p9)
}
  0x18   :  { %24 = dma.hbm_to_vmem [thread:$0]  %s6025_s1, 512, %s22_s26, [#allocation4]  }
  0x19   :  { %s3965_s7 = scalar_lea.vmem %s43_s28, 8192  ;;  %p3970_p11 = scmp.lt.s32.totalorder %s43_s28, %s43_s28 }
  0x1a   :  { %p3966_p10 = scmp.ne.s32.totalorder %s43_s28, %s3965_s7  ;;  %p3971_p12 = scmp.lt.s32.totalorder %s3965_s7, %s3965_s7 }
  0x1c   :  { %p3972_p13 = por %p3971_p12, %p3970_p11 }
  0x1e   :  { %p3973_p0 = pnand %p3972_p13, %p3966_p10 }
  0x20   :  { %3976 = shalt.err (!%p3973_p0)
}
  0x21   :  { %48 = dma.hbm_to_vmem [thread:$0]  %s6027_s3, 8192, %s43_s28, [#allocation6], %s4004_s21, %s4004_s21, %s4005_s22  }
  0x22   :  { %s4008_s9 = smov [#allocation8]  }
  0x23   :  { %s55_s10 = sshll.u32 %s4008_s9, 4  ;;  %s56_s10 = int_to_ptr.vmem [resolvable:$true] %s55_s10 }
  0x24   :  { %s3985_s11 = scalar_lea.vmem %s56_s10, 128  ;;  %p3990_p2 = scmp.lt.s32.totalorder %s56_s10, %s56_s10 }
  0x25   :  { %p3986_p1 = scmp.ne.s32.totalorder %s56_s10, %s3985_s11  ;;  %p3991_p3 = scmp.lt.s32.totalorder %s3985_s11, %s3985_s11 }
  0x27   :  { %p3992_p4 = por %p3991_p3, %p3990_p2 }
  0x29   :  { %p3993_p5 = pnand %p3992_p4, %p3986_p1 }
  0x2b   :  { %3996 = shalt.err (!%p3993_p5)
}
  0x2c   :  { %58 = dma.hbm_to_vmem [thread:$0]  %s6028_s4, 128, %s56_s10, [#allocation9]  }
  0x2d   :  { %3997 = dma.done.wait [#allocation4], 512  }
  0x2e   :  { %3998 = vsyncadd [#allocation4], 4294966784 }
  0x2f   :  { %3999 = dma.done.wait [#allocation6], 16384  }
  0x30   :  { %4000 = vsyncadd [#allocation6], 4294950912 }
  0x31   :  { %4001 = dma.done.wait [#allocation9], 128  }
  0x32   :  { %4002 = vsyncadd [#allocation9], 4294967168  ;;  %v6030_v0 = vmov 0.0   ;;  %v79_v1 = vld [vmem:[#allocation3] sm:$0x77]  ;;  %vm158_vm0 = vcmask 1042432  }
  0x33   :  { %239 = vmatprep.mubr.f32.mxu0 %v6030_v0  ;;  %352 = vmatprep.mubr.f32.mxu1 %v6030_v0  ;;  %v81_v2 = vld [vmem:[#allocation3 + $0x10] sm:$0x77]  ;;  %v129_v3 = vcombine.high %v79_v1, %v79_v1  ;;  %v80_v5 = vld [vmem:[#allocation3 + $0x8] sm:$0x77]  ;;  %v71_v6 = vld [vmem:[%s6024_s0] sm:$0xff]  ;;  %vm133_vm1 = vcmask 23552  }
  0x34   :  { %v131_v4 = vcombine.high %v81_v2, %v81_v2  ;;  %v130_v7 = vcombine.high %v80_v5, %v80_v5  ;;  %v82_v8 = vld [vmem:[#allocation3 + $0x18] sm:$0x77]  ;;  %v72_v10 = vld [vmem:[%s6024_s0 + $0x8] sm:$0xff]  ;;  %v73_v11 = vld [vmem:[%s6024_s0 + $0x10] sm:$0xff] }
  0x35   :  { %3316 = vmatprep.subr.msk.mxu0 %vm158_vm0, %v129_v3  ;;  %v132_v9 = vcombine.high %v82_v8, %v82_v8  ;;  %v74_v12 = vld [vmem:[%s6024_s0 + $0x18] sm:$0xff]  ;;  %v75_v13 = vld [vmem:[%s6024_s0 + $0x20] sm:$0xff]  ;;  %v76_v14 = vld [vmem:[%s6024_s0 + $0x28] sm:$0xff] }
  0x36   :  { %3317 = vmatpush1.msk.msra.mxu0 %vm158_vm0, %v79_v1  ;;  %3326 = vmatprep.subr.msk.mxu1 %vm158_vm0, %v130_v7  ;;  %v77_v15 = vld [vmem:[%s6024_s0 + $0x30] sm:$0xff]  ;;  %v78_v16 = vld [vmem:[%s6024_s0 + $0x38] sm:$0xff]  ;;  %v4150_v17 = vld [vmem:[#allocation5 + $0x1e8] sm:$0xff] }
  0x37   :  { %3318 = vmatmul.mubr.msk.f32.vlgmr.msra.gmra.mxu0 %vm133_vm1, %v71_v6  ;;  %3336 = vmatprep.subr.msk.mxu0 %vm158_vm0, %v131_v4  ;;  %v4152_v18 = vld [vmem:[#allocation5 + $0x1f8] sm:$0xff]  ;;  %v4156_v19 = vld [vmem:[#allocation5 + $0x1e0] sm:$0xff]  ;;  %v4158_v20 = vld [vmem:[#allocation5 + $0x1f0] sm:$0xff] }
  0x38   :  { %3337 = vmatpush1.msk.msra.mxu0 %vm158_vm0, %v81_v2  ;;  %245 = vmatprep.mubr.f32.mxu0 %v6030_v0  ;;  %v4162_v21 = vld [vmem:[#allocation5 + $0x1c8] sm:$0xff]  ;;  %v4164_v22 = vld [vmem:[#allocation5 + $0x1d8] sm:$0xff]  ;;  %v4168_v23 = vld [vmem:[#allocation5 + $0x1c0] sm:$0xff] }
  0x39   :  { %3327 = vmatpush1.msk.msra.mxu1 %vm158_vm0, %v80_v5  ;;  %867 = vmatprep.subr.mxu0 %v4150_v17  ;;  %v4170_v24 = vld [vmem:[#allocation5 + $0x1d0] sm:$0xff]  ;;  %v4174_v25 = vld [vmem:[#allocation5 + $0x1a8] sm:$0xff]  ;;  %v4176_v26 = vld [vmem:[#allocation5 + $0x1b8] sm:$0xff] }
  0x3a   :  { %3328 = vmatmul.mubr.msk.f32.vlgmr.msra.gmra.mxu1 %vm133_vm1, %v71_v6  ;;  %3346 = vmatprep.subr.msk.mxu1 %vm158_vm0, %v132_v9  ;;  %v4180_v27 = vld [vmem:[#allocation5 + $0x1a0] sm:$0xff]  ;;  %v4182_v28 = vld [vmem:[#allocation5 + $0x1b0] sm:$0xff]  ;;  %v4186_v29 = vld [vmem:[#allocation5 + $0x188] sm:$0xff] }
  0x3b   :  { %3319 = vmatmul.mubr.msk.f32.gmra.mxu0 %vm133_vm1, %v72_v10  ;;  %3347 = vmatpush1.msk.msra.mxu1 %vm158_vm0, %v82_v8  ;;  %v4188_v30 = vld [vmem:[#allocation5 + $0x198] sm:$0xff]  ;;  %v4192_v31 = vld [vmem:[#allocation5 + $0x180] sm:$0xff]  ;;  %v4194_v32 = vld [vmem:[#allocation5 + $0x190] sm:$0xff] }
  0x3c   :  { %251 = vmatprep.mubr.f32.mxu0 %v6030_v0  ;;  %358 = vmatprep.mubr.f32.mxu1 %v6030_v0  ;;  %v4198_v33 = vld [vmem:[#allocation5 + $0x168] sm:$0xff]  ;;  %v4200_v34 = vld [vmem:[#allocation5 + $0x178] sm:$0xff]  ;;  %v4204_v35 = vld [vmem:[#allocation5 + $0x160] sm:$0xff] }
  0x3d   :  { %938 = vmatprep.subr.mxu1 %v4152_v18  ;;  %v4206_v36 = vld [vmem:[#allocation5 + $0x170] sm:$0xff]  ;;  %v4210_v37 = vld [vmem:[#allocation5 + $0x148] sm:$0xff]  ;;  %v4212_v38 = vld [vmem:[#allocation5 + $0x158] sm:$0xff] }
  0x3e   :  { %3329 = vmatmul.mubr.msk.f32.gmra.mxu1 %vm133_vm1, %v72_v10  ;;  %v4216_v39 = vld [vmem:[#allocation5 + $0x140] sm:$0xff]  ;;  %v4218_v40 = vld [vmem:[#allocation5 + $0x150] sm:$0xff]  ;;  %v4222_v41 = vld [vmem:[#allocation5 + $0x128] sm:$0xff] }
  0x3f   :  { %3320 = vmatmul.mubr.msk.f32.gmra.mxu0 %vm133_vm1, %v73_v11  ;;  %364 = vmatprep.mubr.f32.mxu1 %v6030_v0  ;;  %v4224_v42 = vld [vmem:[#allocation5 + $0x138] sm:$0xff]  ;;  %v4228_v43 = vld [vmem:[#allocation5 + $0x120] sm:$0xff]  ;;  %v4230_v44 = vld [vmem:[#allocation5 + $0x130] sm:$0xff] }
  0x40   :  { %257 = vmatprep.mubr.f32.mxu0 %v6030_v0  ;;  %v4234_v45 = vld [vmem:[#allocation5 + $0x108] sm:$0xff]  ;;  %v4236_v46 = vld [vmem:[#allocation5 + $0x118] sm:$0xff]  ;;  %v4240_v47 = vld [vmem:[#allocation5 + $0x100] sm:$0xff] }
  0x41   :  { %v4242_v48 = vld [vmem:[#allocation5 + $0x110] sm:$0xff]  ;;  %v4246_v49 = vld [vmem:[#allocation5 + $0xe8] sm:$0xff]  ;;  %v4248_v50 = vld [vmem:[#allocation5 + $0xf8] sm:$0xff] }
  0x42   :  { %3330 = vmatmul.mubr.msk.f32.gmra.mxu1 %vm133_vm1, %v73_v11  ;;  %v4252_v51 = vld [vmem:[#allocation5 + $0xe0] sm:$0xff]  ;;  %v4254_v52 = vld [vmem:[#allocation5 + $0xf0] sm:$0xff]  ;;  %v4258_v53 = vld [vmem:[#allocation5 + $0xc8] sm:$0xff] }
  0x43   :  { %3321 = vmatmul.mubr.msk.f32.gmra.mxu0 %vm133_vm1, %v74_v12  ;;  %370 = vmatprep.mubr.f32.mxu1 %v6030_v0  ;;  %v4260_v54 = vld [vmem:[#allocation5 + $0xd8] sm:$0xff]  ;;  %v4264_v55 = vld [vmem:[#allocation5 + $0xc0] sm:$0xff]  ;;  %v4266_v56 = vld [vmem:[#allocation5 + $0xd0] sm:$0xff] }
  0x44   :  { %263 = vmatprep.mubr.f32.mxu0 %v6030_v0  ;;  %v4270_v57 = vld [vmem:[#allocation5 + $0xa8] sm:$0xff]  ;;  %v4272_v58 = vld [vmem:[#allocation5 + $0xb8] sm:$0xff]  ;;  %v4276_v59 = vld [vmem:[#allocation5 + $0xa0] sm:$0xff] }
  0x45   :  { %v4278_v60 = vld [vmem:[#allocation5 + $0xb0] sm:$0xff]  ;;  %v4282_v61 = vld [vmem:[#allocation5 + $0x88] sm:$0xff]  ;;  %v4284_v62 = vld [vmem:[#allocation5 + $0x98] sm:$0xff] }
  0x46   :  { %3331 = vmatmul.mubr.msk.f32.gmra.mxu1 %vm133_vm1, %v74_v12  ;;  %6477 = vst [vmem:[#allocation13_spill] sm:$0xff] %v4278_v60  ;;  %6478 = vst [vmem:[#allocation14_spill] sm:$0xff] %v4282_v61  ;;  %v4288_v63 = vld [vmem:[#allocation5 + $0x80] sm:$0xff]  ;;  %v4290_v1 = vld [vmem:[#allocation5 + $0x90] sm:$0xff] }
  0x47   :  { %3322 = vmatmul.mubr.msk.f32.gmra.mxu0 %vm133_vm1, %v75_v13  ;;  %376 = vmatprep.mubr.f32.mxu1 %v6030_v0  ;;  %6479 = vst [vmem:[#allocation15_spill] sm:$0xff] %v4284_v62  ;;  %6480 = vst [vmem:[#allocation16_spill] sm:$0xff] %v4288_v63  ;;  %v4294_v2 = vld [vmem:[#allocation5 + $0x68] sm:$0xff]  ;;  %v4296_v3 = vld [vmem:[#allocation5 + $0x78] sm:$0xff] }
  0x48   :  { %269 = vmatprep.mubr.f32.mxu0 %v6030_v0  ;;  %6481 = vst [vmem:[#allocation17_spill] sm:$0xff] %v4290_v1  ;;  %6482 = vst [vmem:[#allocation18_spill] sm:$0xff] %v4294_v2  ;;  %v4300_v4 = vld [vmem:[#allocation5 + $0x60] sm:$0xff]  ;;  %v4302_v5 = vld [vmem:[#allocation5 + $0x70] sm:$0xff] }
  0x49   :  { %6483 = vst [vmem:[#allocation19_spill] sm:$0xff] %v4296_v3  ;;  %6484 = vst [vmem:[#allocation20_spill] sm:$0xff] %v4300_v4  ;;  %v4308_v7 = vld [vmem:[#allocation5 + $0x58] sm:$0xff]  ;;  %v4312_v8 = vld [vmem:[#allocation5 + $0x40] sm:$0xff] }
  0x4a   :  { %3332 = vmatmul.mubr.msk.f32.gmra.mxu1 %vm133_vm1, %v75_v13  ;;  %6485 = vst [vmem:[#allocation21_spill] sm:$0xff] %v4302_v5  ;;  %6487 = vst [vmem:[#allocation23_spill] sm:$0xff] %v4308_v7  ;;  %v4314_v9 = vld [vmem:[#allocation5 + $0x50] sm:$0xff] }
  0x4b   :  { %3323 = vmatmul.mubr.msk.f32.gmra.mxu0 %vm133_vm1, %v76_v14  ;;  %382 = vmatprep.mubr.f32.mxu1 %v6030_v0  ;;  %6488 = vst [vmem:[#allocation24_spill] sm:$0xff] %v4312_v8  ;;  %6489 = vst [vmem:[#allocation25_spill] sm:$0xff] %v4314_v9 }
  0x4c   :  { %275 = vmatprep.mubr.f32.mxu0 %v6030_v0 }
  0x4e   :  { %3333 = vmatmul.mubr.msk.f32.gmra.mxu1 %vm133_vm1, %v76_v14 }
  0x4f   :  { %3324 = vmatmul.mubr.msk.f32.gmra.mxu0 %vm133_vm1, %v77_v15  ;;  %388 = vmatprep.mubr.f32.mxu1 %v6030_v0 }
  0x50   :  { %281 = vmatprep.mubr.f32.mxu0 %v6030_v0 }
  0x52   :  { %3334 = vmatmul.mubr.msk.f32.gmra.mxu1 %vm133_vm1, %v77_v15 }
  0x53   :  { %3325 = vmatmul.mubr.msk.f32.gmra.mxu0 %vm133_vm1, %v78_v16  ;;  %394 = vmatprep.mubr.f32.mxu1 %v6030_v0 }
  0x54   :  { %465 = vmatprep.mubr.f32.mxu0 %v6030_v0 }
  0x56   :  { %3335 = vmatmul.mubr.msk.f32.gmra.mxu1 %vm133_vm1, %v78_v16 }
  0x57   :  { %3338 = vmatmul.mubr.msk.f32.vlgmr.msra.gmra.mxu0 %vm133_vm1, %v71_v6  ;;  %578 = vmatprep.mubr.f32.mxu1 %v6030_v0 }
  0x58   :  { %471 = vmatprep.mubr.f32.mxu0 %v6030_v0  ;;  %868 = vmatpush1.msra.mxu0 %v4156_v19 }
  0x59   :  { %869 = vmatprep.subr.mxu0 %v4162_v21 }
  0x5a   :  { %3348 = vmatmul.mubr.msk.f32.vlgmr.msra.gmra.mxu1 %vm133_vm1, %v71_v6  ;;  %870 = vmatpush1.msra.mxu0 %v4168_v23  ;;  %v4306_v6 = vld [vmem:[#allocation5 + $0x48] sm:$0xff] }
  0x5b   :  { %3339 = vmatmul.mubr.msk.f32.gmra.mxu0 %vm133_vm1, %v72_v10  ;;  %584 = vmatprep.mubr.f32.mxu1 %v6030_v0  ;;  %6486 = vst [vmem:[#allocation22_spill] sm:$0xff] %v4306_v6 }
  0x5c   :  { %477 = vmatprep.mubr.f32.mxu0 %v6030_v0  ;;  %939 = vmatpush1.msra.mxu1 %v4158_v20 }
  0x5d   :  { %940 = vmatprep.subr.mxu1 %v4164_v22  ;;  %871 = vmatprep.subr.mxu0 %v4174_v25 }
  0x5e   :  { %3349 = vmatmul.mubr.msk.f32.gmra.mxu1 %vm133_vm1, %v72_v10  ;;  %872 = vmatpush1.msra.mxu0 %v4180_v27  ;;  %v4318_v10 = vld [vmem:[#allocation5 + $0x28] sm:$0xff] }
  0x5f   :  { %3340 = vmatmul.mubr.msk.f32.gmra.mxu0 %vm133_vm1, %v73_v11  ;;  %590 = vmatprep.mubr.f32.mxu1 %v6030_v0  ;;  %6490 = vst [vmem:[#allocation26_spill] sm:$0xff] %v4318_v10 }
  0x60   :  { %483 = vmatprep.mubr.f32.mxu0 %v6030_v0  ;;  %941 = vmatpush1.msra.mxu1 %v4170_v24 }
  0x61   :  { %942 = vmatprep.subr.mxu1 %v4176_v26  ;;  %873 = vmatprep.subr.mxu0 %v4186_v29 }
  0x62   :  { %3350 = vmatmul.mubr.msk.f32.gmra.mxu1 %vm133_vm1, %v73_v11  ;;  %874 = vmatpush1.msra.mxu0 %v4192_v31  ;;  %v4320_v11 = vld [vmem:[#allocation5 + $0x38] sm:$0xff] }
  0x63   :  { %3341 = vmatmul.mubr.msk.f32.gmra.mxu0 %vm133_vm1, %v74_v12  ;;  %596 = vmatprep.mubr.f32.mxu1 %v6030_v0  ;;  %6491 = vst [vmem:[#allocation27_spill] sm:$0xff] %v4320_v11 }
  0x64   :  { %489 = vmatprep.mubr.f32.mxu0 %v6030_v0  ;;  %943 = vmatpush1.msra.mxu1 %v4182_v28 }
  0x65   :  { %944 = vmatprep.subr.mxu1 %v4188_v30  ;;  %875 = vmatprep.subr.mxu0 %v4198_v33 }
  0x66   :  { %3351 = vmatmul.mubr.msk.f32.gmra.mxu1 %vm133_vm1, %v74_v12  ;;  %876 = vmatpush1.msra.mxu0 %v4204_v35  ;;  %v4324_v12 = vld [vmem:[#allocation5 + $0x20] sm:$0xff] }
  0x67   :  { %3342 = vmatmul.mubr.msk.f32.gmra.mxu0 %vm133_vm1, %v75_v13  ;;  %602 = vmatprep.mubr.f32.mxu1 %v6030_v0  ;;  %6492 = vst [vmem:[#allocation28_spill] sm:$0xff] %v4324_v12 }
  0x68   :  { %495 = vmatprep.mubr.f32.mxu0 %v6030_v0  ;;  %945 = vmatpush1.msra.mxu1 %v4194_v32 }
  0x69   :  { %946 = vmatprep.subr.mxu1 %v4200_v34  ;;  %877 = vmatprep.subr.mxu0 %v4210_v37 }
  0x6a   :  { %3352 = vmatmul.mubr.msk.f32.gmra.mxu1 %vm133_vm1, %v75_v13  ;;  %878 = vmatpush1.msra.mxu0 %v4216_v39  ;;  %v4326_v13 = vld [vmem:[#allocation5 + $0x30] sm:$0xff] }
  0x6b   :  { %3343 = vmatmul.mubr.msk.f32.gmra.mxu0 %vm133_vm1, %v76_v14  ;;  %608 = vmatprep.mubr.f32.mxu1 %v6030_v0  ;;  %6493 = vst [vmem:[#allocation29_spill] sm:$0xff] %v4326_v13 }
  0x6c   :  { %501 = vmatprep.mubr.f32.mxu0 %v6030_v0  ;;  %947 = vmatpush1.msra.mxu1 %v4206_v36 }
  0x6d   :  { %948 = vmatprep.subr.mxu1 %v4212_v38  ;;  %879 = vmatprep.subr.mxu0 %v4222_v41 }
  0x6e   :  { %3353 = vmatmul.mubr.msk.f32.gmra.mxu1 %vm133_vm1, %v76_v14  ;;  %880 = vmatpush1.msra.mxu0 %v4228_v43  ;;  %v4330_v14 = vld [vmem:[#allocation5 + $0x8] sm:$0xff] }
  0x6f   :  { %3344 = vmatmul.mubr.msk.f32.gmra.mxu0 %vm133_vm1, %v77_v15  ;;  %614 = vmatprep.mubr.f32.mxu1 %v6030_v0  ;;  %6494 = vst [vmem:[#allocation30_spill] sm:$0xff] %v4330_v14 }
  0x70   :  { %507 = vmatprep.mubr.f32.mxu0 %v6030_v0  ;;  %949 = vmatpush1.msra.mxu1 %v4218_v40 }
  0x71   :  { %950 = vmatprep.subr.mxu1 %v4224_v42  ;;  %881 = vmatprep.subr.mxu0 %v4234_v45 }
  0x72   :  { %3354 = vmatmul.mubr.msk.f32.gmra.mxu1 %vm133_vm1, %v77_v15  ;;  %882 = vmatpush1.msra.mxu0 %v4240_v47  ;;  %v4332_v15 = vld [vmem:[#allocation5 + $0x18] sm:$0xff] }
  0x73   :  { %3345 = vmatmul.mubr.msk.f32.gmra.mxu0 %vm133_vm1, %v78_v16  ;;  %620 = vmatprep.mubr.f32.mxu1 %v6030_v0  ;;  %6495 = vst [vmem:[#allocation31_spill] sm:$0xff] %v4332_v15 }
  0x74   :  { %931 = vmatprep.mubr.f32.mxu0 %v6030_v0  ;;  %951 = vmatpush1.msra.mxu1 %v4230_v44 }
  0x75   :  { %952 = vmatprep.subr.mxu1 %v4236_v46  ;;  %883 = vmatprep.subr.mxu0 %v4246_v49 }
  0x76   :  { %3355 = vmatmul.mubr.msk.f32.gmra.mxu1 %vm133_vm1, %v78_v16  ;;  %884 = vmatpush1.msra.mxu0 %v4252_v51  ;;  %v4336_v16 = vld [vmem:[#allocation5] sm:$0xff] }
  0x77   :  { %1002 = vmatprep.mubr.f32.mxu1 %v6030_v0  ;;  %953 = vmatpush1.msra.mxu1 %v4242_v48  ;;  %6496 = vst [vmem:[#allocation32_spill] sm:$0xff] %v4336_v16  ;;  %v4338_v0 = vld [vmem:[#allocation5 + $0x10] sm:$0xff] }
  0x78   :  { %954 = vmatprep.subr.mxu1 %v4248_v50  ;;  %885 = vmatprep.subr.mxu0 %v4258_v53  ;;  %6497 = vst [vmem:[#allocation33_spill] sm:$0xff] %v4338_v0 }
  0x79   :  { %955 = vmatpush1.msra.mxu1 %v4254_v52  ;;  %886 = vmatpush1.msra.mxu0 %v4264_v55 }
  0x7a   :  { %956 = vmatprep.subr.mxu1 %v4260_v54  ;;  %887 = vmatprep.subr.mxu0 %v4270_v57 }
  0x7b   :  { %957 = vmatpush1.msra.mxu1 %v4266_v56  ;;  %888 = vmatpush1.msra.mxu0 %v4276_v59 }
  0x7c   :  { %958 = vmatprep.subr.mxu1 %v4272_v58  ;;  %889 = vmatprep.subr.mxu0 %v4282_v61 }
  0x7d   :  { %959 = vmatpush1.msra.mxu1 %v4278_v60  ;;  %890 = vmatpush1.msra.mxu0 %v4288_v63 }
  0x7e   :  { %960 = vmatprep.subr.mxu1 %v4284_v62  ;;  %891 = vmatprep.subr.mxu0 %v4294_v2 }
  0x7f   :  { %961 = vmatpush1.msra.mxu1 %v4290_v1  ;;  %892 = vmatpush1.msra.mxu0 %v4300_v4 }
  0x80   :  { %962 = vmatprep.subr.mxu1 %v4296_v3  ;;  %893 = vmatprep.subr.mxu0 %v4306_v6 }
  0x81   :  { %963 = vmatpush1.msra.mxu1 %v4302_v5  ;;  %894 = vmatpush1.msra.mxu0 %v4312_v8 }
  0x82   :  { %964 = vmatprep.subr.mxu1 %v4308_v7  ;;  %895 = vmatprep.subr.mxu0 %v4318_v10  ;;  %v4351_v10 = vld [vmem:[#allocation8] sm:$0xff] }
  0x83   :  { %965 = vmatpush1.msra.mxu1 %v4314_v9  ;;  %896 = vmatpush1.msra.mxu0 %v4324_v12  ;;  %v4344_v12 = vld [vmem:[#allocation7 + $0x1f8] sm:$0xff] }
  0x84   :  { %966 = vmatprep.subr.mxu1 %v4320_v11  ;;  %897 = vmatprep.subr.mxu0 %v4330_v14  ;;  %v4342_v11 = vld [vmem:[#allocation7 + $0x1e8] sm:$0xff]  ;;  %6499 = vst [vmem:[#allocation35_spill] sm:$0xff] %v4344_v12 }
  0x85   :  { %967 = vmatpush1.msra.mxu1 %v4326_v13  ;;  %898 = vmatpush1.msra.mxu0 %v4336_v16  ;;  %6498 = vst [vmem:[#allocation34_spill] sm:$0xff] %v4342_v11  ;;  %v85_v13 = vlaneseq }
  0x86   :  { %968 = vmatprep.subr.mxu1 %v4332_v15  ;;  %1037 = vmatprep.subr.mxu0 %v4342_v11 }
  0x87   :  { %969 = vmatpush1.msra.mxu1 %v4338_v0  ;;  %v4348_v14 = vshrl.u32 %v85_v13, 7 }
  0x88   :  { %1108 = vmatprep.subr.mxu1 %v4344_v12 }
  0x89   :  { %v87_v15 = vsub.s32 0, %v4348_v14  ;;  %v99_v0 = vsub.s32 3, %v4348_v14  ;;  %v95_v11 = vsub.s32 2, %v4348_v14 }
  0x8b   :  { %v4354_v9 = vrot.slane %v4351_v10, %v87_v15  ;;  %v4360_v13 = vrot.slane %v4351_v10, %v99_v0  ;;  %v91_v15 = vsub.s32 1, %v4348_v14 }
  0x8d   :  { %v4376_v0 = vrot.slane %v4351_v10, %v91_v15 }
  0xf7   :  { %v241_v16 = vpop.f32.mrf.mxu0 }
  0xf8   :  { %v242_v8 = vadd.f32 %v241_v16, %v4354_v9  ;;  %v4369_v16 = vrot.slane %v4351_v10, %v95_v11 }
  0xf9   :  { %v243_v7 = vpop.f32.mrf.mxu0 }
  0xfa   :  { %v3356_v6 = vmul.f32 -1.442695, %v242_v8  ;;  %v354_v12 = vpop.f32.mrf.mxu1 }
  0xfb   :  { %v247_v5 = vpop.f32.mrf.mxu0 }
  0xfc   :  { %3413 = vpow2.f32 %v3356_v6  ;;  %v4363_v4 = vadd.f32 %v247_v5, %v4354_v9  ;;  %v356_v3 = vpop.f32.mrf.mxu1 }
  0xfd   :  { %v4366_v2 = vpop.f32.mrf.mxu0  ;;  %v357_v8 = vadd.f32 %v356_v3, %v4360_v13 }
  0xfe   :  { %6500 = vst [vmem:[#allocation36_spill] sm:$0xff] %v4363_v4  ;;  %6501 = vst [vmem:[#allocation37_spill] sm:$0xff] %v4366_v2  ;;  %v360_v7 = vpop.f32.mrf.mxu1 }
  0xff   :  { %v253_v1 = vpop.f32.mrf.mxu0  ;;  %v4373_v63 = vadd.f32 %v360_v7, %v4369_v16  ;;  %v3357_v3 = vmul.f32 -1.442695, %v357_v8 }
 0x100   :  { %v4379_v5 = vadd.f32 %v253_v1, %v4354_v9  ;;  %v362_v6 = vpop.f32.mrf.mxu1 }
 0x101   :  { %6502 = vst [vmem:[#allocation38_spill] sm:$0xff] %v4373_v63  ;;  %v255_v4 = vpop.f32.mrf.mxu0  ;;  %v4382_v2 = vadd.f32 %v362_v6, %v4360_v13  ;;  %3415 = vpow2.f32 %v3357_v3 }
 0x102   :  { %6503 = vst [vmem:[#allocation39_spill] sm:$0xff] %v4379_v5  ;;  %v4385_v11 = vadd.f32 %v255_v4, %v4376_v0  ;;  %v366_v62 = vpop.f32.mrf.mxu1  ;;  %v355_v4 = vadd.f32 %v354_v12, %v4369_v16 }
 0x103   :  { %6504 = vst [vmem:[#allocation40_spill] sm:$0xff] %v4382_v2  ;;  %v259_v61 = vpop.f32.mrf.mxu0  ;;  %v4388_v7 = vadd.f32 %v366_v62, %v4369_v16 }
 0x104   :  { %6505 = vst [vmem:[#allocation41_spill] sm:$0xff] %v4385_v11  ;;  %v4391_v15 = vadd.f32 %v259_v61, %v4354_v9  ;;  %v368_v63 = vpop.f32.mrf.mxu1  ;;  %3417 = vtanh.f32 %v355_v4 }
 0x105   :  { %6506 = vst [vmem:[#allocation42_spill] sm:$0xff] %v4388_v7  ;;  %v261_v1 = vpop.f32.mrf.mxu0  ;;  %v4394_v5 = vadd.f32 %v368_v63, %v4360_v13 }
 0x106   :  { %6507 = vst [vmem:[#allocation43_spill] sm:$0xff] %v4391_v15  ;;  %v4397_v6 = vadd.f32 %v261_v1, %v4376_v0  ;;  %v372_v2 = vpop.f32.mrf.mxu1 }
 0x107   :  { %6508 = vst [vmem:[#allocation44_spill] sm:$0xff] %v4394_v5  ;;  %v265_v11 = vpop.f32.mrf.mxu0  ;;  %v4401_v8 = vadd.f32 %v372_v2, %v4369_v16 }
 0x108   :  { %6509 = vst [vmem:[#allocation45_spill] sm:$0xff] %v4397_v6  ;;  %v4404_v62 = vadd.f32 %v265_v11, %v4354_v9  ;;  %v374_v61 = vpop.f32.mrf.mxu1 }
 0x109   :  { %6510 = vst [vmem:[#allocation46_spill] sm:$0xff] %v4401_v8  ;;  %v3414_v15 = vpop.eup %3413  ;;  %v267_v7 = vpop.f32.mrf.mxu0  ;;  %v4407_v63 = vadd.f32 %v374_v61, %v4360_v13 }
 0x10a   :  { %6511 = vst [vmem:[#allocation47_spill] sm:$0xff] %v4404_v62  ;;  %v828_v5 = vadd.f32 1.0, %v3414_v15  ;;  %v4410_v1 = vadd.f32 %v267_v7, %v4376_v0  ;;  %v378_v6 = vpop.f32.mrf.mxu1 }
 0x10b   :  { %6512 = vst [vmem:[#allocation48_spill] sm:$0xff] %v4407_v63  ;;  %v271_v12 = vpop.f32.mrf.mxu0  ;;  %v4413_v3 = vadd.f32 %v378_v6, %v4369_v16 }
 0x10c   :  { %6513 = vst [vmem:[#allocation49_spill] sm:$0xff] %v4410_v1  ;;  %3419 = vrcp.f32 %v828_v5  ;;  %v4416_v2 = vadd.f32 %v271_v12, %v4354_v9  ;;  %v380_v11 = vpop.f32.mrf.mxu1  ;;  %v103_v5 = vsub.s32 4, %v4348_v14 }
 0x10d   :  { %6514 = vst [vmem:[#allocation50_spill] sm:$0xff] %v4413_v3  ;;  %v273_v62 = vpop.f32.mrf.mxu0  ;;  %v4419_v8 = vadd.f32 %v380_v11, %v4360_v13 }
 0x10e   :  { %6515 = vst [vmem:[#allocation51_spill] sm:$0xff] %v4416_v2  ;;  %v4422_v15 = vadd.f32 %v273_v62, %v4376_v0  ;;  %v384_v7 = vpop.f32.mrf.mxu1  ;;  %v107_v62 = vsub.s32 5, %v4348_v14  ;;  %v4446_v1 = vrot.slane %v4351_v10, %v103_v5 }
 0x10f   :  { %6516 = vst [vmem:[#allocation52_spill] sm:$0xff] %v4419_v8  ;;  %v277_v61 = vpop.f32.mrf.mxu0  ;;  %v4425_v4 = vadd.f32 %v384_v7, %v4369_v16 }
 0x110   :  { %6517 = vst [vmem:[#allocation53_spill] sm:$0xff] %v4422_v15  ;;  %v4428_v6 = vadd.f32 %v277_v61, %v4354_v9  ;;  %v386_v12 = vpop.f32.mrf.mxu1  ;;  %v111_v61 = vsub.s32 6, %v4348_v14 }
 0x111   :  { %6518 = vst [vmem:[#allocation54_spill] sm:$0xff] %v4425_v4  ;;  %v279_v2 = vpop.f32.mrf.mxu0  ;;  %v4432_v3 = vadd.f32 %v386_v12, %v4360_v13 }
 0x112   :  { %6519 = vst [vmem:[#allocation55_spill] sm:$0xff] %v4428_v6  ;;  %v4435_v11 = vadd.f32 %v279_v2, %v4376_v0  ;;  %v390_v15 = vpop.f32.mrf.mxu1  ;;  %v3416_v6 = vpop.eup %3415  ;;  %v4462_v5 = vrot.slane %v4351_v10, %v111_v61 }
 0x113   :  { %6520 = vst [vmem:[#allocation56_spill] sm:$0xff] %v4432_v3  ;;  %v283_v8 = vpop.f32.mrf.mxu0  ;;  %v4439_v7 = vadd.f32 %v390_v15, %v4369_v16  ;;  %v4456_v15 = vrot.slane %v4351_v10, %v107_v62  ;;  %v835_v60 = vadd.f32 1.0, %v3416_v6 }
 0x114   :  { %6521 = vst [vmem:[#allocation57_spill] sm:$0xff] %v4435_v11  ;;  %v4443_v4 = vadd.f32 %v283_v8, %v4354_v9  ;;  %v392_v12 = vpop.f32.mrf.mxu1  ;;  %v115_v11 = vsub.s32 7, %v4348_v14 }
 0x115   :  { %6522 = vst [vmem:[#allocation58_spill] sm:$0xff] %v4439_v7  ;;  %v285_v3 = vpop.f32.mrf.mxu0  ;;  %v4449_v2 = vadd.f32 %v392_v12, %v4360_v13  ;;  %6526 = vst [vmem:[#allocation62_spill] sm:$0xff] %v4456_v15  ;;  %3421 = vrcp.f32 %v835_v60 }
 0x116   :  { %6523 = vst [vmem:[#allocation59_spill] sm:$0xff] %v4443_v4  ;;  %v4453_v63 = vadd.f32 %v285_v3, %v4376_v0  ;;  %v396_v7 = vpop.f32.mrf.mxu1  ;;  %v3418_v4 = vpop.eup %3417  ;;  %v4471_v62 = vrot.slane %v4351_v10, %v115_v11 }
 0x117   :  { %6524 = vst [vmem:[#allocation60_spill] sm:$0xff] %v4449_v2  ;;  %v467_v9 = vpop.f32.mrf.mxu0  ;;  %v4459_v8 = vadd.f32 %v396_v7, %v4369_v16 }
 0x118   :  { %6525 = vst [vmem:[#allocation61_spill] sm:$0xff] %v4453_v63  ;;  %v4465_v12 = vadd.f32 %v467_v9, %v4446_v1  ;;  %v398_v14 = vpop.f32.mrf.mxu1 }
 0x119   :  { %6527 = vst [vmem:[#allocation63_spill] sm:$0xff] %v4459_v8  ;;  %v3420_v2 = vpop.eup %3419  ;;  %v469_v3 = vpop.f32.mrf.mxu0  ;;  %v4468_v63 = vadd.f32 %v398_v14, %v4360_v13 }
 0x11a   :  { %6528 = vst [vmem:[#allocation64_spill] sm:$0xff] %v4465_v12  ;;  %v4473_v6 = vmul.f32 %v3420_v2, %v3418_v4  ;;  %v4476_v16 = vadd.f32 %v469_v3, %v4456_v15  ;;  %v580_v7 = vpop.f32.mrf.mxu1 }
 0x11b   :  { %6529 = vst [vmem:[#allocation65_spill] sm:$0xff] %v4468_v63  ;;  %v473_v61 = vpop.f32.mrf.mxu0  ;;  %v4479_v9 = vadd.f32 %v580_v7, %v4462_v5 }
 0x11c   :  { %6530 = vst [vmem:[#allocation66_spill] sm:$0xff] %v4476_v16  ;;  %3423 = vtanh.f32 %v4473_v6  ;;  %v4483_v12 = vadd.f32 %v473_v61, %v4446_v1  ;;  %v582_v13 = vpop.f32.mrf.mxu1 }
 0x11d   :  { %6531 = vst [vmem:[#allocation67_spill] sm:$0xff] %v4479_v9  ;;  %v475_v14 = vpop.f32.mrf.mxu0  ;;  %v4486_v10 = vadd.f32 %v582_v13, %v4471_v62 }
 0x11e   :  { %6532 = vst [vmem:[#allocation68_spill] sm:$0xff] %v4483_v12  ;;  %v4489_v4 = vadd.f32 %v475_v14, %v4456_v15  ;;  %v586_v11 = vpop.f32.mrf.mxu1 }
 0x11f   :  { %6533 = vst [vmem:[#allocation69_spill] sm:$0xff] %v4486_v10  ;;  %v479_v2 = vpop.f32.mrf.mxu0  ;;  %v4492_v60 = vadd.f32 %v586_v11, %v4462_v5 }
 0x120   :  { %6534 = vst [vmem:[#allocation70_spill] sm:$0xff] %v4489_v4  ;;  %v4495_v3 = vadd.f32 %v479_v2, %v4446_v1  ;;  %v588_v7 = vpop.f32.mrf.mxu1 }
 0x121   :  { %6535 = vst [vmem:[#allocation71_spill] sm:$0xff] %v4492_v60  ;;  %v481_v9 = vpop.f32.mrf.mxu0  ;;  %v4498_v61 = vadd.f32 %v588_v7, %v4471_v62 }
 0x122   :  { %6536 = vst [vmem:[#allocation72_spill] sm:$0xff] %v4495_v3  ;;  %v4501_v16 = vadd.f32 %v481_v9, %v4456_v15  ;;  %v592_v13 = vpop.f32.mrf.mxu1  ;;  %v3422_v4 = vpop.eup %3421  ;;  %v4527_v3 = vld [vmem:[#allocation7 + $0x1e0] sm:$0xff] }
 0x123   :  { %6537 = vst [vmem:[#allocation73_spill] sm:$0xff] %v4498_v61  ;;  %v485_v10 = vpop.f32.mrf.mxu0  ;;  %v4504_v14 = vadd.f32 %v592_v13, %v4462_v5 }
 0x124   :  { %6538 = vst [vmem:[#allocation74_spill] sm:$0xff] %v4501_v16  ;;  %v4507_v8 = vadd.f32 %v485_v10, %v4446_v1  ;;  %v594_v11 = vpop.f32.mrf.mxu1 }
 0x125   :  { %6539 = vst [vmem:[#allocation75_spill] sm:$0xff] %v4504_v14  ;;  %v487_v63 = vpop.f32.mrf.mxu0  ;;  %v4510_v2 = vadd.f32 %v594_v11, %v4471_v62 }
 0x126   :  { %6540 = vst [vmem:[#allocation76_spill] sm:$0xff] %v4507_v8  ;;  %v4513_v60 = vadd.f32 %v487_v63, %v4456_v15  ;;  %v598_v7 = vpop.f32.mrf.mxu1  ;;  %v4536_v8 = vld [vmem:[#allocation7 + $0x1d8] sm:$0xff] }
 0x127   :  { %6541 = vst [vmem:[#allocation77_spill] sm:$0xff] %v4510_v2  ;;  %v491_v61 = vpop.f32.mrf.mxu0  ;;  %v4516_v9 = vadd.f32 %v598_v7, %v4462_v5  ;;  %6550 = vst [vmem:[#allocation86_spill] sm:$0xff] %v4536_v8 }
 0x128   :  { %6542 = vst [vmem:[#allocation78_spill] sm:$0xff] %v4513_v60  ;;  %v4519_v13 = vadd.f32 %v491_v61, %v4446_v1  ;;  %v600_v12 = vpop.f32.mrf.mxu1  ;;  %v4529_v60 = vld [vmem:[#allocation7 + $0x1f0] sm:$0xff]  ;;  %v4534_v61 = vld [vmem:[#allocation7 + $0x1c8] sm:$0xff] }
 0x129   :  { %6543 = vst [vmem:[#allocation79_spill] sm:$0xff] %v4516_v9  ;;  %v3424_v10 = vpop.eup %3423  ;;  %v493_v14 = vpop.f32.mrf.mxu0  ;;  %v4522_v16 = vadd.f32 %v600_v12, %v4471_v62  ;;  %6547 = vst [vmem:[#allocation83_spill] sm:$0xff] %v4529_v60 }
 0x12a   :  { %6544 = vst [vmem:[#allocation80_spill] sm:$0xff] %v4519_v13  ;;  %v4525_v11 = vadd.f32 %v493_v14, %v4456_v15  ;;  %v840_v63 = vmul.f32 %v3424_v10, %v3422_v4  ;;  %v604_v2 = vpop.f32.mrf.mxu1  ;;  %6549 = vst [vmem:[#allocation85_spill] sm:$0xff] %v4534_v61  ;;  %v4544_v14 = vld [vmem:[#allocation7 + $0x1c0] sm:$0xff]  ;;  %v4546_v10 = vld [vmem:[#allocation7 + $0x1d0] sm:$0xff] }
 0x12b   :  { %6545 = vst [vmem:[#allocation81_spill] sm:$0xff] %v4522_v16  ;;  %v497_v7 = vpop.f32.mrf.mxu0  ;;  %v4532_v9 = vadd.f32 %v604_v2, %v4462_v5  ;;  %6552 = vst [vmem:[#allocation88_spill] sm:$0xff] %v4544_v14  ;;  %v4562_v13 = vld [vmem:[#allocation7 + $0x1a0] sm:$0xff] }
 0x12c   :  { %6546 = vst [vmem:[#allocation82_spill] sm:$0xff] %v4525_v11  ;;  %v4539_v12 = vadd.f32 %v497_v7, %v4446_v1  ;;  %857 = vst [vmem:[%s6029_s5] sm:$0xff] %v840_v63  ;;  %932 = vmatmul.mubr.f32.vlgmr.msra.gmra.mxu0 %v840_v63  ;;  %1003 = vmatmul.mubr.f32.vlgmr.msra.gmra.mxu1 %v840_v63  ;;  %v606_v4 = vpop.f32.mrf.mxu1  ;;  %v4553_v7 = vld [vmem:[#allocation7 + $0x1a8] sm:$0xff] }
 0x12d   :  { %6548 = vst [vmem:[#allocation84_spill] sm:$0xff] %v4532_v9  ;;  %6553 = vst [vmem:[#allocation89_spill] sm:$0xff] %v4546_v10  ;;  %v499_v2 = vpop.f32.mrf.mxu0  ;;  %v4549_v16 = vadd.f32 %v606_v4, %v4471_v62  ;;  %1038 = vmatpush1.msra.mxu0 %v4527_v3  ;;  %1109 = vmatpush1.msra.mxu1 %v4529_v60  ;;  %v4555_v9 = vld [vmem:[#allocation7 + $0x1b8] sm:$0xff]  ;;  %v4564_v4 = vld [vmem:[#allocation7 + $0x1b0] sm:$0xff] }
 0x12e   :  { %6551 = vst [vmem:[#allocation87_spill] sm:$0xff] %v4539_v12  ;;  %6555 = vst [vmem:[#allocation91_spill] sm:$0xff] %v4553_v7  ;;  %v4558_v11 = vadd.f32 %v499_v2, %v4456_v15  ;;  %v610_v63 = vpop.f32.mrf.mxu1  ;;  %1039 = vmatprep.subr.mxu0 %v4534_v61  ;;  %1110 = vmatprep.subr.mxu1 %v4536_v8  ;;  %v4571_v60 = vld [vmem:[#allocation7 + $0x188] sm:$0xff]  ;;  %v4573_v2 = vld [vmem:[#allocation7 + $0x198] sm:$0xff] }
 0x12f   :  { %6554 = vst [vmem:[#allocation90_spill] sm:$0xff] %v4549_v16  ;;  %6556 = vst [vmem:[#allocation92_spill] sm:$0xff] %v4555_v9  ;;  %v503_v16 = vpop.f32.mrf.mxu0  ;;  %v4567_v12 = vadd.f32 %v610_v63, %v4462_v5  ;;  %1040 = vmatpush1.msra.mxu0 %v4544_v14  ;;  %1111 = vmatpush1.msra.mxu1 %v4546_v10  ;;  %v4580_v8 = vld [vmem:[#allocation7 + $0x180] sm:$0xff]  ;;  %v4582_v63 = vld [vmem:[#allocation7 + $0x190] sm:$0xff] }
 0x130   :  { %6557 = vst [vmem:[#allocation93_spill] sm:$0xff] %v4558_v11  ;;  %6558 = vst [vmem:[#allocation94_spill] sm:$0xff] %v4562_v13  ;;  %v4576_v11 = vadd.f32 %v503_v16, %v4446_v1  ;;  %v612_v15 = vpop.f32.mrf.mxu1  ;;  %1041 = vmatprep.subr.mxu0 %v4553_v7  ;;  %1112 = vmatprep.subr.mxu1 %v4555_v9  ;;  %v4591_v16 = vld [vmem:[#allocation7 + $0x168] sm:$0xff]  ;;  %v4597_v9 = vld [vmem:[#allocation7 + $0x160] sm:$0xff] }
 0x131   :  { %6559 = vst [vmem:[#allocation95_spill] sm:$0xff] %v4564_v4  ;;  %6560 = vst [vmem:[#allocation96_spill] sm:$0xff] %v4567_v12  ;;  %v4584_v12 = vpop.f32.mrf.mxu0  ;;  %v4587_v10 = vadd.f32 %v612_v15, %v4471_v62  ;;  %1042 = vmatpush1.msra.mxu0 %v4562_v13  ;;  %1113 = vmatpush1.msra.mxu1 %v4564_v4  ;;  %v4599_v14 = vld [vmem:[#allocation7 + $0x170] sm:$0xff]  ;;  %v4608_v4 = vld [vmem:[#allocation7 + $0x158] sm:$0xff] }
 0x132   :  { %6561 = vst [vmem:[#allocation97_spill] sm:$0xff] %v4571_v60  ;;  %6562 = vst [vmem:[#allocation98_spill] sm:$0xff] %v4573_v2  ;;  %v616_v7 = vpop.f32.mrf.mxu1  ;;  %1043 = vmatprep.subr.mxu0 %v4571_v60  ;;  %1114 = vmatprep.subr.mxu1 %v4573_v2  ;;  %v4613_v2 = vld [vmem:[#allocation7 + $0x140] sm:$0xff]  ;;  %v4615_v61 = vld [vmem:[#allocation7 + $0x150] sm:$0xff] }
 0x133   :  { %6563 = vst [vmem:[#allocation99_spill] sm:$0xff] %v4576_v11  ;;  %6564 = vst [vmem:[#allocation100_spill] sm:$0xff] %v4582_v63  ;;  %v4593_v11 = vld [vmem:[#allocation7 + $0x178] sm:$0xff]  ;;  %v4602_v15 = vadd.f32 %v616_v7, %v4462_v5  ;;  %1044 = vmatpush1.msra.mxu0 %v4580_v8  ;;  %1115 = vmatpush1.msra.mxu1 %v4582_v63  ;;  %v4622_v63 = vld [vmem:[#allocation7 + $0x128] sm:$0xff] }
 0x134   :  { %6565 = vst [vmem:[#allocation101_spill] sm:$0xff] %v4584_v12  ;;  %6566 = vst [vmem:[#allocation102_spill] sm:$0xff] %v4587_v10  ;;  %v509_v12 = vpop.f32.mrf.mxu0  ;;  %v4606_v10 = vld [vmem:[#allocation7 + $0x148] sm:$0xff]  ;;  %v618_v13 = vpop.f32.mrf.mxu1  ;;  %1045 = vmatprep.subr.mxu0 %v4591_v16  ;;  %1116 = vmatprep.subr.mxu1 %v4593_v11 }
 0x135   :  { %6567 = vst [vmem:[#allocation103_spill] sm:$0xff] %v4591_v16  ;;  %6568 = vst [vmem:[#allocation104_spill] sm:$0xff] %v4593_v11  ;;  %v510_v60 = vadd.f32 %v509_v12, %v4446_v1  ;;  %1046 = vmatpush1.msra.mxu0 %v4597_v9  ;;  %1117 = vmatpush1.msra.mxu1 %v4599_v14  ;;  %v4624_v1 = vld [vmem:[#allocation7 + $0x138] sm:$0xff]  ;;  %v4628_v11 = vld [vmem:[#allocation7 + $0x120] sm:$0xff] }
 0x136   :  { %6569 = vst [vmem:[#allocation105_spill] sm:$0xff] %v4599_v14  ;;  %6570 = vst [vmem:[#allocation106_spill] sm:$0xff] %v4602_v15  ;;  %v511_v7 = vpop.f32.mrf.mxu0  ;;  %v4618_v15 = vadd.f32 %v618_v13, %v4471_v62  ;;  %v622_v16 = vpop.f32.mrf.mxu1  ;;  %1047 = vmatprep.subr.mxu0 %v4606_v10  ;;  %1118 = vmatprep.subr.mxu1 %v4608_v4  ;;  %v4634_v13 = vld [vmem:[#allocation7 + $0x108] sm:$0xff] }
 0x137   :  { %6571 = vst [vmem:[#allocation107_spill] sm:$0xff] %v4608_v4  ;;  %6572 = vst [vmem:[#allocation108_spill] sm:$0xff] %v4613_v2  ;;  %v3358_v12 = vmul.f32 -1.442695, %v510_v60  ;;  %v4630_v7 = vld [vmem:[#allocation7 + $0x130] sm:$0xff]  ;;  %1048 = vmatpush1.msra.mxu0 %v4613_v2  ;;  %1119 = vmatpush1.msra.mxu1 %v4615_v61  ;;  %v4640_v60 = vld [vmem:[#allocation7 + $0x100] sm:$0xff] }
 0x138   :  { %6573 = vst [vmem:[#allocation109_spill] sm:$0xff] %v4615_v61  ;;  %6574 = vst [vmem:[#allocation110_spill] sm:$0xff] %v4618_v15  ;;  %v4636_v15 = vld [vmem:[#allocation7 + $0x118] sm:$0xff]  ;;  %v624_v14 = vpop.f32.mrf.mxu1  ;;  %1049 = vmatprep.subr.mxu0 %v4622_v63  ;;  %1120 = vmatprep.subr.mxu1 %v4624_v1  ;;  %v4642_v4 = vld [vmem:[#allocation7 + $0x110] sm:$0xff] }
 0x139   :  { %6575 = vst [vmem:[#allocation111_spill] sm:$0xff] %v4622_v63  ;;  %6576 = vst [vmem:[#allocation112_spill] sm:$0xff] %v4624_v1  ;;  %3425 = vpow2.f32 %v3358_v12  ;;  %1050 = vmatpush1.msra.mxu0 %v4628_v11  ;;  %1121 = vmatpush1.msra.mxu1 %v4630_v7  ;;  %v4646_v2 = vld [vmem:[#allocation7 + $0xe8] sm:$0xff]  ;;  %v4648_v61 = vld [vmem:[#allocation7 + $0xf8] sm:$0xff]  ;;  %v625_v1 = vadd.f32 %v624_v14, %v4471_v62 }
 0x13a   :  { %6577 = vst [vmem:[#allocation113_spill] sm:$0xff] %v4628_v11  ;;  %6578 = vst [vmem:[#allocation114_spill] sm:$0xff] %v4630_v7  ;;  %1051 = vmatprep.subr.mxu0 %v4634_v13  ;;  %1122 = vmatprep.subr.mxu1 %v4636_v15  ;;  %v4652_v12 = vld [vmem:[#allocation7 + $0xe0] sm:$0xff]  ;;  %v4654_v63 = vld [vmem:[#allocation7 + $0xf0] sm:$0xff] }
 0x13b   :  { %6579 = vst [vmem:[#allocation115_spill] sm:$0xff] %v4634_v13  ;;  %6580 = vst [vmem:[#allocation116_spill] sm:$0xff] %v4636_v15  ;;  %1052 = vmatpush1.msra.mxu0 %v4640_v60  ;;  %1123 = vmatpush1.msra.mxu1 %v4642_v4  ;;  %v4659_v11 = vld [vmem:[#allocation7 + $0xc8] sm:$0xff]  ;;  %v4661_v7 = vld [vmem:[#allocation7 + $0xd8] sm:$0xff] }
 0x13c   :  { %6581 = vst [vmem:[#allocation117_spill] sm:$0xff] %v4640_v60  ;;  %6582 = vst [vmem:[#allocation118_spill] sm:$0xff] %v4642_v4  ;;  %1053 = vmatprep.subr.mxu0 %v4646_v2  ;;  %1124 = vmatprep.subr.mxu1 %v4648_v61  ;;  %v4665_v13 = vld [vmem:[#allocation7 + $0xc0] sm:$0xff]  ;;  %v4667_v15 = vld [vmem:[#allocation7 + $0xd0] sm:$0xff] }
 0x13d   :  { %6583 = vst [vmem:[#allocation119_spill] sm:$0xff] %v4646_v2  ;;  %6584 = vst [vmem:[#allocation120_spill] sm:$0xff] %v4648_v61  ;;  %1054 = vmatpush1.msra.mxu0 %v4652_v12  ;;  %1125 = vmatpush1.msra.mxu1 %v4654_v63  ;;  %v4671_v62 = vld [vmem:[#allocation7 + $0xa8] sm:$0xff]  ;;  %v4673_v14 = vld [vmem:[#allocation7 + $0xb8] sm:$0xff]  ;;  %v3359_v61 = vmul.f32 -1.442695, %v625_v1 }
 0x13e   :  { %6585 = vst [vmem:[#allocation121_spill] sm:$0xff] %v4652_v12  ;;  %6586 = vst [vmem:[#allocation122_spill] sm:$0xff] %v4654_v63  ;;  %1055 = vmatprep.subr.mxu0 %v4659_v11  ;;  %1126 = vmatprep.subr.mxu1 %v4661_v7  ;;  %v4677_v4 = vld [vmem:[#allocation7 + $0xa0] sm:$0xff]  ;;  %v4679_v2 = vld [vmem:[#allocation7 + $0xb0] sm:$0xff] }
 0x13f   :  { %6587 = vst [vmem:[#allocation123_spill] sm:$0xff] %v4659_v11  ;;  %6588 = vst [vmem:[#allocation124_spill] sm:$0xff] %v4661_v7  ;;  %1056 = vmatpush1.msra.mxu0 %v4665_v13  ;;  %1127 = vmatpush1.msra.mxu1 %v4667_v15  ;;  %v4683_v12 = vld [vmem:[#allocation7 + $0x88] sm:$0xff]  ;;  %v4685_v63 = vld [vmem:[#allocation7 + $0x98] sm:$0xff]  ;;  %3427 = vpow2.f32 %v3359_v61 }
 0x140   :  { %6589 = vst [vmem:[#allocation125_spill] sm:$0xff] %v4665_v13  ;;  %6590 = vst [vmem:[#allocation126_spill] sm:$0xff] %v4667_v15  ;;  %1057 = vmatprep.subr.mxu0 %v4671_v62  ;;  %1128 = vmatprep.subr.mxu1 %v4673_v14  ;;  %v4689_v11 = vld [vmem:[#allocation7 + $0x80] sm:$0xff]  ;;  %v4691_v7 = vld [vmem:[#allocation7 + $0x90] sm:$0xff] }
 0x141   :  { %6591 = vst [vmem:[#allocation127_spill] sm:$0xff] %v4671_v62  ;;  %6592 = vst [vmem:[#allocation128_spill] sm:$0xff] %v4673_v14  ;;  %1058 = vmatpush1.msra.mxu0 %v4677_v4  ;;  %1129 = vmatpush1.msra.mxu1 %v4679_v2  ;;  %v4695_v1 = vld [vmem:[#allocation7 + $0x68] sm:$0xff]  ;;  %v4697_v13 = vld [vmem:[#allocation7 + $0x78] sm:$0xff]  ;;  %v623_v14 = vadd.f32 %v622_v16, %v4462_v5 }
 0x142   :  { %6593 = vst [vmem:[#allocation129_spill] sm:$0xff] %v4677_v4  ;;  %6594 = vst [vmem:[#allocation130_spill] sm:$0xff] %v4679_v2  ;;  %1059 = vmatprep.subr.mxu0 %v4683_v12  ;;  %1130 = vmatprep.subr.mxu1 %v4685_v63  ;;  %v4701_v15 = vld [vmem:[#allocation7 + $0x60] sm:$0xff]  ;;  %v4703_v62 = vld [vmem:[#allocation7 + $0x70] sm:$0xff] }
 0x143   :  { %6595 = vst [vmem:[#allocation131_spill] sm:$0xff] %v4683_v12  ;;  %6596 = vst [vmem:[#allocation132_spill] sm:$0xff] %v4685_v63  ;;  %1060 = vmatpush1.msra.mxu0 %v4689_v11  ;;  %1131 = vmatpush1.msra.mxu1 %v4691_v7  ;;  %v4708_v2 = vld [vmem:[#allocation7 + $0x48] sm:$0xff]  ;;  %v4710_v4 = vld [vmem:[#allocation7 + $0x58] sm:$0xff]  ;;  %3429 = vtanh.f32 %v623_v14 }
 0x144   :  { %6597 = vst [vmem:[#allocation133_spill] sm:$0xff] %v4691_v7  ;;  %6598 = vst [vmem:[#allocation134_spill] sm:$0xff] %v4695_v1  ;;  %1061 = vmatprep.subr.mxu0 %v4695_v1  ;;  %1132 = vmatprep.subr.mxu1 %v4697_v13  ;;  %v4714_v63 = vld [vmem:[#allocation7 + $0x40] sm:$0xff]  ;;  %v4716_v12 = vld [vmem:[#allocation7 + $0x50] sm:$0xff] }
 0x145   :  { %6599 = vst [vmem:[#allocation135_spill] sm:$0xff] %v4697_v13  ;;  %6600 = vst [vmem:[#allocation136_spill] sm:$0xff] %v4701_v15  ;;  %1062 = vmatpush1.msra.mxu0 %v4701_v15  ;;  %1133 = vmatpush1.msra.mxu1 %v4703_v62  ;;  %v4720_v5 = vld [vmem:[#allocation7 + $0x28] sm:$0xff]  ;;  %v4722_v61 = vld [vmem:[#allocation7 + $0x38] sm:$0xff] }
 0x146   :  { %6601 = vst [vmem:[#allocation137_spill] sm:$0xff] %v4703_v62  ;;  %6602 = vst [vmem:[#allocation138_spill] sm:$0xff] %v4708_v2  ;;  %v3426_v60 = vpop.eup %3425  ;;  %1063 = vmatprep.subr.mxu0 %v4708_v2  ;;  %1134 = vmatprep.subr.mxu1 %v4710_v4  ;;  %v4726_v1 = vld [vmem:[#allocation7 + $0x20] sm:$0xff]  ;;  %v4728_v13 = vld [vmem:[#allocation7 + $0x30] sm:$0xff] }
 0x147   :  { %6603 = vst [vmem:[#allocation139_spill] sm:$0xff] %v4710_v4  ;;  %6604 = vst [vmem:[#allocation140_spill] sm:$0xff] %v4714_v63  ;;  %v844_v16 = vadd.f32 1.0, %v3426_v60  ;;  %1064 = vmatpush1.msra.mxu0 %v4714_v63  ;;  %1135 = vmatpush1.msra.mxu1 %v4716_v12  ;;  %v4732_v15 = vld [vmem:[#allocation7 + $0x8] sm:$0xff]  ;;  %v4734_v62 = vld [vmem:[#allocation7 + $0x18] sm:$0xff] }
 0x148   :  { %6605 = vst [vmem:[#allocation141_spill] sm:$0xff] %v4716_v12  ;;  %6606 = vst [vmem:[#allocation142_spill] sm:$0xff] %v4720_v5  ;;  %1065 = vmatprep.subr.mxu0 %v4720_v5  ;;  %1136 = vmatprep.subr.mxu1 %v4722_v61  ;;  %v4738_v60 = vld [vmem:[#allocation7] sm:$0xff]  ;;  %v4742_v14 = vld [vmem:[#allocation7 + $0x10] sm:$0xff]  ;;  %v6614_v12 = vmov 0.0  }
 0x149   :  { %6607 = vst [vmem:[#allocation143_spill] sm:$0xff] %v4722_v61  ;;  %6608 = vst [vmem:[#allocation144_spill] sm:$0xff] %v4726_v1  ;;  %3431 = vrcp.f32 %v844_v16  ;;  %1066 = vmatpush1.msra.mxu0 %v4726_v1  ;;  %1137 = vmatpush1.msra.mxu1 %v4728_v13 }
 0x14a   :  { %6609 = vst [vmem:[#allocation145_spill] sm:$0xff] %v4728_v13  ;;  %6610 = vst [vmem:[#allocation146_spill] sm:$0xff] %v4732_v15  ;;  %1067 = vmatprep.subr.mxu0 %v4732_v15  ;;  %1138 = vmatprep.subr.mxu1 %v4734_v62 }
 0x14b   :  { %6611 = vst [vmem:[#allocation147_spill] sm:$0xff] %v4734_v62  ;;  %6612 = vst [vmem:[#allocation148_spill] sm:$0xff] %v4738_v60  ;;  %1068 = vmatpush1.msra.mxu0 %v4738_v60  ;;  %1101 = vmatprep.mubr.f32.mxu0 %v6614_v12 }
 0x14c   :  { %6613 = vst [vmem:[#allocation149_spill] sm:$0xff] %v4742_v14  ;;  %1139 = vmatpush1.msra.mxu1 %v4742_v14  ;;  %1172 = vmatprep.mubr.f32.mxu1 %v6614_v12  ;;  %v3428_v16 = vpop.eup %3427 }
 0x14d   :  { %1217 = vmatprep.subr.mxu0 %v4150_v17  ;;  %1288 = vmatprep.subr.mxu1 %v4152_v18  ;;  %v851_v13 = vadd.f32 1.0, %v3428_v16  ;;  %v6615_v17 = vld [vmem:[#allocation13_spill] sm:$0xff]  ;;  %v6616_v18 = vld [vmem:[#allocation14_spill] sm:$0xff] }
 0x14f   :  { %3433 = vrcp.f32 %v851_v13 }
 0x150   :  { %v3430_v1 = vpop.eup %3429 }
 0x156   :  { %v3432_v61 = vpop.eup %3431 }
 0x157   :  { %v4752_v5 = vmul.f32 %v3432_v61, %v3430_v1 }
 0x159   :  { %3435 = vtanh.f32 %v4752_v5 }
 0x15c   :  { %v3434_v60 = vpop.eup %3433 }
 0x166   :  { %v3436_v62 = vpop.eup %3435 }
 0x167   :  { %v856_v15 = vmul.f32 %v3436_v62, %v3434_v60 }
 0x169   :  { %858 = vst [vmem:[%s6029_s5 + $0x78] sm:$0xff] %v856_v15  ;;  %1102 = vmatmul.mubr.f32.vlgmr.msra.gmra.mxu0 %v856_v15  ;;  %1173 = vmatmul.mubr.f32.vlgmr.msra.gmra.mxu1 %v856_v15 }
 0x16a   :  { %1218 = vmatpush1.msra.mxu0 %v4156_v19  ;;  %1289 = vmatpush1.msra.mxu1 %v4158_v20  ;;  %v6617_v19 = vld [vmem:[#allocation15_spill] sm:$0xff]  ;;  %v6618_v20 = vld [vmem:[#allocation16_spill] sm:$0xff] }
 0x16b   :  { %1219 = vmatprep.subr.mxu0 %v4162_v21  ;;  %1290 = vmatprep.subr.mxu1 %v4164_v22  ;;  %v6619_v21 = vld [vmem:[#allocation17_spill] sm:$0xff]  ;;  %v6620_v22 = vld [vmem:[#allocation18_spill] sm:$0xff] }
 0x16c   :  { %1220 = vmatpush1.msra.mxu0 %v4168_v23  ;;  %1291 = vmatpush1.msra.mxu1 %v4170_v24  ;;  %v6621_v23 = vld [vmem:[#allocation19_spill] sm:$0xff]  ;;  %v6622_v24 = vld [vmem:[#allocation20_spill] sm:$0xff] }
 0x16d   :  { %1221 = vmatprep.subr.mxu0 %v4174_v25  ;;  %1292 = vmatprep.subr.mxu1 %v4176_v26  ;;  %v6623_v25 = vld [vmem:[#allocation21_spill] sm:$0xff]  ;;  %v6624_v26 = vld [vmem:[#allocation22_spill] sm:$0xff] }
 0x16e   :  { %1222 = vmatpush1.msra.mxu0 %v4180_v27  ;;  %1293 = vmatpush1.msra.mxu1 %v4182_v28  ;;  %v6625_v27 = vld [vmem:[#allocation23_spill] sm:$0xff]  ;;  %v6626_v28 = vld [vmem:[#allocation24_spill] sm:$0xff] }
 0x16f   :  { %1223 = vmatprep.subr.mxu0 %v4186_v29  ;;  %1294 = vmatprep.subr.mxu1 %v4188_v30  ;;  %v6627_v29 = vld [vmem:[#allocation25_spill] sm:$0xff]  ;;  %v6628_v30 = vld [vmem:[#allocation26_spill] sm:$0xff] }
 0x170   :  { %1224 = vmatpush1.msra.mxu0 %v4192_v31  ;;  %1295 = vmatpush1.msra.mxu1 %v4194_v32  ;;  %v6629_v31 = vld [vmem:[#allocation27_spill] sm:$0xff]  ;;  %v6630_v32 = vld [vmem:[#allocation28_spill] sm:$0xff] }
 0x171   :  { %1225 = vmatprep.subr.mxu0 %v4198_v33  ;;  %1296 = vmatprep.subr.mxu1 %v4200_v34  ;;  %v6631_v33 = vld [vmem:[#allocation29_spill] sm:$0xff]  ;;  %v6632_v34 = vld [vmem:[#allocation30_spill] sm:$0xff] }
 0x172   :  { %1226 = vmatpush1.msra.mxu0 %v4204_v35  ;;  %1297 = vmatpush1.msra.mxu1 %v4206_v36  ;;  %v6633_v35 = vld [vmem:[#allocation31_spill] sm:$0xff]  ;;  %v6634_v36 = vld [vmem:[#allocation32_spill] sm:$0xff] }
 0x173   :  { %1227 = vmatprep.subr.mxu0 %v4210_v37  ;;  %1298 = vmatprep.subr.mxu1 %v4212_v38  ;;  %v6635_v37 = vld [vmem:[#allocation33_spill] sm:$0xff]  ;;  %v6636_v38 = vld [vmem:[#allocation34_spill] sm:$0xff] }
 0x174   :  { %1228 = vmatpush1.msra.mxu0 %v4216_v39  ;;  %1299 = vmatpush1.msra.mxu1 %v4218_v40  ;;  %v6637_v39 = vld [vmem:[#allocation35_spill] sm:$0xff] }
 0x175   :  { %1229 = vmatprep.subr.mxu0 %v4222_v41  ;;  %1300 = vmatprep.subr.mxu1 %v4224_v42  ;;  %v6638_v41 = vld [vmem:[#allocation37_spill] sm:$0xff] }
 0x176   :  { %1230 = vmatpush1.msra.mxu0 %v4228_v43  ;;  %1301 = vmatpush1.msra.mxu1 %v4230_v44  ;;  %v250_v42 = vadd.f32 %v6638_v41, %v4376_v0  ;;  %v6639_v43 = vld [vmem:[#allocation36_spill] sm:$0xff] }
 0x177   :  { %1231 = vmatprep.subr.mxu0 %v4234_v45  ;;  %1302 = vmatprep.subr.mxu1 %v4236_v46 }
 0x178   :  { %1232 = vmatpush1.msra.mxu0 %v4240_v47  ;;  %1303 = vmatpush1.msra.mxu1 %v4242_v48 }
 0x179   :  { %1233 = vmatprep.subr.mxu0 %v4246_v49  ;;  %1304 = vmatprep.subr.mxu1 %v4248_v50 }
 0x17a   :  { %1234 = vmatpush1.msra.mxu0 %v4252_v51  ;;  %1305 = vmatpush1.msra.mxu1 %v4254_v52  ;;  %v6640_v51 = vld [vmem:[#allocation40_spill] sm:$0xff] }
 0x17b   :  { %1235 = vmatprep.subr.mxu0 %v4258_v53  ;;  %1306 = vmatprep.subr.mxu1 %v4260_v54  ;;  %v6641_v53 = vld [vmem:[#allocation38_spill] sm:$0xff] }
 0x17c   :  { %1236 = vmatpush1.msra.mxu0 %v4264_v55  ;;  %1307 = vmatpush1.msra.mxu1 %v4266_v56 }
 0x17d   :  { %1237 = vmatprep.subr.mxu0 %v4270_v57  ;;  %1308 = vmatprep.subr.mxu1 %v4272_v58 }
 0x17e   :  { %1238 = vmatpush1.msra.mxu0 %v4276_v59  ;;  %1309 = vmatpush1.msra.mxu1 %v6615_v17 }
 0x17f   :  { %1239 = vmatprep.subr.mxu0 %v6616_v18  ;;  %1310 = vmatprep.subr.mxu1 %v6617_v19 }
 0x180   :  { %1240 = vmatpush1.msra.mxu0 %v6618_v20  ;;  %1311 = vmatpush1.msra.mxu1 %v6619_v21  ;;  %v6642_v20 = vld [vmem:[#allocation83_spill] sm:$0xff]  ;;  %v6643_v21 = vld [vmem:[#allocation85_spill] sm:$0xff] }
 0x181   :  { %1241 = vmatprep.subr.mxu0 %v6620_v22  ;;  %1312 = vmatprep.subr.mxu1 %v6621_v23  ;;  %v6645_v23 = vld [vmem:[#allocation88_spill] sm:$0xff] }
 0x182   :  { %1242 = vmatpush1.msra.mxu0 %v6622_v24  ;;  %1313 = vmatpush1.msra.mxu1 %v6623_v25  ;;  %v6646_v24 = vld [vmem:[#allocation89_spill] sm:$0xff]  ;;  %v6647_v25 = vld [vmem:[#allocation62_spill] sm:$0xff] }
 0x183   :  { %1243 = vmatprep.subr.mxu0 %v6624_v26  ;;  %1314 = vmatprep.subr.mxu1 %v6625_v27  ;;  %v6648_v26 = vld [vmem:[#allocation101_spill] sm:$0xff] }
 0x184   :  { %1244 = vmatpush1.msra.mxu0 %v6626_v28  ;;  %1315 = vmatpush1.msra.mxu1 %v6627_v29  ;;  %v506_v27 = vadd.f32 %v6648_v26, %v6647_v25  ;;  %v6649_v28 = vld [vmem:[#allocation99_spill] sm:$0xff]  ;;  %v6682_v25 = vld [vmem:[#allocation128_spill] sm:$0xff] }
 0x185   :  { %1245 = vmatprep.subr.mxu0 %v6628_v30  ;;  %1316 = vmatprep.subr.mxu1 %v6629_v31  ;;  %v6650_v30 = vld [vmem:[#allocation91_spill] sm:$0xff]  ;;  %v6651_v31 = vld [vmem:[#allocation92_spill] sm:$0xff] }
 0x186   :  { %1246 = vmatpush1.msra.mxu0 %v6630_v32  ;;  %1317 = vmatpush1.msra.mxu1 %v6631_v33  ;;  %v6652_v33 = vld [vmem:[#allocation94_spill] sm:$0xff] }
 0x187   :  { %1247 = vmatprep.subr.mxu0 %v6632_v34  ;;  %1318 = vmatprep.subr.mxu1 %v6633_v35  ;;  %v6653_v34 = vld [vmem:[#allocation95_spill] sm:$0xff] }
 0x188   :  { %1248 = vmatpush1.msra.mxu0 %v6634_v36  ;;  %1281 = vmatprep.mubr.f32.mxu0 %v6614_v12 }
 0x189   :  { %1319 = vmatpush1.msra.mxu1 %v6635_v37  ;;  %1352 = vmatprep.mubr.f32.mxu1 %v6614_v12  ;;  %v6654_v37 = vld [vmem:[#allocation97_spill] sm:$0xff] }
 0x18a   :  { %1387 = vmatprep.subr.mxu0 %v6636_v38  ;;  %1458 = vmatprep.subr.mxu1 %v6637_v39  ;;  %v6655_v38 = vld [vmem:[#allocation98_spill] sm:$0xff]  ;;  %v6656_v39 = vld [vmem:[#allocation100_spill] sm:$0xff] }
 0x1ec   :  { %v933_v40 = vpop.f32.mrf.mxu0  ;;  %v1004_v48 = vpop.f32.mrf.mxu1 }
 0x1ed   :  { %v1009_v44 = vadd.f32 %v933_v40, %v6639_v43  ;;  %v1011_v54 = vadd.f32 %v1004_v48, %v6641_v53  ;;  %v6658_v43 = vld [vmem:[#allocation104_spill] sm:$0xff]  ;;  %v6667_v53 = vld [vmem:[#allocation115_spill] sm:$0xff] }
 0x1ee   :  { %v935_v45 = vpop.f32.mrf.mxu0  ;;  %v1006_v50 = vpop.f32.mrf.mxu1 }
 0x1ef   :  { %v3360_v46 = vmul.f32 -1.442695, %v1009_v44  ;;  %v1010_v47 = vadd.f32 %v935_v45, %v250_v42  ;;  %v1012_v52 = vadd.f32 %v1006_v50, %v6640_v51  ;;  %v6657_v42 = vld [vmem:[#allocation103_spill] sm:$0xff]  ;;  %v6659_v44 = vld [vmem:[#allocation105_spill] sm:$0xff]  ;;  %v6664_v50 = vld [vmem:[#allocation112_spill] sm:$0xff] }
 0x1f0   :  { %v6660_v45 = vld [vmem:[#allocation107_spill] sm:$0xff]  ;;  %v6665_v51 = vld [vmem:[#allocation113_spill] sm:$0xff] }
 0x1f1   :  { %3437 = vpow2.f32 %v3360_v46  ;;  %v3361_v49 = vmul.f32 -1.442695, %v1010_v47  ;;  %v3362_v55 = vmul.f32 -1.442695, %v1012_v52  ;;  %v6661_v46 = vld [vmem:[#allocation108_spill] sm:$0xff]  ;;  %v6662_v47 = vld [vmem:[#allocation109_spill] sm:$0xff] }
 0x1f2   :  { %v6666_v52 = vld [vmem:[#allocation114_spill] sm:$0xff] }
 0x1f3   :  { %3439 = vpow2.f32 %v3361_v49  ;;  %v6663_v49 = vld [vmem:[#allocation111_spill] sm:$0xff] }
 0x1f4   :  { %3441 = vtanh.f32 %v1011_v54  ;;  %v6668_v54 = vld [vmem:[#allocation116_spill] sm:$0xff] }
 0x1f5   :  { %3443 = vpow2.f32 %v3362_v55  ;;  %v6669_v55 = vld [vmem:[#allocation110_spill] sm:$0xff] }
 0x1fe   :  { %v3438_v56 = vpop.eup %3437 }
 0x1ff   :  { %v1016_v57 = vadd.f32 1.0, %v3438_v56 }
 0x200   :  { %v3440_v58 = vpop.eup %3439 }
 0x201   :  { %3445 = vrcp.f32 %v1016_v57  ;;  %v1022_v59 = vadd.f32 1.0, %v3440_v58  ;;  %v3442_v0 = vpop.eup %3441  ;;  %v6670_v57 = vld [vmem:[#allocation117_spill] sm:$0xff]  ;;  %v6671_v58 = vld [vmem:[#allocation118_spill] sm:$0xff] }
 0x202   :  { %v3444_v15 = vpop.eup %3443 }
 0x203   :  { %3447 = vrcp.f32 %v1022_v59  ;;  %v1029_v61 = vadd.f32 1.0, %v3444_v15  ;;  %v6672_v59 = vld [vmem:[#allocation119_spill] sm:$0xff]  ;;  %v6674_v15 = vld [vmem:[#allocation121_spill] sm:$0xff] }
 0x205   :  { %3449 = vrcp.f32 %v1029_v61  ;;  %v6677_v61 = vld [vmem:[#allocation123_spill] sm:$0xff] }
 0x20e   :  { %v3446_v13 = vpop.eup %3445 }
 0x20f   :  { %v1033_v62 = vmul.f32 %v3446_v13, %v3442_v0  ;;  %v6673_v0 = vld [vmem:[#allocation120_spill] sm:$0xff]  ;;  %v6675_v13 = vld [vmem:[#allocation122_spill] sm:$0xff] }
 0x210   :  { %v3448_v1 = vpop.eup %3447 }
 0x211   :  { %v1032_v60 = vmul.f32 %v3448_v1, %v4473_v6  ;;  %v6644_v6 = vld [vmem:[#allocation86_spill] sm:$0xff] }
 0x212   :  { %v3450_v17 = vpop.eup %3449 }
 0x213   :  { %v4830_v16 = vadd.f32 %v1033_v62, %v1032_v60  ;;  %v6676_v62 = vld [vmem:[#allocation106_spill] sm:$0xff]  ;;  %v6678_v60 = vld [vmem:[#allocation124_spill] sm:$0xff] }
 0x215   :  { %3451 = vtanh.f32 %v4830_v16 }
 0x222   :  { %v3452_v18 = vpop.eup %3451 }
 0x223   :  { %v1036_v19 = vmul.f32 %v3452_v18, %v3450_v17  ;;  %v6679_v18 = vld [vmem:[#allocation125_spill] sm:$0xff] }
 0x225   :  { %1207 = vst [vmem:[%s6029_s5 + $0x10] sm:$0xff] %v1036_v19  ;;  %1282 = vmatmul.mubr.f32.vlgmr.msra.gmra.mxu0 %v1036_v19  ;;  %1353 = vmatmul.mubr.f32.vlgmr.msra.gmra.mxu1 %v1036_v19  ;;  %v6680_v19 = vld [vmem:[#allocation126_spill] sm:$0xff] }
 0x226   :  { %1388 = vmatpush1.msra.mxu0 %v4527_v3  ;;  %1459 = vmatpush1.msra.mxu1 %v6642_v20 }
 0x227   :  { %1389 = vmatprep.subr.mxu0 %v6643_v21  ;;  %1460 = vmatprep.subr.mxu1 %v6644_v6 }
 0x228   :  { %1390 = vmatpush1.msra.mxu0 %v6645_v23  ;;  %1461 = vmatpush1.msra.mxu1 %v6646_v24 }
 0x229   :  { %v1103_v22 = vpop.f32.mrf.mxu0  ;;  %1391 = vmatprep.subr.mxu0 %v6650_v30  ;;  %1462 = vmatprep.subr.mxu1 %v6651_v31  ;;  %v1174_v40 = vpop.f32.mrf.mxu1 }
 0x22a   :  { %v1179_v29 = vadd.f32 %v1103_v22, %v6649_v28  ;;  %1392 = vmatpush1.msra.mxu0 %v6652_v33  ;;  %1463 = vmatpush1.msra.mxu1 %v6653_v34  ;;  %v1181_v1 = vadd.f32 %v1174_v40, %v6676_v62  ;;  %v6681_v22 = vld [vmem:[#allocation127_spill] sm:$0xff]  ;;  %v6684_v28 = vld [vmem:[#allocation130_spill] sm:$0xff]  ;;  %v6691_v62 = vld [vmem:[#allocation141_spill] sm:$0xff] }
 0x22b   :  { %v1105_v32 = vpop.f32.mrf.mxu0  ;;  %1393 = vmatprep.subr.mxu0 %v6654_v37  ;;  %1464 = vmatprep.subr.mxu1 %v6655_v38  ;;  %v1176_v48 = vpop.f32.mrf.mxu1 }
 0x22c   :  { %v3363_v35 = vmul.f32 -1.442695, %v1179_v29  ;;  %v1180_v36 = vadd.f32 %v1105_v32, %v506_v27  ;;  %1394 = vmatpush1.msra.mxu0 %v4580_v8  ;;  %1465 = vmatpush1.msra.mxu1 %v6656_v39  ;;  %v1182_v56 = vadd.f32 %v1176_v48, %v6669_v55  ;;  %v6683_v27 = vld [vmem:[#allocation129_spill] sm:$0xff]  ;;  %v6685_v32 = vld [vmem:[#allocation131_spill] sm:$0xff]  ;;  %v6689_v55 = vld [vmem:[#allocation136_spill] sm:$0xff] }
 0x22d   :  { %1395 = vmatprep.subr.mxu0 %v6657_v42  ;;  %1466 = vmatprep.subr.mxu1 %v6658_v43  ;;  %v6688_v48 = vld [vmem:[#allocation135_spill] sm:$0xff] }
 0x22e   :  { %3453 = vpow2.f32 %v3363_v35  ;;  %v3364_v41 = vmul.f32 -1.442695, %v1180_v36  ;;  %1396 = vmatpush1.msra.mxu0 %v4597_v9  ;;  %1467 = vmatpush1.msra.mxu1 %v6659_v44  ;;  %v3365_v17 = vmul.f32 -1.442695, %v1182_v56  ;;  %v6686_v35 = vld [vmem:[#allocation132_spill] sm:$0xff]  ;;  %v6690_v56 = vld [vmem:[#allocation137_spill] sm:$0xff] }
 0x22f   :  { %1397 = vmatprep.subr.mxu0 %v4606_v10  ;;  %1468 = vmatprep.subr.mxu1 %v6660_v45 }
 0x230   :  { %3455 = vpow2.f32 %v3364_v41  ;;  %1398 = vmatpush1.msra.mxu0 %v6661_v46  ;;  %1469 = vmatpush1.msra.mxu1 %v6662_v47  ;;  %v6687_v41 = vld [vmem:[#allocation134_spill] sm:$0xff] }
 0x231   :  { %1399 = vmatprep.subr.mxu0 %v6663_v49  ;;  %1470 = vmatprep.subr.mxu1 %v6664_v50  ;;  %3457 = vtanh.f32 %v1181_v1  ;;  %v6692_v1 = vld [vmem:[#allocation142_spill] sm:$0xff] }
 0x232   :  { %1400 = vmatpush1.msra.mxu0 %v6665_v51  ;;  %1471 = vmatpush1.msra.mxu1 %v6666_v52  ;;  %3459 = vpow2.f32 %v3365_v17  ;;  %v6693_v17 = vld [vmem:[#allocation143_spill] sm:$0xff] }
 0x233   :  { %1401 = vmatprep.subr.mxu0 %v6667_v53  ;;  %1472 = vmatprep.subr.mxu1 %v6668_v54 }
 0x234   :  { %1402 = vmatpush1.msra.mxu0 %v6670_v57  ;;  %1473 = vmatpush1.msra.mxu1 %v6671_v58 }
 0x235   :  { %1403 = vmatprep.subr.mxu0 %v6672_v59  ;;  %1474 = vmatprep.subr.mxu1 %v6673_v0 }
 0x236   :  { %1404 = vmatpush1.msra.mxu0 %v6674_v15  ;;  %1475 = vmatpush1.msra.mxu1 %v6675_v13 }
 0x237   :  { %1405 = vmatprep.subr.mxu0 %v6677_v61  ;;  %1476 = vmatprep.subr.mxu1 %v6678_v60 }
 0x238   :  { %1406 = vmatpush1.msra.mxu0 %v6679_v18  ;;  %1477 = vmatpush1.msra.mxu1 %v6680_v19 }
 0x239   :  { %1407 = vmatprep.subr.mxu0 %v6681_v22  ;;  %1478 = vmatprep.subr.mxu1 %v6682_v25 }
 0x23a   :  { %1408 = vmatpush1.msra.mxu0 %v6683_v27  ;;  %1479 = vmatpush1.msra.mxu1 %v6684_v28 }
 0x23b   :  { %v3454_v26 = vpop.eup %3453  ;;  %1409 = vmatprep.subr.mxu0 %v6685_v32  ;;  %1480 = vmatprep.subr.mxu1 %v6686_v35 }
 0x23c   :  { %v1186_v29 = vadd.f32 1.0, %v3454_v26  ;;  %1410 = vmatpush1.msra.mxu0 %v4689_v11  ;;  %1481 = vmatpush1.msra.mxu1 %v4691_v7  ;;  %v6694_v26 = vld [vmem:[#allocation144_spill] sm:$0xff] }
 0x23d   :  { %v3456_v36 = vpop.eup %3455  ;;  %1411 = vmatprep.subr.mxu0 %v6687_v41  ;;  %1482 = vmatprep.subr.mxu1 %v6688_v48 }
 0x23e   :  { %3461 = vrcp.f32 %v1186_v29  ;;  %v1192_v40 = vadd.f32 1.0, %v3456_v36  ;;  %1412 = vmatpush1.msra.mxu0 %v6689_v55  ;;  %1483 = vmatpush1.msra.mxu1 %v6690_v56  ;;  %v6695_v29 = vld [vmem:[#allocation145_spill] sm:$0xff]  ;;  %v6696_v36 = vld [vmem:[#allocation146_spill] sm:$0xff]  ;;  %v6697_v56 = vld [vmem:[#allocation147_spill] sm:$0xff] }
 0x23f   :  { %1413 = vmatprep.subr.mxu0 %v4708_v2  ;;  %1484 = vmatprep.subr.mxu1 %v4710_v4  ;;  %v6769_v55 = vld [vmem:[#allocation42_spill] sm:$0xff] }
 0x240   :  { %3463 = vrcp.f32 %v1192_v40  ;;  %1414 = vmatpush1.msra.mxu0 %v4714_v63  ;;  %1485 = vmatpush1.msra.mxu1 %v6691_v62  ;;  %v6698_v40 = vld [vmem:[#allocation148_spill] sm:$0xff]  ;;  %v4905_v62 = vld [vmem:[#allocation5 + $0x1e8] sm:$0xff] }
 0x241   :  { %1415 = vmatprep.subr.mxu0 %v6692_v1  ;;  %1486 = vmatprep.subr.mxu1 %v6693_v17  ;;  %6699 = vst [vmem:[#allocation13_spill] sm:$0xff] %v4905_v62  ;;  %v4908_v17 = vld [vmem:[#allocation5 + $0x1f8] sm:$0xff] }
 0x242   :  { %1416 = vmatpush1.msra.mxu0 %v6694_v26  ;;  %1487 = vmatpush1.msra.mxu1 %v6695_v29  ;;  %6700 = vst [vmem:[#allocation14_spill] sm:$0xff] %v4908_v17  ;;  %v3458_v29 = vpop.eup %3457 }
 0x243   :  { %1417 = vmatprep.subr.mxu0 %v6696_v36  ;;  %1488 = vmatprep.subr.mxu1 %v6697_v56  ;;  %v3460_v36 = vpop.eup %3459 }
 0x244   :  { %1418 = vmatpush1.msra.mxu0 %v6698_v40  ;;  %1451 = vmatprep.mubr.f32.mxu0 %v6614_v12  ;;  %v1199_v40 = vadd.f32 1.0, %v3460_v36  ;;  %v4948_v36 = vld [vmem:[#allocation5 + $0x188] sm:$0xff] }
 0x245   :  { %1489 = vmatpush1.msra.mxu1 %v4742_v14  ;;  %1522 = vmatprep.mubr.f32.mxu1 %v6614_v12  ;;  %6712 = vst [vmem:[#allocation26_spill] sm:$0xff] %v4948_v36 }
 0x246   :  { %1567 = vmatprep.subr.mxu0 %v4905_v62  ;;  %1638 = vmatprep.subr.mxu1 %v4908_v17  ;;  %3465 = vrcp.f32 %v1199_v40  ;;  %v4918_v17 = vld [vmem:[#allocation5 + $0x1e0] sm:$0xff]  ;;  %v4951_v40 = vld [vmem:[#allocation5 + $0x198] sm:$0xff] }
 0x247   :  { %6702 = vst [vmem:[#allocation16_spill] sm:$0xff] %v4918_v17  ;;  %6713 = vst [vmem:[#allocation27_spill] sm:$0xff] %v4951_v40 }
 0x24b   :  { %v3462_v26 = vpop.eup %3461 }
 0x24c   :  { %v1203_v56 = vmul.f32 %v3462_v26, %v3458_v29  ;;  %v4921_v26 = vld [vmem:[#allocation5 + $0x1f0] sm:$0xff] }
 0x24d   :  { %v3464_v1 = vpop.eup %3463  ;;  %6703 = vst [vmem:[#allocation17_spill] sm:$0xff] %v4921_v26  ;;  %v4945_v29 = vld [vmem:[#allocation5 + $0x1b0] sm:$0xff] }
 0x24e   :  { %v1202_v63 = vmul.f32 %v3464_v1, %v4752_v5  ;;  %v4927_v5 = vld [vmem:[#allocation5 + $0x1d8] sm:$0xff]  ;;  %v4942_v1 = vld [vmem:[#allocation5 + $0x1a0] sm:$0xff]  ;;  %6711 = vst [vmem:[#allocation25_spill] sm:$0xff] %v4945_v29 }
 0x24f   :  { %6705 = vst [vmem:[#allocation19_spill] sm:$0xff] %v4927_v5  ;;  %6710 = vst [vmem:[#allocation24_spill] sm:$0xff] %v4942_v1 }
 0x250   :  { %v4912_v4 = vadd.f32 %v1203_v56, %v1202_v63  ;;  %v4924_v63 = vld [vmem:[#allocation5 + $0x1c8] sm:$0xff] }
 0x251   :  { %6704 = vst [vmem:[#allocation18_spill] sm:$0xff] %v4924_v63  ;;  %v4936_v56 = vld [vmem:[#allocation5 + $0x1a8] sm:$0xff] }
 0x252   :  { %6701 = vst [vmem:[#allocation15_spill] sm:$0xff] %v4912_v4  ;;  %3467 = vtanh.f32 %v4912_v4  ;;  %6708 = vst [vmem:[#allocation22_spill] sm:$0xff] %v4936_v56  ;;  %v6768_v4 = vld [vmem:[#allocation44_spill] sm:$0xff] }
 0x253   :  { %v3466_v14 = vpop.eup %3465 }
 0x25f   :  { %v3468_v2 = vpop.eup %3467 }
 0x260   :  { %v1206_v62 = vmul.f32 %v3468_v2, %v3466_v14  ;;  %v4930_v2 = vld [vmem:[#allocation5 + $0x1c0] sm:$0xff]  ;;  %v4933_v14 = vld [vmem:[#allocation5 + $0x1d0] sm:$0xff] }
 0x261   :  { %6706 = vst [vmem:[#allocation20_spill] sm:$0xff] %v4930_v2  ;;  %6707 = vst [vmem:[#allocation21_spill] sm:$0xff] %v4933_v14 }
 0x262   :  { %1208 = vst [vmem:[%s6029_s5 + $0x68] sm:$0xff] %v1206_v62  ;;  %1452 = vmatmul.mubr.f32.vlgmr.msra.gmra.mxu0 %v1206_v62  ;;  %1523 = vmatmul.mubr.f32.vlgmr.msra.gmra.mxu1 %v1206_v62  ;;  %v4939_v62 = vld [vmem:[#allocation5 + $0x1b8] sm:$0xff] }
 0x263   :  { %1568 = vmatpush1.msra.mxu0 %v4918_v17  ;;  %1639 = vmatpush1.msra.mxu1 %v4921_v26  ;;  %6709 = vst [vmem:[#allocation23_spill] sm:$0xff] %v4939_v62 }
 0x264   :  { %1569 = vmatprep.subr.mxu0 %v4924_v63  ;;  %1640 = vmatprep.subr.mxu1 %v4927_v5  ;;  %v6767_v5 = vld [vmem:[#allocation41_spill] sm:$0xff] }
 0x265   :  { %1570 = vmatpush1.msra.mxu0 %v4930_v2  ;;  %1641 = vmatpush1.msra.mxu1 %v4933_v14 }
 0x266   :  { %1571 = vmatprep.subr.mxu0 %v4936_v56  ;;  %1642 = vmatprep.subr.mxu1 %v4939_v62  ;;  %v4954_v56 = vld [vmem:[#allocation5 + $0x180] sm:$0xff]  ;;  %v4957_v62 = vld [vmem:[#allocation5 + $0x190] sm:$0xff] }
 0x267   :  { %1572 = vmatpush1.msra.mxu0 %v4942_v1  ;;  %1643 = vmatpush1.msra.mxu1 %v4945_v29  ;;  %6714 = vst [vmem:[#allocation28_spill] sm:$0xff] %v4954_v56  ;;  %6715 = vst [vmem:[#allocation29_spill] sm:$0xff] %v4957_v62  ;;  %v4960_v1 = vld [vmem:[#allocation5 + $0x168] sm:$0xff]  ;;  %v4963_v29 = vld [vmem:[#allocation5 + $0x178] sm:$0xff] }
 0x268   :  { %1573 = vmatprep.subr.mxu0 %v4948_v36  ;;  %1644 = vmatprep.subr.mxu1 %v4951_v40  ;;  %6716 = vst [vmem:[#allocation30_spill] sm:$0xff] %v4960_v1  ;;  %6717 = vst [vmem:[#allocation31_spill] sm:$0xff] %v4963_v29  ;;  %v4966_v36 = vld [vmem:[#allocation5 + $0x160] sm:$0xff]  ;;  %v4969_v40 = vld [vmem:[#allocation5 + $0x170] sm:$0xff] }
 0x269   :  { %1574 = vmatpush1.msra.mxu0 %v4954_v56  ;;  %1645 = vmatpush1.msra.mxu1 %v4957_v62  ;;  %6718 = vst [vmem:[#allocation32_spill] sm:$0xff] %v4966_v36  ;;  %6719 = vst [vmem:[#allocation33_spill] sm:$0xff] %v4969_v40  ;;  %v4972_v56 = vld [vmem:[#allocation5 + $0x148] sm:$0xff]  ;;  %v4975_v62 = vld [vmem:[#allocation5 + $0x158] sm:$0xff] }
 0x26a   :  { %1575 = vmatprep.subr.mxu0 %v4960_v1  ;;  %1646 = vmatprep.subr.mxu1 %v4963_v29  ;;  %6720 = vst [vmem:[#allocation34_spill] sm:$0xff] %v4972_v56  ;;  %6721 = vst [vmem:[#allocation35_spill] sm:$0xff] %v4975_v62  ;;  %v4978_v1 = vld [vmem:[#allocation5 + $0x140] sm:$0xff]  ;;  %v4981_v29 = vld [vmem:[#allocation5 + $0x150] sm:$0xff] }
 0x26b   :  { %1576 = vmatpush1.msra.mxu0 %v4966_v36  ;;  %1647 = vmatpush1.msra.mxu1 %v4969_v40  ;;  %6722 = vst [vmem:[#allocation37_spill] sm:$0xff] %v4978_v1  ;;  %6723 = vst [vmem:[#allocation36_spill] sm:$0xff] %v4981_v29  ;;  %v4984_v36 = vld [vmem:[#allocation5 + $0x128] sm:$0xff]  ;;  %v4987_v40 = vld [vmem:[#allocation5 + $0x138] sm:$0xff] }
 0x26c   :  { %1577 = vmatprep.subr.mxu0 %v4972_v56  ;;  %1648 = vmatprep.subr.mxu1 %v4975_v62  ;;  %6724 = vst [vmem:[#allocation40_spill] sm:$0xff] %v4984_v36  ;;  %6725 = vst [vmem:[#allocation38_spill] sm:$0xff] %v4987_v40  ;;  %v4990_v56 = vld [vmem:[#allocation5 + $0x120] sm:$0xff]  ;;  %v4993_v62 = vld [vmem:[#allocation5 + $0x130] sm:$0xff] }
 0x26d   :  { %1578 = vmatpush1.msra.mxu0 %v4978_v1  ;;  %1649 = vmatpush1.msra.mxu1 %v4981_v29  ;;  %6726 = vst [vmem:[#allocation83_spill] sm:$0xff] %v4990_v56  ;;  %6727 = vst [vmem:[#allocation85_spill] sm:$0xff] %v4993_v62  ;;  %v4996_v1 = vld [vmem:[#allocation5 + $0x108] sm:$0xff]  ;;  %v4999_v29 = vld [vmem:[#allocation5 + $0x118] sm:$0xff] }
 0x26e   :  { %1579 = vmatprep.subr.mxu0 %v4984_v36  ;;  %1650 = vmatprep.subr.mxu1 %v4987_v40  ;;  %6728 = vst [vmem:[#allocation86_spill] sm:$0xff] %v4996_v1  ;;  %6729 = vst [vmem:[#allocation88_spill] sm:$0xff] %v4999_v29  ;;  %v5002_v36 = vld [vmem:[#allocation5 + $0x100] sm:$0xff]  ;;  %v5005_v40 = vld [vmem:[#allocation5 + $0x110] sm:$0xff] }
 0x26f   :  { %1580 = vmatpush1.msra.mxu0 %v4990_v56  ;;  %1651 = vmatpush1.msra.mxu1 %v4993_v62  ;;  %6730 = vst [vmem:[#allocation89_spill] sm:$0xff] %v5002_v36  ;;  %6731 = vst [vmem:[#allocation62_spill] sm:$0xff] %v5005_v40  ;;  %v5008_v56 = vld [vmem:[#allocation5 + $0xe8] sm:$0xff]  ;;  %v5011_v62 = vld [vmem:[#allocation5 + $0xf8] sm:$0xff] }
 0x270   :  { %1581 = vmatprep.subr.mxu0 %v4996_v1  ;;  %1652 = vmatprep.subr.mxu1 %v4999_v29  ;;  %6732 = vst [vmem:[#allocation101_spill] sm:$0xff] %v5008_v56  ;;  %6733 = vst [vmem:[#allocation99_spill] sm:$0xff] %v5011_v62  ;;  %v5014_v1 = vld [vmem:[#allocation5 + $0xe0] sm:$0xff]  ;;  %v5017_v29 = vld [vmem:[#allocation5 + $0xf0] sm:$0xff] }
 0x271   :  { %1582 = vmatpush1.msra.mxu0 %v5002_v36  ;;  %1653 = vmatpush1.msra.mxu1 %v5005_v40  ;;  %6734 = vst [vmem:[#allocation91_spill] sm:$0xff] %v5014_v1  ;;  %6735 = vst [vmem:[#allocation92_spill] sm:$0xff] %v5017_v29  ;;  %v5020_v36 = vld [vmem:[#allocation5 + $0xc8] sm:$0xff]  ;;  %v5023_v40 = vld [vmem:[#allocation5 + $0xd8] sm:$0xff] }
 0x272   :  { %1583 = vmatprep.subr.mxu0 %v5008_v56  ;;  %1654 = vmatprep.subr.mxu1 %v5011_v62  ;;  %6736 = vst [vmem:[#allocation94_spill] sm:$0xff] %v5020_v36  ;;  %6737 = vst [vmem:[#allocation95_spill] sm:$0xff] %v5023_v40  ;;  %v5026_v56 = vld [vmem:[#allocation5 + $0xc0] sm:$0xff]  ;;  %v5029_v62 = vld [vmem:[#allocation5 + $0xd0] sm:$0xff] }
 0x273   :  { %1584 = vmatpush1.msra.mxu0 %v5014_v1  ;;  %1655 = vmatpush1.msra.mxu1 %v5017_v29  ;;  %6738 = vst [vmem:[#allocation97_spill] sm:$0xff] %v5026_v56  ;;  %6739 = vst [vmem:[#allocation98_spill] sm:$0xff] %v5029_v62  ;;  %v5032_v1 = vld [vmem:[#allocation5 + $0xa8] sm:$0xff]  ;;  %v5035_v29 = vld [vmem:[#allocation5 + $0xb8] sm:$0xff] }
 0x274   :  { %1585 = vmatprep.subr.mxu0 %v5020_v36  ;;  %1656 = vmatprep.subr.mxu1 %v5023_v40  ;;  %6740 = vst [vmem:[#allocation100_spill] sm:$0xff] %v5032_v1  ;;  %6741 = vst [vmem:[#allocation103_spill] sm:$0xff] %v5035_v29  ;;  %v5038_v36 = vld [vmem:[#allocation5 + $0xa0] sm:$0xff]  ;;  %v5041_v40 = vld [vmem:[#allocation5 + $0xb0] sm:$0xff] }
 0x275   :  { %1586 = vmatpush1.msra.mxu0 %v5026_v56  ;;  %1657 = vmatpush1.msra.mxu1 %v5029_v62  ;;  %6742 = vst [vmem:[#allocation104_spill] sm:$0xff] %v5038_v36  ;;  %6743 = vst [vmem:[#allocation105_spill] sm:$0xff] %v5041_v40  ;;  %v5044_v56 = vld [vmem:[#allocation5 + $0x88] sm:$0xff]  ;;  %v5047_v62 = vld [vmem:[#allocation5 + $0x98] sm:$0xff] }
 0x276   :  { %1587 = vmatprep.subr.mxu0 %v5032_v1  ;;  %1658 = vmatprep.subr.mxu1 %v5035_v29  ;;  %6744 = vst [vmem:[#allocation107_spill] sm:$0xff] %v5044_v56  ;;  %6745 = vst [vmem:[#allocation108_spill] sm:$0xff] %v5047_v62  ;;  %v5050_v1 = vld [vmem:[#allocation5 + $0x80] sm:$0xff]  ;;  %v5053_v29 = vld [vmem:[#allocation5 + $0x90] sm:$0xff] }
 0x277   :  { %1588 = vmatpush1.msra.mxu0 %v5038_v36  ;;  %1659 = vmatpush1.msra.mxu1 %v5041_v40  ;;  %6746 = vst [vmem:[#allocation109_spill] sm:$0xff] %v5050_v1  ;;  %6747 = vst [vmem:[#allocation111_spill] sm:$0xff] %v5053_v29  ;;  %v5056_v36 = vld [vmem:[#allocation5 + $0x68] sm:$0xff]  ;;  %v5059_v40 = vld [vmem:[#allocation5 + $0x78] sm:$0xff] }
 0x278   :  { %1589 = vmatprep.subr.mxu0 %v5044_v56  ;;  %1660 = vmatprep.subr.mxu1 %v5047_v62  ;;  %6748 = vst [vmem:[#allocation112_spill] sm:$0xff] %v5056_v36  ;;  %6749 = vst [vmem:[#allocation113_spill] sm:$0xff] %v5059_v40  ;;  %v5062_v56 = vld [vmem:[#allocation5 + $0x60] sm:$0xff]  ;;  %v5065_v62 = vld [vmem:[#allocation5 + $0x70] sm:$0xff] }
 0x279   :  { %1590 = vmatpush1.msra.mxu0 %v5050_v1  ;;  %1661 = vmatpush1.msra.mxu1 %v5053_v29  ;;  %6750 = vst [vmem:[#allocation114_spill] sm:$0xff] %v5062_v56  ;;  %6751 = vst [vmem:[#allocation115_spill] sm:$0xff] %v5065_v62  ;;  %v5068_v1 = vld [vmem:[#allocation5 + $0x48] sm:$0xff]  ;;  %v5071_v29 = vld [vmem:[#allocation5 + $0x58] sm:$0xff] }
 0x27a   :  { %1591 = vmatprep.subr.mxu0 %v5056_v36  ;;  %1662 = vmatprep.subr.mxu1 %v5059_v40  ;;  %6752 = vst [vmem:[#allocation116_spill] sm:$0xff] %v5068_v1  ;;  %6753 = vst [vmem:[#allocation110_spill] sm:$0xff] %v5071_v29  ;;  %v5074_v36 = vld [vmem:[#allocation5 + $0x40] sm:$0xff]  ;;  %v5077_v40 = vld [vmem:[#allocation5 + $0x50] sm:$0xff] }
 0x27b   :  { %1592 = vmatpush1.msra.mxu0 %v5062_v56  ;;  %1663 = vmatpush1.msra.mxu1 %v5065_v62  ;;  %6754 = vst [vmem:[#allocation117_spill] sm:$0xff] %v5074_v36  ;;  %6755 = vst [vmem:[#allocation118_spill] sm:$0xff] %v5077_v40  ;;  %v5080_v56 = vld [vmem:[#allocation5 + $0x28] sm:$0xff]  ;;  %v5083_v62 = vld [vmem:[#allocation5 + $0x38] sm:$0xff] }
 0x27c   :  { %1593 = vmatprep.subr.mxu0 %v5068_v1  ;;  %1664 = vmatprep.subr.mxu1 %v5071_v29  ;;  %6756 = vst [vmem:[#allocation119_spill] sm:$0xff] %v5080_v56  ;;  %6757 = vst [vmem:[#allocation120_spill] sm:$0xff] %v5083_v62  ;;  %v5086_v1 = vld [vmem:[#allocation5 + $0x20] sm:$0xff]  ;;  %v5089_v29 = vld [vmem:[#allocation5 + $0x30] sm:$0xff] }
 0x27d   :  { %1594 = vmatpush1.msra.mxu0 %v5074_v36  ;;  %1665 = vmatpush1.msra.mxu1 %v5077_v40  ;;  %6758 = vst [vmem:[#allocation121_spill] sm:$0xff] %v5086_v1  ;;  %6759 = vst [vmem:[#allocation122_spill] sm:$0xff] %v5089_v29  ;;  %v5092_v36 = vld [vmem:[#allocation5 + $0x8] sm:$0xff]  ;;  %v5095_v40 = vld [vmem:[#allocation5 + $0x18] sm:$0xff] }
 0x27e   :  { %1595 = vmatprep.subr.mxu0 %v5080_v56  ;;  %1666 = vmatprep.subr.mxu1 %v5083_v62  ;;  %6760 = vst [vmem:[#allocation106_spill] sm:$0xff] %v5092_v36  ;;  %6761 = vst [vmem:[#allocation123_spill] sm:$0xff] %v5095_v40  ;;  %v5098_v56 = vld [vmem:[#allocation5] sm:$0xff]  ;;  %v5102_v62 = vld [vmem:[#allocation5 + $0x10] sm:$0xff] }
 0x27f   :  { %1596 = vmatpush1.msra.mxu0 %v5086_v1  ;;  %1667 = vmatpush1.msra.mxu1 %v5089_v29  ;;  %6762 = vst [vmem:[#allocation124_spill] sm:$0xff] %v5098_v56  ;;  %6763 = vst [vmem:[#allocation125_spill] sm:$0xff] %v5102_v62  ;;  %v5106_v29 = vld [vmem:[#allocation7 + $0x1e8] sm:$0xff]  ;;  %v6766_v1 = vld [vmem:[#allocation39_spill] sm:$0xff] }
 0x280   :  { %1597 = vmatprep.subr.mxu0 %v5092_v36  ;;  %1668 = vmatprep.subr.mxu1 %v5095_v40  ;;  %6764 = vst [vmem:[#allocation126_spill] sm:$0xff] %v5106_v29  ;;  %v5109_v36 = vld [vmem:[#allocation7 + $0x1f8] sm:$0xff] }
 0x281   :  { %1598 = vmatpush1.msra.mxu0 %v5098_v56  ;;  %1631 = vmatprep.mubr.f32.mxu0 %v6614_v12  ;;  %6765 = vst [vmem:[#allocation127_spill] sm:$0xff] %v5109_v36 }
 0x282   :  { %1669 = vmatpush1.msra.mxu1 %v5102_v62  ;;  %1702 = vmatprep.mubr.f32.mxu1 %v6614_v12 }
 0x283   :  { %1737 = vmatprep.subr.mxu0 %v5106_v29  ;;  %1808 = vmatprep.subr.mxu1 %v5109_v36 }
 0x2e5   :  { %v1283_v40 = vpop.f32.mrf.mxu0  ;;  %v1354_v26 = vpop.f32.mrf.mxu1 }
 0x2e6   :  { %v1359_v14 = vadd.f32 %v1283_v40, %v6766_v1  ;;  %v1361_v29 = vadd.f32 %v1354_v26, %v6769_v55 }
 0x2e7   :  { %v1285_v56 = vpop.f32.mrf.mxu0  ;;  %v1356_v17 = vpop.f32.mrf.mxu1 }
 0x2e8   :  { %v3366_v2 = vmul.f32 -1.442695, %v1359_v14  ;;  %v1360_v63 = vadd.f32 %v1285_v56, %v6767_v5  ;;  %v1362_v12 = vadd.f32 %v1356_v17, %v6768_v4 }
 0x2ea   :  { %3469 = vpow2.f32 %v3366_v2  ;;  %v3367_v62 = vmul.f32 -1.442695, %v1360_v63  ;;  %v3368_v48 = vmul.f32 -1.442695, %v1362_v12 }
 0x2ec   :  { %3471 = vpow2.f32 %v3367_v62 }
 0x2ed   :  { %3473 = vtanh.f32 %v1361_v29 }
 0x2ee   :  { %3475 = vpow2.f32 %v3368_v48 }
 0x2f7   :  { %v3470_v41 = vpop.eup %3469 }
 0x2f8   :  { %v1366_v7 = vadd.f32 1.0, %v3470_v41 }
 0x2f9   :  { %v3472_v36 = vpop.eup %3471 }
 0x2fa   :  { %3477 = vrcp.f32 %v1366_v7  ;;  %v1372_v1 = vadd.f32 1.0, %v3472_v36  ;;  %v3474_v14 = vpop.eup %3473  ;;  %v6795_v36 = vld [vmem:[#allocation16_spill] sm:$0xff] }
 0x2fb   :  { %v3476_v5 = vpop.eup %3475 }
 0x2fc   :  { %3479 = vrcp.f32 %v1372_v1  ;;  %v1379_v62 = vadd.f32 1.0, %v3476_v5  ;;  %v6796_v1 = vld [vmem:[#allocation17_spill] sm:$0xff]  ;;  %v6798_v5 = vld [vmem:[#allocation19_spill] sm:$0xff] }
 0x2fe   :  { %3481 = vrcp.f32 %v1379_v62  ;;  %v6802_v62 = vld [vmem:[#allocation23_spill] sm:$0xff] }
 0x307   :  { %v3478_v2 = vpop.eup %3477 }
 0x308   :  { %v1383_v56 = vmul.f32 %v3478_v2, %v3474_v14  ;;  %v6797_v14 = vld [vmem:[#allocation18_spill] sm:$0xff]  ;;  %v6799_v2 = vld [vmem:[#allocation20_spill] sm:$0xff] }
 0x309   :  { %v3480_v63 = vpop.eup %3479 }
 0x30a   :  { %v1382_v40 = vmul.f32 %v3480_v63, %v4830_v16  ;;  %v6770_v16 = vld [vmem:[#allocation87_spill] sm:$0xff]  ;;  %v6801_v63 = vld [vmem:[#allocation22_spill] sm:$0xff] }
 0x30b   :  { %v3482_v12 = vpop.eup %3481 }
 0x30c   :  { %v5117_v4 = vadd.f32 %v1383_v56, %v1382_v40  ;;  %v6800_v56 = vld [vmem:[#allocation21_spill] sm:$0xff]  ;;  %v6803_v40 = vld [vmem:[#allocation24_spill] sm:$0xff] }
 0x30e   :  { %3483 = vtanh.f32 %v5117_v4 }
 0x31b   :  { %v3484_v41 = vpop.eup %3483 }
 0x31c   :  { %v1386_v55 = vmul.f32 %v3484_v41, %v3482_v12  ;;  %v6804_v12 = vld [vmem:[#allocation25_spill] sm:$0xff]  ;;  %v6805_v41 = vld [vmem:[#allocation26_spill] sm:$0xff] }
 0x31e   :  { %1557 = vst [vmem:[%s6029_s5 + $0x20] sm:$0xff] %v1386_v55  ;;  %1632 = vmatmul.mubr.f32.vlgmr.msra.gmra.mxu0 %v1386_v55  ;;  %1703 = vmatmul.mubr.f32.vlgmr.msra.gmra.mxu1 %v1386_v55  ;;  %v6806_v55 = vld [vmem:[#allocation27_spill] sm:$0xff] }
 0x31f   :  { %1738 = vmatpush1.msra.mxu0 %v4527_v3  ;;  %1809 = vmatpush1.msra.mxu1 %v6642_v20  ;;  %v6771_v20 = vld [vmem:[#allocation93_spill] sm:$0xff] }
 0x320   :  { %1739 = vmatprep.subr.mxu0 %v6643_v21  ;;  %1810 = vmatprep.subr.mxu1 %v6644_v6 }
 0x321   :  { %1740 = vmatpush1.msra.mxu0 %v6645_v23  ;;  %1811 = vmatpush1.msra.mxu1 %v6646_v24  ;;  %v6773_v24 = vld [vmem:[#allocation96_spill] sm:$0xff] }
 0x322   :  { %v1453_v7 = vpop.f32.mrf.mxu0  ;;  %1741 = vmatprep.subr.mxu0 %v6650_v30  ;;  %1812 = vmatprep.subr.mxu1 %v6651_v31  ;;  %v1524_v6 = vpop.f32.mrf.mxu1 }
 0x323   :  { %v1529_v48 = vadd.f32 %v1453_v7, %v6770_v16  ;;  %1742 = vmatpush1.msra.mxu0 %v6652_v33  ;;  %1813 = vmatpush1.msra.mxu1 %v6653_v34  ;;  %v1531_v30 = vadd.f32 %v1524_v6, %v6773_v24  ;;  %v6807_v7 = vld [vmem:[#allocation28_spill] sm:$0xff]  ;;  %v6808_v16 = vld [vmem:[#allocation29_spill] sm:$0xff]  ;;  %v6814_v6 = vld [vmem:[#allocation35_spill] sm:$0xff] }
 0x324   :  { %v1455_v17 = vpop.f32.mrf.mxu0  ;;  %1743 = vmatprep.subr.mxu0 %v6654_v37  ;;  %1814 = vmatprep.subr.mxu1 %v6655_v38  ;;  %v6774_v38 = vld [vmem:[#allocation133_spill] sm:$0xff]  ;;  %v6819_v24 = vld [vmem:[#allocation83_spill] sm:$0xff] }
 0x325   :  { %v3369_v3 = vmul.f32 -1.442695, %v1529_v48  ;;  %v1530_v21 = vadd.f32 %v1455_v17, %v6771_v20  ;;  %1744 = vmatpush1.msra.mxu0 %v4580_v8  ;;  %1815 = vmatpush1.msra.mxu1 %v6656_v39  ;;  %v1526_v8 = vpop.f32.mrf.mxu1  ;;  %v6809_v48 = vld [vmem:[#allocation30_spill] sm:$0xff]  ;;  %v6810_v17 = vld [vmem:[#allocation31_spill] sm:$0xff]  ;;  %v6812_v20 = vld [vmem:[#allocation33_spill] sm:$0xff] }
 0x326   :  { %1745 = vmatprep.subr.mxu0 %v6657_v42  ;;  %1816 = vmatprep.subr.mxu1 %v6658_v43  ;;  %v6775_v42 = vld [vmem:[#allocation134_spill] sm:$0xff]  ;;  %v6776_v43 = vld [vmem:[#allocation135_spill] sm:$0xff] }
 0x327   :  { %3485 = vpow2.f32 %v3369_v3  ;;  %v3370_v23 = vmul.f32 -1.442695, %v1530_v21  ;;  %1746 = vmatpush1.msra.mxu0 %v4597_v9  ;;  %1817 = vmatpush1.msra.mxu1 %v6659_v44  ;;  %v6772_v9 = vld [vmem:[#allocation102_spill] sm:$0xff]  ;;  %v6777_v44 = vld [vmem:[#allocation136_spill] sm:$0xff] }
 0x328   :  { %1747 = vmatprep.subr.mxu0 %v4606_v10  ;;  %1818 = vmatprep.subr.mxu1 %v6660_v45  ;;  %v1532_v10 = vadd.f32 %v1526_v8, %v6772_v9  ;;  %v6778_v45 = vld [vmem:[#allocation137_spill] sm:$0xff]  ;;  %v6811_v3 = vld [vmem:[#allocation32_spill] sm:$0xff]  ;;  %v6813_v21 = vld [vmem:[#allocation34_spill] sm:$0xff] }
 0x329   :  { %3487 = vpow2.f32 %v3370_v23  ;;  %1748 = vmatpush1.msra.mxu0 %v6661_v46  ;;  %1819 = vmatpush1.msra.mxu1 %v6662_v47  ;;  %v6779_v46 = vld [vmem:[#allocation138_spill] sm:$0xff]  ;;  %v6780_v47 = vld [vmem:[#allocation139_spill] sm:$0xff]  ;;  %v6815_v23 = vld [vmem:[#allocation37_spill] sm:$0xff] }
 0x32a   :  { %1749 = vmatprep.subr.mxu0 %v6663_v49  ;;  %1820 = vmatprep.subr.mxu1 %v6664_v50  ;;  %v3371_v31 = vmul.f32 -1.442695, %v1532_v10  ;;  %3489 = vtanh.f32 %v1531_v30  ;;  %v6781_v49 = vld [vmem:[#allocation140_spill] sm:$0xff]  ;;  %v6783_v50 = vld [vmem:[#allocation142_spill] sm:$0xff]  ;;  %v6820_v30 = vld [vmem:[#allocation85_spill] sm:$0xff] }
 0x32b   :  { %1750 = vmatpush1.msra.mxu0 %v6665_v51  ;;  %1821 = vmatpush1.msra.mxu1 %v6666_v52  ;;  %v6784_v51 = vld [vmem:[#allocation143_spill] sm:$0xff]  ;;  %v6785_v52 = vld [vmem:[#allocation144_spill] sm:$0xff]  ;;  %v6818_v10 = vld [vmem:[#allocation38_spill] sm:$0xff] }
 0x32c   :  { %1751 = vmatprep.subr.mxu0 %v6667_v53  ;;  %1822 = vmatprep.subr.mxu1 %v6668_v54  ;;  %3491 = vpow2.f32 %v3371_v31  ;;  %v6786_v53 = vld [vmem:[#allocation145_spill] sm:$0xff]  ;;  %v6787_v54 = vld [vmem:[#allocation146_spill] sm:$0xff]  ;;  %v6816_v8 = vld [vmem:[#allocation36_spill] sm:$0xff] }
 0x32d   :  { %1752 = vmatpush1.msra.mxu0 %v6670_v57  ;;  %1823 = vmatpush1.msra.mxu1 %v6671_v58  ;;  %v6788_v57 = vld [vmem:[#allocation147_spill] sm:$0xff]  ;;  %v6789_v58 = vld [vmem:[#allocation148_spill] sm:$0xff]  ;;  %v6821_v31 = vld [vmem:[#allocation86_spill] sm:$0xff] }
 0x32e   :  { %1753 = vmatprep.subr.mxu0 %v6672_v59  ;;  %1824 = vmatprep.subr.mxu1 %v6673_v0  ;;  %v6790_v59 = vmov 0.0   ;;  %v6791_v0 = vld [vmem:[#allocation149_spill] sm:$0xff]  ;;  %v6817_v9 = vld [vmem:[#allocation40_spill] sm:$0xff] }
 0x32f   :  { %1754 = vmatpush1.msra.mxu0 %v6674_v15  ;;  %1825 = vmatpush1.msra.mxu1 %v6675_v13  ;;  %v6792_v15 = vld [vmem:[#allocation13_spill] sm:$0xff]  ;;  %v6793_v13 = vld [vmem:[#allocation14_spill] sm:$0xff] }
 0x330   :  { %1755 = vmatprep.subr.mxu0 %v6677_v61  ;;  %1826 = vmatprep.subr.mxu1 %v6678_v60 }
 0x331   :  { %1756 = vmatpush1.msra.mxu0 %v6679_v18  ;;  %1827 = vmatpush1.msra.mxu1 %v6680_v19 }
 0x332   :  { %1757 = vmatprep.subr.mxu0 %v6681_v22  ;;  %1828 = vmatprep.subr.mxu1 %v6682_v25 }
 0x333   :  { %1758 = vmatpush1.msra.mxu0 %v6683_v27  ;;  %1829 = vmatpush1.msra.mxu1 %v6684_v28  ;;  %v6794_v27 = vld [vmem:[#allocation15_spill] sm:$0xff] }
 0x334   :  { %v3486_v33 = vpop.eup %3485  ;;  %1759 = vmatprep.subr.mxu0 %v6685_v32  ;;  %1830 = vmatprep.subr.mxu1 %v6686_v35 }
 0x335   :  { %v1536_v34 = vadd.f32 1.0, %v3486_v33  ;;  %1760 = vmatpush1.msra.mxu0 %v4689_v11  ;;  %1831 = vmatpush1.msra.mxu1 %v6774_v38  ;;  %v6782_v11 = vld [vmem:[#allocation141_spill] sm:$0xff]  ;;  %v6822_v33 = vld [vmem:[#allocation88_spill] sm:$0xff] }
 0x336   :  { %v3488_v37 = vpop.eup %3487  ;;  %1761 = vmatprep.subr.mxu0 %v6775_v42  ;;  %1832 = vmatprep.subr.mxu1 %v6776_v43  ;;  %v6825_v38 = vld [vmem:[#allocation101_spill] sm:$0xff]  ;;  %v6827_v42 = vld [vmem:[#allocation91_spill] sm:$0xff]  ;;  %v6828_v43 = vld [vmem:[#allocation92_spill] sm:$0xff] }
 0x337   :  { %3493 = vrcp.f32 %v1536_v34  ;;  %v1542_v39 = vadd.f32 1.0, %v3488_v37  ;;  %1762 = vmatpush1.msra.mxu0 %v6777_v44  ;;  %1833 = vmatpush1.msra.mxu1 %v6778_v45  ;;  %v3490_v61 = vpop.eup %3489  ;;  %v6823_v34 = vld [vmem:[#allocation89_spill] sm:$0xff]  ;;  %v6824_v37 = vld [vmem:[#allocation62_spill] sm:$0xff]  ;;  %v6830_v45 = vld [vmem:[#allocation95_spill] sm:$0xff] }
 0x338   :  { %1763 = vmatprep.subr.mxu0 %v6779_v46  ;;  %1834 = vmatprep.subr.mxu1 %v6780_v47  ;;  %v6829_v44 = vld [vmem:[#allocation94_spill] sm:$0xff]  ;;  %v6831_v46 = vld [vmem:[#allocation97_spill] sm:$0xff] }
 0x339   :  { %3495 = vrcp.f32 %v1542_v39  ;;  %1764 = vmatpush1.msra.mxu0 %v6781_v49  ;;  %1835 = vmatpush1.msra.mxu1 %v6782_v11  ;;  %v3492_v60 = vpop.eup %3491  ;;  %v6826_v39 = vld [vmem:[#allocation99_spill] sm:$0xff]  ;;  %v6832_v47 = vld [vmem:[#allocation98_spill] sm:$0xff]  ;;  %v6833_v49 = vld [vmem:[#allocation100_spill] sm:$0xff] }
 0x33a   :  { %1765 = vmatprep.subr.mxu0 %v6783_v50  ;;  %1836 = vmatprep.subr.mxu1 %v6784_v51  ;;  %v1549_v25 = vadd.f32 1.0, %v3492_v60  ;;  %v6834_v11 = vld [vmem:[#allocation103_spill] sm:$0xff]  ;;  %v6835_v50 = vld [vmem:[#allocation104_spill] sm:$0xff]  ;;  %v6836_v51 = vld [vmem:[#allocation105_spill] sm:$0xff] }
 0x33b   :  { %1766 = vmatpush1.msra.mxu0 %v6785_v52  ;;  %1837 = vmatpush1.msra.mxu1 %v6786_v53  ;;  %v6837_v52 = vld [vmem:[#allocation107_spill] sm:$0xff]  ;;  %v6838_v53 = vld [vmem:[#allocation108_spill] sm:$0xff] }
 0x33c   :  { %1767 = vmatprep.subr.mxu0 %v6787_v54  ;;  %1838 = vmatprep.subr.mxu1 %v6788_v57  ;;  %3497 = vrcp.f32 %v1549_v25  ;;  %v6839_v54 = vld [vmem:[#allocation109_spill] sm:$0xff]  ;;  %v6840_v57 = vld [vmem:[#allocation111_spill] sm:$0xff]  ;;  %v6848_v25 = vld [vmem:[#allocation118_spill] sm:$0xff] }
 0x33d   :  { %1768 = vmatpush1.msra.mxu0 %v6789_v58  ;;  %1801 = vmatprep.mubr.f32.mxu0 %v6790_v59  ;;  %v6841_v58 = vld [vmem:[#allocation112_spill] sm:$0xff]  ;;  %v6844_v60 = vld [vmem:[#allocation115_spill] sm:$0xff] }
 0x33e   :  { %1839 = vmatpush1.msra.mxu1 %v6791_v0  ;;  %1872 = vmatprep.mubr.f32.mxu1 %v6790_v59  ;;  %v6842_v0 = vld [vmem:[#allocation113_spill] sm:$0xff] }
 0x33f   :  { %1917 = vmatprep.subr.mxu0 %v6792_v15  ;;  %1988 = vmatprep.subr.mxu1 %v6793_v13 }
 0x344   :  { %v3494_v18 = vpop.eup %3493 }
 0x345   :  { %v1553_v19 = vmul.f32 %v3494_v18, %v3490_v61  ;;  %v6843_v61 = vld [vmem:[#allocation114_spill] sm:$0xff]  ;;  %v6845_v18 = vld [vmem:[#allocation116_spill] sm:$0xff] }
 0x346   :  { %v3496_v22 = vpop.eup %3495 }
 0x347   :  { %v1552_v28 = vmul.f32 %v3496_v22, %v6794_v27  ;;  %v6847_v22 = vld [vmem:[#allocation117_spill] sm:$0xff]  ;;  %v6849_v27 = vld [vmem:[#allocation119_spill] sm:$0xff] }
 0x349   :  { %v5194_v32 = vadd.f32 %v1553_v19, %v1552_v28  ;;  %v3498_v35 = vpop.eup %3497  ;;  %v6846_v19 = vld [vmem:[#allocation110_spill] sm:$0xff]  ;;  %v6850_v28 = vld [vmem:[#allocation120_spill] sm:$0xff] }
 0x34b   :  { %3499 = vtanh.f32 %v5194_v32 }
 0x358   :  { %v3500_v26 = vpop.eup %3499 }
 0x359   :  { %v1556_v29 = vmul.f32 %v3500_v26, %v3498_v35  ;;  %v6851_v35 = vld [vmem:[#allocation121_spill] sm:$0xff]  ;;  %v6852_v26 = vld [vmem:[#allocation122_spill] sm:$0xff] }
 0x35b   :  { %1558 = vst [vmem:[%s6029_s5 + $0x58] sm:$0xff] %v1556_v29  ;;  %1802 = vmatmul.mubr.f32.vlgmr.msra.gmra.mxu0 %v1556_v29  ;;  %1873 = vmatmul.mubr.f32.vlgmr.msra.gmra.mxu1 %v1556_v29  ;;  %v6853_v29 = vld [vmem:[#allocation106_spill] sm:$0xff] }
 0x35c   :  { %1918 = vmatpush1.msra.mxu0 %v6795_v36  ;;  %1989 = vmatpush1.msra.mxu1 %v6796_v1 }
 0x35d   :  { %1919 = vmatprep.subr.mxu0 %v6797_v14  ;;  %1990 = vmatprep.subr.mxu1 %v6798_v5 }
 0x35e   :  { %1920 = vmatpush1.msra.mxu0 %v6799_v2  ;;  %1991 = vmatpush1.msra.mxu1 %v6800_v56 }
 0x35f   :  { %1921 = vmatprep.subr.mxu0 %v6801_v63  ;;  %1992 = vmatprep.subr.mxu1 %v6802_v62 }
 0x360   :  { %1922 = vmatpush1.msra.mxu0 %v6803_v40  ;;  %1993 = vmatpush1.msra.mxu1 %v6804_v12 }
 0x361   :  { %1923 = vmatprep.subr.mxu0 %v6805_v41  ;;  %1994 = vmatprep.subr.mxu1 %v6806_v55 }
 0x362   :  { %1924 = vmatpush1.msra.mxu0 %v6807_v7  ;;  %1995 = vmatpush1.msra.mxu1 %v6808_v16 }
 0x363   :  { %1925 = vmatprep.subr.mxu0 %v6809_v48  ;;  %1996 = vmatprep.subr.mxu1 %v6810_v17 }
 0x364   :  { %1926 = vmatpush1.msra.mxu0 %v6811_v3  ;;  %1997 = vmatpush1.msra.mxu1 %v6812_v20 }
 0x365   :  { %1927 = vmatprep.subr.mxu0 %v6813_v21  ;;  %1998 = vmatprep.subr.mxu1 %v6814_v6 }
 0x366   :  { %1928 = vmatpush1.msra.mxu0 %v6815_v23  ;;  %1999 = vmatpush1.msra.mxu1 %v6816_v8 }
 0x367   :  { %1929 = vmatprep.subr.mxu0 %v6817_v9  ;;  %2000 = vmatprep.subr.mxu1 %v6818_v10 }
 0x368   :  { %1930 = vmatpush1.msra.mxu0 %v6819_v24  ;;  %2001 = vmatpush1.msra.mxu1 %v6820_v30 }
 0x369   :  { %1931 = vmatprep.subr.mxu0 %v6821_v31  ;;  %2002 = vmatprep.subr.mxu1 %v6822_v33 }
 0x36a   :  { %1932 = vmatpush1.msra.mxu0 %v6823_v34  ;;  %2003 = vmatpush1.msra.mxu1 %v6824_v37 }
 0x36b   :  { %1933 = vmatprep.subr.mxu0 %v6825_v38  ;;  %2004 = vmatprep.subr.mxu1 %v6826_v39 }
 0x36c   :  { %1934 = vmatpush1.msra.mxu0 %v6827_v42  ;;  %2005 = vmatpush1.msra.mxu1 %v6828_v43 }
 0x36d   :  { %1935 = vmatprep.subr.mxu0 %v6829_v44  ;;  %2006 = vmatprep.subr.mxu1 %v6830_v45 }
 0x36e   :  { %1936 = vmatpush1.msra.mxu0 %v6831_v46  ;;  %2007 = vmatpush1.msra.mxu1 %v6832_v47 }
 0x36f   :  { %1937 = vmatprep.subr.mxu0 %v6833_v49  ;;  %2008 = vmatprep.subr.mxu1 %v6834_v11 }
 0x370   :  { %1938 = vmatpush1.msra.mxu0 %v6835_v50  ;;  %2009 = vmatpush1.msra.mxu1 %v6836_v51 }
 0x371   :  { %1939 = vmatprep.subr.mxu0 %v6837_v52  ;;  %2010 = vmatprep.subr.mxu1 %v6838_v53 }
 0x372   :  { %1940 = vmatpush1.msra.mxu0 %v6839_v54  ;;  %2011 = vmatpush1.msra.mxu1 %v6840_v57  ;;  %v6861_v57 = vld [vmem:[#allocation48_spill] sm:$0xff]  ;;  %v6862_v54 = vld [vmem:[#allocation46_spill] sm:$0xff] }
 0x373   :  { %1941 = vmatprep.subr.mxu0 %v6841_v58  ;;  %2012 = vmatprep.subr.mxu1 %v6842_v0 }
 0x374   :  { %1942 = vmatpush1.msra.mxu0 %v6843_v61  ;;  %2013 = vmatpush1.msra.mxu1 %v6844_v60  ;;  %v6854_v61 = vld [vmem:[#allocation123_spill] sm:$0xff]  ;;  %v6855_v60 = vld [vmem:[#allocation124_spill] sm:$0xff] }
 0x375   :  { %1943 = vmatprep.subr.mxu0 %v6845_v18  ;;  %2014 = vmatprep.subr.mxu1 %v6846_v19  ;;  %v6856_v19 = vld [vmem:[#allocation125_spill] sm:$0xff] }
 0x376   :  { %1944 = vmatpush1.msra.mxu0 %v6847_v22  ;;  %2015 = vmatpush1.msra.mxu1 %v6848_v25  ;;  %v6857_v25 = vld [vmem:[#allocation126_spill] sm:$0xff] }
 0x377   :  { %1945 = vmatprep.subr.mxu0 %v6849_v27  ;;  %2016 = vmatprep.subr.mxu1 %v6850_v28  ;;  %v6858_v27 = vld [vmem:[#allocation127_spill] sm:$0xff] }
 0x378   :  { %1946 = vmatpush1.msra.mxu0 %v6851_v35  ;;  %2017 = vmatpush1.msra.mxu1 %v6852_v26  ;;  %v6859_v35 = vld [vmem:[#allocation43_spill] sm:$0xff] }
 0x379   :  { %1947 = vmatprep.subr.mxu0 %v6853_v29  ;;  %2018 = vmatprep.subr.mxu1 %v6854_v61  ;;  %v6860_v29 = vld [vmem:[#allocation45_spill] sm:$0xff] }
 0x37a   :  { %1948 = vmatpush1.msra.mxu0 %v6855_v60  ;;  %1981 = vmatprep.mubr.f32.mxu0 %v6790_v59 }
 0x37b   :  { %2019 = vmatpush1.msra.mxu1 %v6856_v19  ;;  %2052 = vmatprep.mubr.f32.mxu1 %v6790_v59 }
 0x37c   :  { %2087 = vmatprep.subr.mxu0 %v6857_v25  ;;  %2158 = vmatprep.subr.mxu1 %v6858_v27 }
 0x3de   :  { %v1633_v28 = vpop.f32.mrf.mxu0  ;;  %v1704_v61 = vpop.f32.mrf.mxu1 }
 0x3df   :  { %v1709_v22 = vadd.f32 %v1633_v28, %v6859_v35  ;;  %v1711_v53 = vadd.f32 %v1704_v61, %v6862_v54  ;;  %v5286_v61 = vld [vmem:[#allocation7 + $0x1d8] sm:$0xff] }
 0x3e0   :  { %v1635_v26 = vpop.f32.mrf.mxu0  ;;  %v1706_v58 = vpop.f32.mrf.mxu1 }
 0x3e1   :  { %v3372_v18 = vmul.f32 -1.442695, %v1709_v22  ;;  %v1710_v0 = vadd.f32 %v1635_v26, %v6860_v29  ;;  %v1712_v19 = vadd.f32 %v1706_v58, %v6861_v57 }
 0x3e3   :  { %3501 = vpow2.f32 %v3372_v18  ;;  %v3373_v60 = vmul.f32 -1.442695, %v1710_v0  ;;  %v3374_v52 = vmul.f32 -1.442695, %v1712_v19 }
 0x3e5   :  { %3503 = vpow2.f32 %v3373_v60 }
 0x3e6   :  { %3505 = vtanh.f32 %v1711_v53 }
 0x3e7   :  { %3507 = vpow2.f32 %v3374_v52  ;;  %v5280_v52 = vld [vmem:[#allocation7 + $0x1f0] sm:$0xff] }
 0x3f0   :  { %v3502_v25 = vpop.eup %3501 }
 0x3f1   :  { %v1716_v51 = vadd.f32 1.0, %v3502_v25  ;;  %v5289_v25 = vld [vmem:[#allocation7 + $0x1c0] sm:$0xff] }
 0x3f2   :  { %v3504_v27 = vpop.eup %3503 }
 0x3f3   :  { %3509 = vrcp.f32 %v1716_v51  ;;  %v1722_v28 = vadd.f32 1.0, %v3504_v27  ;;  %v3506_v22 = vpop.eup %3505  ;;  %v5277_v51 = vld [vmem:[#allocation7 + $0x1e0] sm:$0xff]  ;;  %v5292_v27 = vld [vmem:[#allocation7 + $0x1d0] sm:$0xff] }
 0x3f4   :  { %v3508_v35 = vpop.eup %3507 }
 0x3f5   :  { %3511 = vrcp.f32 %v1722_v28  ;;  %v1729_v60 = vadd.f32 1.0, %v3508_v35  ;;  %v6863_v28 = vld [vmem:[#allocation80_spill] sm:$0xff]  ;;  %v5296_v35 = vld [vmem:[#allocation7 + $0x1a8] sm:$0xff] }
 0x3f7   :  { %3513 = vrcp.f32 %v1729_v60  ;;  %v5305_v60 = vld [vmem:[#allocation7 + $0x1b0] sm:$0xff] }
 0x3f8   :  { %6866 = vst [vmem:[#allocation130_spill] sm:$0xff] %v5305_v60 }
 0x400   :  { %v3510_v18 = vpop.eup %3509 }
 0x401   :  { %v1733_v26 = vmul.f32 %v3510_v18, %v3506_v22  ;;  %v5299_v18 = vld [vmem:[#allocation7 + $0x1b8] sm:$0xff] }
 0x402   :  { %v3512_v0 = vpop.eup %3511  ;;  %6864 = vst [vmem:[#allocation128_spill] sm:$0xff] %v5299_v18 }
 0x403   :  { %v1732_v29 = vmul.f32 %v3512_v0, %v5117_v4  ;;  %v5283_v4 = vld [vmem:[#allocation7 + $0x1c8] sm:$0xff]  ;;  %v5302_v0 = vld [vmem:[#allocation7 + $0x1a0] sm:$0xff] }
 0x404   :  { %v3514_v54 = vpop.eup %3513  ;;  %6865 = vst [vmem:[#allocation129_spill] sm:$0xff] %v5302_v0 }
 0x405   :  { %v5271_v57 = vadd.f32 %v1733_v26, %v1732_v29 }
 0x407   :  { %3515 = vtanh.f32 %v5271_v57 }
 0x414   :  { %v3516_v53 = vpop.eup %3515 }
 0x415   :  { %v1736_v58 = vmul.f32 %v3516_v53, %v3514_v54  ;;  %v6867_v54 = vld [vmem:[#allocation82_spill] sm:$0xff] }
 0x417   :  { %1907 = vst [vmem:[%s6029_s5 + $0x30] sm:$0xff] %v1736_v58  ;;  %1982 = vmatmul.mubr.f32.vlgmr.msra.gmra.mxu0 %v1736_v58  ;;  %2053 = vmatmul.mubr.f32.vlgmr.msra.gmra.mxu1 %v1736_v58  ;;  %v5309_v58 = vld [vmem:[#allocation7 + $0x188] sm:$0xff] }
 0x418   :  { %2088 = vmatpush1.msra.mxu0 %v5277_v51  ;;  %2159 = vmatpush1.msra.mxu1 %v5280_v52  ;;  %6868 = vst [vmem:[#allocation131_spill] sm:$0xff] %v5309_v58 }
 0x419   :  { %2089 = vmatprep.subr.mxu0 %v5283_v4  ;;  %2160 = vmatprep.subr.mxu1 %v5286_v61 }
 0x41a   :  { %2090 = vmatpush1.msra.mxu0 %v5289_v25  ;;  %2161 = vmatpush1.msra.mxu1 %v5292_v27 }
 0x41b   :  { %v1803_v19 = vpop.f32.mrf.mxu0  ;;  %2091 = vmatprep.subr.mxu0 %v5296_v35  ;;  %2162 = vmatprep.subr.mxu1 %v5299_v18 }
 0x41c   :  { %v1879_v22 = vadd.f32 %v1803_v19, %v6863_v28  ;;  %2092 = vmatpush1.msra.mxu0 %v5302_v0  ;;  %2163 = vmatpush1.msra.mxu1 %v5305_v60  ;;  %v5312_v19 = vld [vmem:[#allocation7 + $0x198] sm:$0xff]  ;;  %v5315_v28 = vld [vmem:[#allocation7 + $0x180] sm:$0xff]  ;;  %v5318_v0 = vld [vmem:[#allocation7 + $0x190] sm:$0xff] }
 0x41d   :  { %v1805_v26 = vpop.f32.mrf.mxu0  ;;  %2093 = vmatprep.subr.mxu0 %v5309_v58  ;;  %6869 = vst [vmem:[#allocation132_spill] sm:$0xff] %v5312_v19  ;;  %2164 = vmatprep.subr.mxu1 %v5312_v19  ;;  %6870 = vst [vmem:[#allocation39_spill] sm:$0xff] %v5315_v28  ;;  %v5327_v19 = vld [vmem:[#allocation7 + $0x160] sm:$0xff] }
 0x41e   :  { %v3375_v29 = vmul.f32 -1.442695, %v1879_v22  ;;  %v1880_v53 = vadd.f32 %v1805_v26, %v6867_v54  ;;  %2094 = vmatpush1.msra.mxu0 %v5315_v28  ;;  %6871 = vst [vmem:[#allocation41_spill] sm:$0xff] %v5318_v0  ;;  %2165 = vmatpush1.msra.mxu1 %v5318_v0  ;;  %v1874_v22 = vpop.f32.mrf.mxu1  ;;  %v5321_v26 = vld [vmem:[#allocation7 + $0x168] sm:$0xff]  ;;  %v5324_v54 = vld [vmem:[#allocation7 + $0x178] sm:$0xff]  ;;  %6874 = vst [vmem:[#allocation87_spill] sm:$0xff] %v5327_v19 }
 0x41f   :  { %6872 = vst [vmem:[#allocation44_spill] sm:$0xff] %v5321_v26  ;;  %2095 = vmatprep.subr.mxu0 %v5321_v26  ;;  %6873 = vst [vmem:[#allocation42_spill] sm:$0xff] %v5324_v54  ;;  %2166 = vmatprep.subr.mxu1 %v5324_v54  ;;  %v5330_v28 = vld [vmem:[#allocation7 + $0x170] sm:$0xff]  ;;  %v5339_v26 = vld [vmem:[#allocation7 + $0x140] sm:$0xff] }
 0x420   :  { %3517 = vpow2.f32 %v3375_v29  ;;  %v3376_v60 = vmul.f32 -1.442695, %v1880_v53  ;;  %2096 = vmatpush1.msra.mxu0 %v5327_v19  ;;  %6875 = vst [vmem:[#allocation93_spill] sm:$0xff] %v5330_v28  ;;  %2167 = vmatpush1.msra.mxu1 %v5330_v28  ;;  %v5333_v29 = vld [vmem:[#allocation7 + $0x148] sm:$0xff]  ;;  %v5336_v53 = vld [vmem:[#allocation7 + $0x158] sm:$0xff]  ;;  %6878 = vst [vmem:[#allocation133_spill] sm:$0xff] %v5339_v26  ;;  %v1876_v19 = vpop.f32.mrf.mxu1 }
 0x421   :  { %6876 = vst [vmem:[#allocation102_spill] sm:$0xff] %v5333_v29  ;;  %2097 = vmatprep.subr.mxu0 %v5333_v29  ;;  %6877 = vst [vmem:[#allocation96_spill] sm:$0xff] %v5336_v53  ;;  %2168 = vmatprep.subr.mxu1 %v5336_v53  ;;  %v5342_v54 = vld [vmem:[#allocation7 + $0x150] sm:$0xff]  ;;  %v5345_v0 = vld [vmem:[#allocation7 + $0x128] sm:$0xff] }
 0x422   :  { %3519 = vpow2.f32 %v3376_v60  ;;  %2098 = vmatpush1.msra.mxu0 %v5339_v26  ;;  %6879 = vst [vmem:[#allocation134_spill] sm:$0xff] %v5342_v54  ;;  %2169 = vmatpush1.msra.mxu1 %v5342_v54  ;;  %6880 = vst [vmem:[#allocation135_spill] sm:$0xff] %v5345_v0  ;;  %v5348_v60 = vld [vmem:[#allocation7 + $0x138] sm:$0xff]  ;;  %v5351_v29 = vld [vmem:[#allocation7 + $0x120] sm:$0xff] }
 0x423   :  { %2099 = vmatprep.subr.mxu0 %v5345_v0  ;;  %6881 = vst [vmem:[#allocation136_spill] sm:$0xff] %v5348_v60  ;;  %2170 = vmatprep.subr.mxu1 %v5348_v60  ;;  %6882 = vst [vmem:[#allocation137_spill] sm:$0xff] %v5351_v29  ;;  %v5354_v53 = vld [vmem:[#allocation7 + $0x130] sm:$0xff]  ;;  %v5357_v26 = vld [vmem:[#allocation7 + $0x108] sm:$0xff] }
 0x424   :  { %2100 = vmatpush1.msra.mxu0 %v5351_v29  ;;  %6883 = vst [vmem:[#allocation138_spill] sm:$0xff] %v5354_v53  ;;  %2171 = vmatpush1.msra.mxu1 %v5354_v53  ;;  %6884 = vst [vmem:[#allocation139_spill] sm:$0xff] %v5357_v26  ;;  %v5360_v54 = vld [vmem:[#allocation7 + $0x118] sm:$0xff]  ;;  %v6886_v0 = vld [vmem:[#allocation90_spill] sm:$0xff] }
 0x425   :  { %2101 = vmatprep.subr.mxu0 %v5357_v26  ;;  %6885 = vst [vmem:[#allocation140_spill] sm:$0xff] %v5360_v54  ;;  %2172 = vmatprep.subr.mxu1 %v5360_v54  ;;  %v1882_v28 = vadd.f32 %v1876_v19, %v6886_v0  ;;  %v5364_v58 = vld [vmem:[#allocation7 + $0x100] sm:$0xff]  ;;  %v5367_v60 = vld [vmem:[#allocation7 + $0x110] sm:$0xff]  ;;  %v5370_v29 = vld [vmem:[#allocation7 + $0xe8] sm:$0xff] }
 0x426   :  { %6887 = vst [vmem:[#allocation141_spill] sm:$0xff] %v5364_v58  ;;  %2102 = vmatpush1.msra.mxu0 %v5364_v58  ;;  %6888 = vst [vmem:[#allocation142_spill] sm:$0xff] %v5367_v60  ;;  %2173 = vmatpush1.msra.mxu1 %v5367_v60  ;;  %v5373_v53 = vld [vmem:[#allocation7 + $0xf8] sm:$0xff]  ;;  %v5376_v26 = vld [vmem:[#allocation7 + $0xe0] sm:$0xff] }
 0x427   :  { %6889 = vst [vmem:[#allocation143_spill] sm:$0xff] %v5370_v29  ;;  %2103 = vmatprep.subr.mxu0 %v5370_v29  ;;  %6890 = vst [vmem:[#allocation144_spill] sm:$0xff] %v5373_v53  ;;  %2174 = vmatprep.subr.mxu1 %v5373_v53  ;;  %v5379_v0 = vld [vmem:[#allocation7 + $0xf0] sm:$0xff]  ;;  %v6893_v19 = vld [vmem:[#allocation84_spill] sm:$0xff]  ;;  %v3377_v29 = vmul.f32 -1.442695, %v1882_v28 }
 0x428   :  { %6891 = vst [vmem:[#allocation145_spill] sm:$0xff] %v5376_v26  ;;  %2104 = vmatpush1.msra.mxu0 %v5376_v26  ;;  %6892 = vst [vmem:[#allocation146_spill] sm:$0xff] %v5379_v0  ;;  %2175 = vmatpush1.msra.mxu1 %v5379_v0  ;;  %v1881_v58 = vadd.f32 %v1874_v22, %v6893_v19  ;;  %v5383_v54 = vld [vmem:[#allocation7 + $0xc8] sm:$0xff]  ;;  %v5386_v60 = vld [vmem:[#allocation7 + $0xd8] sm:$0xff] }
 0x429   :  { %6894 = vst [vmem:[#allocation147_spill] sm:$0xff] %v5383_v54  ;;  %2105 = vmatprep.subr.mxu0 %v5383_v54  ;;  %6895 = vst [vmem:[#allocation148_spill] sm:$0xff] %v5386_v60  ;;  %2176 = vmatprep.subr.mxu1 %v5386_v60  ;;  %v5389_v53 = vld [vmem:[#allocation7 + $0xc0] sm:$0xff]  ;;  %v5392_v26 = vld [vmem:[#allocation7 + $0xd0] sm:$0xff] }
 0x42a   :  { %6896 = vst [vmem:[#allocation149_spill] sm:$0xff] %v5389_v53  ;;  %2106 = vmatpush1.msra.mxu0 %v5389_v53  ;;  %6897 = vst [vmem:[#allocation13_spill] sm:$0xff] %v5392_v26  ;;  %2177 = vmatpush1.msra.mxu1 %v5392_v26  ;;  %v5395_v0 = vld [vmem:[#allocation7 + $0xa8] sm:$0xff]  ;;  %v5398_v22 = vld [vmem:[#allocation7 + $0xb8] sm:$0xff]  ;;  %3521 = vtanh.f32 %v1881_v58 }
 0x42b   :  { %6898 = vst [vmem:[#allocation14_spill] sm:$0xff] %v5395_v0  ;;  %2107 = vmatprep.subr.mxu0 %v5395_v0  ;;  %6899 = vst [vmem:[#allocation15_spill] sm:$0xff] %v5398_v22  ;;  %2178 = vmatprep.subr.mxu1 %v5398_v22  ;;  %v5401_v54 = vld [vmem:[#allocation7 + $0xa0] sm:$0xff]  ;;  %v5404_v28 = vld [vmem:[#allocation7 + $0xb0] sm:$0xff]  ;;  %3523 = vpow2.f32 %v3377_v29 }
 0x42c   :  { %6900 = vst [vmem:[#allocation16_spill] sm:$0xff] %v5401_v54  ;;  %2108 = vmatpush1.msra.mxu0 %v5401_v54  ;;  %6901 = vst [vmem:[#allocation17_spill] sm:$0xff] %v5404_v28  ;;  %2179 = vmatpush1.msra.mxu1 %v5404_v28  ;;  %v5407_v26 = vld [vmem:[#allocation7 + $0x88] sm:$0xff]  ;;  %v5410_v0 = vld [vmem:[#allocation7 + $0x98] sm:$0xff] }
 0x42d   :  { %v3518_v19 = vpop.eup %3517  ;;  %6902 = vst [vmem:[#allocation18_spill] sm:$0xff] %v5407_v26  ;;  %2109 = vmatprep.subr.mxu0 %v5407_v26  ;;  %6903 = vst [vmem:[#allocation19_spill] sm:$0xff] %v5410_v0  ;;  %2180 = vmatprep.subr.mxu1 %v5410_v0  ;;  %v5413_v60 = vld [vmem:[#allocation7 + $0x80] sm:$0xff]  ;;  %v5416_v54 = vld [vmem:[#allocation7 + $0x90] sm:$0xff] }
 0x42e   :  { %v1886_v53 = vadd.f32 1.0, %v3518_v19  ;;  %6904 = vst [vmem:[#allocation20_spill] sm:$0xff] %v5413_v60  ;;  %2110 = vmatpush1.msra.mxu0 %v5413_v60  ;;  %6905 = vst [vmem:[#allocation21_spill] sm:$0xff] %v5416_v54  ;;  %2181 = vmatpush1.msra.mxu1 %v5416_v54  ;;  %v5419_v19 = vld [vmem:[#allocation7 + $0x68] sm:$0xff]  ;;  %v5422_v26 = vld [vmem:[#allocation7 + $0x78] sm:$0xff] }
 0x42f   :  { %v3520_v22 = vpop.eup %3519  ;;  %6906 = vst [vmem:[#allocation22_spill] sm:$0xff] %v5419_v19  ;;  %2111 = vmatprep.subr.mxu0 %v5419_v19  ;;  %6907 = vst [vmem:[#allocation23_spill] sm:$0xff] %v5422_v26  ;;  %2182 = vmatprep.subr.mxu1 %v5422_v26  ;;  %v5425_v0 = vld [vmem:[#allocation7 + $0x60] sm:$0xff]  ;;  %v5428_v29 = vld [vmem:[#allocation7 + $0x70] sm:$0xff] }
 0x430   :  { %3525 = vrcp.f32 %v1886_v53  ;;  %v1892_v58 = vadd.f32 1.0, %v3520_v22  ;;  %6908 = vst [vmem:[#allocation24_spill] sm:$0xff] %v5425_v0  ;;  %2112 = vmatpush1.msra.mxu0 %v5425_v0  ;;  %6909 = vst [vmem:[#allocation25_spill] sm:$0xff] %v5428_v29  ;;  %2183 = vmatpush1.msra.mxu1 %v5428_v29  ;;  %v5431_v54 = vld [vmem:[#allocation7 + $0x48] sm:$0xff]  ;;  %v5434_v53 = vld [vmem:[#allocation7 + $0x58] sm:$0xff] }
 0x431   :  { %6910 = vst [vmem:[#allocation26_spill] sm:$0xff] %v5431_v54  ;;  %2113 = vmatprep.subr.mxu0 %v5431_v54  ;;  %6911 = vst [vmem:[#allocation27_spill] sm:$0xff] %v5434_v53  ;;  %2184 = vmatprep.subr.mxu1 %v5434_v53  ;;  %v5437_v22 = vld [vmem:[#allocation7 + $0x40] sm:$0xff]  ;;  %v5440_v26 = vld [vmem:[#allocation7 + $0x50] sm:$0xff] }
 0x432   :  { %3527 = vrcp.f32 %v1892_v58  ;;  %6912 = vst [vmem:[#allocation28_spill] sm:$0xff] %v5437_v22  ;;  %2114 = vmatpush1.msra.mxu0 %v5437_v22  ;;  %6913 = vst [vmem:[#allocation29_spill] sm:$0xff] %v5440_v26  ;;  %2185 = vmatpush1.msra.mxu1 %v5440_v26  ;;  %v5443_v0 = vld [vmem:[#allocation7 + $0x28] sm:$0xff]  ;;  %v5446_v58 = vld [vmem:[#allocation7 + $0x38] sm:$0xff] }
 0x433   :  { %6914 = vst [vmem:[#allocation30_spill] sm:$0xff] %v5443_v0  ;;  %2115 = vmatprep.subr.mxu0 %v5443_v0  ;;  %6915 = vst [vmem:[#allocation31_spill] sm:$0xff] %v5446_v58  ;;  %2186 = vmatprep.subr.mxu1 %v5446_v58  ;;  %v5449_v54 = vld [vmem:[#allocation7 + $0x20] sm:$0xff]  ;;  %v5452_v53 = vld [vmem:[#allocation7 + $0x30] sm:$0xff] }
 0x434   :  { %6916 = vst [vmem:[#allocation32_spill] sm:$0xff] %v5449_v54  ;;  %2116 = vmatpush1.msra.mxu0 %v5449_v54  ;;  %6917 = vst [vmem:[#allocation33_spill] sm:$0xff] %v5452_v53  ;;  %2187 = vmatpush1.msra.mxu1 %v5452_v53  ;;  %v5455_v22 = vld [vmem:[#allocation7 + $0x8] sm:$0xff]  ;;  %v5458_v26 = vld [vmem:[#allocation7 + $0x18] sm:$0xff] }
 0x435   :  { %6918 = vst [vmem:[#allocation34_spill] sm:$0xff] %v5455_v22  ;;  %2117 = vmatprep.subr.mxu0 %v5455_v22  ;;  %6919 = vst [vmem:[#allocation35_spill] sm:$0xff] %v5458_v26  ;;  %2188 = vmatprep.subr.mxu1 %v5458_v26  ;;  %v5461_v0 = vld [vmem:[#allocation7] sm:$0xff]  ;;  %v5465_v58 = vld [vmem:[#allocation7 + $0x10] sm:$0xff] }
 0x436   :  { %6920 = vst [vmem:[#allocation37_spill] sm:$0xff] %v5461_v0  ;;  %2118 = vmatpush1.msra.mxu0 %v5461_v0  ;;  %2151 = vmatprep.mubr.f32.mxu0 %v6790_v59  ;;  %6921 = vst [vmem:[#allocation36_spill] sm:$0xff] %v5465_v58 }
 0x437   :  { %2189 = vmatpush1.msra.mxu1 %v5465_v58  ;;  %2222 = vmatprep.mubr.f32.mxu1 %v6790_v59  ;;  %v3522_v22 = vpop.eup %3521 }
 0x438   :  { %2267 = vmatprep.subr.mxu0 %v6792_v15  ;;  %2338 = vmatprep.subr.mxu1 %v6793_v13  ;;  %v3524_v53 = vpop.eup %3523  ;;  %v6922_v15 = vld [vmem:[#allocation105_spill] sm:$0xff]  ;;  %v6923_v13 = vld [vmem:[#allocation107_spill] sm:$0xff] }
 0x439   :  { %v1899_v19 = vadd.f32 1.0, %v3524_v53 }
 0x43b   :  { %3529 = vrcp.f32 %v1899_v19 }
 0x43d   :  { %v3526_v54 = vpop.eup %3525 }
 0x43e   :  { %v1903_v26 = vmul.f32 %v3526_v54, %v3522_v22 }
 0x43f   :  { %v3528_v29 = vpop.eup %3527 }
 0x440   :  { %v1902_v0 = vmul.f32 %v3528_v29, %v5194_v32  ;;  %v6924_v32 = vld [vmem:[#allocation108_spill] sm:$0xff] }
 0x442   :  { %v5472_v60 = vadd.f32 %v1903_v26, %v1902_v0 }
 0x444   :  { %3531 = vtanh.f32 %v5472_v60 }
 0x448   :  { %v3530_v58 = vpop.eup %3529 }
 0x451   :  { %v3532_v28 = vpop.eup %3531 }
 0x452   :  { %v1906_v18 = vmul.f32 %v3532_v28, %v3530_v58  ;;  %v6949_v58 = vld [vmem:[#allocation76_spill] sm:$0xff] }
 0x454   :  { %1908 = vst [vmem:[%s6029_s5 + $0x48] sm:$0xff] %v1906_v18  ;;  %2152 = vmatmul.mubr.f32.vlgmr.msra.gmra.mxu0 %v1906_v18  ;;  %2223 = vmatmul.mubr.f32.vlgmr.msra.gmra.mxu1 %v1906_v18 }
 0x455   :  { %2268 = vmatpush1.msra.mxu0 %v6795_v36  ;;  %2339 = vmatpush1.msra.mxu1 %v6796_v1  ;;  %v6925_v36 = vld [vmem:[#allocation109_spill] sm:$0xff]  ;;  %v6926_v1 = vld [vmem:[#allocation111_spill] sm:$0xff] }
 0x456   :  { %2269 = vmatprep.subr.mxu0 %v6797_v14  ;;  %2340 = vmatprep.subr.mxu1 %v6798_v5  ;;  %v6927_v14 = vld [vmem:[#allocation112_spill] sm:$0xff]  ;;  %v6928_v5 = vld [vmem:[#allocation113_spill] sm:$0xff] }
 0x457   :  { %2270 = vmatpush1.msra.mxu0 %v6799_v2  ;;  %2341 = vmatpush1.msra.mxu1 %v6800_v56  ;;  %v6929_v2 = vld [vmem:[#allocation114_spill] sm:$0xff]  ;;  %v6930_v56 = vld [vmem:[#allocation115_spill] sm:$0xff] }
 0x458   :  { %2271 = vmatprep.subr.mxu0 %v6801_v63  ;;  %2342 = vmatprep.subr.mxu1 %v6802_v62  ;;  %v6931_v63 = vld [vmem:[#allocation116_spill] sm:$0xff]  ;;  %v6932_v62 = vld [vmem:[#allocation110_spill] sm:$0xff] }
 0x459   :  { %2272 = vmatpush1.msra.mxu0 %v6803_v40  ;;  %2343 = vmatpush1.msra.mxu1 %v6804_v12  ;;  %v6933_v40 = vld [vmem:[#allocation117_spill] sm:$0xff]  ;;  %v6934_v12 = vld [vmem:[#allocation118_spill] sm:$0xff] }
 0x45a   :  { %2273 = vmatprep.subr.mxu0 %v6805_v41  ;;  %2344 = vmatprep.subr.mxu1 %v6806_v55  ;;  %v6935_v41 = vld [vmem:[#allocation119_spill] sm:$0xff]  ;;  %v6936_v55 = vld [vmem:[#allocation120_spill] sm:$0xff] }
 0x45b   :  { %2274 = vmatpush1.msra.mxu0 %v6807_v7  ;;  %2345 = vmatpush1.msra.mxu1 %v6808_v16  ;;  %v6937_v7 = vld [vmem:[#allocation121_spill] sm:$0xff]  ;;  %v6938_v16 = vld [vmem:[#allocation122_spill] sm:$0xff] }
 0x45c   :  { %2275 = vmatprep.subr.mxu0 %v6809_v48  ;;  %2346 = vmatprep.subr.mxu1 %v6810_v17  ;;  %v6939_v48 = vld [vmem:[#allocation106_spill] sm:$0xff]  ;;  %v6940_v17 = vld [vmem:[#allocation123_spill] sm:$0xff] }
 0x45d   :  { %2276 = vmatpush1.msra.mxu0 %v6811_v3  ;;  %2347 = vmatpush1.msra.mxu1 %v6812_v20  ;;  %v6941_v3 = vld [vmem:[#allocation124_spill] sm:$0xff]  ;;  %v6942_v20 = vld [vmem:[#allocation125_spill] sm:$0xff] }
 0x45e   :  { %2277 = vmatprep.subr.mxu0 %v6813_v21  ;;  %2348 = vmatprep.subr.mxu1 %v6814_v6  ;;  %v6943_v21 = vld [vmem:[#allocation126_spill] sm:$0xff]  ;;  %v6944_v6 = vld [vmem:[#allocation127_spill] sm:$0xff] }
 0x45f   :  { %2278 = vmatpush1.msra.mxu0 %v6815_v23  ;;  %2349 = vmatpush1.msra.mxu1 %v6816_v8  ;;  %v6945_v8 = vld [vmem:[#allocation47_spill] sm:$0xff] }
 0x460   :  { %2279 = vmatprep.subr.mxu0 %v6817_v9  ;;  %2350 = vmatprep.subr.mxu1 %v6818_v10 }
 0x461   :  { %2280 = vmatpush1.msra.mxu0 %v6819_v24  ;;  %2351 = vmatpush1.msra.mxu1 %v6820_v30  ;;  %v6946_v30 = vld [vmem:[#allocation49_spill] sm:$0xff] }
 0x462   :  { %2281 = vmatprep.subr.mxu0 %v6821_v31  ;;  %2352 = vmatprep.subr.mxu1 %v6822_v33 }
 0x463   :  { %2282 = vmatpush1.msra.mxu0 %v6823_v34  ;;  %2353 = vmatpush1.msra.mxu1 %v6824_v37 }
 0x464   :  { %2283 = vmatprep.subr.mxu0 %v6825_v38  ;;  %2354 = vmatprep.subr.mxu1 %v6826_v39  ;;  %v6947_v38 = vld [vmem:[#allocation52_spill] sm:$0xff] }
 0x465   :  { %2284 = vmatpush1.msra.mxu0 %v6827_v42  ;;  %2355 = vmatpush1.msra.mxu1 %v6828_v43  ;;  %v6948_v42 = vld [vmem:[#allocation50_spill] sm:$0xff] }
 0x466   :  { %2285 = vmatprep.subr.mxu0 %v6829_v44  ;;  %2356 = vmatprep.subr.mxu1 %v6830_v45 }
 0x467   :  { %2286 = vmatpush1.msra.mxu0 %v6831_v46  ;;  %2357 = vmatpush1.msra.mxu1 %v6832_v47 }
 0x468   :  { %2287 = vmatprep.subr.mxu0 %v6833_v49  ;;  %2358 = vmatprep.subr.mxu1 %v6834_v11 }
 0x469   :  { %2288 = vmatpush1.msra.mxu0 %v6835_v50  ;;  %2359 = vmatpush1.msra.mxu1 %v6922_v15 }
 0x46a   :  { %2289 = vmatprep.subr.mxu0 %v6923_v13  ;;  %2360 = vmatprep.subr.mxu1 %v6924_v32  ;;  %v6950_v13 = vld [vmem:[#allocation128_spill] sm:$0xff] }
 0x46b   :  { %2290 = vmatpush1.msra.mxu0 %v6925_v36  ;;  %2361 = vmatpush1.msra.mxu1 %v6926_v1  ;;  %v6951_v36 = vld [vmem:[#allocation129_spill] sm:$0xff]  ;;  %v6952_v1 = vld [vmem:[#allocation130_spill] sm:$0xff] }
 0x46c   :  { %2291 = vmatprep.subr.mxu0 %v6927_v14  ;;  %2362 = vmatprep.subr.mxu1 %v6928_v5  ;;  %v6953_v5 = vld [vmem:[#allocation78_spill] sm:$0xff] }
 0x46d   :  { %2292 = vmatpush1.msra.mxu0 %v6929_v2  ;;  %2363 = vmatpush1.msra.mxu1 %v6930_v56  ;;  %v6954_v56 = vld [vmem:[#allocation131_spill] sm:$0xff] }
 0x46e   :  { %2293 = vmatprep.subr.mxu0 %v6931_v63  ;;  %2364 = vmatprep.subr.mxu1 %v6932_v62  ;;  %v6955_v63 = vld [vmem:[#allocation132_spill] sm:$0xff]  ;;  %v6956_v62 = vld [vmem:[#allocation39_spill] sm:$0xff] }
 0x46f   :  { %2294 = vmatpush1.msra.mxu0 %v6933_v40  ;;  %2365 = vmatpush1.msra.mxu1 %v6934_v12  ;;  %v6957_v40 = vld [vmem:[#allocation41_spill] sm:$0xff] }
 0x470   :  { %2295 = vmatprep.subr.mxu0 %v6935_v41  ;;  %2366 = vmatprep.subr.mxu1 %v6936_v55  ;;  %v6958_v55 = vld [vmem:[#allocation44_spill] sm:$0xff] }
 0x471   :  { %2296 = vmatpush1.msra.mxu0 %v6937_v7  ;;  %2367 = vmatpush1.msra.mxu1 %v6938_v16  ;;  %v6959_v7 = vld [vmem:[#allocation42_spill] sm:$0xff]  ;;  %v6960_v16 = vld [vmem:[#allocation87_spill] sm:$0xff] }
 0x472   :  { %2297 = vmatprep.subr.mxu0 %v6939_v48  ;;  %2368 = vmatprep.subr.mxu1 %v6940_v17  ;;  %v6961_v48 = vld [vmem:[#allocation93_spill] sm:$0xff]  ;;  %v6962_v17 = vld [vmem:[#allocation102_spill] sm:$0xff] }
 0x473   :  { %2298 = vmatpush1.msra.mxu0 %v6941_v3  ;;  %2331 = vmatprep.mubr.f32.mxu0 %v6790_v59  ;;  %v6963_v3 = vld [vmem:[#allocation96_spill] sm:$0xff] }
 0x474   :  { %2369 = vmatpush1.msra.mxu1 %v6942_v20  ;;  %2402 = vmatprep.mubr.f32.mxu1 %v6790_v59  ;;  %v6964_v20 = vld [vmem:[#allocation133_spill] sm:$0xff] }
 0x475   :  { %2437 = vmatprep.subr.mxu0 %v6943_v21  ;;  %2508 = vmatprep.subr.mxu1 %v6944_v6  ;;  %v6965_v21 = vld [vmem:[#allocation134_spill] sm:$0xff] }
 0x4d7   :  { %v1983_v23 = vpop.f32.mrf.mxu0  ;;  %v2054_v33 = vpop.f32.mrf.mxu1 }
 0x4d8   :  { %v2059_v9 = vadd.f32 %v1983_v23, %v6945_v8  ;;  %v2061_v43 = vadd.f32 %v2054_v33, %v6948_v42  ;;  %v6966_v23 = vld [vmem:[#allocation135_spill] sm:$0xff]  ;;  %v6967_v8 = vld [vmem:[#allocation136_spill] sm:$0xff]  ;;  %v6977_v42 = vld [vmem:[#allocation145_spill] sm:$0xff] }
 0x4d9   :  { %v1985_v10 = vpop.f32.mrf.mxu0  ;;  %v2056_v37 = vpop.f32.mrf.mxu1 }
 0x4da   :  { %v3378_v24 = vmul.f32 -1.442695, %v2059_v9  ;;  %v2060_v31 = vadd.f32 %v1985_v10, %v6946_v30  ;;  %v2062_v39 = vadd.f32 %v2056_v37, %v6947_v38  ;;  %v6968_v9 = vld [vmem:[#allocation137_spill] sm:$0xff]  ;;  %v6969_v10 = vld [vmem:[#allocation138_spill] sm:$0xff]  ;;  %v6971_v30 = vld [vmem:[#allocation140_spill] sm:$0xff] }
 0x4db   :  { %v6974_v37 = vld [vmem:[#allocation142_spill] sm:$0xff]  ;;  %v6975_v38 = vld [vmem:[#allocation143_spill] sm:$0xff] }
 0x4dc   :  { %3533 = vpow2.f32 %v3378_v24  ;;  %v3379_v34 = vmul.f32 -1.442695, %v2060_v31  ;;  %v3380_v44 = vmul.f32 -1.442695, %v2062_v39  ;;  %v6970_v24 = vld [vmem:[#allocation139_spill] sm:$0xff]  ;;  %v6972_v31 = vld [vmem:[#allocation81_spill] sm:$0xff] }
 0x4dd   :  { %v6976_v39 = vld [vmem:[#allocation144_spill] sm:$0xff] }
 0x4de   :  { %3535 = vpow2.f32 %v3379_v34  ;;  %v6973_v34 = vld [vmem:[#allocation141_spill] sm:$0xff] }
 0x4df   :  { %3537 = vtanh.f32 %v2061_v43  ;;  %v6978_v43 = vld [vmem:[#allocation146_spill] sm:$0xff] }
 0x4e0   :  { %3539 = vpow2.f32 %v3380_v44  ;;  %v6979_v44 = vld [vmem:[#allocation79_spill] sm:$0xff] }
 0x4e9   :  { %v3534_v45 = vpop.eup %3533 }
 0x4ea   :  { %v2066_v46 = vadd.f32 1.0, %v3534_v45 }
 0x4eb   :  { %v3536_v47 = vpop.eup %3535 }
 0x4ec   :  { %3541 = vrcp.f32 %v2066_v46  ;;  %v2072_v49 = vadd.f32 1.0, %v3536_v47  ;;  %v3538_v11 = vpop.eup %3537  ;;  %v6980_v46 = vld [vmem:[#allocation147_spill] sm:$0xff]  ;;  %v6981_v47 = vld [vmem:[#allocation148_spill] sm:$0xff] }
 0x4ed   :  { %v3540_v50 = vpop.eup %3539 }
 0x4ee   :  { %3543 = vrcp.f32 %v2072_v49  ;;  %v2079_v0 = vadd.f32 1.0, %v3540_v50  ;;  %v6983_v50 = vld [vmem:[#allocation13_spill] sm:$0xff] }
 0x4f0   :  { %3545 = vrcp.f32 %v2079_v0  ;;  %v6986_v0 = vld [vmem:[#allocation16_spill] sm:$0xff] }
 0x4f9   :  { %v3542_v18 = vpop.eup %3541 }
 0x4fa   :  { %v2083_v26 = vmul.f32 %v3542_v18, %v3538_v11  ;;  %v6982_v11 = vld [vmem:[#allocation149_spill] sm:$0xff]  ;;  %v6984_v18 = vld [vmem:[#allocation14_spill] sm:$0xff] }
 0x4fb   :  { %v3544_v54 = vpop.eup %3543 }
 0x4fc   :  { %v2082_v28 = vmul.f32 %v3544_v54, %v5271_v57 }
 0x4fd   :  { %v3546_v29 = vpop.eup %3545 }
 0x4fe   :  { %v5549_v19 = vadd.f32 %v2083_v26, %v2082_v28  ;;  %v6985_v26 = vld [vmem:[#allocation15_spill] sm:$0xff]  ;;  %v6987_v28 = vld [vmem:[#allocation17_spill] sm:$0xff] }
 0x500   :  { %3547 = vtanh.f32 %v5549_v19 }
 0x50d   :  { %v3548_v53 = vpop.eup %3547 }
 0x50e   :  { %v2086_v22 = vmul.f32 %v3548_v53, %v3546_v29  ;;  %v6988_v53 = vld [vmem:[#allocation18_spill] sm:$0xff] }
 0x510   :  { %2257 = vst [vmem:[%s6029_s5 + $0x40] sm:$0xff] %v2086_v22  ;;  %2332 = vmatmul.mubr.f32.vlgmr.msra.gmra.mxu0 %v2086_v22  ;;  %2403 = vmatmul.mubr.f32.vlgmr.msra.gmra.mxu1 %v2086_v22  ;;  %v6989_v22 = vld [vmem:[#allocation19_spill] sm:$0xff] }
 0x511   :  { %2438 = vmatpush1.msra.mxu0 %v5277_v51  ;;  %2509 = vmatpush1.msra.mxu1 %v5280_v52 }
 0x512   :  { %2439 = vmatprep.subr.mxu0 %v5283_v4  ;;  %2510 = vmatprep.subr.mxu1 %v5286_v61 }
 0x513   :  { %2440 = vmatpush1.msra.mxu0 %v5289_v25  ;;  %2511 = vmatpush1.msra.mxu1 %v5292_v27 }
 0x514   :  { %v2153_v57 = vpop.f32.mrf.mxu0  ;;  %2441 = vmatprep.subr.mxu0 %v5296_v35  ;;  %2512 = vmatprep.subr.mxu1 %v6950_v13  ;;  %v2224_v12 = vpop.f32.mrf.mxu1 }
 0x515   :  { %v2229_v15 = vadd.f32 %v2153_v57, %v6949_v58  ;;  %2442 = vmatpush1.msra.mxu0 %v6951_v36  ;;  %2513 = vmatpush1.msra.mxu1 %v6952_v1  ;;  %v2231_v45 = vadd.f32 %v2224_v12, %v6979_v44  ;;  %v6990_v58 = vld [vmem:[#allocation20_spill] sm:$0xff]  ;;  %v6995_v12 = vld [vmem:[#allocation25_spill] sm:$0xff]  ;;  %v7000_v44 = vld [vmem:[#allocation30_spill] sm:$0xff] }
 0x516   :  { %v2155_v32 = vpop.f32.mrf.mxu0  ;;  %2443 = vmatprep.subr.mxu0 %v6954_v56  ;;  %2514 = vmatprep.subr.mxu1 %v6955_v63  ;;  %v2226_v6 = vpop.f32.mrf.mxu1 }
 0x517   :  { %v3381_v14 = vmul.f32 -1.442695, %v2229_v15  ;;  %v2230_v2 = vadd.f32 %v2155_v32, %v6953_v5  ;;  %2444 = vmatpush1.msra.mxu0 %v6956_v62  ;;  %2515 = vmatpush1.msra.mxu1 %v6957_v40  ;;  %v2232_v33 = vadd.f32 %v2226_v6, %v6972_v31  ;;  %v6991_v15 = vld [vmem:[#allocation21_spill] sm:$0xff]  ;;  %v6993_v5 = vld [vmem:[#allocation23_spill] sm:$0xff]  ;;  %v6998_v31 = vld [vmem:[#allocation28_spill] sm:$0xff] }
 0x518   :  { %2445 = vmatprep.subr.mxu0 %v6958_v55  ;;  %2516 = vmatprep.subr.mxu1 %v6959_v7  ;;  %v6997_v6 = vld [vmem:[#allocation27_spill] sm:$0xff] }
 0x519   :  { %3549 = vpow2.f32 %v3381_v14  ;;  %v3382_v41 = vmul.f32 -1.442695, %v2230_v2  ;;  %2446 = vmatpush1.msra.mxu0 %v6960_v16  ;;  %2517 = vmatpush1.msra.mxu1 %v6961_v48  ;;  %v3383_v49 = vmul.f32 -1.442695, %v2232_v33  ;;  %v6992_v14 = vld [vmem:[#allocation22_spill] sm:$0xff]  ;;  %v6994_v2 = vld [vmem:[#allocation24_spill] sm:$0xff] }
 0x51a   :  { %2447 = vmatprep.subr.mxu0 %v6962_v17  ;;  %2518 = vmatprep.subr.mxu1 %v6963_v3  ;;  %v6999_v33 = vld [vmem:[#allocation29_spill] sm:$0xff] }
 0x51b   :  { %3551 = vpow2.f32 %v3382_v41  ;;  %2448 = vmatpush1.msra.mxu0 %v6964_v20  ;;  %2519 = vmatpush1.msra.mxu1 %v6965_v21  ;;  %v6996_v41 = vld [vmem:[#allocation26_spill] sm:$0xff] }
 0x51c   :  { %2449 = vmatprep.subr.mxu0 %v6966_v23  ;;  %2520 = vmatprep.subr.mxu1 %v6967_v8  ;;  %3553 = vtanh.f32 %v2231_v45  ;;  %v7001_v45 = vld [vmem:[#allocation31_spill] sm:$0xff] }
 0x51d   :  { %2450 = vmatpush1.msra.mxu0 %v6968_v9  ;;  %2521 = vmatpush1.msra.mxu1 %v6969_v10  ;;  %3555 = vpow2.f32 %v3383_v49  ;;  %v7002_v49 = vld [vmem:[#allocation32_spill] sm:$0xff] }
 0x51e   :  { %2451 = vmatprep.subr.mxu0 %v6970_v24  ;;  %2522 = vmatprep.subr.mxu1 %v6971_v30 }
 0x51f   :  { %2452 = vmatpush1.msra.mxu0 %v6973_v34  ;;  %2523 = vmatpush1.msra.mxu1 %v6974_v37 }
 0x520   :  { %2453 = vmatprep.subr.mxu0 %v6975_v38  ;;  %2524 = vmatprep.subr.mxu1 %v6976_v39 }
 0x521   :  { %2454 = vmatpush1.msra.mxu0 %v6977_v42  ;;  %2525 = vmatpush1.msra.mxu1 %v6978_v43 }
 0x522   :  { %2455 = vmatprep.subr.mxu0 %v6980_v46  ;;  %2526 = vmatprep.subr.mxu1 %v6981_v47 }
 0x523   :  { %2456 = vmatpush1.msra.mxu0 %v6982_v11  ;;  %2527 = vmatpush1.msra.mxu1 %v6983_v50 }
 0x524   :  { %2457 = vmatprep.subr.mxu0 %v6984_v18  ;;  %2528 = vmatprep.subr.mxu1 %v6985_v26 }
 0x525   :  { %2458 = vmatpush1.msra.mxu0 %v6986_v0  ;;  %2529 = vmatpush1.msra.mxu1 %v6987_v28 }
 0x526   :  { %v3550_v54 = vpop.eup %3549  ;;  %2459 = vmatprep.subr.mxu0 %v6988_v53  ;;  %2530 = vmatprep.subr.mxu1 %v6989_v22 }
 0x527   :  { %v2236_v29 = vadd.f32 1.0, %v3550_v54  ;;  %2460 = vmatpush1.msra.mxu0 %v6990_v58  ;;  %2531 = vmatpush1.msra.mxu1 %v6991_v15  ;;  %v7003_v54 = vld [vmem:[#allocation33_spill] sm:$0xff] }
 0x528   :  { %v3552_v57 = vpop.eup %3551  ;;  %2461 = vmatprep.subr.mxu0 %v6992_v14  ;;  %2532 = vmatprep.subr.mxu1 %v6993_v5 }
 0x529   :  { %3557 = vrcp.f32 %v2236_v29  ;;  %v2242_v32 = vadd.f32 1.0, %v3552_v57  ;;  %2462 = vmatpush1.msra.mxu0 %v6994_v2  ;;  %2533 = vmatpush1.msra.mxu1 %v6995_v12  ;;  %v7004_v29 = vld [vmem:[#allocation34_spill] sm:$0xff]  ;;  %v7005_v57 = vld [vmem:[#allocation35_spill] sm:$0xff] }
 0x52a   :  { %2463 = vmatprep.subr.mxu0 %v6996_v41  ;;  %2534 = vmatprep.subr.mxu1 %v6997_v6  ;;  %v7007_v6 = vld [vmem:[#allocation36_spill] sm:$0xff]  ;;  %v7078_v2 = vld [vmem:[#allocation54_spill] sm:$0xff] }
 0x52b   :  { %3559 = vrcp.f32 %v2242_v32  ;;  %2464 = vmatpush1.msra.mxu0 %v6998_v31  ;;  %2535 = vmatpush1.msra.mxu1 %v6999_v33  ;;  %v7006_v32 = vld [vmem:[#allocation37_spill] sm:$0xff] }
 0x52c   :  { %2465 = vmatprep.subr.mxu0 %v7000_v44  ;;  %2536 = vmatprep.subr.mxu1 %v7001_v45  ;;  %v5623_v33 = vld [vmem:[#allocation5 + $0x1e8] sm:$0xff]  ;;  %v5626_v45 = vld [vmem:[#allocation5 + $0x1f8] sm:$0xff] }
 0x52d   :  { %2466 = vmatpush1.msra.mxu0 %v7002_v49  ;;  %2537 = vmatpush1.msra.mxu1 %v7003_v54  ;;  %7008 = vst [vmem:[#allocation40_spill] sm:$0xff] %v5623_v33  ;;  %7009 = vst [vmem:[#allocation38_spill] sm:$0xff] %v5626_v45  ;;  %v3554_v54 = vpop.eup %3553 }
 0x52e   :  { %2467 = vmatprep.subr.mxu0 %v7004_v29  ;;  %2538 = vmatprep.subr.mxu1 %v7005_v57  ;;  %v3556_v29 = vpop.eup %3555 }
 0x52f   :  { %2468 = vmatpush1.msra.mxu0 %v7006_v32  ;;  %2501 = vmatprep.mubr.f32.mxu0 %v6790_v59  ;;  %v2249_v32 = vadd.f32 1.0, %v3556_v29  ;;  %v5663_v29 = vld [vmem:[#allocation5 + $0x1b0] sm:$0xff] }
 0x530   :  { %2539 = vmatpush1.msra.mxu1 %v7007_v6  ;;  %2572 = vmatprep.mubr.f32.mxu1 %v6790_v59  ;;  %7020 = vst [vmem:[#allocation94_spill] sm:$0xff] %v5663_v29 }
 0x531   :  { %2617 = vmatprep.subr.mxu0 %v5623_v33  ;;  %2688 = vmatprep.subr.mxu1 %v5626_v45  ;;  %3561 = vrcp.f32 %v2249_v32  ;;  %v5636_v45 = vld [vmem:[#allocation5 + $0x1e0] sm:$0xff]  ;;  %v5669_v32 = vld [vmem:[#allocation5 + $0x198] sm:$0xff] }
 0x532   :  { %7011 = vst [vmem:[#allocation85_spill] sm:$0xff] %v5636_v45  ;;  %7022 = vst [vmem:[#allocation97_spill] sm:$0xff] %v5669_v32 }
 0x536   :  { %v3558_v49 = vpop.eup %3557 }
 0x537   :  { %v2253_v57 = vmul.f32 %v3558_v49, %v3554_v54  ;;  %v5639_v49 = vld [vmem:[#allocation5 + $0x1f0] sm:$0xff]  ;;  %v5660_v54 = vld [vmem:[#allocation5 + $0x1a0] sm:$0xff] }
 0x538   :  { %v3560_v44 = vpop.eup %3559  ;;  %7012 = vst [vmem:[#allocation86_spill] sm:$0xff] %v5639_v49  ;;  %7019 = vst [vmem:[#allocation92_spill] sm:$0xff] %v5660_v54 }
 0x539   :  { %v2252_v31 = vmul.f32 %v3560_v44, %v5472_v60  ;;  %v5642_v60 = vld [vmem:[#allocation5 + $0x1c8] sm:$0xff]  ;;  %v5657_v44 = vld [vmem:[#allocation5 + $0x1b8] sm:$0xff] }
 0x53a   :  { %7013 = vst [vmem:[#allocation88_spill] sm:$0xff] %v5642_v60  ;;  %7018 = vst [vmem:[#allocation91_spill] sm:$0xff] %v5657_v44 }
 0x53b   :  { %v5630_v41 = vadd.f32 %v2253_v57, %v2252_v31  ;;  %v5645_v31 = vld [vmem:[#allocation5 + $0x1d8] sm:$0xff]  ;;  %v5666_v57 = vld [vmem:[#allocation5 + $0x188] sm:$0xff] }
 0x53c   :  { %7014 = vst [vmem:[#allocation89_spill] sm:$0xff] %v5645_v31  ;;  %7021 = vst [vmem:[#allocation95_spill] sm:$0xff] %v5666_v57 }
 0x53d   :  { %7010 = vst [vmem:[#allocation83_spill] sm:$0xff] %v5630_v41  ;;  %3563 = vtanh.f32 %v5630_v41  ;;  %v7077_v41 = vld [vmem:[#allocation56_spill] sm:$0xff] }
 0x53e   :  { %v3562_v6 = vpop.eup %3561 }
 0x54a   :  { %v3564_v12 = vpop.eup %3563 }
 0x54b   :  { %v2256_v33 = vmul.f32 %v3564_v12, %v3562_v6  ;;  %v5648_v12 = vld [vmem:[#allocation5 + $0x1c0] sm:$0xff]  ;;  %v5651_v6 = vld [vmem:[#allocation5 + $0x1d0] sm:$0xff] }
 0x54c   :  { %7015 = vst [vmem:[#allocation62_spill] sm:$0xff] %v5648_v12  ;;  %7016 = vst [vmem:[#allocation101_spill] sm:$0xff] %v5651_v6 }
 0x54d   :  { %2258 = vst [vmem:[%s6029_s5 + $0x38] sm:$0xff] %v2256_v33  ;;  %2502 = vmatmul.mubr.f32.vlgmr.msra.gmra.mxu0 %v2256_v33  ;;  %2573 = vmatmul.mubr.f32.vlgmr.msra.gmra.mxu1 %v2256_v33  ;;  %v5654_v33 = vld [vmem:[#allocation5 + $0x1a8] sm:$0xff] }
 0x54e   :  { %2618 = vmatpush1.msra.mxu0 %v5636_v45  ;;  %2689 = vmatpush1.msra.mxu1 %v5639_v49  ;;  %7017 = vst [vmem:[#allocation99_spill] sm:$0xff] %v5654_v33 }
 0x54f   :  { %2619 = vmatprep.subr.mxu0 %v5642_v60  ;;  %2690 = vmatprep.subr.mxu1 %v5645_v31  ;;  %v7076_v31 = vld [vmem:[#allocation53_spill] sm:$0xff] }
 0x550   :  { %2620 = vmatpush1.msra.mxu0 %v5648_v12  ;;  %2691 = vmatpush1.msra.mxu1 %v5651_v6 }
 0x551   :  { %2621 = vmatprep.subr.mxu0 %v5654_v33  ;;  %2692 = vmatprep.subr.mxu1 %v5657_v44  ;;  %v5672_v33 = vld [vmem:[#allocation5 + $0x180] sm:$0xff]  ;;  %v5675_v44 = vld [vmem:[#allocation5 + $0x190] sm:$0xff] }
 0x552   :  { %2622 = vmatpush1.msra.mxu0 %v5660_v54  ;;  %2693 = vmatpush1.msra.mxu1 %v5663_v29  ;;  %7023 = vst [vmem:[#allocation98_spill] sm:$0xff] %v5672_v33  ;;  %7024 = vst [vmem:[#allocation100_spill] sm:$0xff] %v5675_v44  ;;  %v5678_v54 = vld [vmem:[#allocation5 + $0x168] sm:$0xff]  ;;  %v5681_v29 = vld [vmem:[#allocation5 + $0x178] sm:$0xff] }
 0x553   :  { %2623 = vmatprep.subr.mxu0 %v5666_v57  ;;  %2694 = vmatprep.subr.mxu1 %v5669_v32  ;;  %7025 = vst [vmem:[#allocation103_spill] sm:$0xff] %v5678_v54  ;;  %7026 = vst [vmem:[#allocation104_spill] sm:$0xff] %v5681_v29  ;;  %v5684_v57 = vld [vmem:[#allocation5 + $0x160] sm:$0xff]  ;;  %v5687_v32 = vld [vmem:[#allocation5 + $0x170] sm:$0xff] }
 0x554   :  { %2624 = vmatpush1.msra.mxu0 %v5672_v33  ;;  %2695 = vmatpush1.msra.mxu1 %v5675_v44  ;;  %7027 = vst [vmem:[#allocation43_spill] sm:$0xff] %v5684_v57  ;;  %7028 = vst [vmem:[#allocation45_spill] sm:$0xff] %v5687_v32  ;;  %v5690_v33 = vld [vmem:[#allocation5 + $0x148] sm:$0xff]  ;;  %v5693_v44 = vld [vmem:[#allocation5 + $0x158] sm:$0xff] }
 0x555   :  { %2625 = vmatprep.subr.mxu0 %v5678_v54  ;;  %2696 = vmatprep.subr.mxu1 %v5681_v29  ;;  %7029 = vst [vmem:[#allocation48_spill] sm:$0xff] %v5690_v33  ;;  %7030 = vst [vmem:[#allocation46_spill] sm:$0xff] %v5693_v44  ;;  %v5696_v54 = vld [vmem:[#allocation5 + $0x140] sm:$0xff]  ;;  %v5699_v29 = vld [vmem:[#allocation5 + $0x150] sm:$0xff] }
 0x556   :  { %2626 = vmatpush1.msra.mxu0 %v5684_v57  ;;  %2697 = vmatpush1.msra.mxu1 %v5687_v32  ;;  %7031 = vst [vmem:[#allocation80_spill] sm:$0xff] %v5696_v54  ;;  %7032 = vst [vmem:[#allocation82_spill] sm:$0xff] %v5699_v29  ;;  %v5702_v57 = vld [vmem:[#allocation5 + $0x128] sm:$0xff]  ;;  %v5705_v32 = vld [vmem:[#allocation5 + $0x138] sm:$0xff] }
 0x557   :  { %2627 = vmatprep.subr.mxu0 %v5690_v33  ;;  %2698 = vmatprep.subr.mxu1 %v5693_v44  ;;  %7033 = vst [vmem:[#allocation90_spill] sm:$0xff] %v5702_v57  ;;  %7034 = vst [vmem:[#allocation84_spill] sm:$0xff] %v5705_v32  ;;  %v5708_v33 = vld [vmem:[#allocation5 + $0x120] sm:$0xff]  ;;  %v5711_v44 = vld [vmem:[#allocation5 + $0x130] sm:$0xff] }
 0x558   :  { %2628 = vmatpush1.msra.mxu0 %v5696_v54  ;;  %2699 = vmatpush1.msra.mxu1 %v5699_v29  ;;  %7035 = vst [vmem:[#allocation105_spill] sm:$0xff] %v5708_v33  ;;  %7036 = vst [vmem:[#allocation107_spill] sm:$0xff] %v5711_v44  ;;  %v5714_v54 = vld [vmem:[#allocation5 + $0x108] sm:$0xff]  ;;  %v5717_v29 = vld [vmem:[#allocation5 + $0x118] sm:$0xff] }
 0x559   :  { %2629 = vmatprep.subr.mxu0 %v5702_v57  ;;  %2700 = vmatprep.subr.mxu1 %v5705_v32  ;;  %7037 = vst [vmem:[#allocation108_spill] sm:$0xff] %v5714_v54  ;;  %7038 = vst [vmem:[#allocation109_spill] sm:$0xff] %v5717_v29  ;;  %v5720_v57 = vld [vmem:[#allocation5 + $0x100] sm:$0xff]  ;;  %v5723_v32 = vld [vmem:[#allocation5 + $0x110] sm:$0xff] }
 0x55a   :  { %2630 = vmatpush1.msra.mxu0 %v5708_v33  ;;  %2701 = vmatpush1.msra.mxu1 %v5711_v44  ;;  %7039 = vst [vmem:[#allocation111_spill] sm:$0xff] %v5720_v57  ;;  %7040 = vst [vmem:[#allocation112_spill] sm:$0xff] %v5723_v32  ;;  %v5726_v33 = vld [vmem:[#allocation5 + $0xe8] sm:$0xff]  ;;  %v5729_v44 = vld [vmem:[#allocation5 + $0xf8] sm:$0xff] }
 0x55b   :  { %2631 = vmatprep.subr.mxu0 %v5714_v54  ;;  %2702 = vmatprep.subr.mxu1 %v5717_v29  ;;  %7041 = vst [vmem:[#allocation113_spill] sm:$0xff] %v5726_v33  ;;  %7042 = vst [vmem:[#allocation114_spill] sm:$0xff] %v5729_v44  ;;  %v5732_v54 = vld [vmem:[#allocation5 + $0xe0] sm:$0xff]  ;;  %v5735_v29 = vld [vmem:[#allocation5 + $0xf0] sm:$0xff] }
 0x55c   :  { %2632 = vmatpush1.msra.mxu0 %v5720_v57  ;;  %2703 = vmatpush1.msra.mxu1 %v5723_v32  ;;  %7043 = vst [vmem:[#allocation115_spill] sm:$0xff] %v5732_v54  ;;  %7044 = vst [vmem:[#allocation116_spill] sm:$0xff] %v5735_v29  ;;  %v5738_v57 = vld [vmem:[#allocation5 + $0xc8] sm:$0xff]  ;;  %v5741_v32 = vld [vmem:[#allocation5 + $0xd8] sm:$0xff] }
 0x55d   :  { %2633 = vmatprep.subr.mxu0 %v5726_v33  ;;  %2704 = vmatprep.subr.mxu1 %v5729_v44  ;;  %7045 = vst [vmem:[#allocation110_spill] sm:$0xff] %v5738_v57  ;;  %7046 = vst [vmem:[#allocation117_spill] sm:$0xff] %v5741_v32  ;;  %v5744_v33 = vld [vmem:[#allocation5 + $0xc0] sm:$0xff]  ;;  %v5747_v44 = vld [vmem:[#allocation5 + $0xd0] sm:$0xff] }
 0x55e   :  { %2634 = vmatpush1.msra.mxu0 %v5732_v54  ;;  %2705 = vmatpush1.msra.mxu1 %v5735_v29  ;;  %7047 = vst [vmem:[#allocation118_spill] sm:$0xff] %v5744_v33  ;;  %7048 = vst [vmem:[#allocation119_spill] sm:$0xff] %v5747_v44  ;;  %v5750_v54 = vld [vmem:[#allocation5 + $0xa8] sm:$0xff]  ;;  %v5753_v29 = vld [vmem:[#allocation5 + $0xb8] sm:$0xff] }
 0x55f   :  { %2635 = vmatprep.subr.mxu0 %v5738_v57  ;;  %2706 = vmatprep.subr.mxu1 %v5741_v32  ;;  %7049 = vst [vmem:[#allocation120_spill] sm:$0xff] %v5750_v54  ;;  %7050 = vst [vmem:[#allocation121_spill] sm:$0xff] %v5753_v29  ;;  %v5756_v57 = vld [vmem:[#allocation5 + $0xa0] sm:$0xff]  ;;  %v5759_v32 = vld [vmem:[#allocation5 + $0xb0] sm:$0xff] }
 0x560   :  { %2636 = vmatpush1.msra.mxu0 %v5744_v33  ;;  %2707 = vmatpush1.msra.mxu1 %v5747_v44  ;;  %7051 = vst [vmem:[#allocation122_spill] sm:$0xff] %v5756_v57  ;;  %7052 = vst [vmem:[#allocation106_spill] sm:$0xff] %v5759_v32  ;;  %v5762_v33 = vld [vmem:[#allocation5 + $0x88] sm:$0xff]  ;;  %v5765_v44 = vld [vmem:[#allocation5 + $0x98] sm:$0xff] }
 0x561   :  { %2637 = vmatprep.subr.mxu0 %v5750_v54  ;;  %2708 = vmatprep.subr.mxu1 %v5753_v29  ;;  %7053 = vst [vmem:[#allocation123_spill] sm:$0xff] %v5762_v33  ;;  %7054 = vst [vmem:[#allocation124_spill] sm:$0xff] %v5765_v44  ;;  %v5768_v54 = vld [vmem:[#allocation5 + $0x80] sm:$0xff]  ;;  %v5771_v29 = vld [vmem:[#allocation5 + $0x90] sm:$0xff] }
 0x562   :  { %2638 = vmatpush1.msra.mxu0 %v5756_v57  ;;  %2709 = vmatpush1.msra.mxu1 %v5759_v32  ;;  %7055 = vst [vmem:[#allocation125_spill] sm:$0xff] %v5768_v54  ;;  %7056 = vst [vmem:[#allocation126_spill] sm:$0xff] %v5771_v29  ;;  %v5774_v57 = vld [vmem:[#allocation5 + $0x68] sm:$0xff]  ;;  %v5777_v32 = vld [vmem:[#allocation5 + $0x78] sm:$0xff] }
 0x563   :  { %2639 = vmatprep.subr.mxu0 %v5762_v33  ;;  %2710 = vmatprep.subr.mxu1 %v5765_v44  ;;  %7057 = vst [vmem:[#allocation127_spill] sm:$0xff] %v5774_v57  ;;  %7058 = vst [vmem:[#allocation47_spill] sm:$0xff] %v5777_v32  ;;  %v5780_v33 = vld [vmem:[#allocation5 + $0x60] sm:$0xff]  ;;  %v5783_v44 = vld [vmem:[#allocation5 + $0x70] sm:$0xff] }
 0x564   :  { %2640 = vmatpush1.msra.mxu0 %v5768_v54  ;;  %2711 = vmatpush1.msra.mxu1 %v5771_v29  ;;  %7059 = vst [vmem:[#allocation49_spill] sm:$0xff] %v5780_v33  ;;  %7060 = vst [vmem:[#allocation52_spill] sm:$0xff] %v5783_v44  ;;  %v5786_v54 = vld [vmem:[#allocation5 + $0x48] sm:$0xff]  ;;  %v5789_v29 = vld [vmem:[#allocation5 + $0x58] sm:$0xff] }
 0x565   :  { %2641 = vmatprep.subr.mxu0 %v5774_v57  ;;  %2712 = vmatprep.subr.mxu1 %v5777_v32  ;;  %7061 = vst [vmem:[#allocation50_spill] sm:$0xff] %v5786_v54  ;;  %7062 = vst [vmem:[#allocation76_spill] sm:$0xff] %v5789_v29  ;;  %v5792_v57 = vld [vmem:[#allocation5 + $0x40] sm:$0xff]  ;;  %v5795_v32 = vld [vmem:[#allocation5 + $0x50] sm:$0xff] }
 0x566   :  { %2642 = vmatpush1.msra.mxu0 %v5780_v33  ;;  %2713 = vmatpush1.msra.mxu1 %v5783_v44  ;;  %7063 = vst [vmem:[#allocation128_spill] sm:$0xff] %v5792_v57  ;;  %7064 = vst [vmem:[#allocation129_spill] sm:$0xff] %v5795_v32  ;;  %v5798_v33 = vld [vmem:[#allocation5 + $0x28] sm:$0xff]  ;;  %v5801_v44 = vld [vmem:[#allocation5 + $0x38] sm:$0xff] }
 0x567   :  { %2643 = vmatprep.subr.mxu0 %v5786_v54  ;;  %2714 = vmatprep.subr.mxu1 %v5789_v29  ;;  %7065 = vst [vmem:[#allocation130_spill] sm:$0xff] %v5798_v33  ;;  %7066 = vst [vmem:[#allocation78_spill] sm:$0xff] %v5801_v44  ;;  %v5804_v54 = vld [vmem:[#allocation5 + $0x20] sm:$0xff]  ;;  %v5807_v29 = vld [vmem:[#allocation5 + $0x30] sm:$0xff] }
 0x568   :  { %2644 = vmatpush1.msra.mxu0 %v5792_v57  ;;  %2715 = vmatpush1.msra.mxu1 %v5795_v32  ;;  %7067 = vst [vmem:[#allocation131_spill] sm:$0xff] %v5804_v54  ;;  %7068 = vst [vmem:[#allocation132_spill] sm:$0xff] %v5807_v29  ;;  %v5810_v57 = vld [vmem:[#allocation5 + $0x8] sm:$0xff]  ;;  %v5813_v32 = vld [vmem:[#allocation5 + $0x18] sm:$0xff] }
 0x569   :  { %2645 = vmatprep.subr.mxu0 %v5798_v33  ;;  %2716 = vmatprep.subr.mxu1 %v5801_v44  ;;  %7069 = vst [vmem:[#allocation39_spill] sm:$0xff] %v5810_v57  ;;  %7070 = vst [vmem:[#allocation41_spill] sm:$0xff] %v5813_v32  ;;  %v5816_v33 = vld [vmem:[#allocation5] sm:$0xff]  ;;  %v5820_v44 = vld [vmem:[#allocation5 + $0x10] sm:$0xff] }
 0x56a   :  { %2646 = vmatpush1.msra.mxu0 %v5804_v54  ;;  %2717 = vmatpush1.msra.mxu1 %v5807_v29  ;;  %7071 = vst [vmem:[#allocation44_spill] sm:$0xff] %v5816_v33  ;;  %7072 = vst [vmem:[#allocation42_spill] sm:$0xff] %v5820_v44  ;;  %v5824_v29 = vld [vmem:[#allocation7 + $0x1e8] sm:$0xff]  ;;  %v7075_v54 = vld [vmem:[#allocation51_spill] sm:$0xff] }
 0x56b   :  { %2647 = vmatprep.subr.mxu0 %v5810_v57  ;;  %2718 = vmatprep.subr.mxu1 %v5813_v32  ;;  %7073 = vst [vmem:[#allocation87_spill] sm:$0xff] %v5824_v29  ;;  %v5827_v57 = vld [vmem:[#allocation7 + $0x1f8] sm:$0xff] }
 0x56c   :  { %2648 = vmatpush1.msra.mxu0 %v5816_v33  ;;  %2681 = vmatprep.mubr.f32.mxu0 %v6790_v59  ;;  %7074 = vst [vmem:[#allocation93_spill] sm:$0xff] %v5827_v57 }
 0x56d   :  { %2719 = vmatpush1.msra.mxu1 %v5820_v44  ;;  %2752 = vmatprep.mubr.f32.mxu1 %v6790_v59 }
 0x56e   :  { %2787 = vmatprep.subr.mxu0 %v5824_v29  ;;  %2858 = vmatprep.subr.mxu1 %v5827_v57 }
 0x5d0   :  { %v2333_v32 = vpop.f32.mrf.mxu0  ;;  %v2404_v49 = vpop.f32.mrf.mxu1 }
 0x5d1   :  { %v2409_v6 = vadd.f32 %v2333_v32, %v7075_v54  ;;  %v2411_v29 = vadd.f32 %v2404_v49, %v7078_v2 }
 0x5d2   :  { %v2335_v33 = vpop.f32.mrf.mxu0  ;;  %v2406_v45 = vpop.f32.mrf.mxu1 }
 0x5d3   :  { %v3384_v12 = vmul.f32 -1.442695, %v2409_v6  ;;  %v2410_v60 = vadd.f32 %v2335_v33, %v7076_v31  ;;  %v2412_v59 = vadd.f32 %v2406_v45, %v7077_v41 }
 0x5d5   :  { %3565 = vpow2.f32 %v3384_v12  ;;  %v3385_v44 = vmul.f32 -1.442695, %v2410_v60  ;;  %v3386_v5 = vmul.f32 -1.442695, %v2412_v59 }
 0x5d7   :  { %3567 = vpow2.f32 %v3385_v44 }
 0x5d8   :  { %3569 = vtanh.f32 %v2411_v29 }
 0x5d9   :  { %3571 = vpow2.f32 %v3386_v5 }
 0x5e2   :  { %v3566_v14 = vpop.eup %3565 }
 0x5e3   :  { %v2416_v15 = vadd.f32 1.0, %v3566_v14 }
 0x5e4   :  { %v3568_v57 = vpop.eup %3567 }
 0x5e5   :  { %3573 = vrcp.f32 %v2416_v15  ;;  %v2422_v54 = vadd.f32 1.0, %v3568_v57  ;;  %v3570_v6 = vpop.eup %3569  ;;  %v7079_v15 = vld [vmem:[#allocation72_spill] sm:$0xff]  ;;  %v7104_v57 = vld [vmem:[#allocation85_spill] sm:$0xff] }
 0x5e6   :  { %v3572_v31 = vpop.eup %3571 }
 0x5e7   :  { %3575 = vrcp.f32 %v2422_v54  ;;  %v2429_v44 = vadd.f32 1.0, %v3572_v31  ;;  %v7105_v54 = vld [vmem:[#allocation86_spill] sm:$0xff]  ;;  %v7107_v31 = vld [vmem:[#allocation89_spill] sm:$0xff] }
 0x5e9   :  { %3577 = vrcp.f32 %v2429_v44  ;;  %v7111_v44 = vld [vmem:[#allocation91_spill] sm:$0xff] }
 0x5f2   :  { %v3574_v12 = vpop.eup %3573 }
 0x5f3   :  { %v2433_v33 = vmul.f32 %v3574_v12, %v3570_v6  ;;  %v7106_v6 = vld [vmem:[#allocation88_spill] sm:$0xff]  ;;  %v7108_v12 = vld [vmem:[#allocation62_spill] sm:$0xff] }
 0x5f4   :  { %v3576_v60 = vpop.eup %3575 }
 0x5f5   :  { %v2432_v32 = vmul.f32 %v3576_v60, %v5549_v19  ;;  %v7110_v60 = vld [vmem:[#allocation99_spill] sm:$0xff] }
 0x5f6   :  { %v3578_v59 = vpop.eup %3577 }
 0x5f7   :  { %v5835_v41 = vadd.f32 %v2433_v33, %v2432_v32  ;;  %v7109_v33 = vld [vmem:[#allocation101_spill] sm:$0xff]  ;;  %v7112_v32 = vld [vmem:[#allocation92_spill] sm:$0xff] }
 0x5f9   :  { %3579 = vtanh.f32 %v5835_v41 }
 0x606   :  { %v3580_v14 = vpop.eup %3579 }
 0x607   :  { %v2436_v2 = vmul.f32 %v3580_v14, %v3578_v59  ;;  %v7113_v59 = vld [vmem:[#allocation94_spill] sm:$0xff]  ;;  %v7114_v14 = vld [vmem:[#allocation95_spill] sm:$0xff] }
 0x609   :  { %2607 = vst [vmem:[%s6029_s5 + $0x50] sm:$0xff] %v2436_v2  ;;  %2682 = vmatmul.mubr.f32.vlgmr.msra.gmra.mxu0 %v2436_v2  ;;  %2753 = vmatmul.mubr.f32.vlgmr.msra.gmra.mxu1 %v2436_v2  ;;  %v7115_v2 = vld [vmem:[#allocation97_spill] sm:$0xff] }
 0x60a   :  { %2788 = vmatpush1.msra.mxu0 %v5277_v51  ;;  %2859 = vmatpush1.msra.mxu1 %v5280_v52  ;;  %v7080_v52 = vld [vmem:[#allocation74_spill] sm:$0xff] }
 0x60b   :  { %2789 = vmatprep.subr.mxu0 %v5283_v4  ;;  %2860 = vmatprep.subr.mxu1 %v5286_v61 }
 0x60c   :  { %2790 = vmatpush1.msra.mxu0 %v5289_v25  ;;  %2861 = vmatpush1.msra.mxu1 %v5292_v27 }
 0x60d   :  { %v2503_v19 = vpop.f32.mrf.mxu0  ;;  %2791 = vmatprep.subr.mxu0 %v5296_v35  ;;  %2862 = vmatprep.subr.mxu1 %v6950_v13  ;;  %v2574_v61 = vpop.f32.mrf.mxu1  ;;  %v7081_v35 = vld [vmem:[#allocation77_spill] sm:$0xff] }
 0x60e   :  { %v2579_v5 = vadd.f32 %v2503_v19, %v7079_v15  ;;  %2792 = vmatpush1.msra.mxu0 %v6951_v36  ;;  %2863 = vmatpush1.msra.mxu1 %v6952_v1  ;;  %v7082_v36 = vld [vmem:[#allocation75_spill] sm:$0xff]  ;;  %v7116_v19 = vld [vmem:[#allocation98_spill] sm:$0xff]  ;;  %v7117_v15 = vld [vmem:[#allocation100_spill] sm:$0xff] }
 0x60f   :  { %v2505_v45 = vpop.f32.mrf.mxu0  ;;  %2793 = vmatprep.subr.mxu0 %v6954_v56  ;;  %2864 = vmatprep.subr.mxu1 %v6955_v63  ;;  %v2576_v27 = vpop.f32.mrf.mxu1  ;;  %v2581_v1 = vadd.f32 %v2574_v61, %v7082_v36  ;;  %v7123_v61 = vld [vmem:[#allocation46_spill] sm:$0xff]  ;;  %v7128_v36 = vld [vmem:[#allocation105_spill] sm:$0xff] }
 0x610   :  { %v3387_v51 = vmul.f32 -1.442695, %v2579_v5  ;;  %v2580_v4 = vadd.f32 %v2505_v45, %v7080_v52  ;;  %2794 = vmatpush1.msra.mxu0 %v6956_v62  ;;  %2865 = vmatpush1.msra.mxu1 %v6957_v40  ;;  %v2582_v13 = vadd.f32 %v2576_v27, %v7081_v35  ;;  %v7118_v5 = vld [vmem:[#allocation103_spill] sm:$0xff]  ;;  %v7119_v45 = vld [vmem:[#allocation104_spill] sm:$0xff]  ;;  %v7121_v52 = vld [vmem:[#allocation45_spill] sm:$0xff] }
 0x611   :  { %2795 = vmatprep.subr.mxu0 %v6958_v55  ;;  %2866 = vmatprep.subr.mxu1 %v6959_v7  ;;  %v7083_v55 = vld [vmem:[#allocation21_spill] sm:$0xff]  ;;  %v7125_v27 = vld [vmem:[#allocation82_spill] sm:$0xff] }
 0x612   :  { %3581 = vpow2.f32 %v3387_v51  ;;  %v3388_v25 = vmul.f32 -1.442695, %v2580_v4  ;;  %2796 = vmatpush1.msra.mxu0 %v6960_v16  ;;  %2867 = vmatpush1.msra.mxu1 %v6961_v48  ;;  %v3389_v56 = vmul.f32 -1.442695, %v2582_v13  ;;  %v7084_v16 = vld [vmem:[#allocation22_spill] sm:$0xff]  ;;  %v7085_v48 = vld [vmem:[#allocation23_spill] sm:$0xff] }
 0x613   :  { %2797 = vmatprep.subr.mxu0 %v6962_v17  ;;  %2868 = vmatprep.subr.mxu1 %v6963_v3  ;;  %v7086_v17 = vld [vmem:[#allocation24_spill] sm:$0xff]  ;;  %v7087_v3 = vld [vmem:[#allocation25_spill] sm:$0xff]  ;;  %v7120_v51 = vld [vmem:[#allocation43_spill] sm:$0xff] }
 0x614   :  { %3583 = vpow2.f32 %v3388_v25  ;;  %2798 = vmatpush1.msra.mxu0 %v6964_v20  ;;  %2869 = vmatpush1.msra.mxu1 %v6965_v21  ;;  %v7088_v20 = vld [vmem:[#allocation26_spill] sm:$0xff]  ;;  %v7089_v21 = vld [vmem:[#allocation27_spill] sm:$0xff]  ;;  %v7122_v4 = vld [vmem:[#allocation48_spill] sm:$0xff] }
 0x615   :  { %2799 = vmatprep.subr.mxu0 %v6966_v23  ;;  %2870 = vmatprep.subr.mxu1 %v6967_v8  ;;  %3585 = vtanh.f32 %v2581_v1  ;;  %v7090_v23 = vld [vmem:[#allocation28_spill] sm:$0xff]  ;;  %v7091_v8 = vld [vmem:[#allocation29_spill] sm:$0xff]  ;;  %v7126_v35 = vld [vmem:[#allocation90_spill] sm:$0xff] }
 0x616   :  { %2800 = vmatpush1.msra.mxu0 %v6968_v9  ;;  %2871 = vmatpush1.msra.mxu1 %v6969_v10  ;;  %3587 = vpow2.f32 %v3389_v56  ;;  %v7092_v9 = vld [vmem:[#allocation30_spill] sm:$0xff]  ;;  %v7093_v10 = vld [vmem:[#allocation31_spill] sm:$0xff]  ;;  %v7124_v25 = vld [vmem:[#allocation80_spill] sm:$0xff] }
 0x617   :  { %2801 = vmatprep.subr.mxu0 %v6970_v24  ;;  %2872 = vmatprep.subr.mxu1 %v6971_v30  ;;  %v7094_v24 = vld [vmem:[#allocation32_spill] sm:$0xff]  ;;  %v7095_v30 = vld [vmem:[#allocation33_spill] sm:$0xff]  ;;  %v7129_v1 = vld [vmem:[#allocation107_spill] sm:$0xff] }
 0x618   :  { %2802 = vmatpush1.msra.mxu0 %v6973_v34  ;;  %2873 = vmatpush1.msra.mxu1 %v6974_v37  ;;  %v7096_v34 = vld [vmem:[#allocation34_spill] sm:$0xff]  ;;  %v7097_v37 = vld [vmem:[#allocation35_spill] sm:$0xff]  ;;  %v7127_v13 = vld [vmem:[#allocation84_spill] sm:$0xff] }
 0x619   :  { %2803 = vmatprep.subr.mxu0 %v6975_v38  ;;  %2874 = vmatprep.subr.mxu1 %v6976_v39  ;;  %v7098_v38 = vld [vmem:[#allocation37_spill] sm:$0xff]  ;;  %v7099_v39 = vmov 0.0   ;;  %v7130_v56 = vld [vmem:[#allocation108_spill] sm:$0xff] }
 0x61a   :  { %2804 = vmatpush1.msra.mxu0 %v6977_v42  ;;  %2875 = vmatpush1.msra.mxu1 %v6978_v43  ;;  %v7100_v42 = vld [vmem:[#allocation36_spill] sm:$0xff] }
 0x61b   :  { %2805 = vmatprep.subr.mxu0 %v6980_v46  ;;  %2876 = vmatprep.subr.mxu1 %v6981_v47  ;;  %v7101_v43 = vld [vmem:[#allocation40_spill] sm:$0xff]  ;;  %v7102_v46 = vld [vmem:[#allocation38_spill] sm:$0xff] }
 0x61c   :  { %2806 = vmatpush1.msra.mxu0 %v6982_v11  ;;  %2877 = vmatpush1.msra.mxu1 %v6983_v50 }
 0x61d   :  { %2807 = vmatprep.subr.mxu0 %v6984_v18  ;;  %2878 = vmatprep.subr.mxu1 %v6985_v26 }
 0x61e   :  { %2808 = vmatpush1.msra.mxu0 %v6986_v0  ;;  %2879 = vmatpush1.msra.mxu1 %v6987_v28  ;;  %v7103_v28 = vld [vmem:[#allocation83_spill] sm:$0xff] }
 0x61f   :  { %v3582_v63 = vpop.eup %3581  ;;  %2809 = vmatprep.subr.mxu0 %v6988_v53  ;;  %2880 = vmatprep.subr.mxu1 %v6989_v22 }
 0x620   :  { %v2586_v62 = vadd.f32 1.0, %v3582_v63  ;;  %2810 = vmatpush1.msra.mxu0 %v6990_v58  ;;  %2881 = vmatpush1.msra.mxu1 %v7083_v55  ;;  %v7131_v63 = vld [vmem:[#allocation109_spill] sm:$0xff] }
 0x621   :  { %v3584_v40 = vpop.eup %3583  ;;  %2811 = vmatprep.subr.mxu0 %v7084_v16  ;;  %2882 = vmatprep.subr.mxu1 %v7085_v48  ;;  %v7134_v55 = vld [vmem:[#allocation113_spill] sm:$0xff]  ;;  %v7136_v16 = vld [vmem:[#allocation115_spill] sm:$0xff]  ;;  %v7137_v48 = vld [vmem:[#allocation116_spill] sm:$0xff] }
 0x622   :  { %3589 = vrcp.f32 %v2586_v62  ;;  %v2592_v7 = vadd.f32 1.0, %v3584_v40  ;;  %2812 = vmatpush1.msra.mxu0 %v7086_v17  ;;  %2883 = vmatpush1.msra.mxu1 %v7087_v3  ;;  %v3586_v47 = vpop.eup %3585  ;;  %v7132_v62 = vld [vmem:[#allocation111_spill] sm:$0xff]  ;;  %v7133_v40 = vld [vmem:[#allocation112_spill] sm:$0xff]  ;;  %v7138_v17 = vld [vmem:[#allocation110_spill] sm:$0xff] }
 0x623   :  { %2813 = vmatprep.subr.mxu0 %v7088_v20  ;;  %2884 = vmatprep.subr.mxu1 %v7089_v21  ;;  %v3588_v11 = vpop.eup %3587  ;;  %v7139_v3 = vld [vmem:[#allocation117_spill] sm:$0xff]  ;;  %v7140_v20 = vld [vmem:[#allocation118_spill] sm:$0xff]  ;;  %v7141_v21 = vld [vmem:[#allocation119_spill] sm:$0xff] }
 0x624   :  { %3591 = vrcp.f32 %v2592_v7  ;;  %2814 = vmatpush1.msra.mxu0 %v7090_v23  ;;  %2885 = vmatpush1.msra.mxu1 %v7091_v8  ;;  %v2599_v0 = vadd.f32 1.0, %v3588_v11  ;;  %v7135_v7 = vld [vmem:[#allocation114_spill] sm:$0xff]  ;;  %v7142_v23 = vld [vmem:[#allocation120_spill] sm:$0xff]  ;;  %v7143_v8 = vld [vmem:[#allocation121_spill] sm:$0xff] }
 0x625   :  { %2815 = vmatprep.subr.mxu0 %v7092_v9  ;;  %2886 = vmatprep.subr.mxu1 %v7093_v10  ;;  %v7144_v9 = vld [vmem:[#allocation122_spill] sm:$0xff]  ;;  %v7155_v11 = vld [vmem:[#allocation76_spill] sm:$0xff] }
 0x626   :  { %2816 = vmatpush1.msra.mxu0 %v7094_v24  ;;  %2887 = vmatpush1.msra.mxu1 %v7095_v30  ;;  %3593 = vrcp.f32 %v2599_v0  ;;  %v7145_v10 = vld [vmem:[#allocation106_spill] sm:$0xff]  ;;  %v7146_v24 = vld [vmem:[#allocation123_spill] sm:$0xff]  ;;  %v7147_v30 = vld [vmem:[#allocation124_spill] sm:$0xff] }
 0x627   :  { %2817 = vmatprep.subr.mxu0 %v7096_v34  ;;  %2888 = vmatprep.subr.mxu1 %v7097_v37  ;;  %v7148_v34 = vld [vmem:[#allocation125_spill] sm:$0xff]  ;;  %v7149_v37 = vld [vmem:[#allocation126_spill] sm:$0xff] }
 0x628   :  { %2818 = vmatpush1.msra.mxu0 %v7098_v38  ;;  %2851 = vmatprep.mubr.f32.mxu0 %v7099_v39  ;;  %v7150_v38 = vld [vmem:[#allocation127_spill] sm:$0xff]  ;;  %v7159_v0 = vld [vmem:[#allocation78_spill] sm:$0xff] }
 0x629   :  { %2889 = vmatpush1.msra.mxu1 %v7100_v42  ;;  %2922 = vmatprep.mubr.f32.mxu1 %v7099_v39  ;;  %v7151_v42 = vld [vmem:[#allocation47_spill] sm:$0xff] }
 0x62a   :  { %2967 = vmatprep.subr.mxu0 %v7101_v43  ;;  %3038 = vmatprep.subr.mxu1 %v7102_v46  ;;  %v7152_v43 = vld [vmem:[#allocation49_spill] sm:$0xff]  ;;  %v7153_v46 = vld [vmem:[#allocation52_spill] sm:$0xff] }
 0x62f   :  { %v3590_v50 = vpop.eup %3589 }
 0x630   :  { %v2603_v18 = vmul.f32 %v3590_v50, %v3586_v47  ;;  %v7154_v47 = vld [vmem:[#allocation50_spill] sm:$0xff]  ;;  %v7156_v50 = vld [vmem:[#allocation128_spill] sm:$0xff] }
 0x631   :  { %v3592_v26 = vpop.eup %3591 }
 0x632   :  { %v2602_v53 = vmul.f32 %v3592_v26, %v7103_v28  ;;  %v7158_v26 = vld [vmem:[#allocation130_spill] sm:$0xff]  ;;  %v7160_v28 = vld [vmem:[#allocation131_spill] sm:$0xff] }
 0x633   :  { %v3594_v58 = vpop.eup %3593 }
 0x634   :  { %v5912_v22 = vadd.f32 %v2603_v18, %v2602_v53  ;;  %v7157_v18 = vld [vmem:[#allocation129_spill] sm:$0xff]  ;;  %v7161_v53 = vld [vmem:[#allocation132_spill] sm:$0xff] }
 0x636   :  { %3595 = vtanh.f32 %v5912_v22 }
 0x643   :  { %v3596_v49 = vpop.eup %3595 }
 0x644   :  { %v2606_v29 = vmul.f32 %v3596_v49, %v3594_v58  ;;  %v7162_v58 = vld [vmem:[#allocation39_spill] sm:$0xff]  ;;  %v7163_v49 = vld [vmem:[#allocation41_spill] sm:$0xff] }
 0x646   :  { %2608 = vst [vmem:[%s6029_s5 + $0x28] sm:$0xff] %v2606_v29  ;;  %2852 = vmatmul.mubr.f32.vlgmr.msra.gmra.mxu0 %v2606_v29  ;;  %2923 = vmatmul.mubr.f32.vlgmr.msra.gmra.mxu1 %v2606_v29  ;;  %v7164_v29 = vld [vmem:[#allocation44_spill] sm:$0xff] }
 0x647   :  { %2968 = vmatpush1.msra.mxu0 %v7104_v57  ;;  %3039 = vmatpush1.msra.mxu1 %v7105_v54  ;;  %v7165_v57 = vld [vmem:[#allocation42_spill] sm:$0xff]  ;;  %v7166_v54 = vld [vmem:[#allocation87_spill] sm:$0xff] }
 0x648   :  { %2969 = vmatprep.subr.mxu0 %v7106_v6  ;;  %3040 = vmatprep.subr.mxu1 %v7107_v31  ;;  %v7167_v6 = vld [vmem:[#allocation93_spill] sm:$0xff] }
 0x649   :  { %2970 = vmatpush1.msra.mxu0 %v7108_v12  ;;  %3041 = vmatpush1.msra.mxu1 %v7109_v33  ;;  %v7168_v12 = vld [vmem:[#allocation55_spill] sm:$0xff] }
 0x64a   :  { %2971 = vmatprep.subr.mxu0 %v7110_v60  ;;  %3042 = vmatprep.subr.mxu1 %v7111_v44 }
 0x64b   :  { %2972 = vmatpush1.msra.mxu0 %v7112_v32  ;;  %3043 = vmatpush1.msra.mxu1 %v7113_v59  ;;  %v7169_v32 = vld [vmem:[#allocation57_spill] sm:$0xff] }
 0x64c   :  { %2973 = vmatprep.subr.mxu0 %v7114_v14  ;;  %3044 = vmatprep.subr.mxu1 %v7115_v2 }
 0x64d   :  { %2974 = vmatpush1.msra.mxu0 %v7116_v19  ;;  %3045 = vmatpush1.msra.mxu1 %v7117_v15  ;;  %v7170_v15 = vld [vmem:[#allocation60_spill] sm:$0xff] }
 0x64e   :  { %2975 = vmatprep.subr.mxu0 %v7118_v5  ;;  %3046 = vmatprep.subr.mxu1 %v7119_v45  ;;  %v7171_v45 = vld [vmem:[#allocation58_spill] sm:$0xff] }
 0x64f   :  { %2976 = vmatpush1.msra.mxu0 %v7120_v51  ;;  %3047 = vmatpush1.msra.mxu1 %v7121_v52 }
 0x650   :  { %2977 = vmatprep.subr.mxu0 %v7122_v4  ;;  %3048 = vmatprep.subr.mxu1 %v7123_v61 }
 0x651   :  { %2978 = vmatpush1.msra.mxu0 %v7124_v25  ;;  %3049 = vmatpush1.msra.mxu1 %v7125_v27 }
 0x652   :  { %2979 = vmatprep.subr.mxu0 %v7126_v35  ;;  %3050 = vmatprep.subr.mxu1 %v7127_v13 }
 0x653   :  { %2980 = vmatpush1.msra.mxu0 %v7128_v36  ;;  %3051 = vmatpush1.msra.mxu1 %v7129_v1 }
 0x654   :  { %2981 = vmatprep.subr.mxu0 %v7130_v56  ;;  %3052 = vmatprep.subr.mxu1 %v7131_v63 }
 0x655   :  { %2982 = vmatpush1.msra.mxu0 %v7132_v62  ;;  %3053 = vmatpush1.msra.mxu1 %v7133_v40 }
 0x656   :  { %2983 = vmatprep.subr.mxu0 %v7134_v55  ;;  %3054 = vmatprep.subr.mxu1 %v7135_v7 }
 0x657   :  { %2984 = vmatpush1.msra.mxu0 %v7136_v16  ;;  %3055 = vmatpush1.msra.mxu1 %v7137_v48  ;;  %v3855_v48 = vld [vmem:[#allocation7 + $0x1e0] sm:$0xff] }
 0x658   :  { %2985 = vmatprep.subr.mxu0 %v7138_v17  ;;  %3056 = vmatprep.subr.mxu1 %v7139_v3  ;;  %v3856_v17 = vld [vmem:[#allocation7 + $0x1f0] sm:$0xff]  ;;  %v3857_v3 = vld [vmem:[#allocation7 + $0x1c8] sm:$0xff] }
 0x659   :  { %2986 = vmatpush1.msra.mxu0 %v7140_v20  ;;  %3057 = vmatpush1.msra.mxu1 %v7141_v21  ;;  %v3859_v21 = vld [vmem:[#allocation7 + $0x1c0] sm:$0xff] }
 0x65a   :  { %2987 = vmatprep.subr.mxu0 %v7142_v23  ;;  %3058 = vmatprep.subr.mxu1 %v7143_v8  ;;  %v3860_v23 = vld [vmem:[#allocation7 + $0x1d0] sm:$0xff]  ;;  %v7172_v8 = vld [vmem:[#allocation68_spill] sm:$0xff] }
 0x65b   :  { %2988 = vmatpush1.msra.mxu0 %v7144_v9  ;;  %3059 = vmatpush1.msra.mxu1 %v7145_v10  ;;  %v3861_v10 = vld [vmem:[#allocation7 + $0x1a8] sm:$0xff] }
 0x65c   :  { %2989 = vmatprep.subr.mxu0 %v7146_v24  ;;  %3060 = vmatprep.subr.mxu1 %v7147_v30  ;;  %v3862_v24 = vld [vmem:[#allocation7 + $0x1b8] sm:$0xff] }
 0x65d   :  { %2990 = vmatpush1.msra.mxu0 %v7148_v34  ;;  %3061 = vmatpush1.msra.mxu1 %v7149_v37  ;;  %v3863_v34 = vld [vmem:[#allocation7 + $0x1a0] sm:$0xff]  ;;  %v3864_v37 = vld [vmem:[#allocation7 + $0x1b0] sm:$0xff] }
 0x65e   :  { %2991 = vmatprep.subr.mxu0 %v7150_v38  ;;  %3062 = vmatprep.subr.mxu1 %v7151_v42  ;;  %v7173_v42 = vld [vmem:[#allocation70_spill] sm:$0xff] }
 0x65f   :  { %2992 = vmatpush1.msra.mxu0 %v7152_v43  ;;  %3063 = vmatpush1.msra.mxu1 %v7153_v46  ;;  %v3865_v46 = vld [vmem:[#allocation7 + $0x188] sm:$0xff] }
 0x660   :  { %2993 = vmatprep.subr.mxu0 %v7154_v47  ;;  %3064 = vmatprep.subr.mxu1 %v7155_v11  ;;  %v3866_v47 = vld [vmem:[#allocation7 + $0x198] sm:$0xff]  ;;  %v3867_v11 = vld [vmem:[#allocation7 + $0x180] sm:$0xff] }
 0x661   :  { %2994 = vmatpush1.msra.mxu0 %v7156_v50  ;;  %3065 = vmatpush1.msra.mxu1 %v7157_v18  ;;  %v3868_v50 = vld [vmem:[#allocation7 + $0x190] sm:$0xff] }
 0x662   :  { %2995 = vmatprep.subr.mxu0 %v7158_v26  ;;  %3066 = vmatprep.subr.mxu1 %v7159_v0  ;;  %v3869_v0 = vld [vmem:[#allocation7 + $0x168] sm:$0xff] }
 0x663   :  { %2996 = vmatpush1.msra.mxu0 %v7160_v28  ;;  %3067 = vmatpush1.msra.mxu1 %v7161_v53  ;;  %v3870_v28 = vld [vmem:[#allocation7 + $0x178] sm:$0xff]  ;;  %v3871_v53 = vld [vmem:[#allocation7 + $0x160] sm:$0xff] }
 0x664   :  { %2997 = vmatprep.subr.mxu0 %v7162_v58  ;;  %3068 = vmatprep.subr.mxu1 %v7163_v49  ;;  %v3872_v58 = vld [vmem:[#allocation7 + $0x170] sm:$0xff]  ;;  %v3873_v49 = vld [vmem:[#allocation7 + $0x148] sm:$0xff] }
 0x665   :  { %2998 = vmatpush1.msra.mxu0 %v7164_v29  ;;  %3031 = vmatprep.mubr.f32.mxu0 %v7099_v39  ;;  %v3874_v29 = vld [vmem:[#allocation7 + $0x158] sm:$0xff] }
 0x666   :  { %3069 = vmatpush1.msra.mxu1 %v7165_v57  ;;  %3102 = vmatprep.mubr.f32.mxu1 %v7099_v39  ;;  %v3875_v57 = vld [vmem:[#allocation7 + $0x140] sm:$0xff] }
 0x667   :  { %3137 = vmatprep.subr.mxu0 %v7166_v54  ;;  %3208 = vmatprep.subr.mxu1 %v7167_v6  ;;  %v3876_v54 = vld [vmem:[#allocation7 + $0x150] sm:$0xff] }
 0x6c9   :  { %v2683_v31 = vpop.f32.mrf.mxu0  ;;  %v2754_v14 = vpop.f32.mrf.mxu1 }
 0x6ca   :  { %v2759_v33 = vadd.f32 %v2683_v31, %v7168_v12  ;;  %v2761_v51 = vadd.f32 %v2754_v14, %v7171_v45  ;;  %v3877_v31 = vld [vmem:[#allocation7 + $0x128] sm:$0xff]  ;;  %v3878_v12 = vld [vmem:[#allocation7 + $0x138] sm:$0xff]  ;;  %v3887_v45 = vld [vmem:[#allocation7 + $0xe0] sm:$0xff] }
 0x6cb   :  { %v2685_v60 = vpop.f32.mrf.mxu0  ;;  %v2756_v19 = vpop.f32.mrf.mxu1 }
 0x6cc   :  { %v3390_v44 = vmul.f32 -1.442695, %v2759_v33  ;;  %v2760_v59 = vadd.f32 %v2685_v60, %v7169_v32  ;;  %v2762_v5 = vadd.f32 %v2756_v19, %v7170_v15  ;;  %v3879_v33 = vld [vmem:[#allocation7 + $0x120] sm:$0xff]  ;;  %v3880_v60 = vld [vmem:[#allocation7 + $0x130] sm:$0xff]  ;;  %v3882_v32 = vld [vmem:[#allocation7 + $0x118] sm:$0xff] }
 0x6cd   :  { %v3884_v19 = vld [vmem:[#allocation7 + $0x110] sm:$0xff]  ;;  %v3885_v15 = vld [vmem:[#allocation7 + $0xe8] sm:$0xff] }
 0x6ce   :  { %3597 = vpow2.f32 %v3390_v44  ;;  %v3391_v2 = vmul.f32 -1.442695, %v2760_v59  ;;  %v3392_v52 = vmul.f32 -1.442695, %v2762_v5  ;;  %v3881_v44 = vld [vmem:[#allocation7 + $0x108] sm:$0xff]  ;;  %v3886_v5 = vld [vmem:[#allocation7 + $0xf8] sm:$0xff] }
 0x6cf   :  { %v7174_v59 = vld [vmem:[#allocation73_spill] sm:$0xff] }
 0x6d0   :  { %3599 = vpow2.f32 %v3391_v2  ;;  %v3883_v2 = vld [vmem:[#allocation7 + $0x100] sm:$0xff] }
 0x6d1   :  { %3601 = vtanh.f32 %v2761_v51  ;;  %v3888_v51 = vld [vmem:[#allocation7 + $0xf0] sm:$0xff] }
 0x6d2   :  { %3603 = vpow2.f32 %v3392_v52  ;;  %v7175_v52 = vld [vmem:[#allocation71_spill] sm:$0xff] }
 0x6db   :  { %v3598_v4 = vpop.eup %3597 }
 0x6dc   :  { %v2766_v61 = vadd.f32 1.0, %v3598_v4 }
 0x6dd   :  { %v3600_v25 = vpop.eup %3599 }
 0x6de   :  { %3605 = vrcp.f32 %v2766_v61  ;;  %v2772_v27 = vadd.f32 1.0, %v3600_v25  ;;  %v3602_v35 = vpop.eup %3601  ;;  %v3889_v61 = vld [vmem:[#allocation7 + $0xc8] sm:$0xff]  ;;  %v3890_v25 = vld [vmem:[#allocation7 + $0xd8] sm:$0xff] }
 0x6df   :  { %v3604_v13 = vpop.eup %3603 }
 0x6e0   :  { %3607 = vrcp.f32 %v2772_v27  ;;  %v2779_v63 = vadd.f32 1.0, %v3604_v13  ;;  %v3892_v13 = vld [vmem:[#allocation7 + $0xd0] sm:$0xff] }
 0x6e2   :  { %3609 = vrcp.f32 %v2779_v63  ;;  %v3895_v63 = vld [vmem:[#allocation7 + $0xa0] sm:$0xff] }
 0x6eb   :  { %v3606_v36 = vpop.eup %3605 }
 0x6ec   :  { %v2783_v1 = vmul.f32 %v3606_v36, %v3602_v35  ;;  %v3891_v35 = vld [vmem:[#allocation7 + $0xc0] sm:$0xff]  ;;  %v3893_v36 = vld [vmem:[#allocation7 + $0xa8] sm:$0xff] }
 0x6ed   :  { %v3608_v56 = vpop.eup %3607 }
 0x6ee   :  { %v2782_v62 = vmul.f32 %v3608_v56, %v5835_v41  ;;  %v3858_v41 = vld [vmem:[#allocation7 + $0x1d8] sm:$0xff] }
 0x6ef   :  { %v3610_v55 = vpop.eup %3609 }
 0x6f0   :  { %v5989_v40 = vadd.f32 %v2783_v1, %v2782_v62  ;;  %v3894_v1 = vld [vmem:[#allocation7 + $0xb8] sm:$0xff]  ;;  %v3896_v62 = vld [vmem:[#allocation7 + $0xb0] sm:$0xff] }
 0x6f2   :  { %3611 = vtanh.f32 %v5989_v40 }
 0x6ff   :  { %v3612_v7 = vpop.eup %3611 }
 0x700   :  { %v2786_v16 = vmul.f32 %v3612_v7, %v3610_v55  ;;  %v3897_v7 = vld [vmem:[#allocation7 + $0x88] sm:$0xff] }
 0x702   :  { %2957 = vst [vmem:[%s6029_s5 + $0x60] sm:$0xff] %v2786_v16  ;;  %3032 = vmatmul.mubr.f32.vlgmr.msra.gmra.mxu0 %v2786_v16  ;;  %3103 = vmatmul.mubr.f32.vlgmr.msra.gmra.mxu1 %v2786_v16  ;;  %v3898_v16 = vld [vmem:[#allocation7 + $0x98] sm:$0xff] }
 0x703   :  { %3138 = vmatpush1.msra.mxu0 %v3855_v48  ;;  %3209 = vmatpush1.msra.mxu1 %v3856_v17  ;;  %v3899_v17 = vld [vmem:[#allocation7 + $0x80] sm:$0xff] }
 0x704   :  { %3139 = vmatprep.subr.mxu0 %v3857_v3  ;;  %3210 = vmatprep.subr.mxu1 %v3858_v41  ;;  %v3900_v3 = vld [vmem:[#allocation7 + $0x90] sm:$0xff] }
 0x705   :  { %3140 = vmatpush1.msra.mxu0 %v3859_v21  ;;  %3211 = vmatpush1.msra.mxu1 %v3860_v23  ;;  %v3902_v21 = vld [vmem:[#allocation7 + $0x78] sm:$0xff]  ;;  %v3903_v23 = vld [vmem:[#allocation7 + $0x60] sm:$0xff] }
 0x706   :  { %v2853_v20 = vpop.f32.mrf.mxu0  ;;  %3141 = vmatprep.subr.mxu0 %v3861_v10  ;;  %3212 = vmatprep.subr.mxu1 %v3862_v24  ;;  %v2924_v18 = vpop.f32.mrf.mxu1  ;;  %v3906_v10 = vld [vmem:[#allocation7 + $0x58] sm:$0xff]  ;;  %v3907_v24 = vld [vmem:[#allocation7 + $0x40] sm:$0xff] }
 0x707   :  { %v2929_v9 = vadd.f32 %v2853_v20, %v7172_v8  ;;  %3142 = vmatpush1.msra.mxu0 %v3863_v34  ;;  %3213 = vmatpush1.msra.mxu1 %v3864_v37  ;;  %v2931_v4 = vadd.f32 %v2924_v18, %v7175_v52  ;;  %v3901_v20 = vld [vmem:[#allocation7 + $0x68] sm:$0xff]  ;;  %v3904_v8 = vld [vmem:[#allocation7 + $0x70] sm:$0xff]  ;;  %v3910_v37 = vld [vmem:[#allocation7 + $0x38] sm:$0xff] }
 0x708   :  { %v2855_v30 = vpop.f32.mrf.mxu0  ;;  %3143 = vmatprep.subr.mxu0 %v3865_v46  ;;  %3214 = vmatprep.subr.mxu1 %v3866_v47  ;;  %v2926_v6 = vpop.f32.mrf.mxu1  ;;  %v3909_v34 = vld [vmem:[#allocation7 + $0x28] sm:$0xff]  ;;  %v3914_v46 = vld [vmem:[#allocation7 + $0x18] sm:$0xff]  ;;  %v3915_v47 = vld [vmem:[#allocation7] sm:$0xff] }
 0x709   :  { %v3393_v38 = vmul.f32 -1.442695, %v2929_v9  ;;  %v2930_v43 = vadd.f32 %v2855_v30, %v7173_v42  ;;  %3144 = vmatpush1.msra.mxu0 %v3867_v11  ;;  %3215 = vmatpush1.msra.mxu1 %v3868_v50  ;;  %v2932_v14 = vadd.f32 %v2926_v6, %v7174_v59  ;;  %v3905_v9 = vld [vmem:[#allocation7 + $0x48] sm:$0xff]  ;;  %v3908_v30 = vld [vmem:[#allocation7 + $0x50] sm:$0xff]  ;;  %v7176_v6 = vld [vmem:[#allocation59_spill] sm:$0xff] }
 0x70a   :  { %3145 = vmatprep.subr.mxu0 %v3869_v0  ;;  %3216 = vmatprep.subr.mxu1 %v3870_v28  ;;  %v3912_v42 = vld [vmem:[#allocation7 + $0x30] sm:$0xff] }
 0x70b   :  { %3613 = vpow2.f32 %v3393_v38  ;;  %v3394_v26 = vmul.f32 -1.442695, %v2930_v43  ;;  %3146 = vmatpush1.msra.mxu0 %v3871_v53  ;;  %3217 = vmatpush1.msra.mxu1 %v3872_v58  ;;  %v3395_v27 = vmul.f32 -1.442695, %v2932_v14  ;;  %v3911_v38 = vld [vmem:[#allocation7 + $0x20] sm:$0xff]  ;;  %v3913_v43 = vld [vmem:[#allocation7 + $0x8] sm:$0xff] }
 0x70c   :  { %3147 = vmatprep.subr.mxu0 %v3873_v49  ;;  %3218 = vmatprep.subr.mxu1 %v3874_v29  ;;  %v3916_v11 = vld [vmem:[#allocation7 + $0x10] sm:$0xff]  ;;  %v7178_v14 = vld [vmem:[#allocation65_spill] sm:$0xff] }
 0x70d   :  { %3615 = vpow2.f32 %v3394_v26  ;;  %3148 = vmatpush1.msra.mxu0 %v3875_v57  ;;  %3219 = vmatpush1.msra.mxu1 %v3876_v54 }
 0x70e   :  { %3149 = vmatprep.subr.mxu0 %v3877_v31  ;;  %3220 = vmatprep.subr.mxu1 %v3878_v12  ;;  %3617 = vtanh.f32 %v2931_v4 }
 0x70f   :  { %3150 = vmatpush1.msra.mxu0 %v3879_v33  ;;  %3221 = vmatpush1.msra.mxu1 %v3880_v60  ;;  %3619 = vpow2.f32 %v3395_v27 }
 0x710   :  { %3151 = vmatprep.subr.mxu0 %v3881_v44  ;;  %3222 = vmatprep.subr.mxu1 %v3882_v32 }
 0x711   :  { %3152 = vmatpush1.msra.mxu0 %v3883_v2  ;;  %3223 = vmatpush1.msra.mxu1 %v3884_v19  ;;  %v7179_v19 = vld [vmem:[#allocation63_spill] sm:$0xff] }
 0x712   :  { %3153 = vmatprep.subr.mxu0 %v3885_v15  ;;  %3224 = vmatprep.subr.mxu1 %v3886_v5 }
 0x713   :  { %3154 = vmatpush1.msra.mxu0 %v3887_v45  ;;  %3225 = vmatpush1.msra.mxu1 %v3888_v51 }
 0x714   :  { %3155 = vmatprep.subr.mxu0 %v3889_v61  ;;  %3226 = vmatprep.subr.mxu1 %v3890_v25 }
 0x715   :  { %3156 = vmatpush1.msra.mxu0 %v3891_v35  ;;  %3227 = vmatpush1.msra.mxu1 %v3892_v13 }
 0x716   :  { %3157 = vmatprep.subr.mxu0 %v3893_v36  ;;  %3228 = vmatprep.subr.mxu1 %v3894_v1 }
 0x717   :  { %3158 = vmatpush1.msra.mxu0 %v3895_v63  ;;  %3229 = vmatpush1.msra.mxu1 %v3896_v62 }
 0x718   :  { %v3614_v56 = vpop.eup %3613  ;;  %3159 = vmatprep.subr.mxu0 %v3897_v7  ;;  %3230 = vmatprep.subr.mxu1 %v3898_v16  ;;  %v7180_v16 = vld [vmem:[#allocation64_spill] sm:$0xff] }
 0x719   :  { %v2936_v55 = vadd.f32 1.0, %v3614_v56  ;;  %3160 = vmatpush1.msra.mxu0 %v3899_v17  ;;  %3231 = vmatpush1.msra.mxu1 %v3900_v3 }
 0x71a   :  { %v3616_v48 = vpop.eup %3615  ;;  %3161 = vmatprep.subr.mxu0 %v3901_v20  ;;  %3232 = vmatprep.subr.mxu1 %v3902_v21 }
 0x71b   :  { %3621 = vrcp.f32 %v2936_v55  ;;  %v2942_v41 = vadd.f32 1.0, %v3616_v48  ;;  %3162 = vmatpush1.msra.mxu0 %v3903_v23  ;;  %3233 = vmatpush1.msra.mxu1 %v3904_v8  ;;  %v3618_v50 = vpop.eup %3617  ;;  %v7182_v8 = vld [vmem:[#allocation69_spill] sm:$0xff] }
 0x71c   :  { %3163 = vmatprep.subr.mxu0 %v3905_v9  ;;  %3234 = vmatprep.subr.mxu1 %v3906_v10  ;;  %v3620_v18 = vpop.eup %3619  ;;  %v7183_v10 = vld [vmem:[#allocation67_spill] sm:$0xff] }
 0x71d   :  { %3623 = vrcp.f32 %v2942_v41  ;;  %3164 = vmatpush1.msra.mxu0 %v3907_v24  ;;  %3235 = vmatpush1.msra.mxu1 %v3908_v30  ;;  %v2949_v53 = vadd.f32 1.0, %v3620_v18  ;;  %v7181_v41 = vld [vmem:[#allocation66_spill] sm:$0xff] }
 0x71e   :  { %3165 = vmatprep.subr.mxu0 %v3909_v34  ;;  %3236 = vmatprep.subr.mxu1 %v3910_v37 }
 0x71f   :  { %3166 = vmatpush1.msra.mxu0 %v3911_v38  ;;  %3237 = vmatpush1.msra.mxu1 %v3912_v42  ;;  %3625 = vrcp.f32 %v2949_v53 }
 0x720   :  { %3167 = vmatprep.subr.mxu0 %v3913_v43  ;;  %3238 = vmatprep.subr.mxu1 %v3914_v46 }
 0x721   :  { %3168 = vmatpush1.msra.mxu0 %v3915_v47  ;;  %3201 = vmatprep.mubr.f32.mxu0 %v7099_v39 }
 0x722   :  { %3239 = vmatpush1.msra.mxu1 %v3916_v11  ;;  %3272 = vmatprep.mubr.f32.mxu1 %v7099_v39 }
 0x728   :  { %v3622_v26 = vpop.eup %3621 }
 0x729   :  { %v2953_v0 = vmul.f32 %v3622_v26, %v3618_v50 }
 0x72a   :  { %v3624_v28 = vpop.eup %3623 }
 0x72b   :  { %v2952_v58 = vmul.f32 %v3624_v28, %v5912_v22  ;;  %v7177_v22 = vld [vmem:[#allocation61_spill] sm:$0xff] }
 0x72c   :  { %v3626_v29 = vpop.eup %3625 }
 0x72d   :  { %v6002_v49 = vadd.f32 %v2953_v0, %v2952_v58 }
 0x72f   :  { %3627 = vtanh.f32 %v6002_v49 }
 0x73c   :  { %v3628_v57 = vpop.eup %3627 }
 0x73d   :  { %v2956_v54 = vmul.f32 %v3628_v57, %v3626_v29 }
 0x73f   :  { %2958 = vst [vmem:[%s6029_s5 + $0x18] sm:$0xff] %v2956_v54  ;;  %3202 = vmatmul.mubr.f32.vlgmr.msra.gmra.mxu0 %v2956_v54  ;;  %3273 = vmatmul.mubr.f32.vlgmr.msra.gmra.mxu1 %v2956_v54 }
 0x7c2   :  { %v3033_v39 = vpop.f32.mrf.mxu0  ;;  %v3104_v44 = vpop.f32.mrf.mxu1 }
 0x7c3   :  { %v3109_v31 = vadd.f32 %v3033_v39, %v7176_v6  ;;  %v3111_v15 = vadd.f32 %v3104_v44, %v7179_v19 }
 0x7c4   :  { %v3035_v12 = vpop.f32.mrf.mxu0  ;;  %v3106_v59 = vpop.f32.mrf.mxu1 }
 0x7c5   :  { %v3396_v33 = vmul.f32 -1.442695, %v3109_v31  ;;  %v3110_v60 = vadd.f32 %v3035_v12, %v7177_v22  ;;  %v3112_v2 = vadd.f32 %v3106_v59, %v7178_v14 }
 0x7c7   :  { %3629 = vpow2.f32 %v3396_v33  ;;  %v3397_v32 = vmul.f32 -1.442695, %v3110_v60  ;;  %v3398_v5 = vmul.f32 -1.442695, %v3112_v2 }
 0x7c9   :  { %3631 = vpow2.f32 %v3397_v32 }
 0x7ca   :  { %3633 = vtanh.f32 %v3111_v15 }
 0x7cb   :  { %3635 = vpow2.f32 %v3398_v5 }
 0x7d4   :  { %v3630_v45 = vpop.eup %3629 }
 0x7d5   :  { %v3116_v51 = vadd.f32 1.0, %v3630_v45 }
 0x7d6   :  { %v3632_v52 = vpop.eup %3631 }
 0x7d7   :  { %3637 = vrcp.f32 %v3116_v51  ;;  %v3122_v4 = vadd.f32 1.0, %v3632_v52  ;;  %v3634_v61 = vpop.eup %3633 }
 0x7d8   :  { %v3636_v25 = vpop.eup %3635 }
 0x7d9   :  { %3639 = vrcp.f32 %v3122_v4  ;;  %v3129_v36 = vadd.f32 1.0, %v3636_v25 }
 0x7db   :  { %3641 = vrcp.f32 %v3129_v36 }
 0x7e4   :  { %v3638_v27 = vpop.eup %3637 }
 0x7e5   :  { %v3133_v35 = vmul.f32 %v3638_v27, %v3634_v61 }
 0x7e6   :  { %v3640_v13 = vpop.eup %3639 }
 0x7e7   :  { %v3132_v1 = vmul.f32 %v3640_v13, %v5989_v40 }
 0x7e8   :  { %v3642_v63 = vpop.eup %3641 }
 0x7e9   :  { %v3134_v56 = vadd.f32 %v3133_v35, %v3132_v1 }
 0x7eb   :  { %3643 = vtanh.f32 %v3134_v56 }
 0x7f8   :  { %v3644_v62 = vpop.eup %3643 }
 0x7f9   :  { %v3136_v55 = vmul.f32 %v3644_v62, %v3642_v63 }
 0x7fb   :  { %3307 = vst [vmem:[%s6029_s5 + $0x70] sm:$0xff] %v3136_v55 }
 0x7ff   :  { %v3203_v7 = vpop.f32.mrf.mxu0  ;;  %v3274_v21 = vpop.f32.mrf.mxu1 }
 0x800   :  { %v3279_v48 = vadd.f32 %v3203_v7, %v7180_v16  ;;  %v3281_v24 = vadd.f32 %v3274_v21, %v7183_v10 }
 0x801   :  { %v3205_v17 = vpop.f32.mrf.mxu0  ;;  %v3276_v23 = vpop.f32.mrf.mxu1 }
 0x802   :  { %v3399_v3 = vmul.f32 -1.442695, %v3279_v48  ;;  %v3280_v20 = vadd.f32 %v3205_v17, %v7181_v41  ;;  %v3282_v9 = vadd.f32 %v3276_v23, %v7182_v8 }
 0x804   :  { %3645 = vpow2.f32 %v3399_v3  ;;  %v3400_v40 = vmul.f32 -1.442695, %v3280_v20  ;;  %v3401_v30 = vmul.f32 -1.442695, %v3282_v9 }
 0x806   :  { %3647 = vpow2.f32 %v3400_v40 }
 0x807   :  { %3649 = vtanh.f32 %v3281_v24 }
 0x808   :  { %3651 = vpow2.f32 %v3401_v30 }
 0x811   :  { %v3646_v34 = vpop.eup %3645 }
 0x812   :  { %v3286_v37 = vadd.f32 1.0, %v3646_v34 }
 0x813   :  { %v3648_v38 = vpop.eup %3647 }
 0x814   :  { %3653 = vrcp.f32 %v3286_v37  ;;  %v3292_v42 = vadd.f32 1.0, %v3648_v38  ;;  %v3650_v43 = vpop.eup %3649 }
 0x815   :  { %v3652_v46 = vpop.eup %3651 }
 0x816   :  { %3655 = vrcp.f32 %v3292_v42  ;;  %v3299_v18 = vadd.f32 1.0, %v3652_v46 }
 0x818   :  { %3657 = vrcp.f32 %v3299_v18 }
 0x821   :  { %v3654_v47 = vpop.eup %3653 }
 0x822   :  { %v3303_v11 = vmul.f32 %v3654_v47, %v3650_v43 }
 0x823   :  { %v3656_v50 = vpop.eup %3655 }
 0x824   :  { %v3302_v26 = vmul.f32 %v3656_v50, %v6002_v49 }
 0x825   :  { %v3658_v28 = vpop.eup %3657 }
 0x826   :  { %v3304_v0 = vadd.f32 %v3303_v11, %v3302_v26 }
 0x828   :  { %3659 = vtanh.f32 %v3304_v0 }
 0x835   :  { %v3660_v53 = vpop.eup %3659 }
 0x836   :  { %v3306_v58 = vmul.f32 %v3660_v53, %v3658_v28 }
 0x838   :  { %3308 = vst [vmem:[%s6029_s5 + $0x8] sm:$0xff] %v3306_v58 }
 0x839   :  { %3313 = vsyncpa [#allocation4], 1 }
 0x83a   :  { %3314 = vsyncpa [#allocation6], 1 }
 0x83b   :  { %3315 = vsyncpa [#allocation9], 1 }

</bundles_post_ra>
